<compile_context>
chip_gen: v6e
topology: v6e:2x2x1
jax: 0.10.0
libtpu: 0.0.40
codegen_flags: <defaults>
</compile_context>

<pallas_src>
import math
from functools import partial

import jax
import jax.numpy as jnp
from jax.experimental import pallas as pl
from jax.experimental.pallas import tpu as pltpu

# ----------------------------- config -----------------------------
SRC_VOCAB = 16
TRG_VOCAB = 16
HID_DIM = 32
N_HEADS = 4
HEAD_DIM = HID_DIM // N_HEADS
PF_DIM = 64
N_LAYERS = 2
MAX_LEN = 16
LN_EPS = 1e-5
NEG_INF = -1e10


# --------------------------- fused whole-model kernel ---------------------------
def _seq2seq_kernel(
    src_x_ref, trg_x_ref, src_bias_ref, trg_bias_ref,
    # encoder (stacked over layers)
    e_wqkv, e_bqkv, e_wo, e_bo, e_ln, e_w1, e_b1, e_w2, e_b2,
    # decoder self-attention
    ds_wqkv, ds_bqkv, ds_wo, ds_bo,
    # decoder encoder-attention
    dx_wqkv, dx_bqkv, dx_wo, dx_bo,
    # decoder LayerNorms + FFN
    d_ln, d_w1, d_b1, d_w2, d_b2,
    # output projection
    w_out, b_out,
    # outputs
    out_ref, attn_ref,
):
    B, Ls, D = src_x_ref.shape
    Lt = trg_x_ref.shape[1]
    scale = 1.0 / math.sqrt(HEAD_DIM)

    # ---- helpers (static Python loops; everything stays in VMEM/vregs) ----
    def layer_norm(x, ln_ref, idx):
        g = ln_ref[idx]          # [1, D]
        b = ln_ref[idx + 1]      # [1, D]
        mu = jnp.mean(x, axis=-1, keepdims=True)
        var = jnp.mean((x - mu) ** 2, axis=-1, keepdims=True)
        return (x - mu) * jax.lax.rsqrt(var + LN_EPS) * g + b

    def ffn(x, l, w1_ref, b1_ref, w2_ref, b2_ref):
        h = jnp.maximum(
            jnp.dot(x, w1_ref[l], preferred_element_type=jnp.float32) + b1_ref[l], 0.0)
        return jnp.dot(h, w2_ref[l], preferred_element_type=jnp.float32) + b2_ref[l]

    def mha(xq, xkv, Lq, Lk, bias, wqkv, bqkv, wo, bo, l, self_attn, store_attn=False):
        # xq: [B*Lq, D], xkv: [B*Lk, D], bias: [B, Lq, Lk] additive (0 / -1e10)
        W = wqkv[l]              # [D, 3D]
        bW = bqkv[l]             # [1, 3D]
        if self_attn:
            qkv = jnp.dot(xq, W, preferred_element_type=jnp.float32) + bW   # [B*L, 3D]
            q, k, v = qkv[:, :D], qkv[:, D:2 * D], qkv[:, 2 * D:]
        else:
            q = jnp.dot(xq, W[:, :D], preferred_element_type=jnp.float32) + bW[:, :D]
            kv = jnp.dot(xkv, W[:, D:], preferred_element_type=jnp.float32) + bW[:, D:]
            k, v = kv[:, :D], kv[:, D:]
        q3 = q.reshape(B, Lq, D)
        k3 = k.reshape(B, Lk, D)
        v3 = v.reshape(B, Lk, D)

        ctx_parts = []
        attn_parts = []
        for h in range(N_HEADS):
            sl = slice(h * HEAD_DIM, (h + 1) * HEAD_DIM)
            # batched contraction over the head dim: no explicit k.T transpose
            e = jnp.einsum("bqd,bkd->bqk", q3[:, :, sl], k3[:, :, sl],
                           preferred_element_type=jnp.float32) * scale + bias
            m = jnp.max(e, axis=-1, keepdims=True)
            p = jnp.exp(e - m)
            s = jnp.sum(p, axis=-1, keepdims=True)
            attn = p * pl.reciprocal(s, approx=True)            # softmax over keys (EUP recip)
            ctx_parts.append(jnp.einsum("bqk,bkd->bqd", attn, v3[:, :, sl],
                                        preferred_element_type=jnp.float32))
            if store_attn:
                attn_parts.append(attn)
        ctx = jnp.concatenate(ctx_parts, axis=-1).reshape(B * Lq, D)   # merge heads (lane concat)
        if store_attn:
            attn_ref[...] = jnp.concatenate(attn_parts, axis=-1)       # [B, Lt, H*Ls] single store
        return jnp.dot(ctx, wo[l], preferred_element_type=jnp.float32) + bo[l]

    # ---- additive mask biases (built once, hoisted out of all head loops) ----
    src_bias = src_bias_ref[...]                                   # [B, 1, Ls]  0 / -1e10
    trg_bias = trg_bias_ref[...]                                   # [B, 1, Lt]
    bias_enc = jnp.broadcast_to(src_bias, (B, Ls, Ls))
    bias_cross = jnp.broadcast_to(src_bias, (B, Lt, Ls))
    r = jax.lax.broadcasted_iota(jnp.int32, (Lt, Lt), 0)
    c = jax.lax.broadcasted_iota(jnp.int32, (Lt, Lt), 1)
    causal = jnp.where(r >= c, 0.0, NEG_INF)[None, :, :]           # [1, Lt, Lt]
    bias_dec = jnp.minimum(jnp.broadcast_to(trg_bias, (B, Lt, Lt)),
                           jnp.broadcast_to(causal, (B, Lt, Lt)))  # == AND of pad & causal masks

    # ---- encoder (batch fused into the M dim of every matmul) ----
    x = src_x_ref[...].reshape(B * Ls, D)
    for l in range(N_LAYERS):
        a = mha(x, x, Ls, Ls, bias_enc, e_wqkv, e_bqkv, e_wo, e_bo, l, True)
        x = layer_norm(x + a, e_ln, l * 4 + 0)
        f = ffn(x, l, e_w1, e_b1, e_w2, e_b2)
        x = layer_norm(x + f, e_ln, l * 4 + 2)

    # ---- decoder ----
    y = trg_x_ref[...].reshape(B * Lt, D)
    for l in range(N_LAYERS):
        a = mha(y, y, Lt, Lt, bias_dec, ds_wqkv, ds_bqkv, ds_wo, ds_bo, l, True)
        y = layer_norm(y + a, d_ln, l * 6 + 0)
        a2 = mha(y, x, Lt, Ls, bias_cross, dx_wqkv, dx_bqkv, dx_wo, dx_bo, l, False,
                 store_attn=(l == N_LAYERS - 1))
        y = layer_norm(y + a2, d_ln, l * 6 + 2)
        f = ffn(y, l, d_w1, d_b1, d_w2, d_b2)
        y = layer_norm(y + f, d_ln, l * 6 + 4)

    # ---- output projection (fc_out): ONE lane-dense matmul + ONE store ----
    out_ref[...] = jnp.dot(y, w_out[...], preferred_element_type=jnp.float32) + b_out[...]


# --------------------------- JAX wrapper (embeddings + one pallas_call) ---------------------------
def seq2seq_forward(params, packed, src, trg, src_pad_mask, trg_pad_mask):
    enc_p, dec_p = params["encoder"], params["decoder"]
    B, Ls = src.shape
    Lt = trg.shape[1]

    # embedding glue (gather) stays in plain JAX
    src_x = (jnp.take(enc_p["tok_emb"], src, axis=0) * math.sqrt(HID_DIM)
             + enc_p["pos_emb"][:Ls][None, :, :]).astype(jnp.float32)
    trg_x = (jnp.take(dec_p["tok_emb"], trg, axis=0) * math.sqrt(HID_DIM)
             + dec_p["pos_emb"][:Lt][None, :, :]).astype(jnp.float32)
    # per-batch additive key-mask rows (0 keep / -1e10 mask); full bias tensors built in-kernel
    src_bias = jnp.where(src_pad_mask, 0.0, NEG_INF).astype(jnp.float32)[:, None, :]  # [B,1,Ls]
    trg_bias = jnp.where(trg_pad_mask, 0.0, NEG_INF).astype(jnp.float32)[:, None, :]  # [B,1,Lt]

    inputs = (src_x, trg_x, src_bias, trg_bias) + tuple(packed)
    out2d, attn_packed = pl.pallas_call(
        _seq2seq_kernel,
        out_shape=(jax.ShapeDtypeStruct((B * Lt, TRG_VOCAB), jnp.float32),
                   jax.ShapeDtypeStruct((B, Lt, N_HEADS * Ls), jnp.float32)),
        in_specs=[pl.BlockSpec(memory_space=pltpu.MemorySpace.VMEM)] * len(inputs),
        out_specs=(pl.BlockSpec(memory_space=pltpu.MemorySpace.VMEM),
                   pl.BlockSpec(memory_space=pltpu.MemorySpace.VMEM)),
    )(*inputs)

    out = out2d.reshape(B, Lt, TRG_VOCAB)
    attn = attn_packed.reshape(B, Lt, N_HEADS, Ls).transpose(0, 2, 1, 3)  # [B, H, Lt, Ls]
    return out, attn


# --------------------------- parameter init (same structure/semantics as before) ---------------------------
def init_mha(key):
    ks = jax.random.split(key, 4)
    d = {}
    for name, k in zip(["q", "k", "v", "o"], ks):
        d["w" + name] = jax.random.normal(k, (HID_DIM, HID_DIM), jnp.float32) * 0.02
        d["b" + name] = jnp.zeros((HID_DIM,), jnp.float32)
    return d


def init_ln():
    return {"g": jnp.ones((HID_DIM,), jnp.float32), "b": jnp.zeros((HID_DIM,), jnp.float32)}


def init_ffn(key):
    k1, k2 = jax.random.split(key)
    return {"w1": jax.random.normal(k1, (HID_DIM, PF_DIM), jnp.float32) * 0.02,
            "b1": jnp.zeros((PF_DIM,), jnp.float32),
            "w2": jax.random.normal(k2, (PF_DIM, HID_DIM), jnp.float32) * 0.02,
            "b2": jnp.zeros((HID_DIM,), jnp.float32)}


def init_encoder_layer(key):
    k1, k2 = jax.random.split(key)
    return {"self_attn": init_mha(k1), "ff": init_ffn(k2), "ln1": init_ln(), "ln2": init_ln()}


def init_decoder_layer(key):
    k1, k2, k3 = jax.random.split(key, 3)
    return {"self_attn": init_mha(k1), "enc_attn": init_mha(k2), "ff": init_ffn(k3),
            "ln1": init_ln(), "ln2": init_ln(), "ln3": init_ln()}


def init_params(key):
    keys = jax.random.split(key, 6 + 2 * N_LAYERS)
    enc = {"tok_emb": jax.random.normal(keys[0], (SRC_VOCAB, HID_DIM), jnp.float32) * 0.02,
           "pos_emb": jax.random.normal(keys[1], (MAX_LEN, HID_DIM), jnp.float32) * 0.02,
           "layers": [init_encoder_layer(keys[6 + i]) for i in range(N_LAYERS)]}
    dec = {"tok_emb": jax.random.normal(keys[2], (TRG_VOCAB, HID_DIM), jnp.float32) * 0.02,
           "pos_emb": jax.random.normal(keys[3], (MAX_LEN, HID_DIM), jnp.float32) * 0.02,
           "w_out": jax.random.normal(keys[4], (HID_DIM, TRG_VOCAB), jnp.float32) * 0.02,
           "b_out": jnp.zeros((TRG_VOCAB,), jnp.float32),
           "layers": [init_decoder_layer(keys[6 + N_LAYERS + i]) for i in range(N_LAYERS)]}
    return {"encoder": enc, "decoder": dec}


# --------------------------- one-time packing into lane-dense kernel layout ---------------------------
def _pack_mha(mha_list):
    # Wqkv: [NL, D, 3D]  (column blocks [Wq | Wk | Wv]), biases: [NL, 1, 3D]
    wqkv = jnp.stack([jnp.concatenate([m["wq"], m["wk"], m["wv"]], axis=1) for m in mha_list])
    bqkv = jnp.stack([jnp.concatenate([m["bq"], m["bk"], m["bv"]]).reshape(1, 3 * HID_DIM)
                      for m in mha_list])
    wo = jnp.stack([m["wo"] for m in mha_list])                          # [NL, D, D]
    bo = jnp.stack([m["bo"].reshape(1, HID_DIM) for m in mha_list])      # [NL, 1, D]
    return wqkv, bqkv, wo, bo


def _pack_ln(layers, names):
    rows = []
    for lp in layers:
        for nm in names:
            rows.append(lp[nm]["g"].reshape(1, HID_DIM))
            rows.append(lp[nm]["b"].reshape(1, HID_DIM))
    return jnp.stack(rows)   # [NL * len(names) * 2, 1, D]


def _pack_ffn(layers):
    w1 = jnp.stack([lp["ff"]["w1"] for lp in layers])                     # [NL, D, PF]
    b1 = jnp.stack([lp["ff"]["b1"].reshape(1, PF_DIM) for lp in layers])  # [NL, 1, PF]
    w2 = jnp.stack([lp["ff"]["w2"] for lp in layers])                     # [NL, PF, D]
    b2 = jnp.stack([lp["ff"]["b2"].reshape(1, HID_DIM) for lp in layers]) # [NL, 1, D]
    return w1, b1, w2, b2


def pack_params(params):
    e_layers = params["encoder"]["layers"]
    d_layers = params["decoder"]["layers"]

    e_wqkv, e_bqkv, e_wo, e_bo = _pack_mha([lp["self_attn"] for lp in e_layers])
    e_ln = _pack_ln(e_layers, ("ln1", "ln2"))
    e_w1, e_b1, e_w2, e_b2 = _pack_ffn(e_layers)

    ds_wqkv, ds_bqkv, ds_wo, ds_bo = _pack_mha([lp["self_attn"] for lp in d_layers])
    dx_wqkv, dx_bqkv, dx_wo, dx_bo = _pack_mha([lp["enc_attn"] for lp in d_layers])
    d_ln = _pack_ln(d_layers, ("ln1", "ln2", "ln3"))
    d_w1, d_b1, d_w2, d_b2 = _pack_ffn(d_layers)

    w_out = params["decoder"]["w_out"]
    b_out = params["decoder"]["b_out"].reshape(1, TRG_VOCAB)

    return (e_wqkv, e_bqkv, e_wo, e_bo, e_ln, e_w1, e_b1, e_w2, e_b2,
            ds_wqkv, ds_bqkv, ds_wo, ds_bo,
            dx_wqkv, dx_bqkv, dx_wo, dx_bo,
            d_ln, d_w1, d_b1, d_w2, d_b2,
            w_out, b_out)


# --------------------------- main ---------------------------
if __name__ == "__main__":
    key = jax.random.PRNGKey(0)
    pkey, skey, tkey = jax.random.split(key, 3)
    params = init_params(pkey)
    packed = pack_params(params)

    B, Ls, Lt = 2, 8, 8
    src = jax.random.randint(skey, (B, Ls), 1, SRC_VOCAB)
    trg = jax.random.randint(tkey, (B, Lt), 1, TRG_VOCAB)
    # emulate padding (token id 0) on the tail of sequence 1
    src = src.at[1, -2:].set(0)
    trg = trg.at[1, -1:].set(0)
    src_pad_mask = (src != 0)   # [B, Ls] bool
    trg_pad_mask = (trg != 0)   # [B, Lt] bool

    fwd = jax.jit(partial(seq2seq_forward, params, packed))
    output, attention = fwd(src, trg, src_pad_mask, trg_pad_mask)
    jax.block_until_ready((output, attention))

    assert output.shape == (B, Lt, TRG_VOCAB)
    assert attention.shape == (B, N_HEADS, Lt, Ls)
    assert bool(jnp.all(jnp.isfinite(output))) and bool(jnp.all(jnp.isfinite(attention)))
    # attention rows over keys should sum to ~1 (approx reciprocal -> small tolerance)
    row_sums = jnp.sum(attention, axis=-1)
    assert bool(jnp.all(jnp.abs(row_sums - 1.0) < 1e-2))
    print("KERNEL_OK")
</pallas_src>

<mosaic_0001>
module attributes {stable_mosaic.version = 11 : i64} {
  func.func @_seq2seq_kernel(%arg0: memref<2x8x32xf32, #tpu.memory_space<vmem>>, %arg1: memref<2x8x32xf32, #tpu.memory_space<vmem>>, %arg2: memref<2x1x8xf32, #tpu.memory_space<vmem>>, %arg3: memref<2x1x8xf32, #tpu.memory_space<vmem>>, %arg4: memref<2x32x96xf32, #tpu.memory_space<vmem>>, %arg5: memref<2x1x96xf32, #tpu.memory_space<vmem>>, %arg6: memref<2x32x32xf32, #tpu.memory_space<vmem>>, %arg7: memref<2x1x32xf32, #tpu.memory_space<vmem>>, %arg8: memref<8x1x32xf32, #tpu.memory_space<vmem>>, %arg9: memref<2x32x64xf32, #tpu.memory_space<vmem>>, %arg10: memref<2x1x64xf32, #tpu.memory_space<vmem>>, %arg11: memref<2x64x32xf32, #tpu.memory_space<vmem>>, %arg12: memref<2x1x32xf32, #tpu.memory_space<vmem>>, %arg13: memref<2x32x96xf32, #tpu.memory_space<vmem>>, %arg14: memref<2x1x96xf32, #tpu.memory_space<vmem>>, %arg15: memref<2x32x32xf32, #tpu.memory_space<vmem>>, %arg16: memref<2x1x32xf32, #tpu.memory_space<vmem>>, %arg17: memref<2x32x96xf32, #tpu.memory_space<vmem>>, %arg18: memref<2x1x96xf32, #tpu.memory_space<vmem>>, %arg19: memref<2x32x32xf32, #tpu.memory_space<vmem>>, %arg20: memref<2x1x32xf32, #tpu.memory_space<vmem>>, %arg21: memref<12x1x32xf32, #tpu.memory_space<vmem>>, %arg22: memref<2x32x64xf32, #tpu.memory_space<vmem>>, %arg23: memref<2x1x64xf32, #tpu.memory_space<vmem>>, %arg24: memref<2x64x32xf32, #tpu.memory_space<vmem>>, %arg25: memref<2x1x32xf32, #tpu.memory_space<vmem>>, %arg26: memref<32x16xf32, #tpu.memory_space<vmem>>, %arg27: memref<1x16xf32, #tpu.memory_space<vmem>>, %arg28: memref<16x16xf32, #tpu.memory_space<vmem>>, %arg29: memref<2x8x32xf32, #tpu.memory_space<vmem>>) attributes {dimension_semantics = [], scalar_prefetch = 0 : i64, scratch_operands = 0 : i64, tpu.core_type = #tpu.core_type<tc>} {
    %c0 = arith.constant 0 : index
    %c0_0 = arith.constant 0 : index
    %c0_1 = arith.constant 0 : index
    %0 = vector.load %arg2[%c0, %c0_0, %c0_1] : memref<2x1x8xf32, #tpu.memory_space<vmem>>, vector<2x1x8xf32>
    %c0_2 = arith.constant 0 : index
    %c0_3 = arith.constant 0 : index
    %c0_4 = arith.constant 0 : index
    %1 = vector.load %arg3[%c0_2, %c0_3, %c0_4] : memref<2x1x8xf32, #tpu.memory_space<vmem>>, vector<2x1x8xf32>
    %2 = vector.shape_cast %0 : vector<2x1x8xf32> to vector<2x1x8xf32>
    %3 = vector.broadcast %2 : vector<2x1x8xf32> to vector<2x8x8xf32>
    %4 = vector.shape_cast %0 : vector<2x1x8xf32> to vector<2x1x8xf32>
    %5 = vector.broadcast %4 : vector<2x1x8xf32> to vector<2x8x8xf32>
    %6 = tpu.iota {dimensions = array<i32: 0>} : vector<8x8xi32>
    %7 = tpu.iota {dimensions = array<i32: 1>} : vector<8x8xi32>
    %8 = arith.cmpi sge, %6, %7 : vector<8x8xi32>
    %cst = arith.constant 0.000000e+00 : f32
    %cst_5 = arith.constant -1.000000e+10 : f32
    %9 = vector.broadcast %cst : f32 to vector<8x8xf32>
    %10 = vector.broadcast %cst_5 : f32 to vector<8x8xf32>
    %11 = arith.select %8, %9, %10 : vector<8x8xi1>, vector<8x8xf32>
    %12 = vector.shape_cast %11 : vector<8x8xf32> to vector<1x8x8xf32>
    %13 = vector.shape_cast %1 : vector<2x1x8xf32> to vector<2x1x8xf32>
    %14 = vector.broadcast %13 : vector<2x1x8xf32> to vector<2x8x8xf32>
    %15 = vector.shape_cast %12 : vector<1x8x8xf32> to vector<1x8x8xf32>
    %16 = vector.broadcast %15 : vector<1x8x8xf32> to vector<2x8x8xf32>
    %17 = arith.minimumf %14, %16 : vector<2x8x8xf32>
    %c0_6 = arith.constant 0 : index
    %c0_7 = arith.constant 0 : index
    %c0_8 = arith.constant 0 : index
    %18 = vector.load %arg0[%c0_6, %c0_7, %c0_8] : memref<2x8x32xf32, #tpu.memory_space<vmem>>, vector<2x8x32xf32>
    %19 = vector.shape_cast %18 : vector<2x8x32xf32> to vector<16x32xf32>
    %c0_9 = arith.constant 0 : index
    %c0_10 = arith.constant 0 : index
    %c0_11 = arith.constant 0 : index
    %20 = vector.load %arg4[%c0_9, %c0_10, %c0_11] : memref<2x32x96xf32, #tpu.memory_space<vmem>>, vector<1x32x96xf32>
    %21 = vector.shape_cast %20 : vector<1x32x96xf32> to vector<32x96xf32>
    %c0_12 = arith.constant 0 : index
    %c0_13 = arith.constant 0 : index
    %c0_14 = arith.constant 0 : index
    %22 = vector.load %arg5[%c0_12, %c0_13, %c0_14] : memref<2x1x96xf32, #tpu.memory_space<vmem>>, vector<1x1x96xf32>
    %23 = vector.shape_cast %22 : vector<1x1x96xf32> to vector<1x96xf32>
    %cst_15 = arith.constant dense<0.000000e+00> : vector<16x96xf32>
    %24 = tpu.matmul %19, %21, %cst_15 {dimension_numbers = #tpu.dot_dimension_numbers<[1], [0], [0], [1], [0, 0, 1, 1], [], []>} : vector<16x32xf32>, vector<32x96xf32>, vector<16x96xf32> -> vector<16x96xf32>
    %25 = vector.broadcast %23 : vector<1x96xf32> to vector<16x96xf32>
    %26 = arith.addf %24, %25 : vector<16x96xf32>
    %27 = vector.extract_strided_slice %26 {offsets = [0, 0], sizes = [16, 32], strides = [1, 1]} : vector<16x96xf32> to vector<16x32xf32>
    %28 = vector.extract_strided_slice %26 {offsets = [0, 32], sizes = [16, 32], strides = [1, 1]} : vector<16x96xf32> to vector<16x32xf32>
    %29 = vector.extract_strided_slice %26 {offsets = [0, 64], sizes = [16, 32], strides = [1, 1]} : vector<16x96xf32> to vector<16x32xf32>
    %30 = vector.shape_cast %27 : vector<16x32xf32> to vector<2x8x32xf32>
    %31 = vector.shape_cast %28 : vector<16x32xf32> to vector<2x8x32xf32>
    %32 = vector.shape_cast %29 : vector<16x32xf32> to vector<2x8x32xf32>
    %33 = vector.extract_strided_slice %30 {offsets = [0, 0, 0], sizes = [2, 8, 8], strides = [1, 1, 1]} : vector<2x8x32xf32> to vector<2x8x8xf32>
    %34 = vector.extract_strided_slice %31 {offsets = [0, 0, 0], sizes = [2, 8, 8], strides = [1, 1, 1]} : vector<2x8x32xf32> to vector<2x8x8xf32>
    "tpu.trace_start"() <{level = 10 : i32, message = "bqd,bkd->bqk"}> : () -> ()
    %cst_16 = arith.constant dense<0.000000e+00> : vector<2x8x8xf32>
    %35 = tpu.matmul %33, %34, %cst_16 {dimension_numbers = #tpu.dot_dimension_numbers<[2], [2], [1], [1], [0, 0, 0, 1, 1, 1], [0], [0]>} : vector<2x8x8xf32>, vector<2x8x8xf32>, vector<2x8x8xf32> -> vector<2x8x8xf32>
    "tpu.trace_stop"() : () -> ()
    %cst_17 = arith.constant 0.353553385 : f32
    %36 = vector.broadcast %cst_17 : f32 to vector<2x8x8xf32>
    %37 = arith.mulf %35, %36 : vector<2x8x8xf32>
    %38 = arith.addf %37, %3 : vector<2x8x8xf32>
    %cst_18 = arith.constant dense<0xFF800000> : vector<2x8xf32>
    %39 = vector.multi_reduction <maximumf>, %38, %cst_18 [2] : vector<2x8x8xf32> to vector<2x8xf32>
    %40 = vector.shape_cast %39 : vector<2x8xf32> to vector<2x8x1xf32>
    %41 = vector.broadcast %40 : vector<2x8x1xf32> to vector<2x8x8xf32>
    %42 = arith.subf %38, %41 : vector<2x8x8xf32>
    %43 = math.exp %42 : vector<2x8x8xf32>
    %cst_19 = arith.constant dense<0.000000e+00> : vector<2x8xf32>
    %44 = vector.multi_reduction <add>, %43, %cst_19 [2] : vector<2x8x8xf32> to vector<2x8xf32>
    %45 = vector.shape_cast %44 : vector<2x8xf32> to vector<2x8x1xf32>
    %46 = tpu.reciprocal %45 {approx = true} : vector<2x8x1xf32> -> vector<2x8x1xf32>
    %47 = vector.broadcast %46 : vector<2x8x1xf32> to vector<2x8x8xf32>
    %48 = arith.mulf %43, %47 : vector<2x8x8xf32>
    %49 = vector.extract_strided_slice %32 {offsets = [0, 0, 0], sizes = [2, 8, 8], strides = [1, 1, 1]} : vector<2x8x32xf32> to vector<2x8x8xf32>
    "tpu.trace_start"() <{level = 10 : i32, message = "bqk,bkd->bqd"}> : () -> ()
    %cst_20 = arith.constant dense<0.000000e+00> : vector<2x8x8xf32>
    %50 = tpu.matmul %48, %49, %cst_20 {dimension_numbers = #tpu.dot_dimension_numbers<[2], [1], [1], [2], [0, 0, 0, 1, 1, 2], [0], [0]>} : vector<2x8x8xf32>, vector<2x8x8xf32>, vector<2x8x8xf32> -> vector<2x8x8xf32>
    "tpu.trace_stop"() : () -> ()
    %51 = vector.extract_strided_slice %30 {offsets = [0, 0, 8], sizes = [2, 8, 8], strides = [1, 1, 1]} : vector<2x8x32xf32> to vector<2x8x8xf32>
    %52 = vector.extract_strided_slice %31 {offsets = [0, 0, 8], sizes = [2, 8, 8], strides = [1, 1, 1]} : vector<2x8x32xf32> to vector<2x8x8xf32>
    "tpu.trace_start"() <{level = 10 : i32, message = "bqd,bkd->bqk"}> : () -> ()
    %cst_21 = arith.constant dense<0.000000e+00> : vector<2x8x8xf32>
    %53 = tpu.matmul %51, %52, %cst_21 {dimension_numbers = #tpu.dot_dimension_numbers<[2], [2], [1], [1], [0, 0, 0, 1, 1, 1], [0], [0]>} : vector<2x8x8xf32>, vector<2x8x8xf32>, vector<2x8x8xf32> -> vector<2x8x8xf32>
    "tpu.trace_stop"() : () -> ()
    %cst_22 = arith.constant 0.353553385 : f32
    %54 = vector.broadcast %cst_22 : f32 to vector<2x8x8xf32>
    %55 = arith.mulf %53, %54 : vector<2x8x8xf32>
    %56 = arith.addf %55, %3 : vector<2x8x8xf32>
    %cst_23 = arith.constant dense<0xFF800000> : vector<2x8xf32>
    %57 = vector.multi_reduction <maximumf>, %56, %cst_23 [2] : vector<2x8x8xf32> to vector<2x8xf32>
    %58 = vector.shape_cast %57 : vector<2x8xf32> to vector<2x8x1xf32>
    %59 = vector.broadcast %58 : vector<2x8x1xf32> to vector<2x8x8xf32>
    %60 = arith.subf %56, %59 : vector<2x8x8xf32>
    %61 = math.exp %60 : vector<2x8x8xf32>
    %cst_24 = arith.constant dense<0.000000e+00> : vector<2x8xf32>
    %62 = vector.multi_reduction <add>, %61, %cst_24 [2] : vector<2x8x8xf32> to vector<2x8xf32>
    %63 = vector.shape_cast %62 : vector<2x8xf32> to vector<2x8x1xf32>
    %64 = tpu.reciprocal %63 {approx = true} : vector<2x8x1xf32> -> vector<2x8x1xf32>
    %65 = vector.broadcast %64 : vector<2x8x1xf32> to vector<2x8x8xf32>
    %66 = arith.mulf %61, %65 : vector<2x8x8xf32>
    %67 = vector.extract_strided_slice %32 {offsets = [0, 0, 8], sizes = [2, 8, 8], strides = [1, 1, 1]} : vector<2x8x32xf32> to vector<2x8x8xf32>
    "tpu.trace_start"() <{level = 10 : i32, message = "bqk,bkd->bqd"}> : () -> ()
    %cst_25 = arith.constant dense<0.000000e+00> : vector<2x8x8xf32>
    %68 = tpu.matmul %66, %67, %cst_25 {dimension_numbers = #tpu.dot_dimension_numbers<[2], [1], [1], [2], [0, 0, 0, 1, 1, 2], [0], [0]>} : vector<2x8x8xf32>, vector<2x8x8xf32>, vector<2x8x8xf32> -> vector<2x8x8xf32>
    "tpu.trace_stop"() : () -> ()
    %69 = vector.extract_strided_slice %30 {offsets = [0, 0, 16], sizes = [2, 8, 8], strides = [1, 1, 1]} : vector<2x8x32xf32> to vector<2x8x8xf32>
    %70 = vector.extract_strided_slice %31 {offsets = [0, 0, 16], sizes = [2, 8, 8], strides = [1, 1, 1]} : vector<2x8x32xf32> to vector<2x8x8xf32>
    "tpu.trace_start"() <{level = 10 : i32, message = "bqd,bkd->bqk"}> : () -> ()
    %cst_26 = arith.constant dense<0.000000e+00> : vector<2x8x8xf32>
    %71 = tpu.matmul %69, %70, %cst_26 {dimension_numbers = #tpu.dot_dimension_numbers<[2], [2], [1], [1], [0, 0, 0, 1, 1, 1], [0], [0]>} : vector<2x8x8xf32>, vector<2x8x8xf32>, vector<2x8x8xf32> -> vector<2x8x8xf32>
    "tpu.trace_stop"() : () -> ()
    %cst_27 = arith.constant 0.353553385 : f32
    %72 = vector.broadcast %cst_27 : f32 to vector<2x8x8xf32>
    %73 = arith.mulf %71, %72 : vector<2x8x8xf32>
    %74 = arith.addf %73, %3 : vector<2x8x8xf32>
    %cst_28 = arith.constant dense<0xFF800000> : vector<2x8xf32>
    %75 = vector.multi_reduction <maximumf>, %74, %cst_28 [2] : vector<2x8x8xf32> to vector<2x8xf32>
    %76 = vector.shape_cast %75 : vector<2x8xf32> to vector<2x8x1xf32>
    %77 = vector.broadcast %76 : vector<2x8x1xf32> to vector<2x8x8xf32>
    %78 = arith.subf %74, %77 : vector<2x8x8xf32>
    %79 = math.exp %78 : vector<2x8x8xf32>
    %cst_29 = arith.constant dense<0.000000e+00> : vector<2x8xf32>
    %80 = vector.multi_reduction <add>, %79, %cst_29 [2] : vector<2x8x8xf32> to vector<2x8xf32>
    %81 = vector.shape_cast %80 : vector<2x8xf32> to vector<2x8x1xf32>
    %82 = tpu.reciprocal %81 {approx = true} : vector<2x8x1xf32> -> vector<2x8x1xf32>
    %83 = vector.broadcast %82 : vector<2x8x1xf32> to vector<2x8x8xf32>
    %84 = arith.mulf %79, %83 : vector<2x8x8xf32>
    %85 = vector.extract_strided_slice %32 {offsets = [0, 0, 16], sizes = [2, 8, 8], strides = [1, 1, 1]} : vector<2x8x32xf32> to vector<2x8x8xf32>
    "tpu.trace_start"() <{level = 10 : i32, message = "bqk,bkd->bqd"}> : () -> ()
    %cst_30 = arith.constant dense<0.000000e+00> : vector<2x8x8xf32>
    %86 = tpu.matmul %84, %85, %cst_30 {dimension_numbers = #tpu.dot_dimension_numbers<[2], [1], [1], [2], [0, 0, 0, 1, 1, 2], [0], [0]>} : vector<2x8x8xf32>, vector<2x8x8xf32>, vector<2x8x8xf32> -> vector<2x8x8xf32>
    "tpu.trace_stop"() : () -> ()
    %87 = vector.extract_strided_slice %30 {offsets = [0, 0, 24], sizes = [2, 8, 8], strides = [1, 1, 1]} : vector<2x8x32xf32> to vector<2x8x8xf32>
    %88 = vector.extract_strided_slice %31 {offsets = [0, 0, 24], sizes = [2, 8, 8], strides = [1, 1, 1]} : vector<2x8x32xf32> to vector<2x8x8xf32>
    "tpu.trace_start"() <{level = 10 : i32, message = "bqd,bkd->bqk"}> : () -> ()
    %cst_31 = arith.constant dense<0.000000e+00> : vector<2x8x8xf32>
    %89 = tpu.matmul %87, %88, %cst_31 {dimension_numbers = #tpu.dot_dimension_numbers<[2], [2], [1], [1], [0, 0, 0, 1, 1, 1], [0], [0]>} : vector<2x8x8xf32>, vector<2x8x8xf32>, vector<2x8x8xf32> -> vector<2x8x8xf32>
    "tpu.trace_stop"() : () -> ()
    %cst_32 = arith.constant 0.353553385 : f32
    %90 = vector.broadcast %cst_32 : f32 to vector<2x8x8xf32>
    %91 = arith.mulf %89, %90 : vector<2x8x8xf32>
    %92 = arith.addf %91, %3 : vector<2x8x8xf32>
    %cst_33 = arith.constant dense<0xFF800000> : vector<2x8xf32>
    %93 = vector.multi_reduction <maximumf>, %92, %cst_33 [2] : vector<2x8x8xf32> to vector<2x8xf32>
    %94 = vector.shape_cast %93 : vector<2x8xf32> to vector<2x8x1xf32>
    %95 = vector.broadcast %94 : vector<2x8x1xf32> to vector<2x8x8xf32>
    %96 = arith.subf %92, %95 : vector<2x8x8xf32>
    %97 = math.exp %96 : vector<2x8x8xf32>
    %cst_34 = arith.constant dense<0.000000e+00> : vector<2x8xf32>
    %98 = vector.multi_reduction <add>, %97, %cst_34 [2] : vector<2x8x8xf32> to vector<2x8xf32>
    %99 = vector.shape_cast %98 : vector<2x8xf32> to vector<2x8x1xf32>
    %100 = tpu.reciprocal %99 {approx = true} : vector<2x8x1xf32> -> vector<2x8x1xf32>
    %101 = vector.broadcast %100 : vector<2x8x1xf32> to vector<2x8x8xf32>
    %102 = arith.mulf %97, %101 : vector<2x8x8xf32>
    %103 = vector.extract_strided_slice %32 {offsets = [0, 0, 24], sizes = [2, 8, 8], strides = [1, 1, 1]} : vector<2x8x32xf32> to vector<2x8x8xf32>
    "tpu.trace_start"() <{level = 10 : i32, message = "bqk,bkd->bqd"}> : () -> ()
    %cst_35 = arith.constant dense<0.000000e+00> : vector<2x8x8xf32>
    %104 = tpu.matmul %102, %103, %cst_35 {dimension_numbers = #tpu.dot_dimension_numbers<[2], [1], [1], [2], [0, 0, 0, 1, 1, 2], [0], [0]>} : vector<2x8x8xf32>, vector<2x8x8xf32>, vector<2x8x8xf32> -> vector<2x8x8xf32>
    "tpu.trace_stop"() : () -> ()
    %105 = tpu.concatenate %50, %68, %86, %104 in 2 : vector<2x8x8xf32>, vector<2x8x8xf32>, vector<2x8x8xf32>, vector<2x8x8xf32> -> vector<2x8x32xf32>
    %106 = vector.shape_cast %105 : vector<2x8x32xf32> to vector<16x32xf32>
    %c0_36 = arith.constant 0 : index
    %c0_37 = arith.constant 0 : index
    %c0_38 = arith.constant 0 : index
    %107 = vector.load %arg6[%c0_36, %c0_37, %c0_38] : memref<2x32x32xf32, #tpu.memory_space<vmem>>, vector<1x32x32xf32>
    %108 = vector.shape_cast %107 : vector<1x32x32xf32> to vector<32x32xf32>
    %cst_39 = arith.constant dense<0.000000e+00> : vector<16x32xf32>
    %109 = tpu.matmul %106, %108, %cst_39 {dimension_numbers = #tpu.dot_dimension_numbers<[1], [0], [0], [1], [0, 0, 1, 1], [], []>} : vector<16x32xf32>, vector<32x32xf32>, vector<16x32xf32> -> vector<16x32xf32>
    %c0_40 = arith.constant 0 : index
    %c0_41 = arith.constant 0 : index
    %c0_42 = arith.constant 0 : index
    %110 = vector.load %arg7[%c0_40, %c0_41, %c0_42] : memref<2x1x32xf32, #tpu.memory_space<vmem>>, vector<1x1x32xf32>
    %111 = vector.shape_cast %110 : vector<1x1x32xf32> to vector<1x32xf32>
    %112 = vector.broadcast %111 : vector<1x32xf32> to vector<16x32xf32>
    %113 = arith.addf %109, %112 : vector<16x32xf32>
    %114 = arith.addf %19, %113 : vector<16x32xf32>
    %c0_43 = arith.constant 0 : index
    %c0_44 = arith.constant 0 : index
    %c0_45 = arith.constant 0 : index
    %115 = vector.load %arg8[%c0_43, %c0_44, %c0_45] : memref<8x1x32xf32, #tpu.memory_space<vmem>>, vector<1x1x32xf32>
    %116 = vector.shape_cast %115 : vector<1x1x32xf32> to vector<1x32xf32>
    %c1 = arith.constant 1 : index
    %c0_46 = arith.constant 0 : index
    %c0_47 = arith.constant 0 : index
    %117 = vector.load %arg8[%c1, %c0_46, %c0_47] : memref<8x1x32xf32, #tpu.memory_space<vmem>>, vector<1x1x32xf32>
    %118 = vector.shape_cast %117 : vector<1x1x32xf32> to vector<1x32xf32>
    %cst_48 = arith.constant dense<0.000000e+00> : vector<16xf32>
    %119 = vector.multi_reduction <add>, %114, %cst_48 [1] : vector<16x32xf32> to vector<16xf32>
    %120 = vector.shape_cast %119 : vector<16xf32> to vector<16x1xf32>
    %cst_49 = arith.constant 3.200000e+01 : f32
    %121 = vector.broadcast %cst_49 : f32 to vector<16x1xf32>
    %122 = arith.divf %120, %121 : vector<16x1xf32>
    %123 = vector.broadcast %122 : vector<16x1xf32> to vector<16x32xf32>
    %124 = arith.subf %114, %123 : vector<16x32xf32>
    %125 = arith.mulf %124, %124 : vector<16x32xf32>
    %cst_50 = arith.constant dense<0.000000e+00> : vector<16xf32>
    %126 = vector.multi_reduction <add>, %125, %cst_50 [1] : vector<16x32xf32> to vector<16xf32>
    %127 = vector.shape_cast %126 : vector<16xf32> to vector<16x1xf32>
    %cst_51 = arith.constant 3.200000e+01 : f32
    %128 = vector.broadcast %cst_51 : f32 to vector<16x1xf32>
    %129 = arith.divf %127, %128 : vector<16x1xf32>
    %130 = vector.broadcast %122 : vector<16x1xf32> to vector<16x32xf32>
    %131 = arith.subf %114, %130 : vector<16x32xf32>
    %cst_52 = arith.constant 9.99999974E-6 : f32
    %132 = vector.broadcast %cst_52 : f32 to vector<16x1xf32>
    %133 = arith.addf %129, %132 : vector<16x1xf32>
    %134 = math.rsqrt %133 : vector<16x1xf32>
    %135 = vector.broadcast %134 : vector<16x1xf32> to vector<16x32xf32>
    %136 = arith.mulf %131, %135 : vector<16x32xf32>
    %137 = vector.broadcast %116 : vector<1x32xf32> to vector<16x32xf32>
    %138 = arith.mulf %136, %137 : vector<16x32xf32>
    %139 = vector.broadcast %118 : vector<1x32xf32> to vector<16x32xf32>
    %140 = arith.addf %138, %139 : vector<16x32xf32>
    %c0_53 = arith.constant 0 : index
    %c0_54 = arith.constant 0 : index
    %c0_55 = arith.constant 0 : index
    %141 = vector.load %arg9[%c0_53, %c0_54, %c0_55] : memref<2x32x64xf32, #tpu.memory_space<vmem>>, vector<1x32x64xf32>
    %142 = vector.shape_cast %141 : vector<1x32x64xf32> to vector<32x64xf32>
    %cst_56 = arith.constant dense<0.000000e+00> : vector<16x64xf32>
    %143 = tpu.matmul %140, %142, %cst_56 {dimension_numbers = #tpu.dot_dimension_numbers<[1], [0], [0], [1], [0, 0, 1, 1], [], []>} : vector<16x32xf32>, vector<32x64xf32>, vector<16x64xf32> -> vector<16x64xf32>
    %c0_57 = arith.constant 0 : index
    %c0_58 = arith.constant 0 : index
    %c0_59 = arith.constant 0 : index
    %144 = vector.load %arg10[%c0_57, %c0_58, %c0_59] : memref<2x1x64xf32, #tpu.memory_space<vmem>>, vector<1x1x64xf32>
    %145 = vector.shape_cast %144 : vector<1x1x64xf32> to vector<1x64xf32>
    %146 = vector.broadcast %145 : vector<1x64xf32> to vector<16x64xf32>
    %147 = arith.addf %143, %146 : vector<16x64xf32>
    %cst_60 = arith.constant 0.000000e+00 : f32
    %148 = vector.broadcast %cst_60 : f32 to vector<16x64xf32>
    %149 = arith.maximumf %147, %148 : vector<16x64xf32>
    %c0_61 = arith.constant 0 : index
    %c0_62 = arith.constant 0 : index
    %c0_63 = arith.constant 0 : index
    %150 = vector.load %arg11[%c0_61, %c0_62, %c0_63] : memref<2x64x32xf32, #tpu.memory_space<vmem>>, vector<1x64x32xf32>
    %151 = vector.shape_cast %150 : vector<1x64x32xf32> to vector<64x32xf32>
    %cst_64 = arith.constant dense<0.000000e+00> : vector<16x32xf32>
    %152 = tpu.matmul %149, %151, %cst_64 {dimension_numbers = #tpu.dot_dimension_numbers<[1], [0], [0], [1], [0, 0, 1, 1], [], []>} : vector<16x64xf32>, vector<64x32xf32>, vector<16x32xf32> -> vector<16x32xf32>
    %c0_65 = arith.constant 0 : index
    %c0_66 = arith.constant 0 : index
    %c0_67 = arith.constant 0 : index
    %153 = vector.load %arg12[%c0_65, %c0_66, %c0_67] : memref<2x1x32xf32, #tpu.memory_space<vmem>>, vector<1x1x32xf32>
    %154 = vector.shape_cast %153 : vector<1x1x32xf32> to vector<1x32xf32>
    %155 = vector.broadcast %154 : vector<1x32xf32> to vector<16x32xf32>
    %156 = arith.addf %152, %155 : vector<16x32xf32>
    %157 = arith.addf %140, %156 : vector<16x32xf32>
    %c2 = arith.constant 2 : index
    %c0_68 = arith.constant 0 : index
    %c0_69 = arith.constant 0 : index
    %158 = vector.load %arg8[%c2, %c0_68, %c0_69] : memref<8x1x32xf32, #tpu.memory_space<vmem>>, vector<1x1x32xf32>
    %159 = vector.shape_cast %158 : vector<1x1x32xf32> to vector<1x32xf32>
    %c3 = arith.constant 3 : index
    %c0_70 = arith.constant 0 : index
    %c0_71 = arith.constant 0 : index
    %160 = vector.load %arg8[%c3, %c0_70, %c0_71] : memref<8x1x32xf32, #tpu.memory_space<vmem>>, vector<1x1x32xf32>
    %161 = vector.shape_cast %160 : vector<1x1x32xf32> to vector<1x32xf32>
    %cst_72 = arith.constant dense<0.000000e+00> : vector<16xf32>
    %162 = vector.multi_reduction <add>, %157, %cst_72 [1] : vector<16x32xf32> to vector<16xf32>
    %163 = vector.shape_cast %162 : vector<16xf32> to vector<16x1xf32>
    %cst_73 = arith.constant 3.200000e+01 : f32
    %164 = vector.broadcast %cst_73 : f32 to vector<16x1xf32>
    %165 = arith.divf %163, %164 : vector<16x1xf32>
    %166 = vector.broadcast %165 : vector<16x1xf32> to vector<16x32xf32>
    %167 = arith.subf %157, %166 : vector<16x32xf32>
    %168 = arith.mulf %167, %167 : vector<16x32xf32>
    %cst_74 = arith.constant dense<0.000000e+00> : vector<16xf32>
    %169 = vector.multi_reduction <add>, %168, %cst_74 [1] : vector<16x32xf32> to vector<16xf32>
    %170 = vector.shape_cast %169 : vector<16xf32> to vector<16x1xf32>
    %cst_75 = arith.constant 3.200000e+01 : f32
    %171 = vector.broadcast %cst_75 : f32 to vector<16x1xf32>
    %172 = arith.divf %170, %171 : vector<16x1xf32>
    %173 = vector.broadcast %165 : vector<16x1xf32> to vector<16x32xf32>
    %174 = arith.subf %157, %173 : vector<16x32xf32>
    %cst_76 = arith.constant 9.99999974E-6 : f32
    %175 = vector.broadcast %cst_76 : f32 to vector<16x1xf32>
    %176 = arith.addf %172, %175 : vector<16x1xf32>
    %177 = math.rsqrt %176 : vector<16x1xf32>
    %178 = vector.broadcast %177 : vector<16x1xf32> to vector<16x32xf32>
    %179 = arith.mulf %174, %178 : vector<16x32xf32>
    %180 = vector.broadcast %159 : vector<1x32xf32> to vector<16x32xf32>
    %181 = arith.mulf %179, %180 : vector<16x32xf32>
    %182 = vector.broadcast %161 : vector<1x32xf32> to vector<16x32xf32>
    %183 = arith.addf %181, %182 : vector<16x32xf32>
    %c1_77 = arith.constant 1 : index
    %c0_78 = arith.constant 0 : index
    %c0_79 = arith.constant 0 : index
    %184 = vector.load %arg4[%c1_77, %c0_78, %c0_79] : memref<2x32x96xf32, #tpu.memory_space<vmem>>, vector<1x32x96xf32>
    %185 = vector.shape_cast %184 : vector<1x32x96xf32> to vector<32x96xf32>
    %c1_80 = arith.constant 1 : index
    %c0_81 = arith.constant 0 : index
    %c0_82 = arith.constant 0 : index
    %186 = vector.load %arg5[%c1_80, %c0_81, %c0_82] : memref<2x1x96xf32, #tpu.memory_space<vmem>>, vector<1x1x96xf32>
    %187 = vector.shape_cast %186 : vector<1x1x96xf32> to vector<1x96xf32>
    %cst_83 = arith.constant dense<0.000000e+00> : vector<16x96xf32>
    %188 = tpu.matmul %183, %185, %cst_83 {dimension_numbers = #tpu.dot_dimension_numbers<[1], [0], [0], [1], [0, 0, 1, 1], [], []>} : vector<16x32xf32>, vector<32x96xf32>, vector<16x96xf32> -> vector<16x96xf32>
    %189 = vector.broadcast %187 : vector<1x96xf32> to vector<16x96xf32>
    %190 = arith.addf %188, %189 : vector<16x96xf32>
    %191 = vector.extract_strided_slice %190 {offsets = [0, 0], sizes = [16, 32], strides = [1, 1]} : vector<16x96xf32> to vector<16x32xf32>
    %192 = vector.extract_strided_slice %190 {offsets = [0, 32], sizes = [16, 32], strides = [1, 1]} : vector<16x96xf32> to vector<16x32xf32>
    %193 = vector.extract_strided_slice %190 {offsets = [0, 64], sizes = [16, 32], strides = [1, 1]} : vector<16x96xf32> to vector<16x32xf32>
    %194 = vector.shape_cast %191 : vector<16x32xf32> to vector<2x8x32xf32>
    %195 = vector.shape_cast %192 : vector<16x32xf32> to vector<2x8x32xf32>
    %196 = vector.shape_cast %193 : vector<16x32xf32> to vector<2x8x32xf32>
    %197 = vector.extract_strided_slice %194 {offsets = [0, 0, 0], sizes = [2, 8, 8], strides = [1, 1, 1]} : vector<2x8x32xf32> to vector<2x8x8xf32>
    %198 = vector.extract_strided_slice %195 {offsets = [0, 0, 0], sizes = [2, 8, 8], strides = [1, 1, 1]} : vector<2x8x32xf32> to vector<2x8x8xf32>
    "tpu.trace_start"() <{level = 10 : i32, message = "bqd,bkd->bqk"}> : () -> ()
    %cst_84 = arith.constant dense<0.000000e+00> : vector<2x8x8xf32>
    %199 = tpu.matmul %197, %198, %cst_84 {dimension_numbers = #tpu.dot_dimension_numbers<[2], [2], [1], [1], [0, 0, 0, 1, 1, 1], [0], [0]>} : vector<2x8x8xf32>, vector<2x8x8xf32>, vector<2x8x8xf32> -> vector<2x8x8xf32>
    "tpu.trace_stop"() : () -> ()
    %cst_85 = arith.constant 0.353553385 : f32
    %200 = vector.broadcast %cst_85 : f32 to vector<2x8x8xf32>
    %201 = arith.mulf %199, %200 : vector<2x8x8xf32>
    %202 = arith.addf %201, %3 : vector<2x8x8xf32>
    %cst_86 = arith.constant dense<0xFF800000> : vector<2x8xf32>
    %203 = vector.multi_reduction <maximumf>, %202, %cst_86 [2] : vector<2x8x8xf32> to vector<2x8xf32>
    %204 = vector.shape_cast %203 : vector<2x8xf32> to vector<2x8x1xf32>
    %205 = vector.broadcast %204 : vector<2x8x1xf32> to vector<2x8x8xf32>
    %206 = arith.subf %202, %205 : vector<2x8x8xf32>
    %207 = math.exp %206 : vector<2x8x8xf32>
    %cst_87 = arith.constant dense<0.000000e+00> : vector<2x8xf32>
    %208 = vector.multi_reduction <add>, %207, %cst_87 [2] : vector<2x8x8xf32> to vector<2x8xf32>
    %209 = vector.shape_cast %208 : vector<2x8xf32> to vector<2x8x1xf32>
    %210 = tpu.reciprocal %209 {approx = true} : vector<2x8x1xf32> -> vector<2x8x1xf32>
    %211 = vector.broadcast %210 : vector<2x8x1xf32> to vector<2x8x8xf32>
    %212 = arith.mulf %207, %211 : vector<2x8x8xf32>
    %213 = vector.extract_strided_slice %196 {offsets = [0, 0, 0], sizes = [2, 8, 8], strides = [1, 1, 1]} : vector<2x8x32xf32> to vector<2x8x8xf32>
    "tpu.trace_start"() <{level = 10 : i32, message = "bqk,bkd->bqd"}> : () -> ()
    %cst_88 = arith.constant dense<0.000000e+00> : vector<2x8x8xf32>
    %214 = tpu.matmul %212, %213, %cst_88 {dimension_numbers = #tpu.dot_dimension_numbers<[2], [1], [1], [2], [0, 0, 0, 1, 1, 2], [0], [0]>} : vector<2x8x8xf32>, vector<2x8x8xf32>, vector<2x8x8xf32> -> vector<2x8x8xf32>
    "tpu.trace_stop"() : () -> ()
    %215 = vector.extract_strided_slice %194 {offsets = [0, 0, 8], sizes = [2, 8, 8], strides = [1, 1, 1]} : vector<2x8x32xf32> to vector<2x8x8xf32>
    %216 = vector.extract_strided_slice %195 {offsets = [0, 0, 8], sizes = [2, 8, 8], strides = [1, 1, 1]} : vector<2x8x32xf32> to vector<2x8x8xf32>
    "tpu.trace_start"() <{level = 10 : i32, message = "bqd,bkd->bqk"}> : () -> ()
    %cst_89 = arith.constant dense<0.000000e+00> : vector<2x8x8xf32>
    %217 = tpu.matmul %215, %216, %cst_89 {dimension_numbers = #tpu.dot_dimension_numbers<[2], [2], [1], [1], [0, 0, 0, 1, 1, 1], [0], [0]>} : vector<2x8x8xf32>, vector<2x8x8xf32>, vector<2x8x8xf32> -> vector<2x8x8xf32>
    "tpu.trace_stop"() : () -> ()
    %cst_90 = arith.constant 0.353553385 : f32
    %218 = vector.broadcast %cst_90 : f32 to vector<2x8x8xf32>
    %219 = arith.mulf %217, %218 : vector<2x8x8xf32>
    %220 = arith.addf %219, %3 : vector<2x8x8xf32>
    %cst_91 = arith.constant dense<0xFF800000> : vector<2x8xf32>
    %221 = vector.multi_reduction <maximumf>, %220, %cst_91 [2] : vector<2x8x8xf32> to vector<2x8xf32>
    %222 = vector.shape_cast %221 : vector<2x8xf32> to vector<2x8x1xf32>
    %223 = vector.broadcast %222 : vector<2x8x1xf32> to vector<2x8x8xf32>
    %224 = arith.subf %220, %223 : vector<2x8x8xf32>
    %225 = math.exp %224 : vector<2x8x8xf32>
    %cst_92 = arith.constant dense<0.000000e+00> : vector<2x8xf32>
    %226 = vector.multi_reduction <add>, %225, %cst_92 [2] : vector<2x8x8xf32> to vector<2x8xf32>
    %227 = vector.shape_cast %226 : vector<2x8xf32> to vector<2x8x1xf32>
    %228 = tpu.reciprocal %227 {approx = true} : vector<2x8x1xf32> -> vector<2x8x1xf32>
    %229 = vector.broadcast %228 : vector<2x8x1xf32> to vector<2x8x8xf32>
    %230 = arith.mulf %225, %229 : vector<2x8x8xf32>
    %231 = vector.extract_strided_slice %196 {offsets = [0, 0, 8], sizes = [2, 8, 8], strides = [1, 1, 1]} : vector<2x8x32xf32> to vector<2x8x8xf32>
    "tpu.trace_start"() <{level = 10 : i32, message = "bqk,bkd->bqd"}> : () -> ()
    %cst_93 = arith.constant dense<0.000000e+00> : vector<2x8x8xf32>
    %232 = tpu.matmul %230, %231, %cst_93 {dimension_numbers = #tpu.dot_dimension_numbers<[2], [1], [1], [2], [0, 0, 0, 1, 1, 2], [0], [0]>} : vector<2x8x8xf32>, vector<2x8x8xf32>, vector<2x8x8xf32> -> vector<2x8x8xf32>
    "tpu.trace_stop"() : () -> ()
    %233 = vector.extract_strided_slice %194 {offsets = [0, 0, 16], sizes = [2, 8, 8], strides = [1, 1, 1]} : vector<2x8x32xf32> to vector<2x8x8xf32>
    %234 = vector.extract_strided_slice %195 {offsets = [0, 0, 16], sizes = [2, 8, 8], strides = [1, 1, 1]} : vector<2x8x32xf32> to vector<2x8x8xf32>
    "tpu.trace_start"() <{level = 10 : i32, message = "bqd,bkd->bqk"}> : () -> ()
    %cst_94 = arith.constant dense<0.000000e+00> : vector<2x8x8xf32>
    %235 = tpu.matmul %233, %234, %cst_94 {dimension_numbers = #tpu.dot_dimension_numbers<[2], [2], [1], [1], [0, 0, 0, 1, 1, 1], [0], [0]>} : vector<2x8x8xf32>, vector<2x8x8xf32>, vector<2x8x8xf32> -> vector<2x8x8xf32>
    "tpu.trace_stop"() : () -> ()
    %cst_95 = arith.constant 0.353553385 : f32
    %236 = vector.broadcast %cst_95 : f32 to vector<2x8x8xf32>
    %237 = arith.mulf %235, %236 : vector<2x8x8xf32>
    %238 = arith.addf %237, %3 : vector<2x8x8xf32>
    %cst_96 = arith.constant dense<0xFF800000> : vector<2x8xf32>
    %239 = vector.multi_reduction <maximumf>, %238, %cst_96 [2] : vector<2x8x8xf32> to vector<2x8xf32>
    %240 = vector.shape_cast %239 : vector<2x8xf32> to vector<2x8x1xf32>
    %241 = vector.broadcast %240 : vector<2x8x1xf32> to vector<2x8x8xf32>
    %242 = arith.subf %238, %241 : vector<2x8x8xf32>
    %243 = math.exp %242 : vector<2x8x8xf32>
    %cst_97 = arith.constant dense<0.000000e+00> : vector<2x8xf32>
    %244 = vector.multi_reduction <add>, %243, %cst_97 [2] : vector<2x8x8xf32> to vector<2x8xf32>
    %245 = vector.shape_cast %244 : vector<2x8xf32> to vector<2x8x1xf32>
    %246 = tpu.reciprocal %245 {approx = true} : vector<2x8x1xf32> -> vector<2x8x1xf32>
    %247 = vector.broadcast %246 : vector<2x8x1xf32> to vector<2x8x8xf32>
    %248 = arith.mulf %243, %247 : vector<2x8x8xf32>
    %249 = vector.extract_strided_slice %196 {offsets = [0, 0, 16], sizes = [2, 8, 8], strides = [1, 1, 1]} : vector<2x8x32xf32> to vector<2x8x8xf32>
    "tpu.trace_start"() <{level = 10 : i32, message = "bqk,bkd->bqd"}> : () -> ()
    %cst_98 = arith.constant dense<0.000000e+00> : vector<2x8x8xf32>
    %250 = tpu.matmul %248, %249, %cst_98 {dimension_numbers = #tpu.dot_dimension_numbers<[2], [1], [1], [2], [0, 0, 0, 1, 1, 2], [0], [0]>} : vector<2x8x8xf32>, vector<2x8x8xf32>, vector<2x8x8xf32> -> vector<2x8x8xf32>
    "tpu.trace_stop"() : () -> ()
    %251 = vector.extract_strided_slice %194 {offsets = [0, 0, 24], sizes = [2, 8, 8], strides = [1, 1, 1]} : vector<2x8x32xf32> to vector<2x8x8xf32>
    %252 = vector.extract_strided_slice %195 {offsets = [0, 0, 24], sizes = [2, 8, 8], strides = [1, 1, 1]} : vector<2x8x32xf32> to vector<2x8x8xf32>
    "tpu.trace_start"() <{level = 10 : i32, message = "bqd,bkd->bqk"}> : () -> ()
    %cst_99 = arith.constant dense<0.000000e+00> : vector<2x8x8xf32>
    %253 = tpu.matmul %251, %252, %cst_99 {dimension_numbers = #tpu.dot_dimension_numbers<[2], [2], [1], [1], [0, 0, 0, 1, 1, 1], [0], [0]>} : vector<2x8x8xf32>, vector<2x8x8xf32>, vector<2x8x8xf32> -> vector<2x8x8xf32>
    "tpu.trace_stop"() : () -> ()
    %cst_100 = arith.constant 0.353553385 : f32
    %254 = vector.broadcast %cst_100 : f32 to vector<2x8x8xf32>
    %255 = arith.mulf %253, %254 : vector<2x8x8xf32>
    %256 = arith.addf %255, %3 : vector<2x8x8xf32>
    %cst_101 = arith.constant dense<0xFF800000> : vector<2x8xf32>
    %257 = vector.multi_reduction <maximumf>, %256, %cst_101 [2] : vector<2x8x8xf32> to vector<2x8xf32>
    %258 = vector.shape_cast %257 : vector<2x8xf32> to vector<2x8x1xf32>
    %259 = vector.broadcast %258 : vector<2x8x1xf32> to vector<2x8x8xf32>
    %260 = arith.subf %256, %259 : vector<2x8x8xf32>
    %261 = math.exp %260 : vector<2x8x8xf32>
    %cst_102 = arith.constant dense<0.000000e+00> : vector<2x8xf32>
    %262 = vector.multi_reduction <add>, %261, %cst_102 [2] : vector<2x8x8xf32> to vector<2x8xf32>
    %263 = vector.shape_cast %262 : vector<2x8xf32> to vector<2x8x1xf32>
    %264 = tpu.reciprocal %263 {approx = true} : vector<2x8x1xf32> -> vector<2x8x1xf32>
    %265 = vector.broadcast %264 : vector<2x8x1xf32> to vector<2x8x8xf32>
    %266 = arith.mulf %261, %265 : vector<2x8x8xf32>
    %267 = vector.extract_strided_slice %196 {offsets = [0, 0, 24], sizes = [2, 8, 8], strides = [1, 1, 1]} : vector<2x8x32xf32> to vector<2x8x8xf32>
    "tpu.trace_start"() <{level = 10 : i32, message = "bqk,bkd->bqd"}> : () -> ()
    %cst_103 = arith.constant dense<0.000000e+00> : vector<2x8x8xf32>
    %268 = tpu.matmul %266, %267, %cst_103 {dimension_numbers = #tpu.dot_dimension_numbers<[2], [1], [1], [2], [0, 0, 0, 1, 1, 2], [0], [0]>} : vector<2x8x8xf32>, vector<2x8x8xf32>, vector<2x8x8xf32> -> vector<2x8x8xf32>
    "tpu.trace_stop"() : () -> ()
    %269 = tpu.concatenate %214, %232, %250, %268 in 2 : vector<2x8x8xf32>, vector<2x8x8xf32>, vector<2x8x8xf32>, vector<2x8x8xf32> -> vector<2x8x32xf32>
    %270 = vector.shape_cast %269 : vector<2x8x32xf32> to vector<16x32xf32>
    %c1_104 = arith.constant 1 : index
    %c0_105 = arith.constant 0 : index
    %c0_106 = arith.constant 0 : index
    %271 = vector.load %arg6[%c1_104, %c0_105, %c0_106] : memref<2x32x32xf32, #tpu.memory_space<vmem>>, vector<1x32x32xf32>
    %272 = vector.shape_cast %271 : vector<1x32x32xf32> to vector<32x32xf32>
    %cst_107 = arith.constant dense<0.000000e+00> : vector<16x32xf32>
    %273 = tpu.matmul %270, %272, %cst_107 {dimension_numbers = #tpu.dot_dimension_numbers<[1], [0], [0], [1], [0, 0, 1, 1], [], []>} : vector<16x32xf32>, vector<32x32xf32>, vector<16x32xf32> -> vector<16x32xf32>
    %c1_108 = arith.constant 1 : index
    %c0_109 = arith.constant 0 : index
    %c0_110 = arith.constant 0 : index
    %274 = vector.load %arg7[%c1_108, %c0_109, %c0_110] : memref<2x1x32xf32, #tpu.memory_space<vmem>>, vector<1x1x32xf32>
    %275 = vector.shape_cast %274 : vector<1x1x32xf32> to vector<1x32xf32>
    %276 = vector.broadcast %275 : vector<1x32xf32> to vector<16x32xf32>
    %277 = arith.addf %273, %276 : vector<16x32xf32>
    %278 = arith.addf %183, %277 : vector<16x32xf32>
    %c4 = arith.constant 4 : index
    %c0_111 = arith.constant 0 : index
    %c0_112 = arith.constant 0 : index
    %279 = vector.load %arg8[%c4, %c0_111, %c0_112] : memref<8x1x32xf32, #tpu.memory_space<vmem>>, vector<1x1x32xf32>
    %280 = vector.shape_cast %279 : vector<1x1x32xf32> to vector<1x32xf32>
    %c5 = arith.constant 5 : index
    %c0_113 = arith.constant 0 : index
    %c0_114 = arith.constant 0 : index
    %281 = vector.load %arg8[%c5, %c0_113, %c0_114] : memref<8x1x32xf32, #tpu.memory_space<vmem>>, vector<1x1x32xf32>
    %282 = vector.shape_cast %281 : vector<1x1x32xf32> to vector<1x32xf32>
    %cst_115 = arith.constant dense<0.000000e+00> : vector<16xf32>
    %283 = vector.multi_reduction <add>, %278, %cst_115 [1] : vector<16x32xf32> to vector<16xf32>
    %284 = vector.shape_cast %283 : vector<16xf32> to vector<16x1xf32>
    %cst_116 = arith.constant 3.200000e+01 : f32
    %285 = vector.broadcast %cst_116 : f32 to vector<16x1xf32>
    %286 = arith.divf %284, %285 : vector<16x1xf32>
    %287 = vector.broadcast %286 : vector<16x1xf32> to vector<16x32xf32>
    %288 = arith.subf %278, %287 : vector<16x32xf32>
    %289 = arith.mulf %288, %288 : vector<16x32xf32>
    %cst_117 = arith.constant dense<0.000000e+00> : vector<16xf32>
    %290 = vector.multi_reduction <add>, %289, %cst_117 [1] : vector<16x32xf32> to vector<16xf32>
    %291 = vector.shape_cast %290 : vector<16xf32> to vector<16x1xf32>
    %cst_118 = arith.constant 3.200000e+01 : f32
    %292 = vector.broadcast %cst_118 : f32 to vector<16x1xf32>
    %293 = arith.divf %291, %292 : vector<16x1xf32>
    %294 = vector.broadcast %286 : vector<16x1xf32> to vector<16x32xf32>
    %295 = arith.subf %278, %294 : vector<16x32xf32>
    %cst_119 = arith.constant 9.99999974E-6 : f32
    %296 = vector.broadcast %cst_119 : f32 to vector<16x1xf32>
    %297 = arith.addf %293, %296 : vector<16x1xf32>
    %298 = math.rsqrt %297 : vector<16x1xf32>
    %299 = vector.broadcast %298 : vector<16x1xf32> to vector<16x32xf32>
    %300 = arith.mulf %295, %299 : vector<16x32xf32>
    %301 = vector.broadcast %280 : vector<1x32xf32> to vector<16x32xf32>
    %302 = arith.mulf %300, %301 : vector<16x32xf32>
    %303 = vector.broadcast %282 : vector<1x32xf32> to vector<16x32xf32>
    %304 = arith.addf %302, %303 : vector<16x32xf32>
    %c1_120 = arith.constant 1 : index
    %c0_121 = arith.constant 0 : index
    %c0_122 = arith.constant 0 : index
    %305 = vector.load %arg9[%c1_120, %c0_121, %c0_122] : memref<2x32x64xf32, #tpu.memory_space<vmem>>, vector<1x32x64xf32>
    %306 = vector.shape_cast %305 : vector<1x32x64xf32> to vector<32x64xf32>
    %cst_123 = arith.constant dense<0.000000e+00> : vector<16x64xf32>
    %307 = tpu.matmul %304, %306, %cst_123 {dimension_numbers = #tpu.dot_dimension_numbers<[1], [0], [0], [1], [0, 0, 1, 1], [], []>} : vector<16x32xf32>, vector<32x64xf32>, vector<16x64xf32> -> vector<16x64xf32>
    %c1_124 = arith.constant 1 : index
    %c0_125 = arith.constant 0 : index
    %c0_126 = arith.constant 0 : index
    %308 = vector.load %arg10[%c1_124, %c0_125, %c0_126] : memref<2x1x64xf32, #tpu.memory_space<vmem>>, vector<1x1x64xf32>
    %309 = vector.shape_cast %308 : vector<1x1x64xf32> to vector<1x64xf32>
    %310 = vector.broadcast %309 : vector<1x64xf32> to vector<16x64xf32>
    %311 = arith.addf %307, %310 : vector<16x64xf32>
    %cst_127 = arith.constant 0.000000e+00 : f32
    %312 = vector.broadcast %cst_127 : f32 to vector<16x64xf32>
    %313 = arith.maximumf %311, %312 : vector<16x64xf32>
    %c1_128 = arith.constant 1 : index
    %c0_129 = arith.constant 0 : index
    %c0_130 = arith.constant 0 : index
    %314 = vector.load %arg11[%c1_128, %c0_129, %c0_130] : memref<2x64x32xf32, #tpu.memory_space<vmem>>, vector<1x64x32xf32>
    %315 = vector.shape_cast %314 : vector<1x64x32xf32> to vector<64x32xf32>
    %cst_131 = arith.constant dense<0.000000e+00> : vector<16x32xf32>
    %316 = tpu.matmul %313, %315, %cst_131 {dimension_numbers = #tpu.dot_dimension_numbers<[1], [0], [0], [1], [0, 0, 1, 1], [], []>} : vector<16x64xf32>, vector<64x32xf32>, vector<16x32xf32> -> vector<16x32xf32>
    %c1_132 = arith.constant 1 : index
    %c0_133 = arith.constant 0 : index
    %c0_134 = arith.constant 0 : index
    %317 = vector.load %arg12[%c1_132, %c0_133, %c0_134] : memref<2x1x32xf32, #tpu.memory_space<vmem>>, vector<1x1x32xf32>
    %318 = vector.shape_cast %317 : vector<1x1x32xf32> to vector<1x32xf32>
    %319 = vector.broadcast %318 : vector<1x32xf32> to vector<16x32xf32>
    %320 = arith.addf %316, %319 : vector<16x32xf32>
    %321 = arith.addf %304, %320 : vector<16x32xf32>
    %c6 = arith.constant 6 : index
    %c0_135 = arith.constant 0 : index
    %c0_136 = arith.constant 0 : index
    %322 = vector.load %arg8[%c6, %c0_135, %c0_136] : memref<8x1x32xf32, #tpu.memory_space<vmem>>, vector<1x1x32xf32>
    %323 = vector.shape_cast %322 : vector<1x1x32xf32> to vector<1x32xf32>
    %c7 = arith.constant 7 : index
    %c0_137 = arith.constant 0 : index
    %c0_138 = arith.constant 0 : index
    %324 = vector.load %arg8[%c7, %c0_137, %c0_138] : memref<8x1x32xf32, #tpu.memory_space<vmem>>, vector<1x1x32xf32>
    %325 = vector.shape_cast %324 : vector<1x1x32xf32> to vector<1x32xf32>
    %cst_139 = arith.constant dense<0.000000e+00> : vector<16xf32>
    %326 = vector.multi_reduction <add>, %321, %cst_139 [1] : vector<16x32xf32> to vector<16xf32>
    %327 = vector.shape_cast %326 : vector<16xf32> to vector<16x1xf32>
    %cst_140 = arith.constant 3.200000e+01 : f32
    %328 = vector.broadcast %cst_140 : f32 to vector<16x1xf32>
    %329 = arith.divf %327, %328 : vector<16x1xf32>
    %330 = vector.broadcast %329 : vector<16x1xf32> to vector<16x32xf32>
    %331 = arith.subf %321, %330 : vector<16x32xf32>
    %332 = arith.mulf %331, %331 : vector<16x32xf32>
    %cst_141 = arith.constant dense<0.000000e+00> : vector<16xf32>
    %333 = vector.multi_reduction <add>, %332, %cst_141 [1] : vector<16x32xf32> to vector<16xf32>
    %334 = vector.shape_cast %333 : vector<16xf32> to vector<16x1xf32>
    %cst_142 = arith.constant 3.200000e+01 : f32
    %335 = vector.broadcast %cst_142 : f32 to vector<16x1xf32>
    %336 = arith.divf %334, %335 : vector<16x1xf32>
    %337 = vector.broadcast %329 : vector<16x1xf32> to vector<16x32xf32>
    %338 = arith.subf %321, %337 : vector<16x32xf32>
    %cst_143 = arith.constant 9.99999974E-6 : f32
    %339 = vector.broadcast %cst_143 : f32 to vector<16x1xf32>
    %340 = arith.addf %336, %339 : vector<16x1xf32>
    %341 = math.rsqrt %340 : vector<16x1xf32>
    %342 = vector.broadcast %341 : vector<16x1xf32> to vector<16x32xf32>
    %343 = arith.mulf %338, %342 : vector<16x32xf32>
    %344 = vector.broadcast %323 : vector<1x32xf32> to vector<16x32xf32>
    %345 = arith.mulf %343, %344 : vector<16x32xf32>
    %346 = vector.broadcast %325 : vector<1x32xf32> to vector<16x32xf32>
    %347 = arith.addf %345, %346 : vector<16x32xf32>
    %c0_144 = arith.constant 0 : index
    %c0_145 = arith.constant 0 : index
    %c0_146 = arith.constant 0 : index
    %348 = vector.load %arg1[%c0_144, %c0_145, %c0_146] : memref<2x8x32xf32, #tpu.memory_space<vmem>>, vector<2x8x32xf32>
    %349 = vector.shape_cast %348 : vector<2x8x32xf32> to vector<16x32xf32>
    %c0_147 = arith.constant 0 : index
    %c0_148 = arith.constant 0 : index
    %c0_149 = arith.constant 0 : index
    %350 = vector.load %arg13[%c0_147, %c0_148, %c0_149] : memref<2x32x96xf32, #tpu.memory_space<vmem>>, vector<1x32x96xf32>
    %351 = vector.shape_cast %350 : vector<1x32x96xf32> to vector<32x96xf32>
    %c0_150 = arith.constant 0 : index
    %c0_151 = arith.constant 0 : index
    %c0_152 = arith.constant 0 : index
    %352 = vector.load %arg14[%c0_150, %c0_151, %c0_152] : memref<2x1x96xf32, #tpu.memory_space<vmem>>, vector<1x1x96xf32>
    %353 = vector.shape_cast %352 : vector<1x1x96xf32> to vector<1x96xf32>
    %cst_153 = arith.constant dense<0.000000e+00> : vector<16x96xf32>
    %354 = tpu.matmul %349, %351, %cst_153 {dimension_numbers = #tpu.dot_dimension_numbers<[1], [0], [0], [1], [0, 0, 1, 1], [], []>} : vector<16x32xf32>, vector<32x96xf32>, vector<16x96xf32> -> vector<16x96xf32>
    %355 = vector.broadcast %353 : vector<1x96xf32> to vector<16x96xf32>
    %356 = arith.addf %354, %355 : vector<16x96xf32>
    %357 = vector.extract_strided_slice %356 {offsets = [0, 0], sizes = [16, 32], strides = [1, 1]} : vector<16x96xf32> to vector<16x32xf32>
    %358 = vector.extract_strided_slice %356 {offsets = [0, 32], sizes = [16, 32], strides = [1, 1]} : vector<16x96xf32> to vector<16x32xf32>
    %359 = vector.extract_strided_slice %356 {offsets = [0, 64], sizes = [16, 32], strides = [1, 1]} : vector<16x96xf32> to vector<16x32xf32>
    %360 = vector.shape_cast %357 : vector<16x32xf32> to vector<2x8x32xf32>
    %361 = vector.shape_cast %358 : vector<16x32xf32> to vector<2x8x32xf32>
    %362 = vector.shape_cast %359 : vector<16x32xf32> to vector<2x8x32xf32>
    %363 = vector.extract_strided_slice %360 {offsets = [0, 0, 0], sizes = [2, 8, 8], strides = [1, 1, 1]} : vector<2x8x32xf32> to vector<2x8x8xf32>
    %364 = vector.extract_strided_slice %361 {offsets = [0, 0, 0], sizes = [2, 8, 8], strides = [1, 1, 1]} : vector<2x8x32xf32> to vector<2x8x8xf32>
    "tpu.trace_start"() <{level = 10 : i32, message = "bqd,bkd->bqk"}> : () -> ()
    %cst_154 = arith.constant dense<0.000000e+00> : vector<2x8x8xf32>
    %365 = tpu.matmul %363, %364, %cst_154 {dimension_numbers = #tpu.dot_dimension_numbers<[2], [2], [1], [1], [0, 0, 0, 1, 1, 1], [0], [0]>} : vector<2x8x8xf32>, vector<2x8x8xf32>, vector<2x8x8xf32> -> vector<2x8x8xf32>
    "tpu.trace_stop"() : () -> ()
    %cst_155 = arith.constant 0.353553385 : f32
    %366 = vector.broadcast %cst_155 : f32 to vector<2x8x8xf32>
    %367 = arith.mulf %365, %366 : vector<2x8x8xf32>
    %368 = arith.addf %367, %17 : vector<2x8x8xf32>
    %cst_156 = arith.constant dense<0xFF800000> : vector<2x8xf32>
    %369 = vector.multi_reduction <maximumf>, %368, %cst_156 [2] : vector<2x8x8xf32> to vector<2x8xf32>
    %370 = vector.shape_cast %369 : vector<2x8xf32> to vector<2x8x1xf32>
    %371 = vector.broadcast %370 : vector<2x8x1xf32> to vector<2x8x8xf32>
    %372 = arith.subf %368, %371 : vector<2x8x8xf32>
    %373 = math.exp %372 : vector<2x8x8xf32>
    %cst_157 = arith.constant dense<0.000000e+00> : vector<2x8xf32>
    %374 = vector.multi_reduction <add>, %373, %cst_157 [2] : vector<2x8x8xf32> to vector<2x8xf32>
    %375 = vector.shape_cast %374 : vector<2x8xf32> to vector<2x8x1xf32>
    %376 = tpu.reciprocal %375 {approx = true} : vector<2x8x1xf32> -> vector<2x8x1xf32>
    %377 = vector.broadcast %376 : vector<2x8x1xf32> to vector<2x8x8xf32>
    %378 = arith.mulf %373, %377 : vector<2x8x8xf32>
    %379 = vector.extract_strided_slice %362 {offsets = [0, 0, 0], sizes = [2, 8, 8], strides = [1, 1, 1]} : vector<2x8x32xf32> to vector<2x8x8xf32>
    "tpu.trace_start"() <{level = 10 : i32, message = "bqk,bkd->bqd"}> : () -> ()
    %cst_158 = arith.constant dense<0.000000e+00> : vector<2x8x8xf32>
    %380 = tpu.matmul %378, %379, %cst_158 {dimension_numbers = #tpu.dot_dimension_numbers<[2], [1], [1], [2], [0, 0, 0, 1, 1, 2], [0], [0]>} : vector<2x8x8xf32>, vector<2x8x8xf32>, vector<2x8x8xf32> -> vector<2x8x8xf32>
    "tpu.trace_stop"() : () -> ()
    %381 = vector.extract_strided_slice %360 {offsets = [0, 0, 8], sizes = [2, 8, 8], strides = [1, 1, 1]} : vector<2x8x32xf32> to vector<2x8x8xf32>
    %382 = vector.extract_strided_slice %361 {offsets = [0, 0, 8], sizes = [2, 8, 8], strides = [1, 1, 1]} : vector<2x8x32xf32> to vector<2x8x8xf32>
    "tpu.trace_start"() <{level = 10 : i32, message = "bqd,bkd->bqk"}> : () -> ()
    %cst_159 = arith.constant dense<0.000000e+00> : vector<2x8x8xf32>
    %383 = tpu.matmul %381, %382, %cst_159 {dimension_numbers = #tpu.dot_dimension_numbers<[2], [2], [1], [1], [0, 0, 0, 1, 1, 1], [0], [0]>} : vector<2x8x8xf32>, vector<2x8x8xf32>, vector<2x8x8xf32> -> vector<2x8x8xf32>
    "tpu.trace_stop"() : () -> ()
    %cst_160 = arith.constant 0.353553385 : f32
    %384 = vector.broadcast %cst_160 : f32 to vector<2x8x8xf32>
    %385 = arith.mulf %383, %384 : vector<2x8x8xf32>
    %386 = arith.addf %385, %17 : vector<2x8x8xf32>
    %cst_161 = arith.constant dense<0xFF800000> : vector<2x8xf32>
    %387 = vector.multi_reduction <maximumf>, %386, %cst_161 [2] : vector<2x8x8xf32> to vector<2x8xf32>
    %388 = vector.shape_cast %387 : vector<2x8xf32> to vector<2x8x1xf32>
    %389 = vector.broadcast %388 : vector<2x8x1xf32> to vector<2x8x8xf32>
    %390 = arith.subf %386, %389 : vector<2x8x8xf32>
    %391 = math.exp %390 : vector<2x8x8xf32>
    %cst_162 = arith.constant dense<0.000000e+00> : vector<2x8xf32>
    %392 = vector.multi_reduction <add>, %391, %cst_162 [2] : vector<2x8x8xf32> to vector<2x8xf32>
    %393 = vector.shape_cast %392 : vector<2x8xf32> to vector<2x8x1xf32>
    %394 = tpu.reciprocal %393 {approx = true} : vector<2x8x1xf32> -> vector<2x8x1xf32>
    %395 = vector.broadcast %394 : vector<2x8x1xf32> to vector<2x8x8xf32>
    %396 = arith.mulf %391, %395 : vector<2x8x8xf32>
    %397 = vector.extract_strided_slice %362 {offsets = [0, 0, 8], sizes = [2, 8, 8], strides = [1, 1, 1]} : vector<2x8x32xf32> to vector<2x8x8xf32>
    "tpu.trace_start"() <{level = 10 : i32, message = "bqk,bkd->bqd"}> : () -> ()
    %cst_163 = arith.constant dense<0.000000e+00> : vector<2x8x8xf32>
    %398 = tpu.matmul %396, %397, %cst_163 {dimension_numbers = #tpu.dot_dimension_numbers<[2], [1], [1], [2], [0, 0, 0, 1, 1, 2], [0], [0]>} : vector<2x8x8xf32>, vector<2x8x8xf32>, vector<2x8x8xf32> -> vector<2x8x8xf32>
    "tpu.trace_stop"() : () -> ()
    %399 = vector.extract_strided_slice %360 {offsets = [0, 0, 16], sizes = [2, 8, 8], strides = [1, 1, 1]} : vector<2x8x32xf32> to vector<2x8x8xf32>
    %400 = vector.extract_strided_slice %361 {offsets = [0, 0, 16], sizes = [2, 8, 8], strides = [1, 1, 1]} : vector<2x8x32xf32> to vector<2x8x8xf32>
    "tpu.trace_start"() <{level = 10 : i32, message = "bqd,bkd->bqk"}> : () -> ()
    %cst_164 = arith.constant dense<0.000000e+00> : vector<2x8x8xf32>
    %401 = tpu.matmul %399, %400, %cst_164 {dimension_numbers = #tpu.dot_dimension_numbers<[2], [2], [1], [1], [0, 0, 0, 1, 1, 1], [0], [0]>} : vector<2x8x8xf32>, vector<2x8x8xf32>, vector<2x8x8xf32> -> vector<2x8x8xf32>
    "tpu.trace_stop"() : () -> ()
    %cst_165 = arith.constant 0.353553385 : f32
    %402 = vector.broadcast %cst_165 : f32 to vector<2x8x8xf32>
    %403 = arith.mulf %401, %402 : vector<2x8x8xf32>
    %404 = arith.addf %403, %17 : vector<2x8x8xf32>
    %cst_166 = arith.constant dense<0xFF800000> : vector<2x8xf32>
    %405 = vector.multi_reduction <maximumf>, %404, %cst_166 [2] : vector<2x8x8xf32> to vector<2x8xf32>
    %406 = vector.shape_cast %405 : vector<2x8xf32> to vector<2x8x1xf32>
    %407 = vector.broadcast %406 : vector<2x8x1xf32> to vector<2x8x8xf32>
    %408 = arith.subf %404, %407 : vector<2x8x8xf32>
    %409 = math.exp %408 : vector<2x8x8xf32>
    %cst_167 = arith.constant dense<0.000000e+00> : vector<2x8xf32>
    %410 = vector.multi_reduction <add>, %409, %cst_167 [2] : vector<2x8x8xf32> to vector<2x8xf32>
    %411 = vector.shape_cast %410 : vector<2x8xf32> to vector<2x8x1xf32>
    %412 = tpu.reciprocal %411 {approx = true} : vector<2x8x1xf32> -> vector<2x8x1xf32>
    %413 = vector.broadcast %412 : vector<2x8x1xf32> to vector<2x8x8xf32>
    %414 = arith.mulf %409, %413 : vector<2x8x8xf32>
    %415 = vector.extract_strided_slice %362 {offsets = [0, 0, 16], sizes = [2, 8, 8], strides = [1, 1, 1]} : vector<2x8x32xf32> to vector<2x8x8xf32>
    "tpu.trace_start"() <{level = 10 : i32, message = "bqk,bkd->bqd"}> : () -> ()
    %cst_168 = arith.constant dense<0.000000e+00> : vector<2x8x8xf32>
    %416 = tpu.matmul %414, %415, %cst_168 {dimension_numbers = #tpu.dot_dimension_numbers<[2], [1], [1], [2], [0, 0, 0, 1, 1, 2], [0], [0]>} : vector<2x8x8xf32>, vector<2x8x8xf32>, vector<2x8x8xf32> -> vector<2x8x8xf32>
    "tpu.trace_stop"() : () -> ()
    %417 = vector.extract_strided_slice %360 {offsets = [0, 0, 24], sizes = [2, 8, 8], strides = [1, 1, 1]} : vector<2x8x32xf32> to vector<2x8x8xf32>
    %418 = vector.extract_strided_slice %361 {offsets = [0, 0, 24], sizes = [2, 8, 8], strides = [1, 1, 1]} : vector<2x8x32xf32> to vector<2x8x8xf32>
    "tpu.trace_start"() <{level = 10 : i32, message = "bqd,bkd->bqk"}> : () -> ()
    %cst_169 = arith.constant dense<0.000000e+00> : vector<2x8x8xf32>
    %419 = tpu.matmul %417, %418, %cst_169 {dimension_numbers = #tpu.dot_dimension_numbers<[2], [2], [1], [1], [0, 0, 0, 1, 1, 1], [0], [0]>} : vector<2x8x8xf32>, vector<2x8x8xf32>, vector<2x8x8xf32> -> vector<2x8x8xf32>
    "tpu.trace_stop"() : () -> ()
    %cst_170 = arith.constant 0.353553385 : f32
    %420 = vector.broadcast %cst_170 : f32 to vector<2x8x8xf32>
    %421 = arith.mulf %419, %420 : vector<2x8x8xf32>
    %422 = arith.addf %421, %17 : vector<2x8x8xf32>
    %cst_171 = arith.constant dense<0xFF800000> : vector<2x8xf32>
    %423 = vector.multi_reduction <maximumf>, %422, %cst_171 [2] : vector<2x8x8xf32> to vector<2x8xf32>
    %424 = vector.shape_cast %423 : vector<2x8xf32> to vector<2x8x1xf32>
    %425 = vector.broadcast %424 : vector<2x8x1xf32> to vector<2x8x8xf32>
    %426 = arith.subf %422, %425 : vector<2x8x8xf32>
    %427 = math.exp %426 : vector<2x8x8xf32>
    %cst_172 = arith.constant dense<0.000000e+00> : vector<2x8xf32>
    %428 = vector.multi_reduction <add>, %427, %cst_172 [2] : vector<2x8x8xf32> to vector<2x8xf32>
    %429 = vector.shape_cast %428 : vector<2x8xf32> to vector<2x8x1xf32>
    %430 = tpu.reciprocal %429 {approx = true} : vector<2x8x1xf32> -> vector<2x8x1xf32>
    %431 = vector.broadcast %430 : vector<2x8x1xf32> to vector<2x8x8xf32>
    %432 = arith.mulf %427, %431 : vector<2x8x8xf32>
    %433 = vector.extract_strided_slice %362 {offsets = [0, 0, 24], sizes = [2, 8, 8], strides = [1, 1, 1]} : vector<2x8x32xf32> to vector<2x8x8xf32>
    "tpu.trace_start"() <{level = 10 : i32, message = "bqk,bkd->bqd"}> : () -> ()
    %cst_173 = arith.constant dense<0.000000e+00> : vector<2x8x8xf32>
    %434 = tpu.matmul %432, %433, %cst_173 {dimension_numbers = #tpu.dot_dimension_numbers<[2], [1], [1], [2], [0, 0, 0, 1, 1, 2], [0], [0]>} : vector<2x8x8xf32>, vector<2x8x8xf32>, vector<2x8x8xf32> -> vector<2x8x8xf32>
    "tpu.trace_stop"() : () -> ()
    %435 = tpu.concatenate %380, %398, %416, %434 in 2 : vector<2x8x8xf32>, vector<2x8x8xf32>, vector<2x8x8xf32>, vector<2x8x8xf32> -> vector<2x8x32xf32>
    %436 = vector.shape_cast %435 : vector<2x8x32xf32> to vector<16x32xf32>
    %c0_174 = arith.constant 0 : index
    %c0_175 = arith.constant 0 : index
    %c0_176 = arith.constant 0 : index
    %437 = vector.load %arg15[%c0_174, %c0_175, %c0_176] : memref<2x32x32xf32, #tpu.memory_space<vmem>>, vector<1x32x32xf32>
    %438 = vector.shape_cast %437 : vector<1x32x32xf32> to vector<32x32xf32>
    %cst_177 = arith.constant dense<0.000000e+00> : vector<16x32xf32>
    %439 = tpu.matmul %436, %438, %cst_177 {dimension_numbers = #tpu.dot_dimension_numbers<[1], [0], [0], [1], [0, 0, 1, 1], [], []>} : vector<16x32xf32>, vector<32x32xf32>, vector<16x32xf32> -> vector<16x32xf32>
    %c0_178 = arith.constant 0 : index
    %c0_179 = arith.constant 0 : index
    %c0_180 = arith.constant 0 : index
    %440 = vector.load %arg16[%c0_178, %c0_179, %c0_180] : memref<2x1x32xf32, #tpu.memory_space<vmem>>, vector<1x1x32xf32>
    %441 = vector.shape_cast %440 : vector<1x1x32xf32> to vector<1x32xf32>
    %442 = vector.broadcast %441 : vector<1x32xf32> to vector<16x32xf32>
    %443 = arith.addf %439, %442 : vector<16x32xf32>
    %444 = arith.addf %349, %443 : vector<16x32xf32>
    %c0_181 = arith.constant 0 : index
    %c0_182 = arith.constant 0 : index
    %c0_183 = arith.constant 0 : index
    %445 = vector.load %arg21[%c0_181, %c0_182, %c0_183] : memref<12x1x32xf32, #tpu.memory_space<vmem>>, vector<1x1x32xf32>
    %446 = vector.shape_cast %445 : vector<1x1x32xf32> to vector<1x32xf32>
    %c1_184 = arith.constant 1 : index
    %c0_185 = arith.constant 0 : index
    %c0_186 = arith.constant 0 : index
    %447 = vector.load %arg21[%c1_184, %c0_185, %c0_186] : memref<12x1x32xf32, #tpu.memory_space<vmem>>, vector<1x1x32xf32>
    %448 = vector.shape_cast %447 : vector<1x1x32xf32> to vector<1x32xf32>
    %cst_187 = arith.constant dense<0.000000e+00> : vector<16xf32>
    %449 = vector.multi_reduction <add>, %444, %cst_187 [1] : vector<16x32xf32> to vector<16xf32>
    %450 = vector.shape_cast %449 : vector<16xf32> to vector<16x1xf32>
    %cst_188 = arith.constant 3.200000e+01 : f32
    %451 = vector.broadcast %cst_188 : f32 to vector<16x1xf32>
    %452 = arith.divf %450, %451 : vector<16x1xf32>
    %453 = vector.broadcast %452 : vector<16x1xf32> to vector<16x32xf32>
    %454 = arith.subf %444, %453 : vector<16x32xf32>
    %455 = arith.mulf %454, %454 : vector<16x32xf32>
    %cst_189 = arith.constant dense<0.000000e+00> : vector<16xf32>
    %456 = vector.multi_reduction <add>, %455, %cst_189 [1] : vector<16x32xf32> to vector<16xf32>
    %457 = vector.shape_cast %456 : vector<16xf32> to vector<16x1xf32>
    %cst_190 = arith.constant 3.200000e+01 : f32
    %458 = vector.broadcast %cst_190 : f32 to vector<16x1xf32>
    %459 = arith.divf %457, %458 : vector<16x1xf32>
    %460 = vector.broadcast %452 : vector<16x1xf32> to vector<16x32xf32>
    %461 = arith.subf %444, %460 : vector<16x32xf32>
    %cst_191 = arith.constant 9.99999974E-6 : f32
    %462 = vector.broadcast %cst_191 : f32 to vector<16x1xf32>
    %463 = arith.addf %459, %462 : vector<16x1xf32>
    %464 = math.rsqrt %463 : vector<16x1xf32>
    %465 = vector.broadcast %464 : vector<16x1xf32> to vector<16x32xf32>
    %466 = arith.mulf %461, %465 : vector<16x32xf32>
    %467 = vector.broadcast %446 : vector<1x32xf32> to vector<16x32xf32>
    %468 = arith.mulf %466, %467 : vector<16x32xf32>
    %469 = vector.broadcast %448 : vector<1x32xf32> to vector<16x32xf32>
    %470 = arith.addf %468, %469 : vector<16x32xf32>
    %c0_192 = arith.constant 0 : index
    %c0_193 = arith.constant 0 : index
    %c0_194 = arith.constant 0 : index
    %471 = vector.load %arg17[%c0_192, %c0_193, %c0_194] : memref<2x32x96xf32, #tpu.memory_space<vmem>>, vector<1x32x96xf32>
    %472 = vector.shape_cast %471 : vector<1x32x96xf32> to vector<32x96xf32>
    %c0_195 = arith.constant 0 : index
    %c0_196 = arith.constant 0 : index
    %c0_197 = arith.constant 0 : index
    %473 = vector.load %arg18[%c0_195, %c0_196, %c0_197] : memref<2x1x96xf32, #tpu.memory_space<vmem>>, vector<1x1x96xf32>
    %474 = vector.shape_cast %473 : vector<1x1x96xf32> to vector<1x96xf32>
    %475 = vector.extract_strided_slice %472 {offsets = [0, 0], sizes = [32, 32], strides = [1, 1]} : vector<32x96xf32> to vector<32x32xf32>
    %cst_198 = arith.constant dense<0.000000e+00> : vector<16x32xf32>
    %476 = tpu.matmul %470, %475, %cst_198 {dimension_numbers = #tpu.dot_dimension_numbers<[1], [0], [0], [1], [0, 0, 1, 1], [], []>} : vector<16x32xf32>, vector<32x32xf32>, vector<16x32xf32> -> vector<16x32xf32>
    %477 = vector.extract_strided_slice %474 {offsets = [0, 0], sizes = [1, 32], strides = [1, 1]} : vector<1x96xf32> to vector<1x32xf32>
    %478 = vector.broadcast %477 : vector<1x32xf32> to vector<16x32xf32>
    %479 = arith.addf %476, %478 : vector<16x32xf32>
    %480 = vector.extract_strided_slice %472 {offsets = [0, 32], sizes = [32, 64], strides = [1, 1]} : vector<32x96xf32> to vector<32x64xf32>
    %cst_199 = arith.constant dense<0.000000e+00> : vector<16x64xf32>
    %481 = tpu.matmul %347, %480, %cst_199 {dimension_numbers = #tpu.dot_dimension_numbers<[1], [0], [0], [1], [0, 0, 1, 1], [], []>} : vector<16x32xf32>, vector<32x64xf32>, vector<16x64xf32> -> vector<16x64xf32>
    %482 = vector.extract_strided_slice %474 {offsets = [0, 32], sizes = [1, 64], strides = [1, 1]} : vector<1x96xf32> to vector<1x64xf32>
    %483 = vector.broadcast %482 : vector<1x64xf32> to vector<16x64xf32>
    %484 = arith.addf %481, %483 : vector<16x64xf32>
    %485 = vector.extract_strided_slice %484 {offsets = [0, 0], sizes = [16, 32], strides = [1, 1]} : vector<16x64xf32> to vector<16x32xf32>
    %486 = vector.extract_strided_slice %484 {offsets = [0, 32], sizes = [16, 32], strides = [1, 1]} : vector<16x64xf32> to vector<16x32xf32>
    %487 = vector.shape_cast %479 : vector<16x32xf32> to vector<2x8x32xf32>
    %488 = vector.shape_cast %485 : vector<16x32xf32> to vector<2x8x32xf32>
    %489 = vector.shape_cast %486 : vector<16x32xf32> to vector<2x8x32xf32>
    %490 = vector.extract_strided_slice %487 {offsets = [0, 0, 0], sizes = [2, 8, 8], strides = [1, 1, 1]} : vector<2x8x32xf32> to vector<2x8x8xf32>
    %491 = vector.extract_strided_slice %488 {offsets = [0, 0, 0], sizes = [2, 8, 8], strides = [1, 1, 1]} : vector<2x8x32xf32> to vector<2x8x8xf32>
    "tpu.trace_start"() <{level = 10 : i32, message = "bqd,bkd->bqk"}> : () -> ()
    %cst_200 = arith.constant dense<0.000000e+00> : vector<2x8x8xf32>
    %492 = tpu.matmul %490, %491, %cst_200 {dimension_numbers = #tpu.dot_dimension_numbers<[2], [2], [1], [1], [0, 0, 0, 1, 1, 1], [0], [0]>} : vector<2x8x8xf32>, vector<2x8x8xf32>, vector<2x8x8xf32> -> vector<2x8x8xf32>
    "tpu.trace_stop"() : () -> ()
    %cst_201 = arith.constant 0.353553385 : f32
    %493 = vector.broadcast %cst_201 : f32 to vector<2x8x8xf32>
    %494 = arith.mulf %492, %493 : vector<2x8x8xf32>
    %495 = arith.addf %494, %5 : vector<2x8x8xf32>
    %cst_202 = arith.constant dense<0xFF800000> : vector<2x8xf32>
    %496 = vector.multi_reduction <maximumf>, %495, %cst_202 [2] : vector<2x8x8xf32> to vector<2x8xf32>
    %497 = vector.shape_cast %496 : vector<2x8xf32> to vector<2x8x1xf32>
    %498 = vector.broadcast %497 : vector<2x8x1xf32> to vector<2x8x8xf32>
    %499 = arith.subf %495, %498 : vector<2x8x8xf32>
    %500 = math.exp %499 : vector<2x8x8xf32>
    %cst_203 = arith.constant dense<0.000000e+00> : vector<2x8xf32>
    %501 = vector.multi_reduction <add>, %500, %cst_203 [2] : vector<2x8x8xf32> to vector<2x8xf32>
    %502 = vector.shape_cast %501 : vector<2x8xf32> to vector<2x8x1xf32>
    %503 = tpu.reciprocal %502 {approx = true} : vector<2x8x1xf32> -> vector<2x8x1xf32>
    %504 = vector.broadcast %503 : vector<2x8x1xf32> to vector<2x8x8xf32>
    %505 = arith.mulf %500, %504 : vector<2x8x8xf32>
    %506 = vector.extract_strided_slice %489 {offsets = [0, 0, 0], sizes = [2, 8, 8], strides = [1, 1, 1]} : vector<2x8x32xf32> to vector<2x8x8xf32>
    "tpu.trace_start"() <{level = 10 : i32, message = "bqk,bkd->bqd"}> : () -> ()
    %cst_204 = arith.constant dense<0.000000e+00> : vector<2x8x8xf32>
    %507 = tpu.matmul %505, %506, %cst_204 {dimension_numbers = #tpu.dot_dimension_numbers<[2], [1], [1], [2], [0, 0, 0, 1, 1, 2], [0], [0]>} : vector<2x8x8xf32>, vector<2x8x8xf32>, vector<2x8x8xf32> -> vector<2x8x8xf32>
    "tpu.trace_stop"() : () -> ()
    %508 = vector.extract_strided_slice %487 {offsets = [0, 0, 8], sizes = [2, 8, 8], strides = [1, 1, 1]} : vector<2x8x32xf32> to vector<2x8x8xf32>
    %509 = vector.extract_strided_slice %488 {offsets = [0, 0, 8], sizes = [2, 8, 8], strides = [1, 1, 1]} : vector<2x8x32xf32> to vector<2x8x8xf32>
    "tpu.trace_start"() <{level = 10 : i32, message = "bqd,bkd->bqk"}> : () -> ()
    %cst_205 = arith.constant dense<0.000000e+00> : vector<2x8x8xf32>
    %510 = tpu.matmul %508, %509, %cst_205 {dimension_numbers = #tpu.dot_dimension_numbers<[2], [2], [1], [1], [0, 0, 0, 1, 1, 1], [0], [0]>} : vector<2x8x8xf32>, vector<2x8x8xf32>, vector<2x8x8xf32> -> vector<2x8x8xf32>
    "tpu.trace_stop"() : () -> ()
    %cst_206 = arith.constant 0.353553385 : f32
    %511 = vector.broadcast %cst_206 : f32 to vector<2x8x8xf32>
    %512 = arith.mulf %510, %511 : vector<2x8x8xf32>
    %513 = arith.addf %512, %5 : vector<2x8x8xf32>
    %cst_207 = arith.constant dense<0xFF800000> : vector<2x8xf32>
    %514 = vector.multi_reduction <maximumf>, %513, %cst_207 [2] : vector<2x8x8xf32> to vector<2x8xf32>
    %515 = vector.shape_cast %514 : vector<2x8xf32> to vector<2x8x1xf32>
    %516 = vector.broadcast %515 : vector<2x8x1xf32> to vector<2x8x8xf32>
    %517 = arith.subf %513, %516 : vector<2x8x8xf32>
    %518 = math.exp %517 : vector<2x8x8xf32>
    %cst_208 = arith.constant dense<0.000000e+00> : vector<2x8xf32>
    %519 = vector.multi_reduction <add>, %518, %cst_208 [2] : vector<2x8x8xf32> to vector<2x8xf32>
    %520 = vector.shape_cast %519 : vector<2x8xf32> to vector<2x8x1xf32>
    %521 = tpu.reciprocal %520 {approx = true} : vector<2x8x1xf32> -> vector<2x8x1xf32>
    %522 = vector.broadcast %521 : vector<2x8x1xf32> to vector<2x8x8xf32>
    %523 = arith.mulf %518, %522 : vector<2x8x8xf32>
    %524 = vector.extract_strided_slice %489 {offsets = [0, 0, 8], sizes = [2, 8, 8], strides = [1, 1, 1]} : vector<2x8x32xf32> to vector<2x8x8xf32>
    "tpu.trace_start"() <{level = 10 : i32, message = "bqk,bkd->bqd"}> : () -> ()
    %cst_209 = arith.constant dense<0.000000e+00> : vector<2x8x8xf32>
    %525 = tpu.matmul %523, %524, %cst_209 {dimension_numbers = #tpu.dot_dimension_numbers<[2], [1], [1], [2], [0, 0, 0, 1, 1, 2], [0], [0]>} : vector<2x8x8xf32>, vector<2x8x8xf32>, vector<2x8x8xf32> -> vector<2x8x8xf32>
    "tpu.trace_stop"() : () -> ()
    %526 = vector.extract_strided_slice %487 {offsets = [0, 0, 16], sizes = [2, 8, 8], strides = [1, 1, 1]} : vector<2x8x32xf32> to vector<2x8x8xf32>
    %527 = vector.extract_strided_slice %488 {offsets = [0, 0, 16], sizes = [2, 8, 8], strides = [1, 1, 1]} : vector<2x8x32xf32> to vector<2x8x8xf32>
    "tpu.trace_start"() <{level = 10 : i32, message = "bqd,bkd->bqk"}> : () -> ()
    %cst_210 = arith.constant dense<0.000000e+00> : vector<2x8x8xf32>
    %528 = tpu.matmul %526, %527, %cst_210 {dimension_numbers = #tpu.dot_dimension_numbers<[2], [2], [1], [1], [0, 0, 0, 1, 1, 1], [0], [0]>} : vector<2x8x8xf32>, vector<2x8x8xf32>, vector<2x8x8xf32> -> vector<2x8x8xf32>
    "tpu.trace_stop"() : () -> ()
    %cst_211 = arith.constant 0.353553385 : f32
    %529 = vector.broadcast %cst_211 : f32 to vector<2x8x8xf32>
    %530 = arith.mulf %528, %529 : vector<2x8x8xf32>
    %531 = arith.addf %530, %5 : vector<2x8x8xf32>
    %cst_212 = arith.constant dense<0xFF800000> : vector<2x8xf32>
    %532 = vector.multi_reduction <maximumf>, %531, %cst_212 [2] : vector<2x8x8xf32> to vector<2x8xf32>
    %533 = vector.shape_cast %532 : vector<2x8xf32> to vector<2x8x1xf32>
    %534 = vector.broadcast %533 : vector<2x8x1xf32> to vector<2x8x8xf32>
    %535 = arith.subf %531, %534 : vector<2x8x8xf32>
    %536 = math.exp %535 : vector<2x8x8xf32>
    %cst_213 = arith.constant dense<0.000000e+00> : vector<2x8xf32>
    %537 = vector.multi_reduction <add>, %536, %cst_213 [2] : vector<2x8x8xf32> to vector<2x8xf32>
    %538 = vector.shape_cast %537 : vector<2x8xf32> to vector<2x8x1xf32>
    %539 = tpu.reciprocal %538 {approx = true} : vector<2x8x1xf32> -> vector<2x8x1xf32>
    %540 = vector.broadcast %539 : vector<2x8x1xf32> to vector<2x8x8xf32>
    %541 = arith.mulf %536, %540 : vector<2x8x8xf32>
    %542 = vector.extract_strided_slice %489 {offsets = [0, 0, 16], sizes = [2, 8, 8], strides = [1, 1, 1]} : vector<2x8x32xf32> to vector<2x8x8xf32>
    "tpu.trace_start"() <{level = 10 : i32, message = "bqk,bkd->bqd"}> : () -> ()
    %cst_214 = arith.constant dense<0.000000e+00> : vector<2x8x8xf32>
    %543 = tpu.matmul %541, %542, %cst_214 {dimension_numbers = #tpu.dot_dimension_numbers<[2], [1], [1], [2], [0, 0, 0, 1, 1, 2], [0], [0]>} : vector<2x8x8xf32>, vector<2x8x8xf32>, vector<2x8x8xf32> -> vector<2x8x8xf32>
    "tpu.trace_stop"() : () -> ()
    %544 = vector.extract_strided_slice %487 {offsets = [0, 0, 24], sizes = [2, 8, 8], strides = [1, 1, 1]} : vector<2x8x32xf32> to vector<2x8x8xf32>
    %545 = vector.extract_strided_slice %488 {offsets = [0, 0, 24], sizes = [2, 8, 8], strides = [1, 1, 1]} : vector<2x8x32xf32> to vector<2x8x8xf32>
    "tpu.trace_start"() <{level = 10 : i32, message = "bqd,bkd->bqk"}> : () -> ()
    %cst_215 = arith.constant dense<0.000000e+00> : vector<2x8x8xf32>
    %546 = tpu.matmul %544, %545, %cst_215 {dimension_numbers = #tpu.dot_dimension_numbers<[2], [2], [1], [1], [0, 0, 0, 1, 1, 1], [0], [0]>} : vector<2x8x8xf32>, vector<2x8x8xf32>, vector<2x8x8xf32> -> vector<2x8x8xf32>
    "tpu.trace_stop"() : () -> ()
    %cst_216 = arith.constant 0.353553385 : f32
    %547 = vector.broadcast %cst_216 : f32 to vector<2x8x8xf32>
    %548 = arith.mulf %546, %547 : vector<2x8x8xf32>
    %549 = arith.addf %548, %5 : vector<2x8x8xf32>
    %cst_217 = arith.constant dense<0xFF800000> : vector<2x8xf32>
    %550 = vector.multi_reduction <maximumf>, %549, %cst_217 [2] : vector<2x8x8xf32> to vector<2x8xf32>
    %551 = vector.shape_cast %550 : vector<2x8xf32> to vector<2x8x1xf32>
    %552 = vector.broadcast %551 : vector<2x8x1xf32> to vector<2x8x8xf32>
    %553 = arith.subf %549, %552 : vector<2x8x8xf32>
    %554 = math.exp %553 : vector<2x8x8xf32>
    %cst_218 = arith.constant dense<0.000000e+00> : vector<2x8xf32>
    %555 = vector.multi_reduction <add>, %554, %cst_218 [2] : vector<2x8x8xf32> to vector<2x8xf32>
    %556 = vector.shape_cast %555 : vector<2x8xf32> to vector<2x8x1xf32>
    %557 = tpu.reciprocal %556 {approx = true} : vector<2x8x1xf32> -> vector<2x8x1xf32>
    %558 = vector.broadcast %557 : vector<2x8x1xf32> to vector<2x8x8xf32>
    %559 = arith.mulf %554, %558 : vector<2x8x8xf32>
    %560 = vector.extract_strided_slice %489 {offsets = [0, 0, 24], sizes = [2, 8, 8], strides = [1, 1, 1]} : vector<2x8x32xf32> to vector<2x8x8xf32>
    "tpu.trace_start"() <{level = 10 : i32, message = "bqk,bkd->bqd"}> : () -> ()
    %cst_219 = arith.constant dense<0.000000e+00> : vector<2x8x8xf32>
    %561 = tpu.matmul %559, %560, %cst_219 {dimension_numbers = #tpu.dot_dimension_numbers<[2], [1], [1], [2], [0, 0, 0, 1, 1, 2], [0], [0]>} : vector<2x8x8xf32>, vector<2x8x8xf32>, vector<2x8x8xf32> -> vector<2x8x8xf32>
    "tpu.trace_stop"() : () -> ()
    %562 = tpu.concatenate %507, %525, %543, %561 in 2 : vector<2x8x8xf32>, vector<2x8x8xf32>, vector<2x8x8xf32>, vector<2x8x8xf32> -> vector<2x8x32xf32>
    %563 = vector.shape_cast %562 : vector<2x8x32xf32> to vector<16x32xf32>
    %c0_220 = arith.constant 0 : index
    %c0_221 = arith.constant 0 : index
    %c0_222 = arith.constant 0 : index
    %564 = vector.load %arg19[%c0_220, %c0_221, %c0_222] : memref<2x32x32xf32, #tpu.memory_space<vmem>>, vector<1x32x32xf32>
    %565 = vector.shape_cast %564 : vector<1x32x32xf32> to vector<32x32xf32>
    %cst_223 = arith.constant dense<0.000000e+00> : vector<16x32xf32>
    %566 = tpu.matmul %563, %565, %cst_223 {dimension_numbers = #tpu.dot_dimension_numbers<[1], [0], [0], [1], [0, 0, 1, 1], [], []>} : vector<16x32xf32>, vector<32x32xf32>, vector<16x32xf32> -> vector<16x32xf32>
    %c0_224 = arith.constant 0 : index
    %c0_225 = arith.constant 0 : index
    %c0_226 = arith.constant 0 : index
    %567 = vector.load %arg20[%c0_224, %c0_225, %c0_226] : memref<2x1x32xf32, #tpu.memory_space<vmem>>, vector<1x1x32xf32>
    %568 = vector.shape_cast %567 : vector<1x1x32xf32> to vector<1x32xf32>
    %569 = vector.broadcast %568 : vector<1x32xf32> to vector<16x32xf32>
    %570 = arith.addf %566, %569 : vector<16x32xf32>
    %571 = arith.addf %470, %570 : vector<16x32xf32>
    %c2_227 = arith.constant 2 : index
    %c0_228 = arith.constant 0 : index
    %c0_229 = arith.constant 0 : index
    %572 = vector.load %arg21[%c2_227, %c0_228, %c0_229] : memref<12x1x32xf32, #tpu.memory_space<vmem>>, vector<1x1x32xf32>
    %573 = vector.shape_cast %572 : vector<1x1x32xf32> to vector<1x32xf32>
    %c3_230 = arith.constant 3 : index
    %c0_231 = arith.constant 0 : index
    %c0_232 = arith.constant 0 : index
    %574 = vector.load %arg21[%c3_230, %c0_231, %c0_232] : memref<12x1x32xf32, #tpu.memory_space<vmem>>, vector<1x1x32xf32>
    %575 = vector.shape_cast %574 : vector<1x1x32xf32> to vector<1x32xf32>
    %cst_233 = arith.constant dense<0.000000e+00> : vector<16xf32>
    %576 = vector.multi_reduction <add>, %571, %cst_233 [1] : vector<16x32xf32> to vector<16xf32>
    %577 = vector.shape_cast %576 : vector<16xf32> to vector<16x1xf32>
    %cst_234 = arith.constant 3.200000e+01 : f32
    %578 = vector.broadcast %cst_234 : f32 to vector<16x1xf32>
    %579 = arith.divf %577, %578 : vector<16x1xf32>
    %580 = vector.broadcast %579 : vector<16x1xf32> to vector<16x32xf32>
    %581 = arith.subf %571, %580 : vector<16x32xf32>
    %582 = arith.mulf %581, %581 : vector<16x32xf32>
    %cst_235 = arith.constant dense<0.000000e+00> : vector<16xf32>
    %583 = vector.multi_reduction <add>, %582, %cst_235 [1] : vector<16x32xf32> to vector<16xf32>
    %584 = vector.shape_cast %583 : vector<16xf32> to vector<16x1xf32>
    %cst_236 = arith.constant 3.200000e+01 : f32
    %585 = vector.broadcast %cst_236 : f32 to vector<16x1xf32>
    %586 = arith.divf %584, %585 : vector<16x1xf32>
    %587 = vector.broadcast %579 : vector<16x1xf32> to vector<16x32xf32>
    %588 = arith.subf %571, %587 : vector<16x32xf32>
    %cst_237 = arith.constant 9.99999974E-6 : f32
    %589 = vector.broadcast %cst_237 : f32 to vector<16x1xf32>
    %590 = arith.addf %586, %589 : vector<16x1xf32>
    %591 = math.rsqrt %590 : vector<16x1xf32>
    %592 = vector.broadcast %591 : vector<16x1xf32> to vector<16x32xf32>
    %593 = arith.mulf %588, %592 : vector<16x32xf32>
    %594 = vector.broadcast %573 : vector<1x32xf32> to vector<16x32xf32>
    %595 = arith.mulf %593, %594 : vector<16x32xf32>
    %596 = vector.broadcast %575 : vector<1x32xf32> to vector<16x32xf32>
    %597 = arith.addf %595, %596 : vector<16x32xf32>
    %c0_238 = arith.constant 0 : index
    %c0_239 = arith.constant 0 : index
    %c0_240 = arith.constant 0 : index
    %598 = vector.load %arg22[%c0_238, %c0_239, %c0_240] : memref<2x32x64xf32, #tpu.memory_space<vmem>>, vector<1x32x64xf32>
    %599 = vector.shape_cast %598 : vector<1x32x64xf32> to vector<32x64xf32>
    %cst_241 = arith.constant dense<0.000000e+00> : vector<16x64xf32>
    %600 = tpu.matmul %597, %599, %cst_241 {dimension_numbers = #tpu.dot_dimension_numbers<[1], [0], [0], [1], [0, 0, 1, 1], [], []>} : vector<16x32xf32>, vector<32x64xf32>, vector<16x64xf32> -> vector<16x64xf32>
    %c0_242 = arith.constant 0 : index
    %c0_243 = arith.constant 0 : index
    %c0_244 = arith.constant 0 : index
    %601 = vector.load %arg23[%c0_242, %c0_243, %c0_244] : memref<2x1x64xf32, #tpu.memory_space<vmem>>, vector<1x1x64xf32>
    %602 = vector.shape_cast %601 : vector<1x1x64xf32> to vector<1x64xf32>
    %603 = vector.broadcast %602 : vector<1x64xf32> to vector<16x64xf32>
    %604 = arith.addf %600, %603 : vector<16x64xf32>
    %cst_245 = arith.constant 0.000000e+00 : f32
    %605 = vector.broadcast %cst_245 : f32 to vector<16x64xf32>
    %606 = arith.maximumf %604, %605 : vector<16x64xf32>
    %c0_246 = arith.constant 0 : index
    %c0_247 = arith.constant 0 : index
    %c0_248 = arith.constant 0 : index
    %607 = vector.load %arg24[%c0_246, %c0_247, %c0_248] : memref<2x64x32xf32, #tpu.memory_space<vmem>>, vector<1x64x32xf32>
    %608 = vector.shape_cast %607 : vector<1x64x32xf32> to vector<64x32xf32>
    %cst_249 = arith.constant dense<0.000000e+00> : vector<16x32xf32>
    %609 = tpu.matmul %606, %608, %cst_249 {dimension_numbers = #tpu.dot_dimension_numbers<[1], [0], [0], [1], [0, 0, 1, 1], [], []>} : vector<16x64xf32>, vector<64x32xf32>, vector<16x32xf32> -> vector<16x32xf32>
    %c0_250 = arith.constant 0 : index
    %c0_251 = arith.constant 0 : index
    %c0_252 = arith.constant 0 : index
    %610 = vector.load %arg25[%c0_250, %c0_251, %c0_252] : memref<2x1x32xf32, #tpu.memory_space<vmem>>, vector<1x1x32xf32>
    %611 = vector.shape_cast %610 : vector<1x1x32xf32> to vector<1x32xf32>
    %612 = vector.broadcast %611 : vector<1x32xf32> to vector<16x32xf32>
    %613 = arith.addf %609, %612 : vector<16x32xf32>
    %614 = arith.addf %597, %613 : vector<16x32xf32>
    %c4_253 = arith.constant 4 : index
    %c0_254 = arith.constant 0 : index
    %c0_255 = arith.constant 0 : index
    %615 = vector.load %arg21[%c4_253, %c0_254, %c0_255] : memref<12x1x32xf32, #tpu.memory_space<vmem>>, vector<1x1x32xf32>
    %616 = vector.shape_cast %615 : vector<1x1x32xf32> to vector<1x32xf32>
    %c5_256 = arith.constant 5 : index
    %c0_257 = arith.constant 0 : index
    %c0_258 = arith.constant 0 : index
    %617 = vector.load %arg21[%c5_256, %c0_257, %c0_258] : memref<12x1x32xf32, #tpu.memory_space<vmem>>, vector<1x1x32xf32>
    %618 = vector.shape_cast %617 : vector<1x1x32xf32> to vector<1x32xf32>
    %cst_259 = arith.constant dense<0.000000e+00> : vector<16xf32>
    %619 = vector.multi_reduction <add>, %614, %cst_259 [1] : vector<16x32xf32> to vector<16xf32>
    %620 = vector.shape_cast %619 : vector<16xf32> to vector<16x1xf32>
    %cst_260 = arith.constant 3.200000e+01 : f32
    %621 = vector.broadcast %cst_260 : f32 to vector<16x1xf32>
    %622 = arith.divf %620, %621 : vector<16x1xf32>
    %623 = vector.broadcast %622 : vector<16x1xf32> to vector<16x32xf32>
    %624 = arith.subf %614, %623 : vector<16x32xf32>
    %625 = arith.mulf %624, %624 : vector<16x32xf32>
    %cst_261 = arith.constant dense<0.000000e+00> : vector<16xf32>
    %626 = vector.multi_reduction <add>, %625, %cst_261 [1] : vector<16x32xf32> to vector<16xf32>
    %627 = vector.shape_cast %626 : vector<16xf32> to vector<16x1xf32>
    %cst_262 = arith.constant 3.200000e+01 : f32
    %628 = vector.broadcast %cst_262 : f32 to vector<16x1xf32>
    %629 = arith.divf %627, %628 : vector<16x1xf32>
    %630 = vector.broadcast %622 : vector<16x1xf32> to vector<16x32xf32>
    %631 = arith.subf %614, %630 : vector<16x32xf32>
    %cst_263 = arith.constant 9.99999974E-6 : f32
    %632 = vector.broadcast %cst_263 : f32 to vector<16x1xf32>
    %633 = arith.addf %629, %632 : vector<16x1xf32>
    %634 = math.rsqrt %633 : vector<16x1xf32>
    %635 = vector.broadcast %634 : vector<16x1xf32> to vector<16x32xf32>
    %636 = arith.mulf %631, %635 : vector<16x32xf32>
    %637 = vector.broadcast %616 : vector<1x32xf32> to vector<16x32xf32>
    %638 = arith.mulf %636, %637 : vector<16x32xf32>
    %639 = vector.broadcast %618 : vector<1x32xf32> to vector<16x32xf32>
    %640 = arith.addf %638, %639 : vector<16x32xf32>
    %c1_264 = arith.constant 1 : index
    %c0_265 = arith.constant 0 : index
    %c0_266 = arith.constant 0 : index
    %641 = vector.load %arg13[%c1_264, %c0_265, %c0_266] : memref<2x32x96xf32, #tpu.memory_space<vmem>>, vector<1x32x96xf32>
    %642 = vector.shape_cast %641 : vector<1x32x96xf32> to vector<32x96xf32>
    %c1_267 = arith.constant 1 : index
    %c0_268 = arith.constant 0 : index
    %c0_269 = arith.constant 0 : index
    %643 = vector.load %arg14[%c1_267, %c0_268, %c0_269] : memref<2x1x96xf32, #tpu.memory_space<vmem>>, vector<1x1x96xf32>
    %644 = vector.shape_cast %643 : vector<1x1x96xf32> to vector<1x96xf32>
    %cst_270 = arith.constant dense<0.000000e+00> : vector<16x96xf32>
    %645 = tpu.matmul %640, %642, %cst_270 {dimension_numbers = #tpu.dot_dimension_numbers<[1], [0], [0], [1], [0, 0, 1, 1], [], []>} : vector<16x32xf32>, vector<32x96xf32>, vector<16x96xf32> -> vector<16x96xf32>
    %646 = vector.broadcast %644 : vector<1x96xf32> to vector<16x96xf32>
    %647 = arith.addf %645, %646 : vector<16x96xf32>
    %648 = vector.extract_strided_slice %647 {offsets = [0, 0], sizes = [16, 32], strides = [1, 1]} : vector<16x96xf32> to vector<16x32xf32>
    %649 = vector.extract_strided_slice %647 {offsets = [0, 32], sizes = [16, 32], strides = [1, 1]} : vector<16x96xf32> to vector<16x32xf32>
    %650 = vector.extract_strided_slice %647 {offsets = [0, 64], sizes = [16, 32], strides = [1, 1]} : vector<16x96xf32> to vector<16x32xf32>
    %651 = vector.shape_cast %648 : vector<16x32xf32> to vector<2x8x32xf32>
    %652 = vector.shape_cast %649 : vector<16x32xf32> to vector<2x8x32xf32>
    %653 = vector.shape_cast %650 : vector<16x32xf32> to vector<2x8x32xf32>
    %654 = vector.extract_strided_slice %651 {offsets = [0, 0, 0], sizes = [2, 8, 8], strides = [1, 1, 1]} : vector<2x8x32xf32> to vector<2x8x8xf32>
    %655 = vector.extract_strided_slice %652 {offsets = [0, 0, 0], sizes = [2, 8, 8], strides = [1, 1, 1]} : vector<2x8x32xf32> to vector<2x8x8xf32>
    "tpu.trace_start"() <{level = 10 : i32, message = "bqd,bkd->bqk"}> : () -> ()
    %cst_271 = arith.constant dense<0.000000e+00> : vector<2x8x8xf32>
    %656 = tpu.matmul %654, %655, %cst_271 {dimension_numbers = #tpu.dot_dimension_numbers<[2], [2], [1], [1], [0, 0, 0, 1, 1, 1], [0], [0]>} : vector<2x8x8xf32>, vector<2x8x8xf32>, vector<2x8x8xf32> -> vector<2x8x8xf32>
    "tpu.trace_stop"() : () -> ()
    %cst_272 = arith.constant 0.353553385 : f32
    %657 = vector.broadcast %cst_272 : f32 to vector<2x8x8xf32>
    %658 = arith.mulf %656, %657 : vector<2x8x8xf32>
    %659 = arith.addf %658, %17 : vector<2x8x8xf32>
    %cst_273 = arith.constant dense<0xFF800000> : vector<2x8xf32>
    %660 = vector.multi_reduction <maximumf>, %659, %cst_273 [2] : vector<2x8x8xf32> to vector<2x8xf32>
    %661 = vector.shape_cast %660 : vector<2x8xf32> to vector<2x8x1xf32>
    %662 = vector.broadcast %661 : vector<2x8x1xf32> to vector<2x8x8xf32>
    %663 = arith.subf %659, %662 : vector<2x8x8xf32>
    %664 = math.exp %663 : vector<2x8x8xf32>
    %cst_274 = arith.constant dense<0.000000e+00> : vector<2x8xf32>
    %665 = vector.multi_reduction <add>, %664, %cst_274 [2] : vector<2x8x8xf32> to vector<2x8xf32>
    %666 = vector.shape_cast %665 : vector<2x8xf32> to vector<2x8x1xf32>
    %667 = tpu.reciprocal %666 {approx = true} : vector<2x8x1xf32> -> vector<2x8x1xf32>
    %668 = vector.broadcast %667 : vector<2x8x1xf32> to vector<2x8x8xf32>
    %669 = arith.mulf %664, %668 : vector<2x8x8xf32>
    %670 = vector.extract_strided_slice %653 {offsets = [0, 0, 0], sizes = [2, 8, 8], strides = [1, 1, 1]} : vector<2x8x32xf32> to vector<2x8x8xf32>
    "tpu.trace_start"() <{level = 10 : i32, message = "bqk,bkd->bqd"}> : () -> ()
    %cst_275 = arith.constant dense<0.000000e+00> : vector<2x8x8xf32>
    %671 = tpu.matmul %669, %670, %cst_275 {dimension_numbers = #tpu.dot_dimension_numbers<[2], [1], [1], [2], [0, 0, 0, 1, 1, 2], [0], [0]>} : vector<2x8x8xf32>, vector<2x8x8xf32>, vector<2x8x8xf32> -> vector<2x8x8xf32>
    "tpu.trace_stop"() : () -> ()
    %672 = vector.extract_strided_slice %651 {offsets = [0, 0, 8], sizes = [2, 8, 8], strides = [1, 1, 1]} : vector<2x8x32xf32> to vector<2x8x8xf32>
    %673 = vector.extract_strided_slice %652 {offsets = [0, 0, 8], sizes = [2, 8, 8], strides = [1, 1, 1]} : vector<2x8x32xf32> to vector<2x8x8xf32>
    "tpu.trace_start"() <{level = 10 : i32, message = "bqd,bkd->bqk"}> : () -> ()
    %cst_276 = arith.constant dense<0.000000e+00> : vector<2x8x8xf32>
    %674 = tpu.matmul %672, %673, %cst_276 {dimension_numbers = #tpu.dot_dimension_numbers<[2], [2], [1], [1], [0, 0, 0, 1, 1, 1], [0], [0]>} : vector<2x8x8xf32>, vector<2x8x8xf32>, vector<2x8x8xf32> -> vector<2x8x8xf32>
    "tpu.trace_stop"() : () -> ()
    %cst_277 = arith.constant 0.353553385 : f32
    %675 = vector.broadcast %cst_277 : f32 to vector<2x8x8xf32>
    %676 = arith.mulf %674, %675 : vector<2x8x8xf32>
    %677 = arith.addf %676, %17 : vector<2x8x8xf32>
    %cst_278 = arith.constant dense<0xFF800000> : vector<2x8xf32>
    %678 = vector.multi_reduction <maximumf>, %677, %cst_278 [2] : vector<2x8x8xf32> to vector<2x8xf32>
    %679 = vector.shape_cast %678 : vector<2x8xf32> to vector<2x8x1xf32>
    %680 = vector.broadcast %679 : vector<2x8x1xf32> to vector<2x8x8xf32>
    %681 = arith.subf %677, %680 : vector<2x8x8xf32>
    %682 = math.exp %681 : vector<2x8x8xf32>
    %cst_279 = arith.constant dense<0.000000e+00> : vector<2x8xf32>
    %683 = vector.multi_reduction <add>, %682, %cst_279 [2] : vector<2x8x8xf32> to vector<2x8xf32>
    %684 = vector.shape_cast %683 : vector<2x8xf32> to vector<2x8x1xf32>
    %685 = tpu.reciprocal %684 {approx = true} : vector<2x8x1xf32> -> vector<2x8x1xf32>
    %686 = vector.broadcast %685 : vector<2x8x1xf32> to vector<2x8x8xf32>
    %687 = arith.mulf %682, %686 : vector<2x8x8xf32>
    %688 = vector.extract_strided_slice %653 {offsets = [0, 0, 8], sizes = [2, 8, 8], strides = [1, 1, 1]} : vector<2x8x32xf32> to vector<2x8x8xf32>
    "tpu.trace_start"() <{level = 10 : i32, message = "bqk,bkd->bqd"}> : () -> ()
    %cst_280 = arith.constant dense<0.000000e+00> : vector<2x8x8xf32>
    %689 = tpu.matmul %687, %688, %cst_280 {dimension_numbers = #tpu.dot_dimension_numbers<[2], [1], [1], [2], [0, 0, 0, 1, 1, 2], [0], [0]>} : vector<2x8x8xf32>, vector<2x8x8xf32>, vector<2x8x8xf32> -> vector<2x8x8xf32>
    "tpu.trace_stop"() : () -> ()
    %690 = vector.extract_strided_slice %651 {offsets = [0, 0, 16], sizes = [2, 8, 8], strides = [1, 1, 1]} : vector<2x8x32xf32> to vector<2x8x8xf32>
    %691 = vector.extract_strided_slice %652 {offsets = [0, 0, 16], sizes = [2, 8, 8], strides = [1, 1, 1]} : vector<2x8x32xf32> to vector<2x8x8xf32>
    "tpu.trace_start"() <{level = 10 : i32, message = "bqd,bkd->bqk"}> : () -> ()
    %cst_281 = arith.constant dense<0.000000e+00> : vector<2x8x8xf32>
    %692 = tpu.matmul %690, %691, %cst_281 {dimension_numbers = #tpu.dot_dimension_numbers<[2], [2], [1], [1], [0, 0, 0, 1, 1, 1], [0], [0]>} : vector<2x8x8xf32>, vector<2x8x8xf32>, vector<2x8x8xf32> -> vector<2x8x8xf32>
    "tpu.trace_stop"() : () -> ()
    %cst_282 = arith.constant 0.353553385 : f32
    %693 = vector.broadcast %cst_282 : f32 to vector<2x8x8xf32>
    %694 = arith.mulf %692, %693 : vector<2x8x8xf32>
    %695 = arith.addf %694, %17 : vector<2x8x8xf32>
    %cst_283 = arith.constant dense<0xFF800000> : vector<2x8xf32>
    %696 = vector.multi_reduction <maximumf>, %695, %cst_283 [2] : vector<2x8x8xf32> to vector<2x8xf32>
    %697 = vector.shape_cast %696 : vector<2x8xf32> to vector<2x8x1xf32>
    %698 = vector.broadcast %697 : vector<2x8x1xf32> to vector<2x8x8xf32>
    %699 = arith.subf %695, %698 : vector<2x8x8xf32>
    %700 = math.exp %699 : vector<2x8x8xf32>
    %cst_284 = arith.constant dense<0.000000e+00> : vector<2x8xf32>
    %701 = vector.multi_reduction <add>, %700, %cst_284 [2] : vector<2x8x8xf32> to vector<2x8xf32>
    %702 = vector.shape_cast %701 : vector<2x8xf32> to vector<2x8x1xf32>
    %703 = tpu.reciprocal %702 {approx = true} : vector<2x8x1xf32> -> vector<2x8x1xf32>
    %704 = vector.broadcast %703 : vector<2x8x1xf32> to vector<2x8x8xf32>
    %705 = arith.mulf %700, %704 : vector<2x8x8xf32>
    %706 = vector.extract_strided_slice %653 {offsets = [0, 0, 16], sizes = [2, 8, 8], strides = [1, 1, 1]} : vector<2x8x32xf32> to vector<2x8x8xf32>
    "tpu.trace_start"() <{level = 10 : i32, message = "bqk,bkd->bqd"}> : () -> ()
    %cst_285 = arith.constant dense<0.000000e+00> : vector<2x8x8xf32>
    %707 = tpu.matmul %705, %706, %cst_285 {dimension_numbers = #tpu.dot_dimension_numbers<[2], [1], [1], [2], [0, 0, 0, 1, 1, 2], [0], [0]>} : vector<2x8x8xf32>, vector<2x8x8xf32>, vector<2x8x8xf32> -> vector<2x8x8xf32>
    "tpu.trace_stop"() : () -> ()
    %708 = vector.extract_strided_slice %651 {offsets = [0, 0, 24], sizes = [2, 8, 8], strides = [1, 1, 1]} : vector<2x8x32xf32> to vector<2x8x8xf32>
    %709 = vector.extract_strided_slice %652 {offsets = [0, 0, 24], sizes = [2, 8, 8], strides = [1, 1, 1]} : vector<2x8x32xf32> to vector<2x8x8xf32>
    "tpu.trace_start"() <{level = 10 : i32, message = "bqd,bkd->bqk"}> : () -> ()
    %cst_286 = arith.constant dense<0.000000e+00> : vector<2x8x8xf32>
    %710 = tpu.matmul %708, %709, %cst_286 {dimension_numbers = #tpu.dot_dimension_numbers<[2], [2], [1], [1], [0, 0, 0, 1, 1, 1], [0], [0]>} : vector<2x8x8xf32>, vector<2x8x8xf32>, vector<2x8x8xf32> -> vector<2x8x8xf32>
    "tpu.trace_stop"() : () -> ()
    %cst_287 = arith.constant 0.353553385 : f32
    %711 = vector.broadcast %cst_287 : f32 to vector<2x8x8xf32>
    %712 = arith.mulf %710, %711 : vector<2x8x8xf32>
    %713 = arith.addf %712, %17 : vector<2x8x8xf32>
    %cst_288 = arith.constant dense<0xFF800000> : vector<2x8xf32>
    %714 = vector.multi_reduction <maximumf>, %713, %cst_288 [2] : vector<2x8x8xf32> to vector<2x8xf32>
    %715 = vector.shape_cast %714 : vector<2x8xf32> to vector<2x8x1xf32>
    %716 = vector.broadcast %715 : vector<2x8x1xf32> to vector<2x8x8xf32>
    %717 = arith.subf %713, %716 : vector<2x8x8xf32>
    %718 = math.exp %717 : vector<2x8x8xf32>
    %cst_289 = arith.constant dense<0.000000e+00> : vector<2x8xf32>
    %719 = vector.multi_reduction <add>, %718, %cst_289 [2] : vector<2x8x8xf32> to vector<2x8xf32>
    %720 = vector.shape_cast %719 : vector<2x8xf32> to vector<2x8x1xf32>
    %721 = tpu.reciprocal %720 {approx = true} : vector<2x8x1xf32> -> vector<2x8x1xf32>
    %722 = vector.broadcast %721 : vector<2x8x1xf32> to vector<2x8x8xf32>
    %723 = arith.mulf %718, %722 : vector<2x8x8xf32>
    %724 = vector.extract_strided_slice %653 {offsets = [0, 0, 24], sizes = [2, 8, 8], strides = [1, 1, 1]} : vector<2x8x32xf32> to vector<2x8x8xf32>
    "tpu.trace_start"() <{level = 10 : i32, message = "bqk,bkd->bqd"}> : () -> ()
    %cst_290 = arith.constant dense<0.000000e+00> : vector<2x8x8xf32>
    %725 = tpu.matmul %723, %724, %cst_290 {dimension_numbers = #tpu.dot_dimension_numbers<[2], [1], [1], [2], [0, 0, 0, 1, 1, 2], [0], [0]>} : vector<2x8x8xf32>, vector<2x8x8xf32>, vector<2x8x8xf32> -> vector<2x8x8xf32>
    "tpu.trace_stop"() : () -> ()
    %726 = tpu.concatenate %671, %689, %707, %725 in 2 : vector<2x8x8xf32>, vector<2x8x8xf32>, vector<2x8x8xf32>, vector<2x8x8xf32> -> vector<2x8x32xf32>
    %727 = vector.shape_cast %726 : vector<2x8x32xf32> to vector<16x32xf32>
    %c1_291 = arith.constant 1 : index
    %c0_292 = arith.constant 0 : index
    %c0_293 = arith.constant 0 : index
    %728 = vector.load %arg15[%c1_291, %c0_292, %c0_293] : memref<2x32x32xf32, #tpu.memory_space<vmem>>, vector<1x32x32xf32>
    %729 = vector.shape_cast %728 : vector<1x32x32xf32> to vector<32x32xf32>
    %cst_294 = arith.constant dense<0.000000e+00> : vector<16x32xf32>
    %730 = tpu.matmul %727, %729, %cst_294 {dimension_numbers = #tpu.dot_dimension_numbers<[1], [0], [0], [1], [0, 0, 1, 1], [], []>} : vector<16x32xf32>, vector<32x32xf32>, vector<16x32xf32> -> vector<16x32xf32>
    %c1_295 = arith.constant 1 : index
    %c0_296 = arith.constant 0 : index
    %c0_297 = arith.constant 0 : index
    %731 = vector.load %arg16[%c1_295, %c0_296, %c0_297] : memref<2x1x32xf32, #tpu.memory_space<vmem>>, vector<1x1x32xf32>
    %732 = vector.shape_cast %731 : vector<1x1x32xf32> to vector<1x32xf32>
    %733 = vector.broadcast %732 : vector<1x32xf32> to vector<16x32xf32>
    %734 = arith.addf %730, %733 : vector<16x32xf32>
    %735 = arith.addf %640, %734 : vector<16x32xf32>
    %c6_298 = arith.constant 6 : index
    %c0_299 = arith.constant 0 : index
    %c0_300 = arith.constant 0 : index
    %736 = vector.load %arg21[%c6_298, %c0_299, %c0_300] : memref<12x1x32xf32, #tpu.memory_space<vmem>>, vector<1x1x32xf32>
    %737 = vector.shape_cast %736 : vector<1x1x32xf32> to vector<1x32xf32>
    %c7_301 = arith.constant 7 : index
    %c0_302 = arith.constant 0 : index
    %c0_303 = arith.constant 0 : index
    %738 = vector.load %arg21[%c7_301, %c0_302, %c0_303] : memref<12x1x32xf32, #tpu.memory_space<vmem>>, vector<1x1x32xf32>
    %739 = vector.shape_cast %738 : vector<1x1x32xf32> to vector<1x32xf32>
    %cst_304 = arith.constant dense<0.000000e+00> : vector<16xf32>
    %740 = vector.multi_reduction <add>, %735, %cst_304 [1] : vector<16x32xf32> to vector<16xf32>
    %741 = vector.shape_cast %740 : vector<16xf32> to vector<16x1xf32>
    %cst_305 = arith.constant 3.200000e+01 : f32
    %742 = vector.broadcast %cst_305 : f32 to vector<16x1xf32>
    %743 = arith.divf %741, %742 : vector<16x1xf32>
    %744 = vector.broadcast %743 : vector<16x1xf32> to vector<16x32xf32>
    %745 = arith.subf %735, %744 : vector<16x32xf32>
    %746 = arith.mulf %745, %745 : vector<16x32xf32>
    %cst_306 = arith.constant dense<0.000000e+00> : vector<16xf32>
    %747 = vector.multi_reduction <add>, %746, %cst_306 [1] : vector<16x32xf32> to vector<16xf32>
    %748 = vector.shape_cast %747 : vector<16xf32> to vector<16x1xf32>
    %cst_307 = arith.constant 3.200000e+01 : f32
    %749 = vector.broadcast %cst_307 : f32 to vector<16x1xf32>
    %750 = arith.divf %748, %749 : vector<16x1xf32>
    %751 = vector.broadcast %743 : vector<16x1xf32> to vector<16x32xf32>
    %752 = arith.subf %735, %751 : vector<16x32xf32>
    %cst_308 = arith.constant 9.99999974E-6 : f32
    %753 = vector.broadcast %cst_308 : f32 to vector<16x1xf32>
    %754 = arith.addf %750, %753 : vector<16x1xf32>
    %755 = math.rsqrt %754 : vector<16x1xf32>
    %756 = vector.broadcast %755 : vector<16x1xf32> to vector<16x32xf32>
    %757 = arith.mulf %752, %756 : vector<16x32xf32>
    %758 = vector.broadcast %737 : vector<1x32xf32> to vector<16x32xf32>
    %759 = arith.mulf %757, %758 : vector<16x32xf32>
    %760 = vector.broadcast %739 : vector<1x32xf32> to vector<16x32xf32>
    %761 = arith.addf %759, %760 : vector<16x32xf32>
    %c1_309 = arith.constant 1 : index
    %c0_310 = arith.constant 0 : index
    %c0_311 = arith.constant 0 : index
    %762 = vector.load %arg17[%c1_309, %c0_310, %c0_311] : memref<2x32x96xf32, #tpu.memory_space<vmem>>, vector<1x32x96xf32>
    %763 = vector.shape_cast %762 : vector<1x32x96xf32> to vector<32x96xf32>
    %c1_312 = arith.constant 1 : index
    %c0_313 = arith.constant 0 : index
    %c0_314 = arith.constant 0 : index
    %764 = vector.load %arg18[%c1_312, %c0_313, %c0_314] : memref<2x1x96xf32, #tpu.memory_space<vmem>>, vector<1x1x96xf32>
    %765 = vector.shape_cast %764 : vector<1x1x96xf32> to vector<1x96xf32>
    %766 = vector.extract_strided_slice %763 {offsets = [0, 0], sizes = [32, 32], strides = [1, 1]} : vector<32x96xf32> to vector<32x32xf32>
    %cst_315 = arith.constant dense<0.000000e+00> : vector<16x32xf32>
    %767 = tpu.matmul %761, %766, %cst_315 {dimension_numbers = #tpu.dot_dimension_numbers<[1], [0], [0], [1], [0, 0, 1, 1], [], []>} : vector<16x32xf32>, vector<32x32xf32>, vector<16x32xf32> -> vector<16x32xf32>
    %768 = vector.extract_strided_slice %765 {offsets = [0, 0], sizes = [1, 32], strides = [1, 1]} : vector<1x96xf32> to vector<1x32xf32>
    %769 = vector.broadcast %768 : vector<1x32xf32> to vector<16x32xf32>
    %770 = arith.addf %767, %769 : vector<16x32xf32>
    %771 = vector.extract_strided_slice %763 {offsets = [0, 32], sizes = [32, 64], strides = [1, 1]} : vector<32x96xf32> to vector<32x64xf32>
    %cst_316 = arith.constant dense<0.000000e+00> : vector<16x64xf32>
    %772 = tpu.matmul %347, %771, %cst_316 {dimension_numbers = #tpu.dot_dimension_numbers<[1], [0], [0], [1], [0, 0, 1, 1], [], []>} : vector<16x32xf32>, vector<32x64xf32>, vector<16x64xf32> -> vector<16x64xf32>
    %773 = vector.extract_strided_slice %765 {offsets = [0, 32], sizes = [1, 64], strides = [1, 1]} : vector<1x96xf32> to vector<1x64xf32>
    %774 = vector.broadcast %773 : vector<1x64xf32> to vector<16x64xf32>
    %775 = arith.addf %772, %774 : vector<16x64xf32>
    %776 = vector.extract_strided_slice %775 {offsets = [0, 0], sizes = [16, 32], strides = [1, 1]} : vector<16x64xf32> to vector<16x32xf32>
    %777 = vector.extract_strided_slice %775 {offsets = [0, 32], sizes = [16, 32], strides = [1, 1]} : vector<16x64xf32> to vector<16x32xf32>
    %778 = vector.shape_cast %770 : vector<16x32xf32> to vector<2x8x32xf32>
    %779 = vector.shape_cast %776 : vector<16x32xf32> to vector<2x8x32xf32>
    %780 = vector.shape_cast %777 : vector<16x32xf32> to vector<2x8x32xf32>
    %781 = vector.extract_strided_slice %778 {offsets = [0, 0, 0], sizes = [2, 8, 8], strides = [1, 1, 1]} : vector<2x8x32xf32> to vector<2x8x8xf32>
    %782 = vector.extract_strided_slice %779 {offsets = [0, 0, 0], sizes = [2, 8, 8], strides = [1, 1, 1]} : vector<2x8x32xf32> to vector<2x8x8xf32>
    "tpu.trace_start"() <{level = 10 : i32, message = "bqd,bkd->bqk"}> : () -> ()
    %cst_317 = arith.constant dense<0.000000e+00> : vector<2x8x8xf32>
    %783 = tpu.matmul %781, %782, %cst_317 {dimension_numbers = #tpu.dot_dimension_numbers<[2], [2], [1], [1], [0, 0, 0, 1, 1, 1], [0], [0]>} : vector<2x8x8xf32>, vector<2x8x8xf32>, vector<2x8x8xf32> -> vector<2x8x8xf32>
    "tpu.trace_stop"() : () -> ()
    %cst_318 = arith.constant 0.353553385 : f32
    %784 = vector.broadcast %cst_318 : f32 to vector<2x8x8xf32>
    %785 = arith.mulf %783, %784 : vector<2x8x8xf32>
    %786 = arith.addf %785, %5 : vector<2x8x8xf32>
    %cst_319 = arith.constant dense<0xFF800000> : vector<2x8xf32>
    %787 = vector.multi_reduction <maximumf>, %786, %cst_319 [2] : vector<2x8x8xf32> to vector<2x8xf32>
    %788 = vector.shape_cast %787 : vector<2x8xf32> to vector<2x8x1xf32>
    %789 = vector.broadcast %788 : vector<2x8x1xf32> to vector<2x8x8xf32>
    %790 = arith.subf %786, %789 : vector<2x8x8xf32>
    %791 = math.exp %790 : vector<2x8x8xf32>
    %cst_320 = arith.constant dense<0.000000e+00> : vector<2x8xf32>
    %792 = vector.multi_reduction <add>, %791, %cst_320 [2] : vector<2x8x8xf32> to vector<2x8xf32>
    %793 = vector.shape_cast %792 : vector<2x8xf32> to vector<2x8x1xf32>
    %794 = tpu.reciprocal %793 {approx = true} : vector<2x8x1xf32> -> vector<2x8x1xf32>
    %795 = vector.broadcast %794 : vector<2x8x1xf32> to vector<2x8x8xf32>
    %796 = arith.mulf %791, %795 : vector<2x8x8xf32>
    %797 = vector.extract_strided_slice %780 {offsets = [0, 0, 0], sizes = [2, 8, 8], strides = [1, 1, 1]} : vector<2x8x32xf32> to vector<2x8x8xf32>
    "tpu.trace_start"() <{level = 10 : i32, message = "bqk,bkd->bqd"}> : () -> ()
    %cst_321 = arith.constant dense<0.000000e+00> : vector<2x8x8xf32>
    %798 = tpu.matmul %796, %797, %cst_321 {dimension_numbers = #tpu.dot_dimension_numbers<[2], [1], [1], [2], [0, 0, 0, 1, 1, 2], [0], [0]>} : vector<2x8x8xf32>, vector<2x8x8xf32>, vector<2x8x8xf32> -> vector<2x8x8xf32>
    "tpu.trace_stop"() : () -> ()
    %799 = vector.extract_strided_slice %778 {offsets = [0, 0, 8], sizes = [2, 8, 8], strides = [1, 1, 1]} : vector<2x8x32xf32> to vector<2x8x8xf32>
    %800 = vector.extract_strided_slice %779 {offsets = [0, 0, 8], sizes = [2, 8, 8], strides = [1, 1, 1]} : vector<2x8x32xf32> to vector<2x8x8xf32>
    "tpu.trace_start"() <{level = 10 : i32, message = "bqd,bkd->bqk"}> : () -> ()
    %cst_322 = arith.constant dense<0.000000e+00> : vector<2x8x8xf32>
    %801 = tpu.matmul %799, %800, %cst_322 {dimension_numbers = #tpu.dot_dimension_numbers<[2], [2], [1], [1], [0, 0, 0, 1, 1, 1], [0], [0]>} : vector<2x8x8xf32>, vector<2x8x8xf32>, vector<2x8x8xf32> -> vector<2x8x8xf32>
    "tpu.trace_stop"() : () -> ()
    %cst_323 = arith.constant 0.353553385 : f32
    %802 = vector.broadcast %cst_323 : f32 to vector<2x8x8xf32>
    %803 = arith.mulf %801, %802 : vector<2x8x8xf32>
    %804 = arith.addf %803, %5 : vector<2x8x8xf32>
    %cst_324 = arith.constant dense<0xFF800000> : vector<2x8xf32>
    %805 = vector.multi_reduction <maximumf>, %804, %cst_324 [2] : vector<2x8x8xf32> to vector<2x8xf32>
    %806 = vector.shape_cast %805 : vector<2x8xf32> to vector<2x8x1xf32>
    %807 = vector.broadcast %806 : vector<2x8x1xf32> to vector<2x8x8xf32>
    %808 = arith.subf %804, %807 : vector<2x8x8xf32>
    %809 = math.exp %808 : vector<2x8x8xf32>
    %cst_325 = arith.constant dense<0.000000e+00> : vector<2x8xf32>
    %810 = vector.multi_reduction <add>, %809, %cst_325 [2] : vector<2x8x8xf32> to vector<2x8xf32>
    %811 = vector.shape_cast %810 : vector<2x8xf32> to vector<2x8x1xf32>
    %812 = tpu.reciprocal %811 {approx = true} : vector<2x8x1xf32> -> vector<2x8x1xf32>
    %813 = vector.broadcast %812 : vector<2x8x1xf32> to vector<2x8x8xf32>
    %814 = arith.mulf %809, %813 : vector<2x8x8xf32>
    %815 = vector.extract_strided_slice %780 {offsets = [0, 0, 8], sizes = [2, 8, 8], strides = [1, 1, 1]} : vector<2x8x32xf32> to vector<2x8x8xf32>
    "tpu.trace_start"() <{level = 10 : i32, message = "bqk,bkd->bqd"}> : () -> ()
    %cst_326 = arith.constant dense<0.000000e+00> : vector<2x8x8xf32>
    %816 = tpu.matmul %814, %815, %cst_326 {dimension_numbers = #tpu.dot_dimension_numbers<[2], [1], [1], [2], [0, 0, 0, 1, 1, 2], [0], [0]>} : vector<2x8x8xf32>, vector<2x8x8xf32>, vector<2x8x8xf32> -> vector<2x8x8xf32>
    "tpu.trace_stop"() : () -> ()
    %817 = vector.extract_strided_slice %778 {offsets = [0, 0, 16], sizes = [2, 8, 8], strides = [1, 1, 1]} : vector<2x8x32xf32> to vector<2x8x8xf32>
    %818 = vector.extract_strided_slice %779 {offsets = [0, 0, 16], sizes = [2, 8, 8], strides = [1, 1, 1]} : vector<2x8x32xf32> to vector<2x8x8xf32>
    "tpu.trace_start"() <{level = 10 : i32, message = "bqd,bkd->bqk"}> : () -> ()
    %cst_327 = arith.constant dense<0.000000e+00> : vector<2x8x8xf32>
    %819 = tpu.matmul %817, %818, %cst_327 {dimension_numbers = #tpu.dot_dimension_numbers<[2], [2], [1], [1], [0, 0, 0, 1, 1, 1], [0], [0]>} : vector<2x8x8xf32>, vector<2x8x8xf32>, vector<2x8x8xf32> -> vector<2x8x8xf32>
    "tpu.trace_stop"() : () -> ()
    %cst_328 = arith.constant 0.353553385 : f32
    %820 = vector.broadcast %cst_328 : f32 to vector<2x8x8xf32>
    %821 = arith.mulf %819, %820 : vector<2x8x8xf32>
    %822 = arith.addf %821, %5 : vector<2x8x8xf32>
    %cst_329 = arith.constant dense<0xFF800000> : vector<2x8xf32>
    %823 = vector.multi_reduction <maximumf>, %822, %cst_329 [2] : vector<2x8x8xf32> to vector<2x8xf32>
    %824 = vector.shape_cast %823 : vector<2x8xf32> to vector<2x8x1xf32>
    %825 = vector.broadcast %824 : vector<2x8x1xf32> to vector<2x8x8xf32>
    %826 = arith.subf %822, %825 : vector<2x8x8xf32>
    %827 = math.exp %826 : vector<2x8x8xf32>
    %cst_330 = arith.constant dense<0.000000e+00> : vector<2x8xf32>
    %828 = vector.multi_reduction <add>, %827, %cst_330 [2] : vector<2x8x8xf32> to vector<2x8xf32>
    %829 = vector.shape_cast %828 : vector<2x8xf32> to vector<2x8x1xf32>
    %830 = tpu.reciprocal %829 {approx = true} : vector<2x8x1xf32> -> vector<2x8x1xf32>
    %831 = vector.broadcast %830 : vector<2x8x1xf32> to vector<2x8x8xf32>
    %832 = arith.mulf %827, %831 : vector<2x8x8xf32>
    %833 = vector.extract_strided_slice %780 {offsets = [0, 0, 16], sizes = [2, 8, 8], strides = [1, 1, 1]} : vector<2x8x32xf32> to vector<2x8x8xf32>
    "tpu.trace_start"() <{level = 10 : i32, message = "bqk,bkd->bqd"}> : () -> ()
    %cst_331 = arith.constant dense<0.000000e+00> : vector<2x8x8xf32>
    %834 = tpu.matmul %832, %833, %cst_331 {dimension_numbers = #tpu.dot_dimension_numbers<[2], [1], [1], [2], [0, 0, 0, 1, 1, 2], [0], [0]>} : vector<2x8x8xf32>, vector<2x8x8xf32>, vector<2x8x8xf32> -> vector<2x8x8xf32>
    "tpu.trace_stop"() : () -> ()
    %835 = vector.extract_strided_slice %778 {offsets = [0, 0, 24], sizes = [2, 8, 8], strides = [1, 1, 1]} : vector<2x8x32xf32> to vector<2x8x8xf32>
    %836 = vector.extract_strided_slice %779 {offsets = [0, 0, 24], sizes = [2, 8, 8], strides = [1, 1, 1]} : vector<2x8x32xf32> to vector<2x8x8xf32>
    "tpu.trace_start"() <{level = 10 : i32, message = "bqd,bkd->bqk"}> : () -> ()
    %cst_332 = arith.constant dense<0.000000e+00> : vector<2x8x8xf32>
    %837 = tpu.matmul %835, %836, %cst_332 {dimension_numbers = #tpu.dot_dimension_numbers<[2], [2], [1], [1], [0, 0, 0, 1, 1, 1], [0], [0]>} : vector<2x8x8xf32>, vector<2x8x8xf32>, vector<2x8x8xf32> -> vector<2x8x8xf32>
    "tpu.trace_stop"() : () -> ()
    %cst_333 = arith.constant 0.353553385 : f32
    %838 = vector.broadcast %cst_333 : f32 to vector<2x8x8xf32>
    %839 = arith.mulf %837, %838 : vector<2x8x8xf32>
    %840 = arith.addf %839, %5 : vector<2x8x8xf32>
    %cst_334 = arith.constant dense<0xFF800000> : vector<2x8xf32>
    %841 = vector.multi_reduction <maximumf>, %840, %cst_334 [2] : vector<2x8x8xf32> to vector<2x8xf32>
    %842 = vector.shape_cast %841 : vector<2x8xf32> to vector<2x8x1xf32>
    %843 = vector.broadcast %842 : vector<2x8x1xf32> to vector<2x8x8xf32>
    %844 = arith.subf %840, %843 : vector<2x8x8xf32>
    %845 = math.exp %844 : vector<2x8x8xf32>
    %cst_335 = arith.constant dense<0.000000e+00> : vector<2x8xf32>
    %846 = vector.multi_reduction <add>, %845, %cst_335 [2] : vector<2x8x8xf32> to vector<2x8xf32>
    %847 = vector.shape_cast %846 : vector<2x8xf32> to vector<2x8x1xf32>
    %848 = tpu.reciprocal %847 {approx = true} : vector<2x8x1xf32> -> vector<2x8x1xf32>
    %849 = vector.broadcast %848 : vector<2x8x1xf32> to vector<2x8x8xf32>
    %850 = arith.mulf %845, %849 : vector<2x8x8xf32>
    %851 = vector.extract_strided_slice %780 {offsets = [0, 0, 24], sizes = [2, 8, 8], strides = [1, 1, 1]} : vector<2x8x32xf32> to vector<2x8x8xf32>
    "tpu.trace_start"() <{level = 10 : i32, message = "bqk,bkd->bqd"}> : () -> ()
    %cst_336 = arith.constant dense<0.000000e+00> : vector<2x8x8xf32>
    %852 = tpu.matmul %850, %851, %cst_336 {dimension_numbers = #tpu.dot_dimension_numbers<[2], [1], [1], [2], [0, 0, 0, 1, 1, 2], [0], [0]>} : vector<2x8x8xf32>, vector<2x8x8xf32>, vector<2x8x8xf32> -> vector<2x8x8xf32>
    "tpu.trace_stop"() : () -> ()
    %853 = tpu.concatenate %798, %816, %834, %852 in 2 : vector<2x8x8xf32>, vector<2x8x8xf32>, vector<2x8x8xf32>, vector<2x8x8xf32> -> vector<2x8x32xf32>
    %854 = vector.shape_cast %853 : vector<2x8x32xf32> to vector<16x32xf32>
    %855 = tpu.concatenate %796, %814, %832, %850 in 2 : vector<2x8x8xf32>, vector<2x8x8xf32>, vector<2x8x8xf32>, vector<2x8x8xf32> -> vector<2x8x32xf32>
    %c0_337 = arith.constant 0 : index
    %c0_338 = arith.constant 0 : index
    %c0_339 = arith.constant 0 : index
    %856 = vector.load %arg29[%c0_337, %c0_338, %c0_339] : memref<2x8x32xf32, #tpu.memory_space<vmem>>, vector<2x8x32xf32>
    tpu.vector_store %arg29[%c0_337, %c0_338, %c0_339], %855 {strides = array<i32>} : memref<2x8x32xf32, #tpu.memory_space<vmem>>, vector<2x8x32xf32>,
    %c1_340 = arith.constant 1 : index
    %c0_341 = arith.constant 0 : index
    %c0_342 = arith.constant 0 : index
    %857 = vector.load %arg19[%c1_340, %c0_341, %c0_342] : memref<2x32x32xf32, #tpu.memory_space<vmem>>, vector<1x32x32xf32>
    %858 = vector.shape_cast %857 : vector<1x32x32xf32> to vector<32x32xf32>
    %cst_343 = arith.constant dense<0.000000e+00> : vector<16x32xf32>
    %859 = tpu.matmul %854, %858, %cst_343 {dimension_numbers = #tpu.dot_dimension_numbers<[1], [0], [0], [1], [0, 0, 1, 1], [], []>} : vector<16x32xf32>, vector<32x32xf32>, vector<16x32xf32> -> vector<16x32xf32>
    %c1_344 = arith.constant 1 : index
    %c0_345 = arith.constant 0 : index
    %c0_346 = arith.constant 0 : index
    %860 = vector.load %arg20[%c1_344, %c0_345, %c0_346] : memref<2x1x32xf32, #tpu.memory_space<vmem>>, vector<1x1x32xf32>
    %861 = vector.shape_cast %860 : vector<1x1x32xf32> to vector<1x32xf32>
    %862 = vector.broadcast %861 : vector<1x32xf32> to vector<16x32xf32>
    %863 = arith.addf %859, %862 : vector<16x32xf32>
    %864 = arith.addf %761, %863 : vector<16x32xf32>
    %c8 = arith.constant 8 : index
    %c0_347 = arith.constant 0 : index
    %c0_348 = arith.constant 0 : index
    %865 = vector.load %arg21[%c8, %c0_347, %c0_348] : memref<12x1x32xf32, #tpu.memory_space<vmem>>, vector<1x1x32xf32>
    %866 = vector.shape_cast %865 : vector<1x1x32xf32> to vector<1x32xf32>
    %c9 = arith.constant 9 : index
    %c0_349 = arith.constant 0 : index
    %c0_350 = arith.constant 0 : index
    %867 = vector.load %arg21[%c9, %c0_349, %c0_350] : memref<12x1x32xf32, #tpu.memory_space<vmem>>, vector<1x1x32xf32>
    %868 = vector.shape_cast %867 : vector<1x1x32xf32> to vector<1x32xf32>
    %cst_351 = arith.constant dense<0.000000e+00> : vector<16xf32>
    %869 = vector.multi_reduction <add>, %864, %cst_351 [1] : vector<16x32xf32> to vector<16xf32>
    %870 = vector.shape_cast %869 : vector<16xf32> to vector<16x1xf32>
    %cst_352 = arith.constant 3.200000e+01 : f32
    %871 = vector.broadcast %cst_352 : f32 to vector<16x1xf32>
    %872 = arith.divf %870, %871 : vector<16x1xf32>
    %873 = vector.broadcast %872 : vector<16x1xf32> to vector<16x32xf32>
    %874 = arith.subf %864, %873 : vector<16x32xf32>
    %875 = arith.mulf %874, %874 : vector<16x32xf32>
    %cst_353 = arith.constant dense<0.000000e+00> : vector<16xf32>
    %876 = vector.multi_reduction <add>, %875, %cst_353 [1] : vector<16x32xf32> to vector<16xf32>
    %877 = vector.shape_cast %876 : vector<16xf32> to vector<16x1xf32>
    %cst_354 = arith.constant 3.200000e+01 : f32
    %878 = vector.broadcast %cst_354 : f32 to vector<16x1xf32>
    %879 = arith.divf %877, %878 : vector<16x1xf32>
    %880 = vector.broadcast %872 : vector<16x1xf32> to vector<16x32xf32>
    %881 = arith.subf %864, %880 : vector<16x32xf32>
    %cst_355 = arith.constant 9.99999974E-6 : f32
    %882 = vector.broadcast %cst_355 : f32 to vector<16x1xf32>
    %883 = arith.addf %879, %882 : vector<16x1xf32>
    %884 = math.rsqrt %883 : vector<16x1xf32>
    %885 = vector.broadcast %884 : vector<16x1xf32> to vector<16x32xf32>
    %886 = arith.mulf %881, %885 : vector<16x32xf32>
    %887 = vector.broadcast %866 : vector<1x32xf32> to vector<16x32xf32>
    %888 = arith.mulf %886, %887 : vector<16x32xf32>
    %889 = vector.broadcast %868 : vector<1x32xf32> to vector<16x32xf32>
    %890 = arith.addf %888, %889 : vector<16x32xf32>
    %c1_356 = arith.constant 1 : index
    %c0_357 = arith.constant 0 : index
    %c0_358 = arith.constant 0 : index
    %891 = vector.load %arg22[%c1_356, %c0_357, %c0_358] : memref<2x32x64xf32, #tpu.memory_space<vmem>>, vector<1x32x64xf32>
    %892 = vector.shape_cast %891 : vector<1x32x64xf32> to vector<32x64xf32>
    %cst_359 = arith.constant dense<0.000000e+00> : vector<16x64xf32>
    %893 = tpu.matmul %890, %892, %cst_359 {dimension_numbers = #tpu.dot_dimension_numbers<[1], [0], [0], [1], [0, 0, 1, 1], [], []>} : vector<16x32xf32>, vector<32x64xf32>, vector<16x64xf32> -> vector<16x64xf32>
    %c1_360 = arith.constant 1 : index
    %c0_361 = arith.constant 0 : index
    %c0_362 = arith.constant 0 : index
    %894 = vector.load %arg23[%c1_360, %c0_361, %c0_362] : memref<2x1x64xf32, #tpu.memory_space<vmem>>, vector<1x1x64xf32>
    %895 = vector.shape_cast %894 : vector<1x1x64xf32> to vector<1x64xf32>
    %896 = vector.broadcast %895 : vector<1x64xf32> to vector<16x64xf32>
    %897 = arith.addf %893, %896 : vector<16x64xf32>
    %cst_363 = arith.constant 0.000000e+00 : f32
    %898 = vector.broadcast %cst_363 : f32 to vector<16x64xf32>
    %899 = arith.maximumf %897, %898 : vector<16x64xf32>
    %c1_364 = arith.constant 1 : index
    %c0_365 = arith.constant 0 : index
    %c0_366 = arith.constant 0 : index
    %900 = vector.load %arg24[%c1_364, %c0_365, %c0_366] : memref<2x64x32xf32, #tpu.memory_space<vmem>>, vector<1x64x32xf32>
    %901 = vector.shape_cast %900 : vector<1x64x32xf32> to vector<64x32xf32>
    %cst_367 = arith.constant dense<0.000000e+00> : vector<16x32xf32>
    %902 = tpu.matmul %899, %901, %cst_367 {dimension_numbers = #tpu.dot_dimension_numbers<[1], [0], [0], [1], [0, 0, 1, 1], [], []>} : vector<16x64xf32>, vector<64x32xf32>, vector<16x32xf32> -> vector<16x32xf32>
    %c1_368 = arith.constant 1 : index
    %c0_369 = arith.constant 0 : index
    %c0_370 = arith.constant 0 : index
    %903 = vector.load %arg25[%c1_368, %c0_369, %c0_370] : memref<2x1x32xf32, #tpu.memory_space<vmem>>, vector<1x1x32xf32>
    %904 = vector.shape_cast %903 : vector<1x1x32xf32> to vector<1x32xf32>
    %905 = vector.broadcast %904 : vector<1x32xf32> to vector<16x32xf32>
    %906 = arith.addf %902, %905 : vector<16x32xf32>
    %907 = arith.addf %890, %906 : vector<16x32xf32>
    %c10 = arith.constant 10 : index
    %c0_371 = arith.constant 0 : index
    %c0_372 = arith.constant 0 : index
    %908 = vector.load %arg21[%c10, %c0_371, %c0_372] : memref<12x1x32xf32, #tpu.memory_space<vmem>>, vector<1x1x32xf32>
    %909 = vector.shape_cast %908 : vector<1x1x32xf32> to vector<1x32xf32>
    %c11 = arith.constant 11 : index
    %c0_373 = arith.constant 0 : index
    %c0_374 = arith.constant 0 : index
    %910 = vector.load %arg21[%c11, %c0_373, %c0_374] : memref<12x1x32xf32, #tpu.memory_space<vmem>>, vector<1x1x32xf32>
    %911 = vector.shape_cast %910 : vector<1x1x32xf32> to vector<1x32xf32>
    %cst_375 = arith.constant dense<0.000000e+00> : vector<16xf32>
    %912 = vector.multi_reduction <add>, %907, %cst_375 [1] : vector<16x32xf32> to vector<16xf32>
    %913 = vector.shape_cast %912 : vector<16xf32> to vector<16x1xf32>
    %cst_376 = arith.constant 3.200000e+01 : f32
    %914 = vector.broadcast %cst_376 : f32 to vector<16x1xf32>
    %915 = arith.divf %913, %914 : vector<16x1xf32>
    %916 = vector.broadcast %915 : vector<16x1xf32> to vector<16x32xf32>
    %917 = arith.subf %907, %916 : vector<16x32xf32>
    %918 = arith.mulf %917, %917 : vector<16x32xf32>
    %cst_377 = arith.constant dense<0.000000e+00> : vector<16xf32>
    %919 = vector.multi_reduction <add>, %918, %cst_377 [1] : vector<16x32xf32> to vector<16xf32>
    %920 = vector.shape_cast %919 : vector<16xf32> to vector<16x1xf32>
    %cst_378 = arith.constant 3.200000e+01 : f32
    %921 = vector.broadcast %cst_378 : f32 to vector<16x1xf32>
    %922 = arith.divf %920, %921 : vector<16x1xf32>
    %923 = vector.broadcast %915 : vector<16x1xf32> to vector<16x32xf32>
    %924 = arith.subf %907, %923 : vector<16x32xf32>
    %cst_379 = arith.constant 9.99999974E-6 : f32
    %925 = vector.broadcast %cst_379 : f32 to vector<16x1xf32>
    %926 = arith.addf %922, %925 : vector<16x1xf32>
    %927 = math.rsqrt %926 : vector<16x1xf32>
    %928 = vector.broadcast %927 : vector<16x1xf32> to vector<16x32xf32>
    %929 = arith.mulf %924, %928 : vector<16x32xf32>
    %930 = vector.broadcast %909 : vector<1x32xf32> to vector<16x32xf32>
    %931 = arith.mulf %929, %930 : vector<16x32xf32>
    %932 = vector.broadcast %911 : vector<1x32xf32> to vector<16x32xf32>
    %933 = arith.addf %931, %932 : vector<16x32xf32>
    %c0_380 = arith.constant 0 : index
    %c0_381 = arith.constant 0 : index
    %934 = vector.load %arg26[%c0_380, %c0_381] : memref<32x16xf32, #tpu.memory_space<vmem>>, vector<32x16xf32>
    %cst_382 = arith.constant dense<0.000000e+00> : vector<16x16xf32>
    %935 = tpu.matmul %933, %934, %cst_382 {dimension_numbers = #tpu.dot_dimension_numbers<[1], [0], [0], [1], [0, 0, 1, 1], [], []>} : vector<16x32xf32>, vector<32x16xf32>, vector<16x16xf32> -> vector<16x16xf32>
    %c0_383 = arith.constant 0 : index
    %c0_384 = arith.constant 0 : index
    %936 = vector.load %arg27[%c0_383, %c0_384] : memref<1x16xf32, #tpu.memory_space<vmem>>, vector<1x16xf32>
    %937 = vector.broadcast %936 : vector<1x16xf32> to vector<16x16xf32>
    %938 = arith.addf %935, %937 : vector<16x16xf32>
    %c0_385 = arith.constant 0 : index
    %c0_386 = arith.constant 0 : index
    %939 = vector.load %arg28[%c0_385, %c0_386] : memref<16x16xf32, #tpu.memory_space<vmem>>, vector<16x16xf32>
    tpu.vector_store %arg28[%c0_385, %c0_386], %938 {strides = array<i32>} : memref<16x16xf32, #tpu.memory_space<vmem>>, vector<16x16xf32>,
    return
  }
}

</mosaic_0001>

<bundles_post_ra>
// kernel: seq2seq_forward.1
= control target key start
LH: loop header
LB: loop body
LE: loop exit
PB: predicated region body
PF: predicated region fallthrough
CT: control target
= control target key end

     0   :  { %s13054_s6 = smov 1   ;;  %s13055_s10 = smov 2   ;;  %s14649_s0 = inlined_call_operand.smem [shape: u32[30], index: -1, kind: input, shape index: {}] }
   0x1   :  { %s13119_s5 = sld [smem:[%s14649_s0]]   ;;  %s13056_s14 = smov 3  }
   0x2   :  { %s13124_s9 = sld [smem:[%s14649_s0 + %s13054_s6]]   ;;  %s13057_s18 = smov 4  }
   0x3   :  { %s13129_s13 = sld [smem:[%s14649_s0 + %s13055_s10]]   ;;  %s13058_s22 = smov 5  }
   0x4   :  { %s13134_s17 = sld [smem:[%s14649_s0 + %s13056_s14]]   ;;  %s13059_s26 = smov 6  }
   0x5   :  { %s13139_s21 = sld [smem:[%s14649_s0 + %s13057_s18]]   ;;  %s13060_s30 = smov 7  }
   0x6   :  { %s13144_s25 = sld [smem:[%s14649_s0 + %s13058_s22]]   ;;  %s13061_s4 = smov 8  }
   0x7   :  { %s13149_s29 = sld [smem:[%s14649_s0 + %s13059_s26]]   ;;  %s13062_s10 = smov 9  }
   0x8   :  { %14662 = sst [smem:[#allocation23_spill]] %s13124_s9  ;;  %s13063_s15 = smov 10  }
   0x9   :  { %s13154_s3 = sld [smem:[%s14649_s0 + %s13060_s30]]   ;;  %s13064_s20 = smov 11  }
   0xa   :  { %14663 = sst [smem:[#allocation24_spill]] %s13134_s17  ;;  %s13065_s26 = smov 12  }
   0xb   :  { %s13159_s8 = sld [smem:[%s14649_s0 + %s13061_s4]]   ;;  %s13066_s1 = smov 13  }
   0xc   :  { %s13164_s14 = sld [smem:[%s14649_s0 + %s13062_s10]]   ;;  %s13067_s7 = smov 14  }
   0xd   :  { %s13169_s19 = sld [smem:[%s14649_s0 + %s13063_s15]]   ;;  %s13068_s15 = smov 15  }
   0xe   :  { %s13174_s24 = sld [smem:[%s14649_s0 + %s13064_s20]]   ;;  %s13069_s22 = smov 16  }
   0xf   :  { %s13179_s30 = sld [smem:[%s14649_s0 + %s13065_s26]]   ;;  %s13070_s28 = smov 17  }
  0x10   :  { %s13184_s6 = sld [smem:[%s14649_s0 + %s13066_s1]]  }
  0x11   :  { %s13189_s12 = sld [smem:[%s14649_s0 + %s13067_s7]]   ;;  %s13071_s7 = smov 18  }
  0x12   :  { %s13194_s20 = sld [smem:[%s14649_s0 + %s13068_s15]]   ;;  %s13072_s15 = smov 19  }
  0x13   :  { %s13199_s27 = sld [smem:[%s14649_s0 + %s13069_s22]]   ;;  %s13073_s22 = smov 20  }
  0x14   :  { %s13204_s4 = sld [smem:[%s14649_s0 + %s13070_s28]]   ;;  %s13074_s28 = smov 21  }
  0x15   :  { %14664 = sst [smem:[#allocation25_spill]] %s13179_s30 }
  0x16   :  { %s13209_s17 = sld [smem:[%s14649_s0 + %s13071_s7]]   ;;  %s13075_s7 = smov 22  }
  0x17   :  { %14665 = sst [smem:[#allocation26_spill]] %s13189_s12 }
  0x18   :  { %s13214_s12 = sld [smem:[%s14649_s0 + %s13072_s15]]   ;;  %s13076_s15 = smov 23  }
  0x19   :  { %14666 = sst [smem:[#allocation27_spill]] %s13199_s27 }
  0x1a   :  { %s13219_s27 = sld [smem:[%s14649_s0 + %s13073_s22]]   ;;  %s13077_s22 = smov 24  }
  0x1b   :  { %s13224_s9 = sld [smem:[%s14649_s0 + %s13074_s28]]   ;;  %s13078_s28 = smov 25  }
  0x1c   :  { %14667 = sst [smem:[#allocation28_spill]] %s13209_s17 }
  0x1d   :  { %s13229_s17 = sld [smem:[%s14649_s0 + %s13075_s7]]   ;;  %s13079_s7 = smov 26  }
  0x1e   :  { %14668 = sst [smem:[#allocation29_spill]] %s13214_s12 }
  0x1f   :  { %s13234_s12 = sld [smem:[%s14649_s0 + %s13076_s15]]   ;;  %s13080_s15 = smov 27  }
  0x20   :  { %14669 = sst [smem:[#allocation30_spill]] %s13219_s27 }
  0x21   :  { %s13239_s27 = sld [smem:[%s14649_s0 + %s13077_s22]]   ;;  %s13081_s22 = smov 28  }
  0x22   :  { %s13244_s30 = sld [smem:[%s14649_s0 + %s13078_s28]]   ;;  %s13082_s28 = smov 29  }
  0x23   :  { %14670 = sst [smem:[#allocation31_spill]] %s13229_s17 }
  0x24   :  { %s13249_s17 = sld [smem:[%s14649_s0 + %s13079_s7]]  }
  0x25   :  { %14671 = sst [smem:[#allocation32_spill]] %s13234_s12 }
  0x26   :  { %s13254_s12 = sld [smem:[%s14649_s0 + %s13080_s15]]  }
  0x27   :  { %14672 = sst [smem:[#allocation33_spill]] %s13239_s27 }
  0x28   :  { %14673 = sst [smem:[#allocation34_spill]] %s13244_s30 }
  0x29   :  { %s13259_s27 = sld [smem:[%s14649_s0 + %s13081_s22]]  }
  0x2a   :  { %s13264_s30 = sld [smem:[%s14649_s0 + %s13082_s28]]  }
  0x2b   :  { %65 = vsyncpa [#allocation3], 0 }
  0x2c   :  { %66 = vsyncpa [#allocation6], 0 }
  0x2d   :  { %67 = vsyncpa [#allocation9], 0 }
  0x2e   :  { %68 = vsyncpa [#allocation12], 0 }
  0x2f   :  { %69 = vsyncpa [#allocation15], 0 }
  0x30   :  { %70 = vsyncpa [#allocation4], 0  ;;  %s13083_s7 = smov [#allocation5]   ;;  %s13084_s11 = smov [#allocation8]  }
  0x31   :  { %s98_s10 = sshll.u32 %s13083_s7, 4  ;;  %s124_s15 = sshll.u32 %s13084_s11, 4  ;;  %s99_s10 = int_to_ptr.vmem [resolvable:$true] %s98_s10  ;;  %s125_s15 = int_to_ptr.vmem [resolvable:$true] %s124_s15 }
  0x32   :  { %s12870_s16 = scalar_lea.vmem %s99_s10, 1024  ;;  %p12875_p1 = scmp.lt.s32.totalorder %s99_s10, %s99_s10 }
  0x33   :  { %p12871_p0 = scmp.ne.s32.totalorder %s99_s10, %s12870_s16  ;;  %p12876_p2 = scmp.lt.s32.totalorder %s12870_s16, %s12870_s16 }
  0x35   :  { %p12877_p3 = por %p12876_p2, %p12875_p1 }
  0x37   :  { %p12878_p4 = pnand %p12877_p3, %p12871_p0 }
  0x39   :  { %12881 = shalt.err (!%p12878_p4)
}
  0x3a   :  { %s13085_s0 = smov 128   ;;  %s13086_s18 = smov 8  }
  0x3b   :  { %104 = dma.hbm_to_vmem [thread:$0]  %s13149_s29, 1024, %s99_s10, [#allocation6], %s13085_s0, %s13085_s0, %s13086_s18  }
  0x3c   :  { %s12890_s22 = scalar_lea.vmem %s125_s15, 1024  ;;  %p12895_p6 = scmp.lt.s32.totalorder %s125_s15, %s125_s15 }
  0x3d   :  { %p12891_p5 = scmp.ne.s32.totalorder %s125_s15, %s12890_s22  ;;  %p12896_p7 = scmp.lt.s32.totalorder %s12890_s22, %s12890_s22 }
  0x3f   :  { %p12897_p8 = por %p12896_p7, %p12895_p6 }
  0x41   :  { %p12898_p9 = pnand %p12897_p8, %p12891_p5 }
  0x43   :  { %12901 = shalt.err (!%p12898_p9)
}
  0x44   :  { %130 = dma.hbm_to_vmem [thread:$0]  %s13164_s14, 1024, %s125_s15, [#allocation9], %s13085_s0, %s13085_s0, %s13086_s18  }
  0x45   :  { %s13087_s23 = smov [#allocation11]   ;;  %s13088_s28 = smov [#allocation2]  }
  0x46   :  { %s156_s26 = sshll.u32 %s13087_s23, 4  ;;  %s84_s1 = sshll.u32 %s13088_s28, 4  ;;  %s157_s26 = int_to_ptr.vmem [resolvable:$true] %s156_s26  ;;  %s85_s1 = int_to_ptr.vmem [resolvable:$true] %s84_s1 }
  0x47   :  { %s12910_s2 = scalar_lea.vmem %s157_s26, 1024  ;;  %p12915_p11 = scmp.lt.s32.totalorder %s157_s26, %s157_s26 }
  0x48   :  { %p12911_p10 = scmp.ne.s32.totalorder %s157_s26, %s12910_s2  ;;  %p12916_p12 = scmp.lt.s32.totalorder %s12910_s2, %s12910_s2 }
  0x4a   :  { %p12917_p13 = por %p12916_p12, %p12915_p11 }
  0x4c   :  { %p12918_p0 = pnand %p12917_p13, %p12911_p10 }
  0x4e   :  { %12921 = shalt.err (!%p12918_p0)
}
  0x4f   :  { %162 = dma.hbm_to_vmem [thread:$0]  %s13194_s20, 1024, %s157_s26, [#allocation12], %s13085_s0, %s13085_s0, %s13086_s18  }
  0x50   :  { %s12930_s29 = scalar_lea.vmem %s85_s1, 1024  ;;  %p12935_p2 = scmp.lt.s32.totalorder %s85_s1, %s85_s1 }
  0x51   :  { %p12931_p1 = scmp.ne.s32.totalorder %s85_s1, %s12930_s29  ;;  %p12936_p3 = scmp.lt.s32.totalorder %s12930_s29, %s12930_s29 }
  0x53   :  { %p12937_p4 = por %p12936_p3, %p12935_p2 }
  0x55   :  { %p12938_p5 = pnand %p12937_p4, %p12931_p1 }
  0x57   :  { %12941 = shalt.err (!%p12938_p5)
}
  0x58   :  { %90 = dma.hbm_to_vmem [thread:$0]  %s13139_s21, 1024, %s85_s1, [#allocation3], %s13085_s0, %s13085_s0, %s13086_s18  }
  0x59   :  { %s13089_s14 = smov [#allocation7]  }
  0x5a   :  { %s112_s7 = sshll.u32 %s13089_s14, 4  ;;  %s113_s7 = int_to_ptr.vmem [resolvable:$true] %s112_s7 }
  0x5b   :  { %s12950_s10 = scalar_lea.vmem %s113_s7, 128  ;;  %p12955_p7 = scmp.lt.s32.totalorder %s113_s7, %s113_s7 }
  0x5c   :  { %p12951_p6 = scmp.ne.s32.totalorder %s113_s7, %s12950_s10  ;;  %p12956_p8 = scmp.lt.s32.totalorder %s12950_s10, %s12950_s10 }
  0x5e   :  { %p12957_p9 = por %p12956_p8, %p12955_p7 }
  0x60   :  { %p12958_p10 = pnand %p12957_p9, %p12951_p6 }
  0x62   :  { %12961 = shalt.err (!%p12958_p10)
}
  0x63   :  { %s13090_s20 = smov 16   ;;  %s13091_s11 = smov 1  }
  0x64   :  { %118 = dma.hbm_to_vmem [thread:$0]  %s13159_s8, 128, %s113_s7, [#allocation6], %s13090_s20, %s13090_s20, %s13091_s11  }
  0x65   :  { %s13092_s15 = smov [#allocation10]   ;;  %s13093_s21 = smov [#allocation13]  }
  0x66   :  { %s142_s16 = sshll.u32 %s13092_s15, 4  ;;  %s170_s22 = sshll.u32 %s13093_s21, 4  ;;  %s143_s16 = int_to_ptr.vmem [resolvable:$true] %s142_s16  ;;  %s171_s22 = int_to_ptr.vmem [resolvable:$true] %s170_s22 }
  0x67   :  { %s12970_s23 = scalar_lea.vmem %s143_s16, 1024  ;;  %p12975_p12 = scmp.lt.s32.totalorder %s143_s16, %s143_s16 }
  0x68   :  { %p12971_p11 = scmp.ne.s32.totalorder %s143_s16, %s12970_s23  ;;  %p12976_p13 = scmp.lt.s32.totalorder %s12970_s23, %s12970_s23 }
  0x6a   :  { %p12977_p0 = por %p12976_p13, %p12975_p12 }
  0x6c   :  { %p12978_p1 = pnand %p12977_p0, %p12971_p11 }
  0x6e   :  { %12981 = shalt.err (!%p12978_p1)
}
  0x6f   :  { %148 = dma.hbm_to_vmem [thread:$0]  %s13184_s6, 1024, %s143_s16, [#allocation9], %s13085_s0, %s13085_s0, %s13086_s18  }
  0x70   :  { %s12990_s26 = scalar_lea.vmem %s171_s22, 1024  ;;  %p12995_p3 = scmp.lt.s32.totalorder %s171_s22, %s171_s22 }
  0x71   :  { %p12991_p2 = scmp.ne.s32.totalorder %s171_s22, %s12990_s26  ;;  %p12996_p4 = scmp.lt.s32.totalorder %s12990_s26, %s12990_s26 }
  0x73   :  { %p12997_p5 = por %p12996_p4, %p12995_p3 }
  0x75   :  { %p12998_p6 = pnand %p12997_p5, %p12991_p2 }
  0x77   :  { %13001 = shalt.err (!%p12998_p6)
}
  0x78   :  { %176 = dma.hbm_to_vmem [thread:$0]  %s13204_s4, 1024, %s171_s22, [#allocation12], %s13085_s0, %s13085_s0, %s13086_s18  }
  0x79   :  { %s13094_s8 = smov [#allocation14]  }
  0x7a   :  { %s188_s28 = sshll.u32 %s13094_s8, 4  ;;  %s189_s28 = int_to_ptr.vmem [resolvable:$true] %s188_s28 }
  0x7b   :  { %s13010_s1 = scalar_lea.vmem %s189_s28, 192  ;;  %p13015_p8 = scmp.lt.s32.totalorder %s189_s28, %s189_s28 }
  0x7c   :  { %p13011_p7 = scmp.ne.s32.totalorder %s189_s28, %s13010_s1  ;;  %p13016_p9 = scmp.lt.s32.totalorder %s13010_s1, %s13010_s1 }
  0x7e   :  { %p13017_p10 = por %p13016_p9, %p13015_p8 }
  0x80   :  { %p13018_p11 = pnand %p13017_p10, %p13011_p7 }
  0x82   :  { %13021 = shalt.err (!%p13018_p11)
}
  0x83   :  { %194 = dma.hbm_to_vmem [thread:$0]  %s13224_s9, 192, %s189_s28, [#allocation15], %s13090_s20, %s13090_s20, %s13091_s11  }
  0x84   :  { %13042 = dma.done.wait [#allocation3], 1024  }
  0x85   :  { %13043 = vsyncadd [#allocation3], 4294966272 }
  0x86   :  { %13044 = dma.done.wait [#allocation6], 1152  }
  0x87   :  { %13045 = vsyncadd [#allocation6], 4294966144 }
  0x88   :  { %13046 = dma.done.wait [#allocation9], 2048  }
  0x89   :  { %13047 = vsyncadd [#allocation9], 4294965248 }
  0x8a   :  { %13048 = dma.done.wait [#allocation12], 2048  }
  0x8b   :  { %13049 = vsyncadd [#allocation12], 4294965248 }
  0x8c   :  { %13050 = dma.done.wait [#allocation15], 192  }
  0x8d   :  { %13051 = vsyncadd [#allocation15], 4294967104  ;;  %vm280_vm0 = vcmask 261120   ;;  %v272_v0 = vld [vmem:[#allocation2 + $0x18] sm:$0xff]  ;;  %v271_v1 = vld [vmem:[#allocation2 + $0x10] sm:$0xff]  ;;  %v13095_v6 = vmov 0.0  }
  0x8e   :  { %11802 = vmatprep.subr.mxu0 %v272_v0  ;;  %v13299_v2 = vld [vmem:[%s13119_s5] sm:$0xff]  ;;  %v270_v3 = vld [vmem:[#allocation2 + $0x8] sm:$0xff]  ;;  %11813 = vmatprep.subr.mxu1 %v13095_v6  ;;  %vm13096_vm1 = vmmov 0   ;;  %vm365_vm2 = vcmask 64512   ;;  %s13098_s9 = smov 64   ;;  %s13099_s6 = smov 88  }
  0x8f   :  { %11803 = vmatpush3.msra.mxu0 %v272_v0  ;;  %11810 = vmatprep.mubr.msk.f32.mxu0 %vm280_vm0, %v13299_v2  ;;  %v269_v4 = vld [vmem:[#allocation2] sm:$0xff]  ;;  %v13304_v5 = vld [vmem:[%s13119_s5 + $0x8] sm:$0xff]  ;;  %s13097_s5 = smov 96   ;;  %s13100_s4 = smov 120   ;;  %vm1726_vm3 = vcmask 195584   ;;  %vm1723_vm4 = vcmask 130048  }
  0x90   :  { %11804 = vmatprep.subr.mxu0 %v271_v1  ;;  %11815 = vmatprep.mubr.msk.f32.mxu1 %vm13096_vm1, %v13095_v6  ;;  %v11191_v8 = vld [vmem:[%s13144_s25] ss:$0 sm:$0xff]  ;;  %v13340_v20 = vld [vmem:[%s13129_s13 + $0x1] ss:$0 sm:$0xff]  ;;  %s13101_s2 = smov 56   ;;  %s13102_s29 = smov 112  }
  0x91   :  { %11805 = vmatpush3.msra.mxu0 %v271_v1  ;;  %v13336_v15 = vld [vmem:[%s13129_s13] ss:$0 sm:$0xff]  ;;  %s13103_s14 = smov 80   ;;  %s13104_s7 = smov 48   ;;  %vm1978_vm5 = vcmask 523264  }
  0x92   :  { %11806 = vmatprep.subr.mxu0 %v270_v3  ;;  %s13105_s10 = smov 72   ;;  %s13106_s11 = smov 104  }
  0x93   :  { %11807 = vmatpush3.msra.mxu0 %v270_v3  ;;  %s13107_s15 = smov 40   ;;  %s13108_s16 = smov 24  }
  0x94   :  { %11808 = vmatprep.subr.mxu0 %v269_v4  ;;  %s14674_s21 = sld [smem:[#allocation25_spill]] }
  0x95   :  { %11809 = vmatpush3.msra.mxu0 %v269_v4  ;;  %s14679_s22 = sld [smem:[#allocation28_spill]] }
  0x96   :  { %11811 = vmatmul.mubr.msk.f32.vlgmr.msra.gmra.mxu0 %vm280_vm0, %v13304_v5  ;;  %11833 = vmatprep.subr.mxu0 %v13095_v6  ;;  %s14680_s23 = sld [smem:[#allocation29_spill]] }
  0x97   :  { %11835 = vmatprep.mubr.msk.f32.mxu0 %vm13096_vm1, %v13095_v6  ;;  %s14681_s26 = sld [smem:[#allocation30_spill]] }
  0x98   :  { %s14682_s8 = sld [smem:[#allocation31_spill]] }
  0x99   :  { %s14683_s28 = sld [smem:[#allocation33_spill]] }
  0x9a   :  { %s14684_s1 = sld [smem:[#allocation32_spill]] }
 0x156   :  { %v11812_v7 = vpop.f32.mrf.mxu0 }
 0x157   :  { %v13319_v11 = vadd.f32 %v11812_v7, %v11191_v8 }
 0x158   :  { %v353_v9 = vpop.f32.mrf.mxu0 }
 0x159   :  { %v13315_v10 = vadd.f32 %v11191_v8, %v353_v9 }
 0x15b   :  { %363 = vrot.lane.b32.xlu0 %v13315_v10, %s13097_s5 }
 0x15f   :  { %441 = vrot.lane.b32.xlu0 %v13319_v11, %s13097_s5 }
 0x1cd   :  { %v364_v12 = vpop.permute.xlu0 %363 }
 0x1ce   :  { %11814 = vmatpush3.xpose.msk.msra.mxu1 %vm365_vm2, %v364_v12 }
 0x1cf   :  { %11818 = vmatprep.subr.mxu1 %v13095_v6 }
 0x1d1   :  { %11816 = vmatmul.mubr.msk.f32.vlgmr.msra.gmra.mxu1 %vm365_vm2, %v13315_v10  ;;  %v442_v13 = vpop.permute.xlu0 %441 }
 0x1d2   :  { %11819 = vmatpush3.xpose.msk.msra.mxu1 %vm365_vm2, %v442_v13  ;;  %11820 = vmatprep.mubr.msk.f32.mxu1 %vm13096_vm1, %v13095_v6 }
 0x1d3   :  { %11823 = vmatprep.subr.mxu1 %v13095_v6 }
 0x1d5   :  { %11821 = vmatmul.mubr.msk.f32.vlgmr.msra.gmra.mxu1 %vm365_vm2, %v13319_v11 }
 0x1d6   :  { %11825 = vmatprep.mubr.msk.f32.mxu1 %vm13096_vm1, %v13095_v6 }
 0x291   :  { %v436_v14 = vpop.f32.mrf.mxu1 }
 0x292   :  { %v517_v16 = vmul.f32 0.35355338, %v436_v14 }
 0x293   :  { %v11817_v17 = vpop.f32.mrf.mxu1 }
 0x294   :  { %v519_v18 = vadd.f32 %v13336_v15, %v517_v16 }
 0x295   :  { %v513_v19 = vpop.f32.mrf.mxu1 }
 0x296   :  { %v518_v21 = vmul.f32 0.35355338, %v513_v19  ;;  %v521_v22 = vsel %vm365_vm2, %v519_v18, -inf }
 0x297   :  { %v11822_v23 = vpop.f32.mrf.mxu1  ;;  %522 = vmax.xlane.f32.xlu1 %v521_v22 }
 0x298   :  { %v520_v24 = vadd.f32 %v13340_v20, %v518_v21 }
 0x29a   :  { %v524_v25 = vsel %vm365_vm2, %v520_v24, -inf }
 0x29b   :  { %525 = vmax.xlane.f32.xlu1 %v524_v25 }
 0x2ac   :  { %543 = vrot.lane.b32.xlu1 %v13315_v10, %s13098_s9 }
 0x2b0   :  { %619 = vrot.lane.b32.xlu1 %v13319_v11, %s13098_s9 }
 0x2b4   :  { %697 = vrot.lane.b32.xlu1 %v13315_v10, %s13099_s6 }
 0x2b8   :  { %775 = vrot.lane.b32.xlu1 %v13319_v11, %s13099_s6 }
 0x320   :  { %v523_v26 = vpop.xlane.xlu1 %522 }
 0x321   :  { %v527_v27 = vsub.f32 %v519_v18, %v523_v26 }
 0x323   :  { %v529_v28 = vmul.f32 1.442695, %v527_v27 }
 0x324   :  { %v526_v29 = vpop.xlane.xlu1 %525 }
 0x325   :  { %12624 = vpow2.f32 %v529_v28  ;;  %v528_v30 = vsub.f32 %v520_v24, %v526_v29 }
 0x327   :  { %v531_v31 = vmul.f32 1.442695, %v528_v30 }
 0x328   :  { %v544_v32 = vpop.permute.xlu1 %543 }
 0x329   :  { %12626 = vpow2.f32 %v531_v31  ;;  %11824 = vmatpush3.msra.mxu1 %v544_v32 }
 0x32a   :  { %11828 = vmatprep.subr.mxu1 %v13095_v6 }
 0x32c   :  { %v620_v33 = vpop.permute.xlu1 %619 }
 0x330   :  { %v698_v34 = vpop.permute.xlu1 %697 }
 0x331   :  { %11834 = vmatpush3.xpose.msk.msra.mxu0 %vm365_vm2, %v698_v34 }
 0x332   :  { %v12625_v35 = vpop.eup %12624  ;;  %11843 = vmatprep.subr.mxu0 %v13095_v6 }
 0x333   :  { %v533_v36 = vsel %vm365_vm2, %v12625_v35, 0.0 }
 0x334   :  { %534 = vadd.xlane.f32.xlu0 %v533_v36  ;;  %v776_v39 = vpop.permute.xlu1 %775 }
 0x336   :  { %v12627_v37 = vpop.eup %12626 }
 0x337   :  { %v536_v38 = vsel %vm365_vm2, %v12627_v37, 0.0 }
 0x338   :  { %537 = vadd.xlane.f32.xlu1 %v536_v38 }
 0x349   :  { %773 = vrot.lane.b32.xlu1 %v13319_v11, %s13100_s4 }
 0x34a   :  { %695 = vrot.lane.b32.xlu0 %v13315_v10, %s13100_s4 }
 0x3bd   :  { %v535_v40 = vpop.xlane.xlu0 %534 }
 0x3be   :  { %12628 = vrcp.f32 %v535_v40 }
 0x3c1   :  { %v696_v41 = vpop.permute.xlu0 %695  ;;  %v538_v42 = vpop.xlane.xlu1 %537 }
 0x3c2   :  { %12630 = vrcp.f32 %v538_v42  ;;  %11836 = vmatmul.mubr.msk.f32.vlgmr.msra.gmra.mxu0 %vm365_vm2, %v696_v41 }
 0x3c3   :  { %11845 = vmatprep.mubr.msk.f32.mxu0 %vm13096_vm1, %v13095_v6 }
 0x3c5   :  { %v774_v47 = vpop.permute.xlu1 %773 }
 0x3cb   :  { %v12629_v43 = vpop.eup %12628 }
 0x3cc   :  { %v541_v44 = vmul.f32 %v12629_v43, %v12625_v35 }
 0x3ce   :  { %11826 = vmatmul.mubr.msk.f32.vlgmr.msra.gmra.mxu1 %vm365_vm2, %v541_v44 }
 0x3cf   :  { %v12631_v45 = vpop.eup %12630  ;;  %11829 = vmatpush3.msra.mxu1 %v620_v33  ;;  %11830 = vmatprep.mubr.msk.f32.mxu1 %vm13096_vm1, %v13095_v6 }
 0x3d0   :  { %11838 = vmatprep.subr.mxu1 %v13095_v6  ;;  %v542_v46 = vmul.f32 %v12631_v45, %v12627_v37 }
 0x3d2   :  { %11831 = vmatmul.mubr.msk.f32.vlgmr.msra.gmra.mxu1 %vm365_vm2, %v542_v46 }
 0x3d3   :  { %11839 = vmatpush3.xpose.msk.msra.mxu1 %vm365_vm2, %v776_v39  ;;  %11840 = vmatprep.mubr.msk.f32.mxu1 %vm13096_vm1, %v13095_v6 }
 0x3d4   :  { %11848 = vmatprep.subr.mxu1 %v13095_v6 }
 0x3d6   :  { %11841 = vmatmul.mubr.msk.f32.vlgmr.msra.gmra.mxu1 %vm365_vm2, %v774_v47 }
 0x3d7   :  { %11850 = vmatprep.mubr.msk.f32.mxu1 %vm13096_vm1, %v13095_v6 }
 0x482   :  { %v769_v48 = vpop.f32.mrf.mxu0 }
 0x483   :  { %v851_v49 = vmul.f32 0.35355338, %v769_v48 }
 0x484   :  { %v11837_v50 = vpop.f32.mrf.mxu0 }
 0x485   :  { %v853_v51 = vadd.f32 %v13336_v15, %v851_v49 }
 0x487   :  { %v855_v52 = vsel %vm365_vm2, %v853_v51, -inf }
 0x488   :  { %856 = vmax.xlane.f32.xlu1 %v855_v52 }
 0x48e   :  { %v13379_v53 = vpop.f32.mrf.mxu1 }
 0x490   :  { %v11827_v54 = vpop.f32.mrf.mxu1 }
 0x492   :  { %v13381_v55 = vpop.f32.mrf.mxu1 }
 0x494   :  { %v11832_v56 = vpop.f32.mrf.mxu1 }
 0x496   :  { %v847_v57 = vpop.f32.mrf.mxu1 }
 0x497   :  { %v852_v58 = vmul.f32 0.35355338, %v847_v57 }
 0x498   :  { %v11842_v59 = vpop.f32.mrf.mxu1 }
 0x499   :  { %v854_v60 = vadd.f32 %v13340_v20, %v852_v58 }
 0x49b   :  { %v858_v61 = vsel %vm365_vm2, %v854_v60, -inf }
 0x49c   :  { %859 = vmax.xlane.f32.xlu0 %v858_v61 }
 0x4b2   :  { %953 = vrot.lane.b32.xlu0 %v13319_v11, %s13101_s2 }
 0x4b6   :  { %1029 = vrot.lane.b32.xlu0 %v13315_v10, %s13102_s29 }
 0x511   :  { %v857_v62 = vpop.xlane.xlu1 %856 }
 0x512   :  { %v861_v63 = vsub.f32 %v853_v51, %v857_v62 }
 0x514   :  { %v863_v0 = vmul.f32 1.442695, %v861_v63 }
 0x516   :  { %12632 = vpow2.f32 %v863_v0 }
 0x523   :  { %v12633_v1 = vpop.eup %12632 }
 0x524   :  { %v867_v3 = vsel %vm365_vm2, %v12633_v1, 0.0 }
 0x525   :  { %v860_v4 = vpop.xlane.xlu0 %859  ;;  %868 = vadd.xlane.f32.xlu1 %v867_v3 }
 0x526   :  { %v862_v8 = vsub.f32 %v854_v60, %v860_v4 }
 0x528   :  { %v865_v9 = vmul.f32 1.442695, %v862_v8 }
 0x529   :  { %v954_v7 = vpop.permute.xlu0 %953 }
 0x52a   :  { %11849 = vmatpush3.msra.mxu1 %v954_v7  ;;  %12634 = vpow2.f32 %v865_v9 }
 0x52b   :  { %11858 = vmatprep.subr.mxu1 %v13095_v6 }
 0x52d   :  { %v1030_v21 = vpop.permute.xlu0 %1029 }
 0x536   :  { %877 = vrot.lane.b32.xlu1 %v13315_v10, %s13101_s2 }
 0x537   :  { %v12635_v12 = vpop.eup %12634 }
 0x538   :  { %v870_v13 = vsel %vm365_vm2, %v12635_v12, 0.0 }
 0x53a   :  { %1031 = vrot.lane.b32.xlu1 %v13315_v10, %s13103_s14 }
 0x53e   :  { %1109 = vrot.lane.b32.xlu1 %v13319_v11, %s13103_s14 }
 0x562   :  { %871 = vadd.xlane.f32.xlu1 %v870_v13 }
 0x573   :  { %1107 = vrot.lane.b32.xlu1 %v13319_v11, %s13102_s29 }
 0x5ae   :  { %v869_v14 = vpop.xlane.xlu1 %868 }
 0x5af   :  { %12636 = vrcp.f32 %v869_v14 }
 0x5b2   :  { %v878_v16 = vpop.permute.xlu1 %877 }
 0x5b3   :  { %11844 = vmatpush3.msra.mxu0 %v878_v16 }
 0x5b4   :  { %11853 = vmatprep.subr.mxu0 %v13095_v6 }
 0x5b6   :  { %v1032_v19 = vpop.permute.xlu1 %1031 }
 0x5ba   :  { %v1110_v22 = vpop.permute.xlu1 %1109 }
 0x5bc   :  { %v12637_v17 = vpop.eup %12636 }
 0x5bd   :  { %v875_v18 = vmul.f32 %v12637_v17, %v12633_v1 }
 0x5bf   :  { %11846 = vmatmul.mubr.msk.f32.vlgmr.msra.gmra.mxu0 %vm365_vm2, %v875_v18 }
 0x5c0   :  { %11854 = vmatpush3.xpose.msk.msra.mxu0 %vm365_vm2, %v1032_v19  ;;  %11855 = vmatprep.mubr.msk.f32.mxu0 %vm13096_vm1, %v13095_v6 }
 0x5c1   :  { %11863 = vmatprep.subr.mxu0 %v13095_v6 }
 0x5c3   :  { %11856 = vmatmul.mubr.msk.f32.vlgmr.msra.gmra.mxu0 %vm365_vm2, %v1030_v21 }
 0x5c4   :  { %11865 = vmatprep.mubr.msk.f32.mxu0 %vm13096_vm1, %v13095_v6 }
 0x5eb   :  { %v872_v23 = vpop.xlane.xlu1 %871 }
 0x5ec   :  { %12638 = vrcp.f32 %v872_v23 }
 0x5ef   :  { %v1108_v26 = vpop.permute.xlu1 %1107 }
 0x5f9   :  { %v12639_v24 = vpop.eup %12638 }
 0x5fa   :  { %v876_v25 = vmul.f32 %v12639_v24, %v12635_v12 }
 0x5fc   :  { %11851 = vmatmul.mubr.msk.f32.vlgmr.msra.gmra.mxu1 %vm365_vm2, %v876_v25 }
 0x5fd   :  { %11859 = vmatpush3.xpose.msk.msra.mxu1 %vm365_vm2, %v1110_v22  ;;  %11860 = vmatprep.mubr.msk.f32.mxu1 %vm13096_vm1, %v13095_v6 }
 0x5fe   :  { %11868 = vmatprep.subr.mxu1 %v13095_v6 }
 0x600   :  { %11861 = vmatmul.mubr.msk.f32.vlgmr.msra.gmra.mxu1 %vm365_vm2, %v1108_v26 }
 0x601   :  { %11870 = vmatprep.mubr.msk.f32.mxu1 %vm13096_vm1, %v13095_v6 }
 0x67f   :  { %v13417_v27 = vpop.f32.mrf.mxu0 }
 0x681   :  { %v11847_v28 = vpop.f32.mrf.mxu0 }
 0x683   :  { %v1103_v29 = vpop.f32.mrf.mxu0 }
 0x684   :  { %v1185_v30 = vmul.f32 0.35355338, %v1103_v29 }
 0x685   :  { %v11857_v31 = vpop.f32.mrf.mxu0 }
 0x686   :  { %v1187_v32 = vadd.f32 %v13336_v15, %v1185_v30 }
 0x688   :  { %v1189_v33 = vsel %vm365_vm2, %v1187_v32, -inf }
 0x689   :  { %1190 = vmax.xlane.f32.xlu0 %v1189_v33 }
 0x6bc   :  { %v13421_v34 = vpop.f32.mrf.mxu1 }
 0x6be   :  { %v11852_v35 = vpop.f32.mrf.mxu1 }
 0x6c0   :  { %v1181_v36 = vpop.f32.mrf.mxu1 }
 0x6c1   :  { %v1186_v37 = vmul.f32 0.35355338, %v1181_v36 }
 0x6c2   :  { %v11862_v38 = vpop.f32.mrf.mxu1 }
 0x6c3   :  { %v1188_v39 = vadd.f32 %v13340_v20, %v1186_v37 }
 0x6c5   :  { %v1192_v40 = vsel %vm365_vm2, %v1188_v39, -inf }
 0x6c6   :  { %1193 = vmax.xlane.f32.xlu1 %v1192_v40  ;;  %v1731_v40 = vld [vmem:[#allocation5 + $0x10] sm:$0xff] }
 0x6d7   :  { %1211 = vrot.lane.b32.xlu1 %v13315_v10, %s13104_s7 }
 0x6db   :  { %1365 = vrot.lane.b32.xlu1 %v13315_v10, %s13105_s10 }
 0x6df   :  { %1443 = vrot.lane.b32.xlu1 %v13319_v11, %s13105_s10 }
 0x6e3   :  { %1441 = vrot.lane.b32.xlu1 %v13319_v11, %s13106_s11 }
 0x712   :  { %v1191_v41 = vpop.xlane.xlu0 %1190 }
 0x713   :  { %v1195_v42 = vsub.f32 %v1187_v32, %v1191_v41  ;;  %v1729_v41 = vld [vmem:[#allocation5] sm:$0xff] }
 0x715   :  { %v1197_v43 = vmul.f32 1.442695, %v1195_v42 }
 0x717   :  { %12640 = vpow2.f32 %v1197_v43 }
 0x724   :  { %v12641_v44 = vpop.eup %12640 }
 0x725   :  { %v1201_v45 = vsel %vm365_vm2, %v12641_v44, 0.0 }
 0x726   :  { %1202 = vadd.xlane.f32.xlu0 %v1201_v45 }
 0x73c   :  { %1287 = vrot.lane.b32.xlu0 %v13319_v11, %s13104_s7 }
 0x74f   :  { %v1194_v46 = vpop.xlane.xlu1 %1193 }
 0x750   :  { %v1196_v47 = vsub.f32 %v1188_v39, %v1194_v46  ;;  %v1732_v39 = vld [vmem:[#allocation5 + $0x18] sm:$0xff] }
 0x752   :  { %v1199_v48 = vmul.f32 1.442695, %v1196_v47 }
 0x753   :  { %v1212_v49 = vpop.permute.xlu1 %1211 }
 0x754   :  { %12642 = vpow2.f32 %v1199_v48  ;;  %11864 = vmatpush3.msra.mxu0 %v1212_v49 }
 0x755   :  { %11873 = vmatprep.subr.mxu0 %v13095_v6 }
 0x757   :  { %v1366_v58 = vpop.permute.xlu1 %1365 }
 0x75b   :  { %v1444_v62 = vpop.permute.xlu1 %1443 }
 0x75f   :  { %v1442_v0 = vpop.permute.xlu1 %1441 }
 0x761   :  { %v12643_v50 = vpop.eup %12642 }
 0x762   :  { %v1204_v51 = vsel %vm365_vm2, %v12643_v50, 0.0 }
 0x763   :  { %1205 = vadd.xlane.f32.xlu0 %v1204_v51 }
 0x779   :  { %1363 = vrot.lane.b32.xlu0 %v13315_v10, %s13106_s11 }
 0x7af   :  { %v1203_v52 = vpop.xlane.xlu0 %1202 }
 0x7b0   :  { %12644 = vrcp.f32 %v1203_v52 }
 0x7b3   :  { %v1288_v54 = vpop.permute.xlu0 %1287 }
 0x7b4   :  { %11869 = vmatpush3.msra.mxu1 %v1288_v54 }
 0x7b5   :  { %11878 = vmatprep.subr.mxu1 %v13095_v6 }
 0x7bd   :  { %v12645_v56 = vpop.eup %12644 }
 0x7be   :  { %v1209_v57 = vmul.f32 %v12645_v56, %v12641_v44 }
 0x7c0   :  { %11866 = vmatmul.mubr.msk.f32.vlgmr.msra.gmra.mxu0 %vm365_vm2, %v1209_v57 }
 0x7c1   :  { %11874 = vmatpush3.xpose.msk.msra.mxu0 %vm365_vm2, %v1366_v58  ;;  %11875 = vmatprep.mubr.msk.f32.mxu0 %vm13096_vm1, %v13095_v6 }
 0x7c2   :  { %11883 = vmatprep.subr.mxu0 %v13095_v6 }
 0x7ec   :  { %v1206_v59 = vpop.xlane.xlu0 %1205 }
 0x7ed   :  { %12646 = vrcp.f32 %v1206_v59 }
 0x7f0   :  { %v1364_v60 = vpop.permute.xlu0 %1363 }
 0x7f1   :  { %11876 = vmatmul.mubr.msk.f32.vlgmr.msra.gmra.mxu0 %vm365_vm2, %v1364_v60 }
 0x7f2   :  { %11885 = vmatprep.mubr.msk.f32.mxu0 %vm13096_vm1, %v13095_v6 }
 0x7fa   :  { %v12647_v61 = vpop.eup %12646 }
 0x7fb   :  { %v1210_v63 = vmul.f32 %v12647_v61, %v12643_v50 }
 0x7fd   :  { %11871 = vmatmul.mubr.msk.f32.vlgmr.msra.gmra.mxu1 %vm365_vm2, %v1210_v63 }
 0x7fe   :  { %11879 = vmatpush3.xpose.msk.msra.mxu1 %vm365_vm2, %v1444_v62  ;;  %11880 = vmatprep.mubr.msk.f32.mxu1 %vm13096_vm1, %v13095_v6 }
 0x7ff   :  { %11888 = vmatprep.subr.mxu1 %v13095_v6 }
 0x801   :  { %11881 = vmatmul.mubr.msk.f32.vlgmr.msra.gmra.mxu1 %vm365_vm2, %v1442_v0 }
 0x802   :  { %11890 = vmatprep.mubr.msk.f32.mxu1 %vm13096_vm1, %v13095_v6 }
 0x880   :  { %v1283_v1 = vpop.f32.mrf.mxu0 }
 0x882   :  { %v11867_v3 = vpop.f32.mrf.mxu0 }
 0x8b1   :  { %v1437_v4 = vpop.f32.mrf.mxu0 }
 0x8b2   :  { %v1519_v7 = vmul.f32 0.35355338, %v1437_v4 }
 0x8b3   :  { %v11877_v8 = vpop.f32.mrf.mxu0 }
 0x8b4   :  { %v1521_v9 = vadd.f32 %v13336_v15, %v1519_v7 }
 0x8b6   :  { %v1523_v12 = vsel %vm365_vm2, %v1521_v9, -inf }
 0x8b7   :  { %1524 = vmax.xlane.f32.xlu0 %v1523_v12 }
 0x8bd   :  { %v1359_v13 = vpop.f32.mrf.mxu1 }
 0x8bf   :  { %v11872_v14 = vpop.f32.mrf.mxu1 }
 0x8c1   :  { %v1515_v16 = vpop.f32.mrf.mxu1 }
 0x8c2   :  { %v1520_v17 = vmul.f32 0.35355338, %v1515_v16 }
 0x8c3   :  { %v11882_v18 = vpop.f32.mrf.mxu1 }
 0x8c4   :  { %v1522_v19 = vadd.f32 %v13340_v20, %v1520_v17  ;;  %v1871_v18 = vld [vmem:[#allocation8 + $0x10] sm:$0xff] }
 0x8c6   :  { %v1526_v21 = vsel %vm365_vm2, %v1522_v19, -inf }
 0x8c7   :  { %1527 = vmax.xlane.f32.xlu1 %v1526_v21  ;;  %v1869_v21 = vld [vmem:[#allocation8] sm:$0xff] }
 0x8d8   :  { %1545 = vrot.lane.b32.xlu1 %v13315_v10, %s13107_s15 }
 0x8dc   :  { %1699 = vrot.lane.b32.xlu1 %v13417_v27, %s13086_s18 }
 0x8e0   :  { %1701 = vrot.lane.b32.xlu1 %v13421_v34, %s13086_s18 }
 0x8e4   :  { %1709 = vrot.lane.b32.xlu1 %v1359_v13, %s13090_s20 }
 0x940   :  { %v1525_v22 = vpop.xlane.xlu0 %1524 }
 0x941   :  { %v1529_v23 = vsub.f32 %v1521_v9, %v1525_v22  ;;  %v1970_v22 = vld [vmem:[%s13174_s24 + $0x38] sm:$0xff] }
 0x943   :  { %v1531_v24 = vmul.f32 1.442695, %v1529_v23  ;;  %v1969_v23 = vld [vmem:[%s13174_s24 + $0x30] sm:$0xff] }
 0x945   :  { %12648 = vpow2.f32 %v1531_v24  ;;  %v1968_v24 = vld [vmem:[%s13174_s24 + $0x28] sm:$0xff] }
 0x950   :  { %v1528_v25 = vpop.xlane.xlu1 %1527 }
 0x951   :  { %v1530_v26 = vsub.f32 %v1522_v19, %v1528_v25  ;;  %v1870_v19 = vld [vmem:[#allocation8 + $0x8] sm:$0xff]  ;;  %v1967_v25 = vld [vmem:[%s13174_s24 + $0x20] sm:$0xff] }
 0x952   :  { %v12649_v28 = vpop.eup %12648 }
 0x953   :  { %v1533_v29 = vmul.f32 1.442695, %v1530_v26  ;;  %v1535_v30 = vsel %vm365_vm2, %v12649_v28, 0.0 }
 0x954   :  { %1536 = vadd.xlane.f32.xlu0 %v1535_v30  ;;  %v1546_v10 = vpop.permute.xlu1 %1545 }
 0x955   :  { %12650 = vpow2.f32 %v1533_v29  ;;  %11884 = vmatpush3.msra.mxu0 %v1546_v10 }
 0x956   :  { %11893 = vmatprep.subr.mxu0 %v1732_v39 }
 0x958   :  { %v1700_v46 = vpop.permute.xlu1 %1699 }
 0x959   :  { %v1721_v48 = vsel %vm365_vm2, %v13379_v53, %v1700_v46  ;;  %v11218_v53 = vld [vmem:[%s13154_s3] ss:$0 sm:$0xff] }
 0x95c   :  { %v1702_v52 = vpop.permute.xlu1 %1701 }
 0x95d   :  { %v1722_v56 = vsel %vm365_vm2, %v13381_v55, %v1702_v52 }
 0x960   :  { %v1710_v54 = vpop.permute.xlu1 %1709 }
 0x961   :  { %v1725_v57 = vsel %vm1723_vm4, %v1722_v56, %v1710_v54 }
 0x962   :  { %v12651_v27 = vpop.eup %12650 }
 0x963   :  { %v1538_v31 = vsel %vm365_vm2, %v12651_v27, 0.0 }
 0x964   :  { %1539 = vadd.xlane.f32.xlu0 %v1538_v31 }
 0x97a   :  { %1621 = vrot.lane.b32.xlu0 %v13319_v11, %s13107_s15  ;;  %v1730_v11 = vld [vmem:[#allocation5 + $0x8] sm:$0xff] }
 0x97e   :  { %1707 = vrot.lane.b32.xlu0 %v1283_v1, %s13090_s20 }
 0x9dd   :  { %v1537_v32 = vpop.xlane.xlu0 %1536 }
 0x9de   :  { %12652 = vrcp.f32 %v1537_v32  ;;  %v11221_v32 = vld [vmem:[#allocation7] ss:$0 sm:$0xff] }
 0x9eb   :  { %v12653_v33 = vpop.eup %12652 }
 0x9ec   :  { %v1543_v34 = vmul.f32 %v12653_v33, %v12649_v28 }
 0x9ed   :  { %v1540_v35 = vpop.xlane.xlu0 %1539 }
 0x9ee   :  { %12654 = vrcp.f32 %v1540_v35  ;;  %11886 = vmatmul.mubr.msk.f32.vlgmr.msra.gmra.mxu0 %vm365_vm2, %v1543_v34  ;;  %v11222_v34 = vld [vmem:[#allocation7 + $0x1] ss:$0 sm:$0xff] }
 0x9ef   :  { %11894 = vmatpush3.msra.mxu0 %v1732_v39 }
 0x9f0   :  { %11895 = vmatprep.subr.mxu0 %v1731_v40 }
 0x9f1   :  { %v1622_v36 = vpop.permute.xlu0 %1621  ;;  %11896 = vmatpush3.msra.mxu0 %v1731_v40 }
 0x9f2   :  { %11889 = vmatpush3.msra.mxu1 %v1622_v36  ;;  %11897 = vmatprep.subr.mxu0 %v1730_v11 }
 0x9f3   :  { %11898 = vmatpush3.msra.mxu0 %v1730_v11  ;;  %v1966_v11 = vld [vmem:[%s13174_s24 + $0x18] sm:$0xff] }
 0x9f4   :  { %11899 = vmatprep.subr.mxu0 %v1729_v41 }
 0x9f5   :  { %11900 = vmatpush3.msra.mxu0 %v1729_v41  ;;  %v1708_v47 = vpop.permute.xlu0 %1707  ;;  %v1965_v41 = vld [vmem:[%s13174_s24 + $0x10] sm:$0xff] }
 0x9f6   :  { %v1724_v49 = vsel %vm1723_vm4, %v1721_v48, %v1708_v47  ;;  %11915 = vmatprep.subr.mxu0 %v1970_v22 }
 0x9fb   :  { %v12655_v37 = vpop.eup %12654 }
 0x9fc   :  { %v1544_v38 = vmul.f32 %v12655_v37, %v12651_v27 }
 0x9fe   :  { %11891 = vmatmul.mubr.msk.f32.vlgmr.msra.gmra.mxu1 %vm365_vm2, %v1544_v38 }
 0xaae   :  { %v1617_v42 = vpop.f32.mrf.mxu0 }
 0xaaf   :  { %1715 = vrot.lane.b32.xlu0 %v1617_v42, %s13108_s16  ;;  %v1964_v42 = vld [vmem:[%s13174_s24 + $0x8] sm:$0xff] }
 0xab0   :  { %v11887_v43 = vpop.f32.mrf.mxu0 }
 0xab1   :  { %v1963_v43 = vld [vmem:[%s13174_s24] sm:$0xff] }
 0xabe   :  { %v1693_v44 = vpop.f32.mrf.mxu1 }
 0xabf   :  { %1717 = vrot.lane.b32.xlu1 %v1693_v44, %s13108_s16  ;;  %v11223_v44 = vld [vmem:[%s13169_s19] ss:$0 sm:$0xff] }
 0xac0   :  { %v11892_v45 = vpop.f32.mrf.mxu1 }
 0xb21   :  { %v1716_v50 = vpop.permute.xlu0 %1715 }
 0xb22   :  { %v1727_v51 = vsel %vm1726_vm3, %v1724_v49, %v1716_v50 }
 0xb23   :  { %11901 = vmatprep.mubr.msk.f32.mxu0 %vm280_vm0, %v1727_v51  ;;  %v11226_v51 = vld [vmem:[%s14674_s21] ss:$0 sm:$0xff] }
 0xb31   :  { %v1718_v58 = vpop.permute.xlu1 %1717 }
 0xb32   :  { %v1728_v59 = vsel %vm1726_vm3, %v1725_v57, %v1718_v58 }
 0xb33   :  { %11902 = vmatmul.mubr.msk.f32.vlgmr.msra.gmra.mxu0 %vm280_vm0, %v1728_v59 }
 0xb34   :  { %11916 = vmatpush3.msra.mxu0 %v1970_v22  ;;  %v11229_v22 = vld [vmem:[#allocation7 + $0x2] ss:$0 sm:$0xff] }
 0xb35   :  { %11917 = vmatprep.subr.mxu0 %v1969_v23 }
 0xb36   :  { %11918 = vmatpush3.msra.mxu0 %v1969_v23 }
 0xb37   :  { %11919 = vmatprep.subr.mxu0 %v1968_v24 }
 0xb38   :  { %11920 = vmatpush3.msra.mxu0 %v1968_v24 }
 0xb39   :  { %11921 = vmatprep.subr.mxu0 %v1967_v25 }
 0xb3a   :  { %11922 = vmatpush3.msra.mxu0 %v1967_v25 }
 0xb3b   :  { %11923 = vmatprep.subr.mxu0 %v1966_v11 }
 0xb3c   :  { %11924 = vmatpush3.msra.mxu0 %v1966_v11 }
 0xb3d   :  { %11925 = vmatprep.subr.mxu0 %v1965_v41 }
 0xb3e   :  { %11926 = vmatpush3.msra.mxu0 %v1965_v41 }
 0xb3f   :  { %11927 = vmatprep.subr.mxu0 %v1964_v42 }
 0xb40   :  { %11928 = vmatpush3.msra.mxu0 %v1964_v42 }
 0xb41   :  { %11929 = vmatprep.subr.mxu0 %v1963_v43 }
 0xb42   :  { %11930 = vmatpush3.msra.mxu0 %v1963_v43 }
 0xb43   :  { %11955 = vmatprep.subr.mxu0 %v13095_v6 }
 0xbf3   :  { %v11903_v60 = vpop.f32.mrf.mxu0 }
 0xbf4   :  { %v1818_v61 = vadd.f32 %v11903_v60, %v11218_v53 }
 0xbf5   :  { %v1812_v62 = vpop.f32.mrf.mxu0 }
 0xbf6   :  { %v1813_v63 = vadd.f32 %v11218_v53, %v1812_v62  ;;  %v1822_v0 = vadd.f32 %v1818_v61, %v13304_v5 }
 0xbf8   :  { %v1829_v1 = vsel %vm280_vm0, %v1822_v0, 0.0  ;;  %v1821_v3 = vadd.f32 %v1813_v63, %v13299_v2  ;;  %v1872_v2 = vld [vmem:[#allocation8 + $0x18] sm:$0xff] }
 0xbf9   :  { %1830 = vadd.xlane.f32.xlu1 %v1829_v1  ;;  %11904 = vmatprep.subr.mxu1 %v1872_v2 }
 0xbfa   :  { %v1826_v55 = vsel %vm280_vm0, %v1821_v3, 0.0  ;;  %11905 = vmatpush3.msra.mxu1 %v1872_v2 }
 0xbfb   :  { %1827 = vadd.xlane.f32.xlu0 %v1826_v55  ;;  %11906 = vmatprep.subr.mxu1 %v1871_v18 }
 0xbfc   :  { %11907 = vmatpush3.msra.mxu1 %v1871_v18 }
 0xbfd   :  { %11908 = vmatprep.subr.mxu1 %v1870_v19 }
 0xbfe   :  { %11909 = vmatpush3.msra.mxu1 %v1870_v19 }
 0xbff   :  { %11910 = vmatprep.subr.mxu1 %v1869_v21 }
 0xc00   :  { %11911 = vmatpush3.msra.mxu1 %v1869_v21 }
 0xc82   :  { %v1831_v4 = vpop.xlane.xlu1 %1830 }
 0xc83   :  { %v1834_v7 = vmul.f32 0.03125, %v1831_v4 }
 0xc84   :  { %v1828_v8 = vpop.xlane.xlu0 %1827 }
 0xc85   :  { %v1833_v9 = vmul.f32 0.03125, %v1828_v8  ;;  %v1836_v12 = vsub.f32 %v1822_v0, %v1834_v7 }
 0xc87   :  { %v1835_v13 = vsub.f32 %v1821_v3, %v1833_v9  ;;  %v1838_v17 = vmul.f32 %v1836_v12, %v1836_v12  ;;  %v2112_v9 = vld [vmem:[#allocation2 + $0x38] sm:$0xff] }
 0xc88   :  { %11934 = vmatprep.subr.mxu1 %v2112_v9 }
 0xc89   :  { %v1837_v14 = vmul.f32 %v1835_v13, %v1835_v13  ;;  %v1842_v5 = vsel %vm280_vm0, %v1838_v17, 0.0 }
 0xc8b   :  { %v1839_v16 = vsel %vm280_vm0, %v1837_v14, 0.0  ;;  %v2109_v14 = vld [vmem:[#allocation2 + $0x20] sm:$0xff] }
 0xc8c   :  { %1840 = vadd.xlane.f32.xlu0 %v1839_v16 }
 0xc90   :  { %1843 = vadd.xlane.f32.xlu0 %v1842_v5 }
 0xd15   :  { %v1841_v26 = vpop.xlane.xlu0 %1840 }
 0xd16   :  { %v1845_v28 = vmul.f32 0.03125, %v1841_v26 }
 0xd18   :  { %v1847_v29 = vadd.f32 1e-05, %v1845_v28  ;;  %v11230_v28 = vld [vmem:[#allocation7 + $0x3] ss:$0 sm:$0xff] }
 0xd19   :  { %v1844_v30 = vpop.xlane.xlu0 %1843 }
 0xd1a   :  { %12656 = vrsqrt.f32 %v1847_v29  ;;  %v1846_v10 = vmul.f32 0.03125, %v1844_v30 }
 0xd1c   :  { %v1848_v27 = vadd.f32 1e-05, %v1846_v10 }
 0xd1e   :  { %12658 = vrsqrt.f32 %v1848_v27  ;;  %v11232_v27 = vld [vmem:[%s13144_s25 + $0x1] ss:$0 sm:$0xff]  ;;  %s14675_s25 = sld [smem:[#allocation23_spill]] }
 0xd27   :  { %v12657_v31 = vpop.eup %12656 }
 0xd28   :  { %v1851_v33 = vmul.f32 %v12657_v31, %v1835_v13  ;;  %v2110_v13 = vld [vmem:[#allocation2 + $0x28] sm:$0xff] }
 0xd2a   :  { %v1859_v35 = vmul.f32 %v11221_v32, %v1851_v33 }
 0xd2b   :  { %v12659_v36 = vpop.eup %12658 }
 0xd2c   :  { %v1852_v37 = vmul.f32 %v12659_v36, %v1836_v12  ;;  %v1867_v38 = vadd.f32 %v11222_v34, %v1859_v35  ;;  %v2111_v12 = vld [vmem:[#allocation2 + $0x30] sm:$0xff] }
 0xd2e   :  { %v1860_v39 = vmul.f32 %v11221_v32, %v1852_v37  ;;  %11912 = vmatprep.mubr.msk.f32.mxu1 %vm280_vm0, %v1867_v38 }
 0xd30   :  { %v1868_v40 = vadd.f32 %v11222_v34, %v1860_v39 }
 0xd32   :  { %11913 = vmatmul.mubr.msk.f32.vlgmr.msra.gmra.mxu1 %vm280_vm0, %v1868_v40 }
 0xd33   :  { %11935 = vmatpush3.msra.mxu1 %v2112_v9 }
 0xd34   :  { %11936 = vmatprep.subr.mxu1 %v2111_v12 }
 0xd35   :  { %11937 = vmatpush3.msra.mxu1 %v2111_v12 }
 0xd36   :  { %11938 = vmatprep.subr.mxu1 %v2110_v13 }
 0xd37   :  { %11939 = vmatpush3.msra.mxu1 %v2110_v13 }
 0xd38   :  { %11940 = vmatprep.subr.mxu1 %v2109_v14 }
 0xd39   :  { %11941 = vmatpush3.msra.mxu1 %v2109_v14  ;;  %v13588_v14 = vld [vmem:[%s13129_s13] ss:$0 sm:$0xff] }
 0xd3a   :  { %11945 = vmatprep.subr.mxu1 %v13095_v6 }
 0xdf2   :  { %v11914_v45 = vpop.f32.mrf.mxu1 }
 0xdf3   :  { %v1958_v46 = vadd.f32 %v11914_v45, %v11223_v44 }
 0xdf4   :  { %v1952_v47 = vpop.f32.mrf.mxu1 }
 0xdf5   :  { %v1953_v48 = vadd.f32 %v11223_v44, %v1952_v47  ;;  %v1962_v50 = vmax.f32 %v1958_v46, 0.0 }
 0xdf7   :  { %v1961_v49 = vmax.f32 %v1953_v48, 0.0 }
 0xdf9   :  { %11931 = vmatprep.mubr.msk.f32.mxu0 %vm1978_vm5, %v1961_v49 }
 0xdfa   :  { %11932 = vmatmul.mubr.msk.f32.vlgmr.msra.gmra.mxu0 %vm1978_vm5, %v1962_v50 }
 0xdfb   :  { %11957 = vmatprep.mubr.msk.f32.mxu0 %vm13096_vm1, %v13095_v6 }
 0xeba   :  { %v11933_v52 = vpop.f32.mrf.mxu0 }
 0xebb   :  { %v2057_v54 = vadd.f32 %v11933_v52, %v11226_v51 }
 0xebc   :  { %v2051_v56 = vpop.f32.mrf.mxu0 }
 0xebd   :  { %v2052_v57 = vadd.f32 %v11226_v51, %v2051_v56  ;;  %v2061_v58 = vadd.f32 %v2057_v54, %v1868_v40 }
 0xebf   :  { %v2069_v59 = vsel %vm280_vm0, %v2061_v58, 0.0  ;;  %v2060_v53 = vadd.f32 %v2052_v57, %v1867_v38 }
 0xec0   :  { %2070 = vadd.xlane.f32.xlu0 %v2069_v59 }
 0xec1   :  { %v2066_v60 = vsel %vm280_vm0, %v2060_v53, 0.0 }
 0xec2   :  { %2067 = vadd.xlane.f32.xlu1 %v2066_v60 }
 0xf49   :  { %v2071_v61 = vpop.xlane.xlu0 %2070 }
 0xf4a   :  { %v2073_v62 = vmul.f32 0.03125, %v2071_v61 }
 0xf4b   :  { %v2068_v63 = vpop.xlane.xlu1 %2067 }
 0xf4c   :  { %v2075_v0 = vsub.f32 %v2061_v58, %v2073_v62  ;;  %v2072_v1 = vmul.f32 0.03125, %v2068_v63 }
 0xf4e   :  { %v2074_v3 = vsub.f32 %v2060_v53, %v2072_v1  ;;  %v2077_v55 = vmul.f32 %v2075_v0, %v2075_v0 }
 0xf50   :  { %v2081_v4 = vsel %vm280_vm0, %v2077_v55, 0.0  ;;  %v2076_v7 = vmul.f32 %v2074_v3, %v2074_v3 }
 0xf51   :  { %2082 = vadd.xlane.f32.xlu0 %v2081_v4 }
 0xf52   :  { %v2078_v8 = vsel %vm280_vm0, %v2076_v7, 0.0 }
 0xf53   :  { %2079 = vadd.xlane.f32.xlu1 %v2078_v8 }
 0xfda   :  { %v2083_v16 = vpop.xlane.xlu0 %2082 }
 0xfdb   :  { %v2085_v17 = vmul.f32 0.03125, %v2083_v16 }
 0xfdc   :  { %v2080_v5 = vpop.xlane.xlu1 %2079 }
 0xfdd   :  { %v2087_v2 = vadd.f32 1e-05, %v2085_v17  ;;  %v2084_v18 = vmul.f32 0.03125, %v2080_v5 }
 0xfdf   :  { %12660 = vrsqrt.f32 %v2087_v2  ;;  %v2086_v19 = vadd.f32 1e-05, %v2084_v18 }
 0xfe1   :  { %12662 = vrsqrt.f32 %v2086_v19  ;;  %v13593_v19 = vld [vmem:[%s13129_s13 + $0x1] ss:$0 sm:$0xff] }
 0xfec   :  { %v12661_v21 = vpop.eup %12660 }
 0xfed   :  { %v2091_v23 = vmul.f32 %v12661_v21, %v2075_v0 }
 0xfee   :  { %v12663_v24 = vpop.eup %12662 }
 0xfef   :  { %v2090_v25 = vmul.f32 %v12663_v24, %v2074_v3  ;;  %v2099_v26 = vmul.f32 %v11229_v22, %v2091_v23 }
 0xff1   :  { %v2098_v29 = vmul.f32 %v11229_v22, %v2090_v25  ;;  %v13518_v10 = vadd.f32 %v11230_v28, %v2099_v26 }
 0xff3   :  { %v13516_v30 = vadd.f32 %v11230_v28, %v2098_v29 }
 0xff5   :  { %11942 = vmatprep.mubr.msk.f32.mxu1 %vm280_vm0, %v13516_v30 }
 0xff6   :  { %11943 = vmatmul.mubr.msk.f32.vlgmr.msra.gmra.mxu1 %vm280_vm0, %v13518_v10 }
 0xff7   :  { %11947 = vmatprep.mubr.msk.f32.mxu1 %vm13096_vm1, %v13095_v6 }
0x10b6   :  { %v11944_v31 = vpop.f32.mrf.mxu1 }
0x10b7   :  { %v13527_v32 = vadd.f32 %v11944_v31, %v11232_v27 }
0x10b8   :  { %v2193_v33 = vpop.f32.mrf.mxu1 }
0x10b9   :  { %v13529_v34 = vadd.f32 %v11232_v27, %v2193_v33  ;;  %2280 = vrot.lane.b32.xlu0 %v13527_v32, %s13097_s5 }
0x10bb   :  { %2203 = vrot.lane.b32.xlu1 %v13529_v34, %s13097_s5 }
0x112b   :  { %v2281_v36 = vpop.permute.xlu0 %2280 }
0x112d   :  { %v2204_v35 = vpop.permute.xlu1 %2203 }
0x112e   :  { %11946 = vmatpush3.xpose.msk.msra.mxu1 %vm365_vm2, %v2204_v35 }
0x112f   :  { %11950 = vmatprep.subr.mxu1 %v13095_v6 }
0x1131   :  { %11948 = vmatmul.mubr.msk.f32.vlgmr.msra.gmra.mxu1 %vm365_vm2, %v13529_v34 }
0x1132   :  { %11951 = vmatpush3.xpose.msk.msra.mxu1 %vm365_vm2, %v2281_v36  ;;  %11952 = vmatprep.mubr.msk.f32.mxu1 %vm13096_vm1, %v13095_v6 }
0x1133   :  { %11960 = vmatprep.subr.mxu1 %v13095_v6 }
0x1135   :  { %11953 = vmatmul.mubr.msk.f32.vlgmr.msra.gmra.mxu1 %vm365_vm2, %v13527_v32 }
0x1136   :  { %11962 = vmatprep.mubr.msk.f32.mxu1 %vm13096_vm1, %v13095_v6 }
0x11f1   :  { %v2275_v37 = vpop.f32.mrf.mxu1 }
0x11f2   :  { %v2356_v38 = vmul.f32 0.35355338, %v2275_v37 }
0x11f3   :  { %v11949_v39 = vpop.f32.mrf.mxu1 }
0x11f4   :  { %v2358_v40 = vadd.f32 %v13336_v15, %v2356_v38 }
0x11f5   :  { %v2352_v11 = vpop.f32.mrf.mxu1 }
0x11f6   :  { %v2357_v41 = vmul.f32 0.35355338, %v2352_v11  ;;  %v2360_v42 = vsel %vm365_vm2, %v2358_v40, -inf }
0x11f7   :  { %2361 = vmax.xlane.f32.xlu1 %v2360_v42  ;;  %v11954_v43 = vpop.f32.mrf.mxu1 }
0x11f8   :  { %v2359_v44 = vadd.f32 %v13340_v20, %v2357_v41 }
0x11fa   :  { %v2363_v45 = vsel %vm365_vm2, %v2359_v44, -inf }
0x11fb   :  { %2364 = vmax.xlane.f32.xlu0 %v2363_v45 }
0x1208   :  { %2382 = vrot.lane.b32.xlu1 %v13529_v34, %s13098_s9 }
0x120c   :  { %2536 = vrot.lane.b32.xlu1 %v13529_v34, %s13099_s6 }
0x1210   :  { %2614 = vrot.lane.b32.xlu1 %v13527_v32, %s13099_s6 }
0x1211   :  { %2458 = vrot.lane.b32.xlu0 %v13527_v32, %s13098_s9 }
0x1280   :  { %v2362_v15 = vpop.xlane.xlu1 %2361 }
0x1281   :  { %v2366_v46 = vsub.f32 %v2358_v40, %v2362_v15 }
0x1283   :  { %v2368_v47 = vmul.f32 1.442695, %v2366_v46 }
0x1284   :  { %v2383_v48 = vpop.permute.xlu1 %2382  ;;  %v2365_v20 = vpop.xlane.xlu0 %2364 }
0x1285   :  { %12664 = vpow2.f32 %v2368_v47  ;;  %v2367_v49 = vsub.f32 %v2359_v44, %v2365_v20  ;;  %11956 = vmatpush3.msra.mxu0 %v2383_v48 }
0x1286   :  { %11965 = vmatprep.subr.mxu0 %v13095_v6 }
0x1287   :  { %v2370_v50 = vmul.f32 1.442695, %v2367_v49 }
0x1288   :  { %v2459_v51 = vpop.permute.xlu0 %2458  ;;  %v2537_v58 = vpop.permute.xlu1 %2536 }
0x1289   :  { %12666 = vpow2.f32 %v2370_v50  ;;  %11961 = vmatpush3.msra.mxu1 %v2459_v51 }
0x128a   :  { %11970 = vmatprep.subr.mxu1 %v13095_v6 }
0x128c   :  { %v2615_v59 = vpop.permute.xlu1 %2614 }
0x1292   :  { %v12665_v52 = vpop.eup %12664 }
0x1293   :  { %v2372_v54 = vsel %vm365_vm2, %v12665_v52, 0.0 }
0x1294   :  { %2373 = vadd.xlane.f32.xlu1 %v2372_v54 }
0x1296   :  { %v12667_v56 = vpop.eup %12666 }
0x1297   :  { %v2375_v57 = vsel %vm365_vm2, %v12667_v56, 0.0 }
0x1298   :  { %2376 = vadd.xlane.f32.xlu0 %v2375_v57 }
0x12a5   :  { %2612 = vrot.lane.b32.xlu1 %v13527_v32, %s13100_s4 }
0x12ae   :  { %2534 = vrot.lane.b32.xlu0 %v13529_v34, %s13100_s4 }
0x131d   :  { %v2374_v53 = vpop.xlane.xlu1 %2373 }
0x131e   :  { %12668 = vrcp.f32 %v2374_v53 }
0x1321   :  { %v2377_v60 = vpop.xlane.xlu0 %2376  ;;  %v2613_v3 = vpop.permute.xlu1 %2612 }
0x1322   :  { %12670 = vrcp.f32 %v2377_v60 }
0x1325   :  { %v2535_v1 = vpop.permute.xlu0 %2534 }
0x132b   :  { %v12669_v61 = vpop.eup %12668 }
0x132c   :  { %v2380_v62 = vmul.f32 %v12669_v61, %v12665_v52 }
0x132e   :  { %11958 = vmatmul.mubr.msk.f32.vlgmr.msra.gmra.mxu0 %vm365_vm2, %v2380_v62 }
0x132f   :  { %v12671_v63 = vpop.eup %12670  ;;  %11966 = vmatpush3.xpose.msk.msra.mxu0 %vm365_vm2, %v2537_v58  ;;  %11967 = vmatprep.mubr.msk.f32.mxu0 %vm13096_vm1, %v13095_v6 }
0x1330   :  { %v2381_v0 = vmul.f32 %v12671_v63, %v12667_v56  ;;  %11975 = vmatprep.subr.mxu0 %v13095_v6 }
0x1332   :  { %11963 = vmatmul.mubr.msk.f32.vlgmr.msra.gmra.mxu1 %vm365_vm2, %v2381_v0  ;;  %11968 = vmatmul.mubr.msk.f32.vlgmr.msra.gmra.mxu0 %vm365_vm2, %v2535_v1 }
0x1333   :  { %11971 = vmatpush3.xpose.msk.msra.mxu1 %vm365_vm2, %v2615_v59  ;;  %11972 = vmatprep.mubr.msk.f32.mxu1 %vm13096_vm1, %v13095_v6 }
0x1334   :  { %11980 = vmatprep.subr.mxu1 %v13095_v6  ;;  %11977 = vmatprep.mubr.msk.f32.mxu0 %vm13096_vm1, %v13095_v6 }
0x1336   :  { %11973 = vmatmul.mubr.msk.f32.vlgmr.msra.gmra.mxu1 %vm365_vm2, %v2613_v3 }
0x1337   :  { %11982 = vmatprep.mubr.msk.f32.mxu1 %vm13096_vm1, %v13095_v6 }
0x13ee   :  { %v13583_v55 = vpop.f32.mrf.mxu0 }
0x13f0   :  { %v11959_v4 = vpop.f32.mrf.mxu0 }
0x13f2   :  { %v13585_v7 = vpop.f32.mrf.mxu1  ;;  %v2608_v8 = vpop.f32.mrf.mxu0 }
0x13f3   :  { %v2690_v9 = vmul.f32 0.35355338, %v2608_v8 }
0x13f4   :  { %v11964_v12 = vpop.f32.mrf.mxu1  ;;  %v11969_v13 = vpop.f32.mrf.mxu0 }
0x13f5   :  { %v2692_v16 = vadd.f32 %v13588_v14, %v2690_v9 }
0x13f6   :  { %v2686_v17 = vpop.f32.mrf.mxu1 }
0x13f7   :  { %v2691_v5 = vmul.f32 0.35355338, %v2686_v17  ;;  %v2694_v2 = vsel %vm365_vm2, %v2692_v16, -inf }
0x13f8   :  { %2695 = vmax.xlane.f32.xlu0 %v2694_v2  ;;  %v11974_v18 = vpop.f32.mrf.mxu1 }
0x13f9   :  { %v2693_v21 = vadd.f32 %v13593_v19, %v2691_v5 }
0x13fb   :  { %v2697_v22 = vsel %vm365_vm2, %v2693_v21, -inf }
0x13fc   :  { %2698 = vmax.xlane.f32.xlu1 %v2697_v22 }
0x140d   :  { %2716 = vrot.lane.b32.xlu1 %v13529_v34, %s13101_s2 }
0x140e   :  { %2792 = vrot.lane.b32.xlu0 %v13527_v32, %s13101_s2 }
0x1411   :  { %2870 = vrot.lane.b32.xlu1 %v13529_v34, %s13103_s14 }
0x1415   :  { %2948 = vrot.lane.b32.xlu1 %v13527_v32, %s13103_s14 }
0x1419   :  { %2946 = vrot.lane.b32.xlu1 %v13527_v32, %s13102_s29 }
0x1481   :  { %v2696_v23 = vpop.xlane.xlu0 %2695 }
0x1482   :  { %v2700_v24 = vsub.f32 %v2692_v16, %v2696_v23 }
0x1484   :  { %v2702_v25 = vmul.f32 1.442695, %v2700_v24 }
0x1485   :  { %v2793_v26 = vpop.permute.xlu0 %2792  ;;  %v2699_v28 = vpop.xlane.xlu1 %2698 }
0x1486   :  { %12672 = vpow2.f32 %v2702_v25  ;;  %v2701_v29 = vsub.f32 %v2693_v21, %v2699_v28  ;;  %11981 = vmatpush3.msra.mxu1 %v2793_v26 }
0x1487   :  { %11990 = vmatprep.subr.mxu1 %v13095_v6 }
0x1488   :  { %v2704_v27 = vmul.f32 1.442695, %v2701_v29 }
0x1489   :  { %v2717_v31 = vpop.permute.xlu1 %2716 }
0x148a   :  { %12674 = vpow2.f32 %v2704_v27  ;;  %11976 = vmatpush3.msra.mxu0 %v2717_v31 }
0x148b   :  { %11985 = vmatprep.subr.mxu0 %v13095_v6 }
0x148d   :  { %v2871_v40 = vpop.permute.xlu1 %2870 }
0x1491   :  { %v2949_v43 = vpop.permute.xlu1 %2948 }
0x1493   :  { %v12673_v33 = vpop.eup %12672 }
0x1494   :  { %v2706_v35 = vsel %vm365_vm2, %v12673_v33, 0.0 }
0x1495   :  { %2707 = vadd.xlane.f32.xlu0 %v2706_v35  ;;  %v2947_v15 = vpop.permute.xlu1 %2946 }
0x1497   :  { %v12675_v36 = vpop.eup %12674 }
0x1498   :  { %v2709_v37 = vsel %vm365_vm2, %v12675_v36, 0.0 }
0x1499   :  { %2710 = vadd.xlane.f32.xlu0 %v2709_v37 }
0x14af   :  { %2868 = vrot.lane.b32.xlu0 %v13529_v34, %s13102_s29 }
0x151e   :  { %v2708_v38 = vpop.xlane.xlu0 %2707 }
0x151f   :  { %12676 = vrcp.f32 %v2708_v38 }
0x1522   :  { %v2711_v39 = vpop.xlane.xlu0 %2710 }
0x1523   :  { %12678 = vrcp.f32 %v2711_v39 }
0x1526   :  { %v2869_v45 = vpop.permute.xlu0 %2868 }
0x152c   :  { %v12677_v11 = vpop.eup %12676 }
0x152d   :  { %v2714_v41 = vmul.f32 %v12677_v11, %v12673_v33 }
0x152f   :  { %11978 = vmatmul.mubr.msk.f32.vlgmr.msra.gmra.mxu0 %vm365_vm2, %v2714_v41 }
0x1530   :  { %v12679_v42 = vpop.eup %12678  ;;  %11986 = vmatpush3.xpose.msk.msra.mxu0 %vm365_vm2, %v2871_v40  ;;  %11987 = vmatprep.mubr.msk.f32.mxu0 %vm13096_vm1, %v13095_v6 }
0x1531   :  { %v2715_v44 = vmul.f32 %v12679_v42, %v12675_v36  ;;  %11995 = vmatprep.subr.mxu0 %v13095_v6 }
0x1533   :  { %11983 = vmatmul.mubr.msk.f32.vlgmr.msra.gmra.mxu1 %vm365_vm2, %v2715_v44  ;;  %11988 = vmatmul.mubr.msk.f32.vlgmr.msra.gmra.mxu0 %vm365_vm2, %v2869_v45 }
0x1534   :  { %11991 = vmatpush3.xpose.msk.msra.mxu1 %vm365_vm2, %v2949_v43  ;;  %11992 = vmatprep.mubr.msk.f32.mxu1 %vm13096_vm1, %v13095_v6 }
0x1535   :  { %12000 = vmatprep.subr.mxu1 %v13095_v6  ;;  %11997 = vmatprep.mubr.msk.f32.mxu0 %vm13096_vm1, %v13095_v6 }
0x1537   :  { %11993 = vmatmul.mubr.msk.f32.vlgmr.msra.gmra.mxu1 %vm365_vm2, %v2947_v15 }
0x1538   :  { %12002 = vmatprep.mubr.msk.f32.mxu1 %vm13096_vm1, %v13095_v6 }
0x15ef   :  { %v13629_v46 = vpop.f32.mrf.mxu0 }
0x15f1   :  { %v11979_v47 = vpop.f32.mrf.mxu0 }
0x15f3   :  { %v13631_v48 = vpop.f32.mrf.mxu1  ;;  %v2942_v20 = vpop.f32.mrf.mxu0 }
0x15f4   :  { %v3024_v49 = vmul.f32 0.35355338, %v2942_v20 }
0x15f5   :  { %v11984_v50 = vpop.f32.mrf.mxu1  ;;  %v11989_v51 = vpop.f32.mrf.mxu0 }
0x15f6   :  { %v3026_v52 = vadd.f32 %v13588_v14, %v3024_v49 }
0x15f7   :  { %v3020_v54 = vpop.f32.mrf.mxu1 }
0x15f8   :  { %v3025_v56 = vmul.f32 0.35355338, %v3020_v54  ;;  %v3028_v57 = vsel %vm365_vm2, %v3026_v52, -inf }
0x15f9   :  { %3029 = vmax.xlane.f32.xlu0 %v3028_v57  ;;  %v11994_v58 = vpop.f32.mrf.mxu1  ;;  %v3570_v57 = vld [vmem:[#allocation5 + $0x38] sm:$0xff] }
0x15fa   :  { %v3027_v59 = vadd.f32 %v13593_v19, %v3025_v56  ;;  %v3569_v58 = vld [vmem:[#allocation5 + $0x30] sm:$0xff] }
0x15fc   :  { %v3031_v53 = vsel %vm365_vm2, %v3027_v59, -inf }
0x15fd   :  { %3032 = vmax.xlane.f32.xlu1 %v3031_v53 }
0x160e   :  { %3050 = vrot.lane.b32.xlu1 %v13529_v34, %s13104_s7 }
0x160f   :  { %3126 = vrot.lane.b32.xlu0 %v13527_v32, %s13104_s7 }
0x1612   :  { %3204 = vrot.lane.b32.xlu1 %v13529_v34, %s13105_s10 }
0x1616   :  { %3282 = vrot.lane.b32.xlu1 %v13527_v32, %s13105_s10 }
0x161a   :  { %3280 = vrot.lane.b32.xlu1 %v13527_v32, %s13106_s11 }
0x1682   :  { %v3030_v60 = vpop.xlane.xlu0 %3029 }
0x1683   :  { %v3034_v61 = vsub.f32 %v3026_v52, %v3030_v60 }
0x1685   :  { %v3036_v62 = vmul.f32 1.442695, %v3034_v61 }
0x1686   :  { %v3127_v63 = vpop.permute.xlu0 %3126  ;;  %v3033_v0 = vpop.xlane.xlu1 %3032 }
0x1687   :  { %12680 = vpow2.f32 %v3036_v62  ;;  %v3035_v1 = vsub.f32 %v3027_v59, %v3033_v0  ;;  %12001 = vmatpush3.msra.mxu1 %v3127_v63  ;;  %v3567_v59 = vld [vmem:[#allocation5 + $0x20] sm:$0xff] }
0x1688   :  { %12010 = vmatprep.subr.mxu1 %v13095_v6 }
0x1689   :  { %v3038_v3 = vmul.f32 1.442695, %v3035_v1 }
0x168a   :  { %v3051_v4 = vpop.permute.xlu1 %3050 }
0x168b   :  { %12682 = vpow2.f32 %v3038_v3  ;;  %11996 = vmatpush3.msra.mxu0 %v3051_v4 }
0x168c   :  { %12005 = vmatprep.subr.mxu0 %v13095_v6 }
0x168e   :  { %v3205_v5 = vpop.permute.xlu1 %3204 }
0x1692   :  { %v3283_v22 = vpop.permute.xlu1 %3282 }
0x1694   :  { %v12681_v8 = vpop.eup %12680 }
0x1695   :  { %v3040_v9 = vsel %vm365_vm2, %v12681_v8, 0.0 }
0x1696   :  { %3041 = vadd.xlane.f32.xlu0 %v3040_v9  ;;  %v3281_v25 = vpop.permute.xlu1 %3280 }
0x1698   :  { %v12683_v12 = vpop.eup %12682 }
0x1699   :  { %v3043_v13 = vsel %vm365_vm2, %v12683_v12, 0.0 }
0x169a   :  { %3044 = vadd.xlane.f32.xlu0 %v3043_v13 }
0x16b0   :  { %3202 = vrot.lane.b32.xlu0 %v13529_v34, %s13106_s11 }
0x171f   :  { %v3042_v16 = vpop.xlane.xlu0 %3041 }
0x1720   :  { %12684 = vrcp.f32 %v3042_v16 }
0x1723   :  { %v3045_v17 = vpop.xlane.xlu0 %3044 }
0x1724   :  { %12686 = vrcp.f32 %v3045_v17 }
0x1727   :  { %v3203_v24 = vpop.permute.xlu0 %3202 }
0x172d   :  { %v12685_v2 = vpop.eup %12684 }
0x172e   :  { %v3048_v18 = vmul.f32 %v12685_v2, %v12681_v8  ;;  %v11260_v2 = vld [vmem:[%s13154_s3 + $0x1] ss:$0 sm:$0xff]  ;;  %s14676_s3 = sld [smem:[#allocation26_spill]] }
0x1730   :  { %11998 = vmatmul.mubr.msk.f32.vlgmr.msra.gmra.mxu0 %vm365_vm2, %v3048_v18 }
0x1731   :  { %v12687_v21 = vpop.eup %12686  ;;  %12006 = vmatpush3.xpose.msk.msra.mxu0 %vm365_vm2, %v3205_v5  ;;  %12007 = vmatprep.mubr.msk.f32.mxu0 %vm13096_vm1, %v13095_v6 }
0x1732   :  { %v3049_v23 = vmul.f32 %v12687_v21, %v12683_v12  ;;  %12015 = vmatprep.subr.mxu0 %v13095_v6 }
0x1734   :  { %12003 = vmatmul.mubr.msk.f32.vlgmr.msra.gmra.mxu1 %vm365_vm2, %v3049_v23  ;;  %12008 = vmatmul.mubr.msk.f32.vlgmr.msra.gmra.mxu0 %vm365_vm2, %v3203_v24 }
0x1735   :  { %12011 = vmatpush3.xpose.msk.msra.mxu1 %vm365_vm2, %v3283_v22  ;;  %12012 = vmatprep.mubr.msk.f32.mxu1 %vm13096_vm1, %v13095_v6 }
0x1736   :  { %12020 = vmatprep.subr.mxu1 %v13095_v6  ;;  %12017 = vmatprep.mubr.msk.f32.mxu0 %vm13096_vm1, %v13095_v6 }
0x1738   :  { %12013 = vmatmul.mubr.msk.f32.vlgmr.msra.gmra.mxu1 %vm365_vm2, %v3281_v25 }
0x1739   :  { %12022 = vmatprep.mubr.msk.f32.mxu1 %vm13096_vm1, %v13095_v6 }
0x17f0   :  { %v3122_v26 = vpop.f32.mrf.mxu0 }
0x17f2   :  { %v11999_v28 = vpop.f32.mrf.mxu0 }
0x17f4   :  { %v3198_v29 = vpop.f32.mrf.mxu1  ;;  %v3276_v27 = vpop.f32.mrf.mxu0 }
0x17f5   :  { %v3358_v31 = vmul.f32 0.35355338, %v3276_v27 }
0x17f6   :  { %v12004_v33 = vpop.f32.mrf.mxu1  ;;  %v12009_v35 = vpop.f32.mrf.mxu0 }
0x17f7   :  { %v3360_v36 = vadd.f32 %v13588_v14, %v3358_v31 }
0x17f8   :  { %v3354_v37 = vpop.f32.mrf.mxu1 }
0x17f9   :  { %v3359_v38 = vmul.f32 0.35355338, %v3354_v37  ;;  %v3362_v39 = vsel %vm365_vm2, %v3360_v36, -inf }
0x17fa   :  { %3363 = vmax.xlane.f32.xlu0 %v3362_v39  ;;  %v12014_v40 = vpop.f32.mrf.mxu1  ;;  %v3710_v39 = vld [vmem:[#allocation8 + $0x28] sm:$0xff] }
0x17fb   :  { %v3361_v11 = vadd.f32 %v13593_v19, %v3359_v38  ;;  %v3711_v38 = vld [vmem:[#allocation8 + $0x30] sm:$0xff]  ;;  %v3709_v40 = vld [vmem:[#allocation8 + $0x20] sm:$0xff] }
0x17fd   :  { %v3365_v41 = vsel %vm365_vm2, %v3361_v11, -inf }
0x17fe   :  { %3366 = vmax.xlane.f32.xlu1 %v3365_v41  ;;  %v11276_v41 = vld [vmem:[%s13174_s24 + $0x78] sm:$0xff] }
0x180f   :  { %3384 = vrot.lane.b32.xlu1 %v13529_v34, %s13107_s15 }
0x1813   :  { %3538 = vrot.lane.b32.xlu1 %v13629_v46, %s13086_s18 }
0x1817   :  { %3540 = vrot.lane.b32.xlu1 %v13631_v48, %s13086_s18 }
0x181b   :  { %3548 = vrot.lane.b32.xlu1 %v3198_v29, %s13090_s20 }
0x1883   :  { %v3364_v14 = vpop.xlane.xlu0 %3363 }
0x1884   :  { %v3368_v42 = vsub.f32 %v3360_v36, %v3364_v14  ;;  %v11275_v14 = vld [vmem:[%s13174_s24 + $0x70] sm:$0xff] }
0x1886   :  { %v3370_v43 = vmul.f32 1.442695, %v3368_v42  ;;  %v11274_v42 = vld [vmem:[%s13174_s24 + $0x68] sm:$0xff] }
0x1887   :  { %v3367_v44 = vpop.xlane.xlu1 %3366 }
0x1888   :  { %12688 = vpow2.f32 %v3370_v43  ;;  %v3369_v19 = vsub.f32 %v3361_v11, %v3367_v44  ;;  %v3955_v11 = vld [vmem:[#allocation10 + $0x18] sm:$0xff] }
0x1889   :  { %v11273_v43 = vld [vmem:[%s13174_s24 + $0x60] sm:$0xff] }
0x188a   :  { %v3372_v45 = vmul.f32 1.442695, %v3369_v19 }
0x188b   :  { %v3385_v15 = vpop.permute.xlu1 %3384 }
0x188c   :  { %12690 = vpow2.f32 %v3372_v45  ;;  %12016 = vmatpush3.msra.mxu0 %v3385_v15 }
0x188d   :  { %12025 = vmatprep.subr.mxu0 %v3570_v57 }
0x188f   :  { %v3539_v63 = vpop.permute.xlu1 %3538 }
0x1890   :  { %v3560_v3 = vsel %vm365_vm2, %v13583_v55, %v3539_v63  ;;  %v11270_v63 = vld [vmem:[%s13174_s24 + $0x48] sm:$0xff] }
0x1893   :  { %v3541_v0 = vpop.permute.xlu1 %3540 }
0x1894   :  { %v3561_v13 = vsel %vm365_vm2, %v13585_v7, %v3541_v0  ;;  %v11269_v0 = vld [vmem:[%s13174_s24 + $0x40] sm:$0xff] }
0x1895   :  { %v12689_v47 = vpop.eup %12688 }
0x1896   :  { %v3374_v34 = vsel %vm365_vm2, %v12689_v47, 0.0 }
0x1897   :  { %3375 = vadd.xlane.f32.xlu0 %v3374_v34  ;;  %v3549_v4 = vpop.permute.xlu1 %3548 }
0x1898   :  { %v3563_v16 = vsel %vm1723_vm4, %v3561_v13, %v3549_v4 }
0x1899   :  { %v12691_v46 = vpop.eup %12690 }
0x189a   :  { %v3377_v20 = vsel %vm365_vm2, %v12691_v46, 0.0 }
0x189b   :  { %3378 = vadd.xlane.f32.xlu0 %v3377_v20  ;;  %v11263_v20 = vld [vmem:[#allocation7 + $0x4] ss:$0 sm:$0xff] }
0x18b1   :  { %3460 = vrot.lane.b32.xlu0 %v13527_v32, %s13107_s15  ;;  %v3568_v32 = vld [vmem:[#allocation5 + $0x28] sm:$0xff] }
0x18b5   :  { %3546 = vrot.lane.b32.xlu0 %v3122_v26, %s13090_s20 }
0x1920   :  { %v3376_v48 = vpop.xlane.xlu0 %3375 }
0x1921   :  { %12692 = vrcp.f32 %v3376_v48 }
0x1924   :  { %v3379_v49 = vpop.xlane.xlu0 %3378 }
0x1925   :  { %12694 = vrcp.f32 %v3379_v49  ;;  %v11264_v49 = vld [vmem:[#allocation7 + $0x5] ss:$0 sm:$0xff] }
0x1928   :  { %v3461_v50 = vpop.permute.xlu0 %3460 }
0x1929   :  { %12021 = vmatpush3.msra.mxu1 %v3461_v50 }
0x192c   :  { %v3547_v1 = vpop.permute.xlu0 %3546 }
0x192d   :  { %v3562_v8 = vsel %vm1723_vm4, %v3560_v3, %v3547_v1  ;;  %v11266_v1 = vld [vmem:[%s13169_s19 + $0x1] ss:$0 sm:$0xff]  ;;  %s14677_s19 = sld [smem:[#allocation24_spill]] }
0x192e   :  { %v12693_v51 = vpop.eup %12692 }
0x192f   :  { %v3382_v52 = vmul.f32 %v12693_v51, %v12689_v47 }
0x1931   :  { %12018 = vmatmul.mubr.msk.f32.vlgmr.msra.gmra.mxu0 %vm365_vm2, %v3382_v52 }
0x1932   :  { %v12695_v54 = vpop.eup %12694  ;;  %12026 = vmatpush3.msra.mxu0 %v3570_v57 }
0x1933   :  { %v3383_v56 = vmul.f32 %v12695_v54, %v12691_v46  ;;  %12027 = vmatprep.subr.mxu0 %v3569_v58 }
0x1934   :  { %12028 = vmatpush3.msra.mxu0 %v3569_v58  ;;  %v13717_v58 = vld [vmem:[%s14675_s25] sm:$0xff] }
0x1935   :  { %12023 = vmatmul.mubr.msk.f32.vlgmr.msra.gmra.mxu1 %vm365_vm2, %v3383_v56  ;;  %12029 = vmatprep.subr.mxu0 %v3568_v32 }
0x1936   :  { %12030 = vmatpush3.msra.mxu0 %v3568_v32  ;;  %v3954_v32 = vld [vmem:[#allocation10 + $0x10] sm:$0xff] }
0x1937   :  { %12031 = vmatprep.subr.mxu0 %v3567_v59 }
0x1938   :  { %12032 = vmatpush3.msra.mxu0 %v3567_v59  ;;  %v3953_v59 = vld [vmem:[#allocation10 + $0x8] sm:$0xff] }
0x1939   :  { %12047 = vmatprep.subr.mxu0 %v11276_v41 }
0x19f1   :  { %v3456_v53 = vpop.f32.mrf.mxu0 }
0x19f2   :  { %3554 = vrot.lane.b32.xlu0 %v3456_v53, %s13108_s16  ;;  %v3952_v53 = vld [vmem:[#allocation10] sm:$0xff] }
0x19f3   :  { %v12019_v60 = vpop.f32.mrf.mxu0 }
0x19f4   :  { %v13724_v60 = vld [vmem:[%s14675_s25 + $0x8] sm:$0xff] }
0x19f5   :  { %v3532_v61 = vpop.f32.mrf.mxu1 }
0x19f6   :  { %3556 = vrot.lane.b32.xlu1 %v3532_v61, %s13108_s16  ;;  %v11272_v61 = vld [vmem:[%s13174_s24 + $0x58] sm:$0xff] }
0x19f7   :  { %v12024_v62 = vpop.f32.mrf.mxu1 }
0x19f8   :  { %v11271_v62 = vld [vmem:[%s13174_s24 + $0x50] sm:$0xff]  ;;  %s14678_s24 = sld [smem:[#allocation27_spill]] }
0x1a64   :  { %v3555_v9 = vpop.permute.xlu0 %3554 }
0x1a65   :  { %v3564_v12 = vsel %vm1726_vm3, %v3562_v8, %v3555_v9 }
0x1a66   :  { %12033 = vmatprep.mubr.msk.f32.mxu0 %vm280_vm0, %v3564_v12 }
0x1a68   :  { %v3557_v17 = vpop.permute.xlu1 %3556 }
0x1a69   :  { %v3565_v5 = vsel %vm1726_vm3, %v3563_v16, %v3557_v17  ;;  %v11283_v16 = vld [vmem:[%s14676_s3] ss:$0 sm:$0xff] }
0x1a6a   :  { %12034 = vmatmul.mubr.msk.f32.vlgmr.msra.gmra.mxu0 %vm280_vm0, %v3565_v5 }
0x1a6b   :  { %12048 = vmatpush3.msra.mxu0 %v11276_v41 }
0x1a6c   :  { %12049 = vmatprep.subr.mxu0 %v11275_v14 }
0x1a6d   :  { %12050 = vmatpush3.msra.mxu0 %v11275_v14 }
0x1a6e   :  { %12051 = vmatprep.subr.mxu0 %v11274_v42 }
0x1a6f   :  { %12052 = vmatpush3.msra.mxu0 %v11274_v42 }
0x1a70   :  { %12053 = vmatprep.subr.mxu0 %v11273_v43 }
0x1a71   :  { %12054 = vmatpush3.msra.mxu0 %v11273_v43 }
0x1a72   :  { %12055 = vmatprep.subr.mxu0 %v11272_v61 }
0x1a73   :  { %12056 = vmatpush3.msra.mxu0 %v11272_v61 }
0x1a74   :  { %12057 = vmatprep.subr.mxu0 %v11271_v62 }
0x1a75   :  { %12058 = vmatpush3.msra.mxu0 %v11271_v62 }
0x1a76   :  { %12059 = vmatprep.subr.mxu0 %v11270_v63 }
0x1a77   :  { %12060 = vmatpush3.msra.mxu0 %v11270_v63 }
0x1a78   :  { %12061 = vmatprep.subr.mxu0 %v11269_v0 }
0x1a79   :  { %12062 = vmatpush3.msra.mxu0 %v11269_v0 }
0x1a7a   :  { %12087 = vmatprep.subr.mxu0 %v13095_v6 }
0x1b2a   :  { %v12035_v55 = vpop.f32.mrf.mxu0 }
0x1b2b   :  { %v3657_v18 = vadd.f32 %v12035_v55, %v11260_v2 }
0x1b2c   :  { %v3651_v21 = vpop.f32.mrf.mxu0 }
0x1b2d   :  { %v3661_v22 = vadd.f32 %v3657_v18, %v13518_v10  ;;  %v3652_v23 = vadd.f32 %v11260_v2, %v3651_v21 }
0x1b2f   :  { %v3669_v24 = vsel %vm280_vm0, %v3661_v22, 0.0  ;;  %v3660_v25 = vadd.f32 %v3652_v23, %v13516_v30  ;;  %v3712_v30 = vld [vmem:[#allocation8 + $0x38] sm:$0xff] }
0x1b30   :  { %3670 = vadd.xlane.f32.xlu1 %v3669_v24  ;;  %12036 = vmatprep.subr.mxu1 %v3712_v30 }
0x1b31   :  { %v3666_v7 = vsel %vm280_vm0, %v3660_v25, 0.0  ;;  %12037 = vmatpush3.msra.mxu1 %v3712_v30 }
0x1b32   :  { %3667 = vadd.xlane.f32.xlu0 %v3666_v7  ;;  %12038 = vmatprep.subr.mxu1 %v3711_v38  ;;  %v13109_v7 = vmov -1e+10  }
0x1b33   :  { %12039 = vmatpush3.msra.mxu1 %v3711_v38 }
0x1b34   :  { %12040 = vmatprep.subr.mxu1 %v3710_v39 }
0x1b35   :  { %12041 = vmatpush3.msra.mxu1 %v3710_v39 }
0x1b36   :  { %12042 = vmatprep.subr.mxu1 %v3709_v40 }
0x1b37   :  { %12043 = vmatpush3.msra.mxu1 %v3709_v40 }
0x1b38   :  { %12066 = vmatprep.subr.mxu1 %v3955_v11 }
0x1bb9   :  { %v3671_v26 = vpop.xlane.xlu1 %3670 }
0x1bba   :  { %v3673_v28 = vmul.f32 0.03125, %v3671_v26 }
0x1bbb   :  { %v3668_v29 = vpop.xlane.xlu0 %3667 }
0x1bbc   :  { %v3672_v27 = vmul.f32 0.03125, %v3668_v29  ;;  %v3675_v31 = vsub.f32 %v3661_v22, %v3673_v28  ;;  %v247_v22 = vlaneseq }
0x1bbe   :  { %v3674_v33 = vsub.f32 %v3660_v25, %v3672_v27  ;;  %v3677_v37 = vmul.f32 %v3675_v31, %v3675_v31  ;;  %v248_v23 = vshrl.u32 %v247_v22, 7  ;;  %v250_v24 = vand.u32 127, %v247_v22  ;;  %v11189_v25 = vld [vmem:[%s14677_s19] ss:$0 sm:$0xff]  ;;  %v11190_v27 = vld [vmem:[%s14677_s19 + $0x1] ss:$0 sm:$0xff] }
0x1bc0   :  { %v3676_v35 = vmul.f32 %v3674_v33, %v3674_v33  ;;  %v3681_v10 = vsel %vm280_vm0, %v3677_v37, 0.0  ;;  %vm251_vm6 = vcmp.ge.s32.totalorder %v248_v23, %v250_v24 }
0x1bc1   :  { %v252_v26 = vsel %vm251_vm6, 0.0, %v13109_v7 }
0x1bc2   :  { %v3678_v36 = vsel %vm280_vm0, %v3676_v35, 0.0  ;;  %v13763_v28 = vmin.f32 %v11189_v25, %v252_v26 }
0x1bc3   :  { %3679 = vadd.xlane.f32.xlu0 %v3678_v36  ;;  %v13767_v36 = vmin.f32 %v11190_v27, %v252_v26 }
0x1bc7   :  { %3682 = vadd.xlane.f32.xlu0 %v3681_v10 }
0x1c4c   :  { %v3680_v44 = vpop.xlane.xlu0 %3679 }
0x1c4d   :  { %v3684_v19 = vmul.f32 0.03125, %v3680_v44 }
0x1c4f   :  { %v3686_v45 = vadd.f32 1e-05, %v3684_v19 }
0x1c50   :  { %v3683_v15 = vpop.xlane.xlu0 %3682 }
0x1c51   :  { %12696 = vrsqrt.f32 %v3686_v45  ;;  %v3685_v47 = vmul.f32 0.03125, %v3683_v15 }
0x1c53   :  { %v3687_v34 = vadd.f32 1e-05, %v3685_v47 }
0x1c55   :  { %12698 = vrsqrt.f32 %v3687_v34 }
0x1c5e   :  { %v12697_v46 = vpop.eup %12696 }
0x1c5f   :  { %v3690_v48 = vmul.f32 %v12697_v46, %v3674_v33 }
0x1c61   :  { %v3698_v50 = vmul.f32 %v11263_v20, %v3690_v48 }
0x1c62   :  { %v12699_v51 = vpop.eup %12698 }
0x1c63   :  { %v3691_v52 = vmul.f32 %v12699_v51, %v3675_v31  ;;  %v13710_v54 = vadd.f32 %v11264_v49, %v3698_v50 }
0x1c65   :  { %v3699_v56 = vmul.f32 %v11263_v20, %v3691_v52  ;;  %12044 = vmatprep.mubr.msk.f32.mxu1 %vm280_vm0, %v13710_v54 }
0x1c67   :  { %v13714_v57 = vadd.f32 %v11264_v49, %v3699_v56 }
0x1c69   :  { %12045 = vmatmul.mubr.msk.f32.vlgmr.msra.gmra.mxu1 %vm280_vm0, %v13714_v57 }
0x1c6a   :  { %12067 = vmatpush3.msra.mxu1 %v3955_v11  ;;  %12074 = vmatprep.mubr.msk.f32.mxu1 %vm280_vm0, %v13717_v58 }
0x1c6b   :  { %12068 = vmatprep.subr.mxu1 %v3954_v32 }
0x1c6c   :  { %12069 = vmatpush3.msra.mxu1 %v3954_v32 }
0x1c6d   :  { %12070 = vmatprep.subr.mxu1 %v3953_v59 }
0x1c6e   :  { %12071 = vmatpush3.msra.mxu1 %v3953_v59 }
0x1c6f   :  { %12072 = vmatprep.subr.mxu1 %v3952_v53 }
0x1c70   :  { %12073 = vmatpush3.msra.mxu1 %v3952_v53 }
0x1c71   :  { %12075 = vmatmul.mubr.msk.f32.vlgmr.msra.gmra.mxu1 %vm280_vm0, %v13724_v60  ;;  %12077 = vmatprep.subr.mxu1 %v13095_v6 }
0x1c72   :  { %12079 = vmatprep.mubr.msk.f32.mxu1 %vm13096_vm1, %v13095_v6 }
0x1d29   :  { %v12046_v3 = vpop.f32.mrf.mxu1 }
0x1d2a   :  { %v3799_v4 = vadd.f32 %v12046_v3, %v11266_v1 }
0x1d2b   :  { %v3793_v8 = vpop.f32.mrf.mxu1 }
0x1d2c   :  { %v3794_v9 = vadd.f32 %v11266_v1, %v3793_v8  ;;  %v3803_v13 = vmax.f32 %v3799_v4, 0.0 }
0x1d2e   :  { %v3802_v12 = vmax.f32 %v3794_v9, 0.0 }
0x1d30   :  { %12063 = vmatprep.mubr.msk.f32.mxu0 %vm1978_vm5, %v3802_v12 }
0x1d31   :  { %v12076_v17 = vpop.f32.mrf.mxu1  ;;  %12064 = vmatmul.mubr.msk.f32.vlgmr.msra.gmra.mxu0 %vm1978_vm5, %v3803_v13 }
0x1d32   :  { %v13740_v5 = vadd.f32 %v12076_v17, %v11283_v16  ;;  %12089 = vmatprep.mubr.msk.f32.mxu0 %vm13096_vm1, %v13095_v6 }
0x1d33   :  { %v4035_v2 = vpop.f32.mrf.mxu1 }
0x1d34   :  { %v13744_v55 = vadd.f32 %v11283_v16, %v4035_v2  ;;  %4122 = vrot.lane.b32.xlu0 %v13740_v5, %s13097_s5 }
0x1d36   :  { %4045 = vrot.lane.b32.xlu1 %v13744_v55, %s13097_s5 }
0x1da6   :  { %v4123_v21 = vpop.permute.xlu0 %4122 }
0x1da8   :  { %v4046_v18 = vpop.permute.xlu1 %4045 }
0x1da9   :  { %12078 = vmatpush3.xpose.msk.msra.mxu1 %vm365_vm2, %v4046_v18 }
0x1daa   :  { %12082 = vmatprep.subr.mxu1 %v13095_v6 }
0x1dac   :  { %12080 = vmatmul.mubr.msk.f32.vlgmr.msra.gmra.mxu1 %vm365_vm2, %v13744_v55 }
0x1dad   :  { %12083 = vmatpush3.xpose.msk.msra.mxu1 %vm365_vm2, %v4123_v21  ;;  %12084 = vmatprep.mubr.msk.f32.mxu1 %vm13096_vm1, %v13095_v6 }
0x1dae   :  { %12092 = vmatprep.subr.mxu1 %v13095_v6 }
0x1db0   :  { %12085 = vmatmul.mubr.msk.f32.vlgmr.msra.gmra.mxu1 %vm365_vm2, %v13740_v5 }
0x1db1   :  { %12094 = vmatprep.mubr.msk.f32.mxu1 %vm13096_vm1, %v13095_v6 }
0x1df1   :  { %v13804_v61 = vpop.f32.mrf.mxu0 }
0x1df3   :  { %v13806_v62 = vpop.f32.mrf.mxu0 }
0x1e6c   :  { %v4117_v29 = vpop.f32.mrf.mxu1 }
0x1e6d   :  { %v4198_v31 = vmul.f32 0.35355338, %v4117_v29 }
0x1e6e   :  { %v12081_v33 = vpop.f32.mrf.mxu1 }
0x1e6f   :  { %v4200_v35 = vadd.f32 %v4198_v31, %v13763_v28 }
0x1e70   :  { %v4194_v37 = vpop.f32.mrf.mxu1 }
0x1e71   :  { %v4199_v10 = vmul.f32 0.35355338, %v4194_v37  ;;  %v4202_v30 = vsel %vm365_vm2, %v4200_v35, -inf }
0x1e72   :  { %4203 = vmax.xlane.f32.xlu1 %v4202_v30  ;;  %v12086_v38 = vpop.f32.mrf.mxu1 }
0x1e73   :  { %v4201_v39 = vadd.f32 %v4199_v10, %v13767_v36 }
0x1e75   :  { %v4205_v40 = vsel %vm365_vm2, %v4201_v39, -inf }
0x1e76   :  { %4206 = vmax.xlane.f32.xlu0 %v4205_v40 }
0x1e83   :  { %4224 = vrot.lane.b32.xlu1 %v13744_v55, %s13098_s9 }
0x1e87   :  { %4378 = vrot.lane.b32.xlu1 %v13744_v55, %s13099_s6 }
0x1e8b   :  { %4456 = vrot.lane.b32.xlu1 %v13740_v5, %s13099_s6 }
0x1e8c   :  { %4300 = vrot.lane.b32.xlu0 %v13740_v5, %s13098_s9 }
0x1efb   :  { %v4204_v11 = vpop.xlane.xlu1 %4203 }
0x1efc   :  { %v4208_v41 = vsub.f32 %v4200_v35, %v4204_v11 }
0x1efe   :  { %v4210_v14 = vmul.f32 1.442695, %v4208_v41 }
0x1eff   :  { %v4225_v42 = vpop.permute.xlu1 %4224  ;;  %v4207_v43 = vpop.xlane.xlu0 %4206 }
0x1f00   :  { %12700 = vpow2.f32 %v4210_v14  ;;  %v4209_v44 = vsub.f32 %v4201_v39, %v4207_v43  ;;  %12088 = vmatpush3.msra.mxu0 %v4225_v42 }
0x1f01   :  { %12097 = vmatprep.subr.mxu0 %v13095_v6 }
0x1f02   :  { %v4212_v19 = vmul.f32 1.442695, %v4209_v44 }
0x1f03   :  { %v4301_v45 = vpop.permute.xlu0 %4300  ;;  %v4379_v20 = vpop.permute.xlu1 %4378 }
0x1f04   :  { %12702 = vpow2.f32 %v4212_v19  ;;  %12093 = vmatpush3.msra.mxu1 %v4301_v45 }
0x1f05   :  { %12102 = vmatprep.subr.mxu1 %v13095_v6 }
0x1f07   :  { %v4457_v48 = vpop.permute.xlu1 %4456 }
0x1f0d   :  { %v12701_v15 = vpop.eup %12700 }
0x1f0e   :  { %v4214_v47 = vsel %vm365_vm2, %v12701_v15, 0.0 }
0x1f0f   :  { %4215 = vadd.xlane.f32.xlu1 %v4214_v47 }
0x1f11   :  { %v12703_v34 = vpop.eup %12702 }
0x1f12   :  { %v4217_v46 = vsel %vm365_vm2, %v12703_v34, 0.0 }
0x1f13   :  { %4218 = vadd.xlane.f32.xlu0 %v4217_v46 }
0x1f20   :  { %4454 = vrot.lane.b32.xlu1 %v13740_v5, %s13100_s4 }
0x1f29   :  { %4376 = vrot.lane.b32.xlu0 %v13744_v55, %s13100_s4 }
0x1f98   :  { %v4216_v49 = vpop.xlane.xlu1 %4215 }
0x1f99   :  { %12704 = vrcp.f32 %v4216_v49 }
0x1f9c   :  { %v4219_v50 = vpop.xlane.xlu0 %4218  ;;  %v4455_v53 = vpop.permute.xlu1 %4454 }
0x1f9d   :  { %12706 = vrcp.f32 %v4219_v50 }
0x1fa0   :  { %v4377_v59 = vpop.permute.xlu0 %4376 }
0x1fa6   :  { %v12705_v51 = vpop.eup %12704 }
0x1fa7   :  { %v4222_v52 = vmul.f32 %v12705_v51, %v12701_v15 }
0x1fa9   :  { %12090 = vmatmul.mubr.msk.f32.vlgmr.msra.gmra.mxu0 %vm365_vm2, %v4222_v52 }
0x1faa   :  { %v12707_v56 = vpop.eup %12706  ;;  %12098 = vmatpush3.xpose.msk.msra.mxu0 %vm365_vm2, %v4379_v20  ;;  %12099 = vmatprep.mubr.msk.f32.mxu0 %vm13096_vm1, %v13095_v6 }
0x1fab   :  { %v4223_v32 = vmul.f32 %v12707_v56, %v12703_v34  ;;  %12107 = vmatprep.subr.mxu0 %v13095_v6 }
0x1fad   :  { %12095 = vmatmul.mubr.msk.f32.vlgmr.msra.gmra.mxu1 %vm365_vm2, %v4223_v32  ;;  %12100 = vmatmul.mubr.msk.f32.vlgmr.msra.gmra.mxu0 %vm365_vm2, %v4377_v59 }
0x1fae   :  { %12103 = vmatpush3.xpose.msk.msra.mxu1 %vm365_vm2, %v4457_v48  ;;  %12104 = vmatprep.mubr.msk.f32.mxu1 %vm13096_vm1, %v13095_v6 }
0x1faf   :  { %12112 = vmatprep.subr.mxu1 %v13095_v6  ;;  %12109 = vmatprep.mubr.msk.f32.mxu0 %vm13096_vm1, %v13095_v6 }
0x1fb1   :  { %12105 = vmatmul.mubr.msk.f32.vlgmr.msra.gmra.mxu1 %vm365_vm2, %v4455_v53 }
0x1fb2   :  { %12114 = vmatprep.mubr.msk.f32.mxu1 %vm13096_vm1, %v13095_v6 }
0x2069   :  { %v13808_v63 = vpop.f32.mrf.mxu0 }
0x206b   :  { %v12091_v0 = vpop.f32.mrf.mxu0 }
0x206d   :  { %v13810_v1 = vpop.f32.mrf.mxu1  ;;  %v4450_v3 = vpop.f32.mrf.mxu0 }
0x206e   :  { %v4532_v4 = vmul.f32 0.35355338, %v4450_v3 }
0x206f   :  { %v12096_v8 = vpop.f32.mrf.mxu1  ;;  %v12101_v9 = vpop.f32.mrf.mxu0 }
0x2070   :  { %v4534_v12 = vadd.f32 %v4532_v4, %v13763_v28 }
0x2071   :  { %v4528_v13 = vpop.f32.mrf.mxu1 }
0x2072   :  { %v4533_v16 = vmul.f32 0.35355338, %v4528_v13  ;;  %v4536_v17 = vsel %vm365_vm2, %v4534_v12, -inf }
0x2073   :  { %v12106_v2 = vpop.f32.mrf.mxu1  ;;  %4537 = vmax.xlane.f32.xlu0 %v4536_v17 }
0x2074   :  { %v4535_v18 = vadd.f32 %v4533_v16, %v13767_v36 }
0x2076   :  { %v4539_v21 = vsel %vm365_vm2, %v4535_v18, -inf }
0x2077   :  { %4540 = vmax.xlane.f32.xlu1 %v4539_v21 }
0x2088   :  { %4558 = vrot.lane.b32.xlu1 %v13744_v55, %s13101_s2 }
0x2089   :  { %4634 = vrot.lane.b32.xlu0 %v13740_v5, %s13101_s2 }
0x208c   :  { %4712 = vrot.lane.b32.xlu1 %v13744_v55, %s13103_s14 }
0x2090   :  { %4790 = vrot.lane.b32.xlu1 %v13740_v5, %s13103_s14 }
0x2094   :  { %4788 = vrot.lane.b32.xlu1 %v13740_v5, %s13102_s29 }
0x20fc   :  { %v4538_v22 = vpop.xlane.xlu0 %4537 }
0x20fd   :  { %v4542_v23 = vsub.f32 %v4534_v12, %v4538_v22 }
0x20ff   :  { %v4544_v24 = vmul.f32 1.442695, %v4542_v23 }
0x2100   :  { %v4541_v25 = vpop.xlane.xlu1 %4540  ;;  %v4635_v7 = vpop.permute.xlu0 %4634 }
0x2101   :  { %12708 = vpow2.f32 %v4544_v24  ;;  %v4543_v26 = vsub.f32 %v4535_v18, %v4541_v25  ;;  %12113 = vmatpush3.msra.mxu1 %v4635_v7 }
0x2102   :  { %12122 = vmatprep.subr.mxu1 %v13095_v6 }
0x2103   :  { %v4546_v29 = vmul.f32 1.442695, %v4543_v26 }
0x2104   :  { %v4559_v27 = vpop.permute.xlu1 %4558 }
0x2105   :  { %12710 = vpow2.f32 %v4546_v29  ;;  %12108 = vmatpush3.msra.mxu0 %v4559_v27 }
0x2106   :  { %12117 = vmatprep.subr.mxu0 %v13095_v6 }
0x2108   :  { %v4713_v38 = vpop.permute.xlu1 %4712 }
0x210c   :  { %v4791_v41 = vpop.permute.xlu1 %4790 }
0x210e   :  { %v12709_v31 = vpop.eup %12708 }
0x210f   :  { %v4548_v33 = vsel %vm365_vm2, %v12709_v31, 0.0 }
0x2110   :  { %4549 = vadd.xlane.f32.xlu0 %v4548_v33  ;;  %v4789_v43 = vpop.permute.xlu1 %4788 }
0x2112   :  { %v12711_v35 = vpop.eup %12710 }
0x2113   :  { %v4551_v37 = vsel %vm365_vm2, %v12711_v35, 0.0 }
0x2114   :  { %4552 = vadd.xlane.f32.xlu0 %v4551_v37 }
0x212a   :  { %4710 = vrot.lane.b32.xlu0 %v13744_v55, %s13102_s29 }
0x2199   :  { %v4550_v10 = vpop.xlane.xlu0 %4549 }
0x219a   :  { %12712 = vrcp.f32 %v4550_v10 }
0x219d   :  { %v4553_v30 = vpop.xlane.xlu0 %4552 }
0x219e   :  { %12714 = vrcp.f32 %v4553_v30 }
0x21a1   :  { %v4711_v42 = vpop.permute.xlu0 %4710 }
0x21a7   :  { %v12713_v39 = vpop.eup %12712 }
0x21a8   :  { %v4556_v40 = vmul.f32 %v12713_v39, %v12709_v31 }
0x21aa   :  { %12110 = vmatmul.mubr.msk.f32.vlgmr.msra.gmra.mxu0 %vm365_vm2, %v4556_v40 }
0x21ab   :  { %v12715_v11 = vpop.eup %12714  ;;  %12118 = vmatpush3.xpose.msk.msra.mxu0 %vm365_vm2, %v4713_v38  ;;  %12119 = vmatprep.mubr.msk.f32.mxu0 %vm13096_vm1, %v13095_v6 }
0x21ac   :  { %v4557_v14 = vmul.f32 %v12715_v11, %v12711_v35  ;;  %12127 = vmatprep.subr.mxu0 %v13095_v6 }
0x21ae   :  { %12115 = vmatmul.mubr.msk.f32.vlgmr.msra.gmra.mxu1 %vm365_vm2, %v4557_v14  ;;  %12120 = vmatmul.mubr.msk.f32.vlgmr.msra.gmra.mxu0 %vm365_vm2, %v4711_v42 }
0x21af   :  { %12123 = vmatpush3.xpose.msk.msra.mxu1 %vm365_vm2, %v4791_v41  ;;  %12124 = vmatprep.mubr.msk.f32.mxu1 %vm13096_vm1, %v13095_v6 }
0x21b0   :  { %12132 = vmatprep.subr.mxu1 %v13095_v6  ;;  %12129 = vmatprep.mubr.msk.f32.mxu0 %vm13096_vm1, %v13095_v6 }
0x21b2   :  { %12125 = vmatmul.mubr.msk.f32.vlgmr.msra.gmra.mxu1 %vm365_vm2, %v4789_v43 }
0x21b3   :  { %12134 = vmatprep.mubr.msk.f32.mxu1 %vm13096_vm1, %v13095_v6 }
0x226a   :  { %v13848_v44 = vpop.f32.mrf.mxu0 }
0x226c   :  { %v12111_v19 = vpop.f32.mrf.mxu0 }
0x226e   :  { %v13850_v45 = vpop.f32.mrf.mxu1  ;;  %v4784_v15 = vpop.f32.mrf.mxu0 }
0x226f   :  { %v4866_v47 = vmul.f32 0.35355338, %v4784_v15 }
0x2270   :  { %v12116_v34 = vpop.f32.mrf.mxu1  ;;  %v12121_v46 = vpop.f32.mrf.mxu0 }
0x2271   :  { %v4868_v20 = vadd.f32 %v4866_v47, %v13763_v28 }
0x2272   :  { %v4862_v48 = vpop.f32.mrf.mxu1 }
0x2273   :  { %v4867_v49 = vmul.f32 0.35355338, %v4862_v48  ;;  %v4870_v50 = vsel %vm365_vm2, %v4868_v20, -inf }
0x2274   :  { %v12126_v51 = vpop.f32.mrf.mxu1  ;;  %4871 = vmax.xlane.f32.xlu0 %v4870_v50 }
0x2275   :  { %v4869_v52 = vadd.f32 %v4867_v49, %v13767_v36 }
0x2277   :  { %v4873_v56 = vsel %vm365_vm2, %v4869_v52, -inf }
0x2278   :  { %4874 = vmax.xlane.f32.xlu1 %v4873_v56 }
0x2289   :  { %4892 = vrot.lane.b32.xlu1 %v13744_v55, %s13104_s7 }
0x228a   :  { %4968 = vrot.lane.b32.xlu0 %v13740_v5, %s13104_s7 }
0x228d   :  { %5046 = vrot.lane.b32.xlu1 %v13744_v55, %s13105_s10 }
0x2291   :  { %5124 = vrot.lane.b32.xlu1 %v13740_v5, %s13105_s10 }
0x2295   :  { %5122 = vrot.lane.b32.xlu1 %v13740_v5, %s13106_s11 }
0x22fd   :  { %v4872_v32 = vpop.xlane.xlu0 %4871 }
0x22fe   :  { %v4876_v59 = vsub.f32 %v4868_v20, %v4872_v32 }
0x2300   :  { %v4878_v53 = vmul.f32 1.442695, %v4876_v59 }
0x2301   :  { %v4875_v0 = vpop.xlane.xlu1 %4874  ;;  %v4969_v3 = vpop.permute.xlu0 %4968 }
0x2302   :  { %12716 = vpow2.f32 %v4878_v53  ;;  %v4877_v4 = vsub.f32 %v4869_v52, %v4875_v0  ;;  %12133 = vmatpush3.msra.mxu1 %v4969_v3  ;;  %v5411_v53 = vld [vmem:[#allocation11 + $0x18] sm:$0xff]  ;;  %v5410_v0 = vld [vmem:[#allocation11 + $0x10] sm:$0xff]  ;;  %v5408_v3 = vld [vmem:[#allocation11] sm:$0xff] }
0x2303   :  { %12142 = vmatprep.subr.mxu1 %v13095_v6 }
0x2304   :  { %v4880_v8 = vmul.f32 1.442695, %v4877_v4 }
0x2305   :  { %v4893_v9 = vpop.permute.xlu1 %4892 }
0x2306   :  { %12718 = vpow2.f32 %v4880_v8  ;;  %12128 = vmatpush3.msra.mxu0 %v4893_v9 }
0x2307   :  { %12137 = vmatprep.subr.mxu0 %v13095_v6 }
0x2309   :  { %v5047_v21 = vpop.permute.xlu1 %5046 }
0x230d   :  { %v5125_v25 = vpop.permute.xlu1 %5124 }
0x230f   :  { %v12717_v12 = vpop.eup %12716 }
0x2310   :  { %v4882_v13 = vsel %vm365_vm2, %v12717_v12, 0.0 }
0x2311   :  { %4883 = vadd.xlane.f32.xlu0 %v4882_v13  ;;  %v5123_v29 = vpop.permute.xlu1 %5122  ;;  %v11278_v13 = vld [vmem:[%s14674_s21 + $0x1] ss:$0 sm:$0xff]  ;;  %s14685_s21 = sld [smem:[#allocation34_spill]] }
0x2313   :  { %v12719_v16 = vpop.eup %12718 }
0x2314   :  { %v4885_v17 = vsel %vm365_vm2, %v12719_v16, 0.0 }
0x2315   :  { %4886 = vadd.xlane.f32.xlu0 %v4885_v17 }
0x232b   :  { %5044 = vrot.lane.b32.xlu0 %v13744_v55, %s13106_s11 }
0x239a   :  { %v4884_v2 = vpop.xlane.xlu0 %4883 }
0x239b   :  { %12720 = vrcp.f32 %v4884_v2 }
0x239e   :  { %v4887_v18 = vpop.xlane.xlu0 %4886 }
0x239f   :  { %12722 = vrcp.f32 %v4887_v18  ;;  %v3899_v18 = vadd.f32 %v13804_v61, %v11278_v13 }
0x23a2   :  { %v5045_v26 = vpop.permute.xlu0 %5044 }
0x23a8   :  { %v12721_v22 = vpop.eup %12720 }
0x23a9   :  { %v4890_v23 = vmul.f32 %v12721_v22, %v12717_v12 }
0x23ab   :  { %12130 = vmatmul.mubr.msk.f32.vlgmr.msra.gmra.mxu0 %vm365_vm2, %v4890_v23 }
0x23ac   :  { %v12723_v24 = vpop.eup %12722  ;;  %12138 = vmatpush3.xpose.msk.msra.mxu0 %vm365_vm2, %v5047_v21  ;;  %12139 = vmatprep.mubr.msk.f32.mxu0 %vm13096_vm1, %v13095_v6  ;;  %v3903_v21 = vadd.f32 %v3899_v18, %v13714_v57 }
0x23ad   :  { %v4891_v7 = vmul.f32 %v12723_v24, %v12719_v16  ;;  %12147 = vmatprep.subr.mxu0 %v13095_v6  ;;  %v3894_v16 = vadd.f32 %v11278_v13, %v13806_v62 }
0x23ae   :  { %v3911_v22 = vsel %vm280_vm0, %v3903_v21, 0.0 }
0x23af   :  { %12135 = vmatmul.mubr.msk.f32.vlgmr.msra.gmra.mxu1 %vm365_vm2, %v4891_v7  ;;  %12140 = vmatmul.mubr.msk.f32.vlgmr.msra.gmra.mxu0 %vm365_vm2, %v5045_v26  ;;  %v3902_v17 = vadd.f32 %v3894_v16, %v13710_v54  ;;  %v11315_v16 = vld [vmem:[%s14679_s22] ss:$0 sm:$0xff] }
0x23b0   :  { %12143 = vmatpush3.xpose.msk.msra.mxu1 %vm365_vm2, %v5125_v25  ;;  %12144 = vmatprep.mubr.msk.f32.mxu1 %vm13096_vm1, %v13095_v6 }
0x23b1   :  { %12152 = vmatprep.subr.mxu1 %v13095_v6  ;;  %12149 = vmatprep.mubr.msk.f32.mxu0 %vm13096_vm1, %v13095_v6  ;;  %v3908_v2 = vsel %vm280_vm0, %v3902_v17, 0.0 }
0x23b3   :  { %12145 = vmatmul.mubr.msk.f32.vlgmr.msra.gmra.mxu1 %vm365_vm2, %v5123_v29 }
0x23b4   :  { %12154 = vmatprep.mubr.msk.f32.mxu1 %vm13096_vm1, %v13095_v6 }
0x246b   :  { %v4964_v27 = vpop.f32.mrf.mxu0 }
0x246d   :  { %v12131_v31 = vpop.f32.mrf.mxu0 }
0x246f   :  { %v5040_v33 = vpop.f32.mrf.mxu1  ;;  %v5118_v35 = vpop.f32.mrf.mxu0 }
0x2470   :  { %v5200_v37 = vmul.f32 0.35355338, %v5118_v35 }
0x2471   :  { %v12136_v10 = vpop.f32.mrf.mxu1  ;;  %v12141_v30 = vpop.f32.mrf.mxu0 }
0x2472   :  { %v5202_v38 = vadd.f32 %v5200_v37, %v13763_v28  ;;  %v5550_v30 = vld [vmem:[#allocation13 + $0x18] sm:$0xff] }
0x2473   :  { %v5196_v39 = vpop.f32.mrf.mxu1 }
0x2474   :  { %v5201_v40 = vmul.f32 0.35355338, %v5196_v39  ;;  %v5204_v11 = vsel %vm365_vm2, %v5202_v38, -inf }
0x2475   :  { %v12146_v41 = vpop.f32.mrf.mxu1  ;;  %5205 = vmax.xlane.f32.xlu0 %v5204_v11 }
0x2476   :  { %v5203_v14 = vadd.f32 %v5201_v40, %v13767_v36  ;;  %v11310_v40 = vld [vmem:[%s14678_s24] ss:$0 sm:$0xff] }
0x2478   :  { %v5207_v42 = vsel %vm365_vm2, %v5203_v14, -inf }
0x2479   :  { %5208 = vmax.xlane.f32.xlu1 %v5207_v42 }
0x248a   :  { %5226 = vrot.lane.b32.xlu1 %v13744_v55, %s13107_s15 }
0x248e   :  { %5380 = vrot.lane.b32.xlu1 %v13848_v44, %s13086_s18 }
0x2492   :  { %5382 = vrot.lane.b32.xlu1 %v13850_v45, %s13086_s18 }
0x2496   :  { %5390 = vrot.lane.b32.xlu1 %v5040_v33, %s13090_s20 }
0x24fe   :  { %v5206_v43 = vpop.xlane.xlu0 %5205 }
0x24ff   :  { %v5210_v19 = vsub.f32 %v5202_v38, %v5206_v43 }
0x2501   :  { %v5212_v15 = vmul.f32 1.442695, %v5210_v19 }
0x2502   :  { %v5209_v47 = vpop.xlane.xlu1 %5208 }
0x2503   :  { %12724 = vpow2.f32 %v5212_v15  ;;  %v5211_v34 = vsub.f32 %v5203_v14, %v5209_v47 }
0x2505   :  { %v5214_v46 = vmul.f32 1.442695, %v5211_v34 }
0x2506   :  { %v5227_v20 = vpop.permute.xlu1 %5226 }
0x2507   :  { %12726 = vpow2.f32 %v5214_v46  ;;  %12148 = vmatpush3.msra.mxu0 %v5227_v20 }
0x2508   :  { %12157 = vmatprep.subr.mxu0 %v5411_v53 }
0x250a   :  { %v5381_v23 = vpop.permute.xlu1 %5380 }
0x250b   :  { %v5402_v7 = vsel %vm365_vm2, %v13808_v63, %v5381_v23 }
0x250e   :  { %v5383_v24 = vpop.permute.xlu1 %5382 }
0x250f   :  { %v5403_v57 = vsel %vm365_vm2, %v13810_v1, %v5383_v24  ;;  %v5548_v1 = vld [vmem:[#allocation13 + $0x8] sm:$0xff] }
0x2510   :  { %v12725_v48 = vpop.eup %12724 }
0x2511   :  { %v5216_v55 = vsel %vm365_vm2, %v12725_v48, 0.0 }
0x2512   :  { %5217 = vadd.xlane.f32.xlu0 %v5216_v55  ;;  %v5391_v26 = vpop.permute.xlu1 %5390 }
0x2513   :  { %v5405_v61 = vsel %vm1723_vm4, %v5403_v57, %v5391_v26 }
0x2514   :  { %v12727_v44 = vpop.eup %12726 }
0x2515   :  { %v5219_v49 = vsel %vm365_vm2, %v12727_v44, 0.0 }
0x2516   :  { %5220 = vadd.xlane.f32.xlu0 %v5219_v49 }
0x252c   :  { %5302 = vrot.lane.b32.xlu0 %v13740_v5, %s13107_s15  ;;  %v5409_v5 = vld [vmem:[#allocation11 + $0x8] sm:$0xff] }
0x2530   :  { %5388 = vrot.lane.b32.xlu0 %v4964_v27, %s13090_s20 }
0x259b   :  { %v5218_v45 = vpop.xlane.xlu0 %5217 }
0x259c   :  { %12728 = vrcp.f32 %v5218_v45  ;;  %v11281_v45 = vld [vmem:[#allocation7 + $0x6] ss:$0 sm:$0xff] }
0x259f   :  { %v5221_v50 = vpop.xlane.xlu0 %5220 }
0x25a0   :  { %12730 = vrcp.f32 %v5221_v50 }
0x25a3   :  { %v5303_v51 = vpop.permute.xlu0 %5302 }
0x25a4   :  { %12153 = vmatpush3.msra.mxu1 %v5303_v51  ;;  %v11282_v51 = vld [vmem:[#allocation7 + $0x7] ss:$0 sm:$0xff] }
0x25a5   :  { %12168 = vmatprep.subr.mxu1 %v5550_v30 }
0x25a7   :  { %v5389_v25 = vpop.permute.xlu0 %5388 }
0x25a8   :  { %v5404_v62 = vsel %vm1723_vm4, %v5402_v7, %v5389_v25 }
0x25a9   :  { %v12729_v52 = vpop.eup %12728 }
0x25aa   :  { %v5224_v56 = vmul.f32 %v12729_v52, %v12725_v48 }
0x25ac   :  { %12150 = vmatmul.mubr.msk.f32.vlgmr.msra.gmra.mxu0 %vm365_vm2, %v5224_v56  ;;  %v5547_v56 = vld [vmem:[#allocation13] sm:$0xff] }
0x25ad   :  { %v12731_v32 = vpop.eup %12730  ;;  %12158 = vmatpush3.msra.mxu0 %v5411_v53 }
0x25ae   :  { %v5225_v59 = vmul.f32 %v12731_v32, %v12727_v44  ;;  %12159 = vmatprep.subr.mxu0 %v5410_v0 }
0x25af   :  { %12160 = vmatpush3.msra.mxu0 %v5410_v0 }
0x25b0   :  { %12155 = vmatmul.mubr.msk.f32.vlgmr.msra.gmra.mxu1 %vm365_vm2, %v5225_v59  ;;  %12161 = vmatprep.subr.mxu0 %v5409_v5 }
0x25b1   :  { %12162 = vmatpush3.msra.mxu0 %v5409_v5  ;;  %12169 = vmatpush3.msra.mxu1 %v5550_v30 }
0x25b2   :  { %12163 = vmatprep.subr.mxu0 %v5408_v3 }
0x25b3   :  { %12164 = vmatpush3.msra.mxu0 %v5408_v3 }
0x266c   :  { %v5298_v4 = vpop.f32.mrf.mxu0 }
0x266d   :  { %5396 = vrot.lane.b32.xlu0 %v5298_v4, %s13108_s16 }
0x266e   :  { %v12151_v8 = vpop.f32.mrf.mxu0 }
0x2670   :  { %v5374_v9 = vpop.f32.mrf.mxu1 }
0x2671   :  { %5398 = vrot.lane.b32.xlu1 %v5374_v9, %s13108_s16 }
0x2672   :  { %v12156_v12 = vpop.f32.mrf.mxu1 }
0x268c   :  { %3909 = vadd.xlane.f32.xlu0 %v3908_v2 }
0x2695   :  { %3912 = vadd.xlane.f32.xlu1 %v3911_v22 }
0x26df   :  { %v5397_v54 = vpop.permute.xlu0 %5396 }
0x26e0   :  { %v5406_v29 = vsel %vm1726_vm3, %v5404_v62, %v5397_v54 }
0x26e1   :  { %12165 = vmatprep.mubr.msk.f32.mxu0 %vm280_vm0, %v5406_v29 }
0x26e3   :  { %v5399_v27 = vpop.permute.xlu1 %5398 }
0x26e4   :  { %v5407_v31 = vsel %vm1726_vm3, %v5405_v61, %v5399_v27 }
0x26e5   :  { %12166 = vmatmul.mubr.msk.f32.vlgmr.msra.gmra.mxu0 %vm280_vm0, %v5407_v31 }
0x2715   :  { %v3910_v63 = vpop.xlane.xlu0 %3909 }
0x2716   :  { %v3914_v33 = vmul.f32 0.03125, %v3910_v63  ;;  %v11313_v63 = vld [vmem:[#allocation14] ss:$0 sm:$0xff] }
0x2718   :  { %v3916_v35 = vsub.f32 %v3902_v17, %v3914_v33 }
0x271a   :  { %v3918_v37 = vmul.f32 %v3916_v35, %v3916_v35 }
0x271c   :  { %v3920_v10 = vsel %vm280_vm0, %v3918_v37, 0.0 }
0x271d   :  { %3921 = vadd.xlane.f32.xlu1 %v3920_v10 }
0x271e   :  { %v3913_v38 = vpop.xlane.xlu1 %3912 }
0x271f   :  { %v3915_v42 = vmul.f32 0.03125, %v3913_v38 }
0x2721   :  { %v3917_v34 = vsub.f32 %v3903_v21, %v3915_v42 }
0x2723   :  { %v3919_v55 = vmul.f32 %v3917_v34, %v3917_v34 }
0x2725   :  { %v3923_v44 = vsel %vm280_vm0, %v3919_v55, 0.0 }
0x272e   :  { %5649 = vrot.lane.b32.xlu1 %v5550_v30, %s13097_s5 }
0x2732   :  { %5645 = vrot.lane.b32.xlu1 %v5548_v1, %s13097_s5 }
0x27a5   :  { %v12167_v39 = vpop.f32.mrf.mxu0 }
0x27a6   :  { %v3922_v11 = vpop.xlane.xlu1 %3921  ;;  %v5497_v43 = vadd.f32 %v12167_v39, %v11310_v40 }
0x27a7   :  { %v3926_v41 = vmul.f32 0.03125, %v3922_v11  ;;  %v5491_v14 = vpop.f32.mrf.mxu0 }
0x27a8   :  { %v5492_v19 = vadd.f32 %v11310_v40, %v5491_v14  ;;  %v5501_v46 = vadd.f32 %v5497_v43, %v13724_v60  ;;  %v5549_v60 = vld [vmem:[#allocation13 + $0x10] sm:$0xff] }
0x27a9   :  { %v3928_v15 = vadd.f32 1e-05, %v3926_v41  ;;  %12170 = vmatprep.subr.mxu1 %v5549_v60 }
0x27aa   :  { %v5500_v47 = vadd.f32 %v5492_v19, %v13717_v58  ;;  %v5508_v48 = vsel %vm280_vm0, %v5501_v46, 0.0  ;;  %12171 = vmatpush3.msra.mxu1 %v5549_v60  ;;  %v5650_v32 = vpop.permute.xlu1 %5649 }
0x27ab   :  { %12732 = vrsqrt.f32 %v3928_v15  ;;  %12172 = vmatprep.subr.mxu1 %v5548_v1  ;;  %12179 = vmatprep.subr.mxu0 %v5650_v32 }
0x27ac   :  { %v5505_v20 = vsel %vm280_vm0, %v5500_v47, 0.0  ;;  %12173 = vmatpush3.msra.mxu1 %v5548_v1  ;;  %12180 = vmatpush3.msra.mxu0 %v5650_v32 }
0x27ad   :  { %5506 = vadd.xlane.f32.xlu0 %v5505_v20  ;;  %12174 = vmatprep.subr.mxu1 %v5547_v56 }
0x27ae   :  { %12175 = vmatpush3.msra.mxu1 %v5547_v56  ;;  %v5646_v21 = vpop.permute.xlu1 %5645 }
0x27af   :  { %12190 = vmatprep.subr.mxu1 %v13095_v6 }
0x27b1   :  { %5509 = vadd.xlane.f32.xlu0 %v5508_v48  ;;  %v13985_v48 = vld [vmem:[%s13129_s13] ss:$0 sm:$0xff] }
0x27b5   :  { %3924 = vadd.xlane.f32.xlu0 %v3923_v44 }
0x27b8   :  { %v12733_v49 = vpop.eup %12732 }
0x27b9   :  { %v3932_v50 = vmul.f32 %v12733_v49, %v3916_v35  ;;  %v11314_v35 = vld [vmem:[#allocation14 + $0x1] ss:$0 sm:$0xff] }
0x27bb   :  { %v3940_v52 = vmul.f32 %v11281_v45, %v3932_v50 }
0x27bd   :  { %v13934_v58 = vadd.f32 %v11282_v51, %v3940_v52 }
0x27bf   :  { %12187 = vmatprep.mubr.msk.f32.mxu0 %vm280_vm0, %v13934_v58 }
0x2836   :  { %v5507_v59 = vpop.xlane.xlu0 %5506 }
0x2837   :  { %v5511_v53 = vmul.f32 0.03125, %v5507_v59 }
0x2839   :  { %v5513_v0 = vsub.f32 %v5500_v47, %v5511_v53 }
0x283a   :  { %v5510_v5 = vpop.xlane.xlu0 %5509 }
0x283b   :  { %v5512_v3 = vmul.f32 0.03125, %v5510_v5  ;;  %v5515_v4 = vmul.f32 %v5513_v0, %v5513_v0 }
0x283d   :  { %v5514_v8 = vsub.f32 %v5501_v46, %v5512_v3  ;;  %v5517_v9 = vsel %vm280_vm0, %v5515_v4, 0.0 }
0x283e   :  { %5518 = vadd.xlane.f32.xlu1 %v5517_v9  ;;  %v3925_v17 = vpop.xlane.xlu0 %3924 }
0x283f   :  { %v5516_v12 = vmul.f32 %v5514_v8, %v5514_v8  ;;  %v3927_v2 = vmul.f32 0.03125, %v3925_v17 }
0x2841   :  { %v5520_v13 = vsel %vm280_vm0, %v5516_v12, 0.0  ;;  %v3929_v18 = vadd.f32 1e-05, %v3927_v2 }
0x2842   :  { %5521 = vadd.xlane.f32.xlu0 %v5520_v13 }
0x2843   :  { %12734 = vrsqrt.f32 %v3929_v18 }
0x284f   :  { %5643 = vrot.lane.b32.xlu1 %v5547_v56, %s13097_s5 }
0x2850   :  { %v12735_v24 = vpop.eup %12734 }
0x2851   :  { %v3933_v62 = vmul.f32 %v12735_v24, %v3917_v34 }
0x2853   :  { %v3941_v57 = vmul.f32 %v11281_v45, %v3933_v62 }
0x2855   :  { %v13945_v27 = vadd.f32 %v11282_v51, %v3941_v57  ;;  %v13990_v51 = vld [vmem:[%s13129_s13 + $0x1] ss:$0 sm:$0xff] }
0x2858   :  { %5647 = vrot.lane.b32.xlu0 %v5549_v60, %s13097_s5 }
0x285c   :  { %5655 = vrot.lane.b32.xlu0 %v11315_v16, %s13097_s5 }
0x28c7   :  { %v5519_v22 = vpop.xlane.xlu1 %5518 }
0x28c8   :  { %v5523_v23 = vmul.f32 0.03125, %v5519_v22 }
0x28ca   :  { %v5525_v25 = vadd.f32 1e-05, %v5523_v23 }
0x28cb   :  { %v5522_v7 = vpop.xlane.xlu0 %5521  ;;  %v5644_v61 = vpop.permute.xlu1 %5643 }
0x28cc   :  { %12736 = vrsqrt.f32 %v5525_v25  ;;  %v5524_v26 = vmul.f32 0.03125, %v5522_v7 }
0x28ce   :  { %v5526_v54 = vadd.f32 1e-05, %v5524_v26 }
0x28cf   :  { %v5648_v29 = vpop.permute.xlu0 %5647 }
0x28d0   :  { %12738 = vrsqrt.f32 %v5526_v54  ;;  %12181 = vmatprep.subr.mxu0 %v5648_v29 }
0x28d1   :  { %12182 = vmatpush3.msra.mxu0 %v5648_v29 }
0x28d2   :  { %12183 = vmatprep.subr.mxu0 %v5646_v21 }
0x28d3   :  { %12184 = vmatpush3.msra.mxu0 %v5646_v21  ;;  %v5656_v11 = vpop.permute.xlu0 %5655 }
0x28d4   :  { %12185 = vmatprep.subr.mxu0 %v5644_v61 }
0x28d5   :  { %12186 = vmatpush3.msra.mxu0 %v5644_v61 }
0x28d6   :  { %12188 = vmatmul.mubr.msk.f32.vlgmr.msra.gmra.mxu0 %vm280_vm0, %v13945_v27  ;;  %12200 = vmatprep.subr.mxu0 %v13095_v6 }
0x28d7   :  { %12202 = vmatprep.mubr.msk.f32.mxu0 %vm13096_vm1, %v13095_v6 }
0x28d9   :  { %v12737_v31 = vpop.eup %12736 }
0x28da   :  { %v5529_v33 = vmul.f32 %v12737_v31, %v5513_v0 }
0x28dc   :  { %v5537_v37 = vmul.f32 %v11313_v63, %v5529_v33 }
0x28dd   :  { %v12739_v10 = vpop.eup %12738 }
0x28de   :  { %v5530_v30 = vmul.f32 %v12739_v10, %v5514_v8  ;;  %v13952_v1 = vadd.f32 %v11314_v35, %v5537_v37 }
0x28e0   :  { %v5538_v38 = vmul.f32 %v11313_v63, %v5530_v30  ;;  %12176 = vmatprep.mubr.msk.f32.mxu1 %vm280_vm0, %v13952_v1 }
0x28e2   :  { %v13956_v39 = vadd.f32 %v11314_v35, %v5538_v38 }
0x28e4   :  { %12177 = vmatmul.mubr.msk.f32.vlgmr.msra.gmra.mxu1 %vm280_vm0, %v13956_v39 }
0x28e5   :  { %12192 = vmatprep.mubr.msk.f32.mxu1 %vm13096_vm1, %v13095_v6 }
0x2996   :  { %v12189_v40 = vpop.f32.mrf.mxu0 }
0x2997   :  { %v13969_v15 = vadd.f32 %v12189_v40, %v5656_v11 }
0x2998   :  { %v5730_v41 = vpop.f32.mrf.mxu0 }
0x2999   :  { %v13962_v14 = vadd.f32 %v5730_v41, %v5656_v11 }
0x299b   :  { %12191 = vmatpush3.xpose.msk.msra.mxu1 %vm365_vm2, %v13962_v14 }
0x299c   :  { %12195 = vmatprep.subr.mxu1 %v13095_v6 }
0x29a4   :  { %v12178_v42 = vpop.f32.mrf.mxu1 }
0x29a5   :  { %v13977_v47 = vadd.f32 %v12178_v42, %v11315_v16 }
0x29a6   :  { %v5630_v43 = vpop.f32.mrf.mxu1 }
0x29a7   :  { %v13967_v19 = vadd.f32 %v11315_v16, %v5630_v43 }
0x29a9   :  { %12193 = vmatmul.mubr.msk.f32.vlgmr.msra.gmra.mxu1 %vm365_vm2, %v13967_v19 }
0x29aa   :  { %12196 = vmatpush3.xpose.msk.msra.mxu1 %vm365_vm2, %v13969_v15  ;;  %12197 = vmatprep.mubr.msk.f32.mxu1 %vm13096_vm1, %v13095_v6 }
0x29ab   :  { %12205 = vmatprep.subr.mxu1 %v13095_v6 }
0x29ad   :  { %12198 = vmatmul.mubr.msk.f32.vlgmr.msra.gmra.mxu1 %vm365_vm2, %v13977_v47 }
0x29ae   :  { %12207 = vmatprep.mubr.msk.f32.mxu1 %vm13096_vm1, %v13095_v6 }
0x2a69   :  { %v5811_v34 = vpop.f32.mrf.mxu1 }
0x2a6a   :  { %v5891_v46 = vmul.f32 0.35355338, %v5811_v34 }
0x2a6b   :  { %v12194_v20 = vpop.f32.mrf.mxu1 }
0x2a6c   :  { %v5893_v55 = vadd.f32 %v13985_v48, %v5891_v46 }
0x2a6d   :  { %v5887_v44 = vpop.f32.mrf.mxu1 }
0x2a6e   :  { %v5892_v49 = vmul.f32 0.35355338, %v5887_v44  ;;  %v5895_v45 = vsel %vm365_vm2, %v5893_v55, -inf }
0x2a6f   :  { %5896 = vmax.xlane.f32.xlu1 %v5895_v45  ;;  %v12199_v50 = vpop.f32.mrf.mxu1 }
0x2a70   :  { %v5894_v52 = vadd.f32 %v13990_v51, %v5892_v49 }
0x2a72   :  { %v5898_v60 = vsel %vm365_vm2, %v5894_v52, -inf }
0x2a73   :  { %5899 = vmax.xlane.f32.xlu0 %v5898_v60 }
0x2a80   :  { %5993 = vrot.lane.b32.xlu1 %v13969_v15, %s13097_s5 }
0x2a84   :  { %6071 = vrot.lane.b32.xlu1 %v13962_v14, %s13100_s4 }
0x2a89   :  { %5917 = vrot.lane.b32.xlu0 %v13962_v14, %s13097_s5 }
0x2af8   :  { %v5897_v56 = vpop.xlane.xlu1 %5896 }
0x2af9   :  { %v5901_v32 = vsub.f32 %v5893_v55, %v5897_v56 }
0x2afb   :  { %v5903_v59 = vmul.f32 1.442695, %v5901_v32 }
0x2afc   :  { %v5994_v53 = vpop.permute.xlu1 %5993  ;;  %v5900_v0 = vpop.xlane.xlu0 %5899 }
0x2afd   :  { %12740 = vpow2.f32 %v5903_v59  ;;  %v5902_v5 = vsub.f32 %v5894_v52, %v5900_v0  ;;  %12206 = vmatpush3.msra.mxu1 %v5994_v53 }
0x2afe   :  { %12215 = vmatprep.subr.mxu1 %v13095_v6 }
0x2aff   :  { %v5905_v3 = vmul.f32 1.442695, %v5902_v5 }
0x2b00   :  { %v5918_v4 = vpop.permute.xlu0 %5917  ;;  %v6072_v16 = vpop.permute.xlu1 %6071 }
0x2b01   :  { %12742 = vpow2.f32 %v5905_v3  ;;  %12201 = vmatpush3.msra.mxu0 %v5918_v4 }
0x2b02   :  { %12210 = vmatprep.subr.mxu0 %v13095_v6 }
0x2b0a   :  { %v12741_v8 = vpop.eup %12740 }
0x2b0b   :  { %v5907_v9 = vsel %vm365_vm2, %v12741_v8, 0.0 }
0x2b0c   :  { %5908 = vadd.xlane.f32.xlu0 %v5907_v9 }
0x2b0e   :  { %v12743_v12 = vpop.eup %12742 }
0x2b0f   :  { %v5910_v13 = vsel %vm365_vm2, %v12743_v12, 0.0 }
0x2b10   :  { %5911 = vadd.xlane.f32.xlu1 %v5910_v13 }
0x2b21   :  { %6069 = vrot.lane.b32.xlu1 %v13967_v19, %s13100_s4 }
0x2b22   :  { %6149 = vrot.lane.b32.xlu0 %v13969_v15, %s13100_s4 }
0x2b26   :  { %6147 = vrot.lane.b32.xlu0 %v13977_v47, %s13100_s4 }
0x2b95   :  { %v5909_v17 = vpop.xlane.xlu0 %5908 }
0x2b96   :  { %12744 = vrcp.f32 %v5909_v17 }
0x2b99   :  { %v5912_v2 = vpop.xlane.xlu1 %5911  ;;  %v6150_v23 = vpop.permute.xlu0 %6149 }
0x2b9a   :  { %12746 = vrcp.f32 %v5912_v2 }
0x2b9d   :  { %v6070_v25 = vpop.permute.xlu1 %6069  ;;  %v6148_v7 = vpop.permute.xlu0 %6147 }
0x2ba3   :  { %v12745_v18 = vpop.eup %12744 }
0x2ba4   :  { %v5915_v21 = vmul.f32 %v12745_v18, %v12741_v8 }
0x2ba6   :  { %12203 = vmatmul.mubr.msk.f32.vlgmr.msra.gmra.mxu0 %vm365_vm2, %v5915_v21 }
0x2ba7   :  { %v12747_v22 = vpop.eup %12746  ;;  %12211 = vmatpush3.xpose.msk.msra.mxu0 %vm365_vm2, %v6072_v16  ;;  %12212 = vmatprep.mubr.msk.f32.mxu0 %vm13096_vm1, %v13095_v6 }
0x2ba8   :  { %v5916_v24 = vmul.f32 %v12747_v22, %v12743_v12  ;;  %12220 = vmatprep.subr.mxu0 %v13095_v6 }
0x2baa   :  { %12208 = vmatmul.mubr.msk.f32.vlgmr.msra.gmra.mxu1 %vm365_vm2, %v5916_v24  ;;  %12213 = vmatmul.mubr.msk.f32.vlgmr.msra.gmra.mxu0 %vm365_vm2, %v6070_v25 }
0x2bab   :  { %12216 = vmatpush3.xpose.msk.msra.mxu1 %vm365_vm2, %v6150_v23  ;;  %12217 = vmatprep.mubr.msk.f32.mxu1 %vm13096_vm1, %v13095_v6 }
0x2bac   :  { %12225 = vmatprep.subr.mxu1 %v13095_v6  ;;  %12222 = vmatprep.mubr.msk.f32.mxu0 %vm13096_vm1, %v13095_v6 }
0x2bae   :  { %12218 = vmatmul.mubr.msk.f32.vlgmr.msra.gmra.mxu1 %vm365_vm2, %v6148_v7 }
0x2baf   :  { %12227 = vmatprep.mubr.msk.f32.mxu1 %vm13096_vm1, %v13095_v6 }
0x2c66   :  { %v14026_v26 = vpop.f32.mrf.mxu0 }
0x2c68   :  { %v12204_v62 = vpop.f32.mrf.mxu0 }
0x2c6a   :  { %v14028_v54 = vpop.f32.mrf.mxu1  ;;  %v6143_v29 = vpop.f32.mrf.mxu0 }
0x2c6b   :  { %v6225_v57 = vmul.f32 0.35355338, %v6143_v29 }
0x2c6c   :  { %v12209_v61 = vpop.f32.mrf.mxu1  ;;  %v12214_v31 = vpop.f32.mrf.mxu0 }
0x2c6d   :  { %v6227_v63 = vadd.f32 %v13985_v48, %v6225_v57 }
0x2c6e   :  { %v6221_v33 = vpop.f32.mrf.mxu1 }
0x2c6f   :  { %v6226_v35 = vmul.f32 0.35355338, %v6221_v33  ;;  %v6229_v37 = vsel %vm365_vm2, %v6227_v63, -inf }
0x2c70   :  { %6230 = vmax.xlane.f32.xlu1 %v6229_v37  ;;  %v12219_v10 = vpop.f32.mrf.mxu1 }
0x2c71   :  { %v6228_v30 = vadd.f32 %v13990_v51, %v6226_v35 }
0x2c73   :  { %v6232_v38 = vsel %vm365_vm2, %v6228_v30, -inf }
0x2c74   :  { %6233 = vmax.xlane.f32.xlu0 %v6232_v38 }
0x2c81   :  { %6327 = vrot.lane.b32.xlu1 %v13969_v15, %s13099_s6 }
0x2c85   :  { %6405 = vrot.lane.b32.xlu1 %v13962_v14, %s13102_s29 }
0x2c8a   :  { %6251 = vrot.lane.b32.xlu0 %v13962_v14, %s13099_s6 }
0x2cf9   :  { %v6231_v40 = vpop.xlane.xlu1 %6230 }
0x2cfa   :  { %v6235_v11 = vsub.f32 %v6227_v63, %v6231_v40 }
0x2cfc   :  { %v6237_v41 = vmul.f32 1.442695, %v6235_v11 }
0x2cfd   :  { %v6328_v42 = vpop.permute.xlu1 %6327  ;;  %v6234_v43 = vpop.xlane.xlu0 %6233 }
0x2cfe   :  { %12748 = vpow2.f32 %v6237_v41  ;;  %v6236_v34 = vsub.f32 %v6228_v30, %v6234_v43  ;;  %12226 = vmatpush3.msra.mxu1 %v6328_v42 }
0x2cff   :  { %12235 = vmatprep.subr.mxu1 %v13095_v6 }
0x2d00   :  { %v6239_v46 = vmul.f32 1.442695, %v6236_v34 }
0x2d01   :  { %v6252_v20 = vpop.permute.xlu0 %6251  ;;  %v6406_v50 = vpop.permute.xlu1 %6405 }
0x2d02   :  { %12750 = vpow2.f32 %v6239_v46  ;;  %12221 = vmatpush3.msra.mxu0 %v6252_v20 }
0x2d03   :  { %12230 = vmatprep.subr.mxu0 %v13095_v6 }
0x2d0b   :  { %v12749_v55 = vpop.eup %12748 }
0x2d0c   :  { %v6241_v44 = vsel %vm365_vm2, %v12749_v55, 0.0 }
0x2d0d   :  { %6242 = vadd.xlane.f32.xlu0 %v6241_v44 }
0x2d0f   :  { %v12751_v49 = vpop.eup %12750 }
0x2d10   :  { %v6244_v45 = vsel %vm365_vm2, %v12751_v49, 0.0 }
0x2d11   :  { %6245 = vadd.xlane.f32.xlu1 %v6244_v45 }
0x2d22   :  { %6403 = vrot.lane.b32.xlu1 %v13967_v19, %s13102_s29 }
0x2d23   :  { %6483 = vrot.lane.b32.xlu0 %v13969_v15, %s13102_s29 }
0x2d27   :  { %6481 = vrot.lane.b32.xlu0 %v13977_v47, %s13102_s29 }
0x2d96   :  { %v6243_v52 = vpop.xlane.xlu0 %6242 }
0x2d97   :  { %12752 = vrcp.f32 %v6243_v52 }
0x2d9a   :  { %v6246_v60 = vpop.xlane.xlu1 %6245  ;;  %v6484_v53 = vpop.permute.xlu0 %6483 }
0x2d9b   :  { %12754 = vrcp.f32 %v6246_v60 }
0x2d9e   :  { %v6404_v5 = vpop.permute.xlu1 %6403  ;;  %v6482_v3 = vpop.permute.xlu0 %6481 }
0x2da4   :  { %v12753_v56 = vpop.eup %12752 }
0x2da5   :  { %v6249_v32 = vmul.f32 %v12753_v56, %v12749_v55 }
0x2da7   :  { %12223 = vmatmul.mubr.msk.f32.vlgmr.msra.gmra.mxu0 %vm365_vm2, %v6249_v32 }
0x2da8   :  { %v12755_v59 = vpop.eup %12754  ;;  %12231 = vmatpush3.xpose.msk.msra.mxu0 %vm365_vm2, %v6406_v50  ;;  %12232 = vmatprep.mubr.msk.f32.mxu0 %vm13096_vm1, %v13095_v6 }
0x2da9   :  { %v6250_v0 = vmul.f32 %v12755_v59, %v12751_v49  ;;  %12240 = vmatprep.subr.mxu0 %v13095_v6 }
0x2dab   :  { %12228 = vmatmul.mubr.msk.f32.vlgmr.msra.gmra.mxu1 %vm365_vm2, %v6250_v0  ;;  %12233 = vmatmul.mubr.msk.f32.vlgmr.msra.gmra.mxu0 %vm365_vm2, %v6404_v5 }
0x2dac   :  { %12236 = vmatpush3.xpose.msk.msra.mxu1 %vm365_vm2, %v6484_v53  ;;  %12237 = vmatprep.mubr.msk.f32.mxu1 %vm13096_vm1, %v13095_v6 }
0x2dad   :  { %12245 = vmatprep.subr.mxu1 %v13095_v6  ;;  %12242 = vmatprep.mubr.msk.f32.mxu0 %vm13096_vm1, %v13095_v6 }
0x2daf   :  { %12238 = vmatmul.mubr.msk.f32.vlgmr.msra.gmra.mxu1 %vm365_vm2, %v6482_v3 }
0x2db0   :  { %12247 = vmatprep.mubr.msk.f32.mxu1 %vm13096_vm1, %v13095_v6 }
0x2e67   :  { %v14066_v4 = vpop.f32.mrf.mxu0 }
0x2e69   :  { %v12224_v8 = vpop.f32.mrf.mxu0 }
0x2e6b   :  { %v14068_v9 = vpop.f32.mrf.mxu1  ;;  %v6477_v12 = vpop.f32.mrf.mxu0 }
0x2e6c   :  { %v6559_v13 = vmul.f32 0.35355338, %v6477_v12 }
0x2e6d   :  { %v12229_v16 = vpop.f32.mrf.mxu1  ;;  %v12234_v17 = vpop.f32.mrf.mxu0 }
0x2e6e   :  { %v6561_v2 = vadd.f32 %v13985_v48, %v6559_v13 }
0x2e6f   :  { %v6555_v18 = vpop.f32.mrf.mxu1 }
0x2e70   :  { %v6560_v21 = vmul.f32 0.35355338, %v6555_v18  ;;  %v6563_v22 = vsel %vm365_vm2, %v6561_v2, -inf }
0x2e71   :  { %6564 = vmax.xlane.f32.xlu1 %v6563_v22  ;;  %v12239_v23 = vpop.f32.mrf.mxu1 }
0x2e72   :  { %v6562_v24 = vadd.f32 %v13990_v51, %v6560_v21 }
0x2e74   :  { %v6566_v25 = vsel %vm365_vm2, %v6562_v24, -inf }
0x2e75   :  { %6567 = vmax.xlane.f32.xlu0 %v6566_v25  ;;  %v7104_v25 = vld [vmem:[%s14680_s23 + $0x18] sm:$0xff] }
0x2e82   :  { %6661 = vrot.lane.b32.xlu1 %v13969_v15, %s13103_s14 }
0x2e86   :  { %6739 = vrot.lane.b32.xlu1 %v13962_v14, %s13106_s11 }
0x2e8b   :  { %6585 = vrot.lane.b32.xlu0 %v13962_v14, %s13103_s14 }
0x2efa   :  { %v6565_v7 = vpop.xlane.xlu1 %6564 }
0x2efb   :  { %v6569_v62 = vsub.f32 %v6561_v2, %v6565_v7  ;;  %v7103_v7 = vld [vmem:[%s14680_s23 + $0x10] sm:$0xff] }
0x2efd   :  { %v6571_v29 = vmul.f32 1.442695, %v6569_v62  ;;  %v7102_v62 = vld [vmem:[%s14680_s23 + $0x8] sm:$0xff] }
0x2efe   :  { %v6662_v57 = vpop.permute.xlu1 %6661  ;;  %v6568_v61 = vpop.xlane.xlu0 %6567 }
0x2eff   :  { %12756 = vpow2.f32 %v6571_v29  ;;  %v6570_v31 = vsub.f32 %v6562_v24, %v6568_v61  ;;  %12246 = vmatpush3.msra.mxu1 %v6662_v57  ;;  %v7101_v29 = vld [vmem:[%s14680_s23] sm:$0xff] }
0x2f00   :  { %12255 = vmatprep.subr.mxu1 %v13095_v6 }
0x2f01   :  { %v6573_v63 = vmul.f32 1.442695, %v6570_v31 }
0x2f02   :  { %v6586_v33 = vpop.permute.xlu0 %6585  ;;  %v6740_v38 = vpop.permute.xlu1 %6739 }
0x2f03   :  { %12758 = vpow2.f32 %v6573_v63  ;;  %12241 = vmatpush3.msra.mxu0 %v6586_v33 }
0x2f04   :  { %12250 = vmatprep.subr.mxu0 %v13095_v6 }
0x2f0c   :  { %v12757_v35 = vpop.eup %12756 }
0x2f0d   :  { %v6575_v37 = vsel %vm365_vm2, %v12757_v35, 0.0 }
0x2f0e   :  { %6576 = vadd.xlane.f32.xlu0 %v6575_v37 }
0x2f10   :  { %v12759_v10 = vpop.eup %12758 }
0x2f11   :  { %v6578_v30 = vsel %vm365_vm2, %v12759_v10, 0.0 }
0x2f12   :  { %6579 = vadd.xlane.f32.xlu1 %v6578_v30 }
0x2f23   :  { %6737 = vrot.lane.b32.xlu1 %v13967_v19, %s13106_s11 }
0x2f24   :  { %6817 = vrot.lane.b32.xlu0 %v13969_v15, %s13106_s11 }
0x2f28   :  { %6815 = vrot.lane.b32.xlu0 %v13977_v47, %s13106_s11 }
0x2f97   :  { %v6577_v40 = vpop.xlane.xlu0 %6576 }
0x2f98   :  { %12760 = vrcp.f32 %v6577_v40 }
0x2f9b   :  { %v6580_v11 = vpop.xlane.xlu1 %6579  ;;  %v6818_v34 = vpop.permute.xlu0 %6817 }
0x2f9c   :  { %12762 = vrcp.f32 %v6580_v11 }
0x2f9f   :  { %v6738_v47 = vpop.permute.xlu1 %6737  ;;  %v6816_v46 = vpop.permute.xlu0 %6815 }
0x2fa5   :  { %v12761_v41 = vpop.eup %12760 }
0x2fa6   :  { %v6583_v42 = vmul.f32 %v12761_v41, %v12757_v35 }
0x2fa8   :  { %12243 = vmatmul.mubr.msk.f32.vlgmr.msra.gmra.mxu0 %vm365_vm2, %v6583_v42 }
0x2fa9   :  { %v12763_v43 = vpop.eup %12762  ;;  %12251 = vmatpush3.xpose.msk.msra.mxu0 %vm365_vm2, %v6740_v38  ;;  %12252 = vmatprep.mubr.msk.f32.mxu0 %vm13096_vm1, %v13095_v6 }
0x2faa   :  { %v6584_v19 = vmul.f32 %v12763_v43, %v12759_v10  ;;  %12260 = vmatprep.subr.mxu0 %v13095_v6 }
0x2fac   :  { %12248 = vmatmul.mubr.msk.f32.vlgmr.msra.gmra.mxu1 %vm365_vm2, %v6584_v19  ;;  %12253 = vmatmul.mubr.msk.f32.vlgmr.msra.gmra.mxu0 %vm365_vm2, %v6738_v47  ;;  %v11344_v19 = vld [vmem:[%s14681_s26] ss:$0 sm:$0xff] }
0x2fad   :  { %12256 = vmatpush3.xpose.msk.msra.mxu1 %vm365_vm2, %v6818_v34  ;;  %12257 = vmatprep.mubr.msk.f32.mxu1 %vm13096_vm1, %v13095_v6 }
0x2fae   :  { %12265 = vmatprep.subr.mxu1 %v13095_v6  ;;  %12262 = vmatprep.mubr.msk.f32.mxu0 %vm13096_vm1, %v13095_v6 }
0x2fb0   :  { %12258 = vmatmul.mubr.msk.f32.vlgmr.msra.gmra.mxu1 %vm365_vm2, %v6816_v46 }
0x2fb1   :  { %12267 = vmatprep.mubr.msk.f32.mxu1 %vm13096_vm1, %v13095_v6 }
0x3068   :  { %v6657_v20 = vpop.f32.mrf.mxu0 }
0x306a   :  { %v12244_v55 = vpop.f32.mrf.mxu0 }
0x306c   :  { %v6733_v44 = vpop.f32.mrf.mxu1  ;;  %v6811_v49 = vpop.f32.mrf.mxu0 }
0x306d   :  { %v6893_v45 = vmul.f32 0.35355338, %v6811_v49 }
0x306e   :  { %v12249_v50 = vpop.f32.mrf.mxu1  ;;  %v12254_v52 = vpop.f32.mrf.mxu0 }
0x306f   :  { %v6895_v60 = vadd.f32 %v13985_v48, %v6893_v45 }
0x3070   :  { %v6889_v56 = vpop.f32.mrf.mxu1 }
0x3071   :  { %v6894_v32 = vmul.f32 0.35355338, %v6889_v56  ;;  %v6897_v59 = vsel %vm365_vm2, %v6895_v60, -inf }
0x3072   :  { %6898 = vmax.xlane.f32.xlu1 %v6897_v59  ;;  %v12259_v53 = vpop.f32.mrf.mxu1 }
0x3073   :  { %v6896_v0 = vadd.f32 %v13990_v51, %v6894_v32 }
0x3075   :  { %v6900_v5 = vsel %vm365_vm2, %v6896_v0, -inf }
0x3076   :  { %6901 = vmax.xlane.f32.xlu0 %v6900_v5  ;;  %v7243_v5 = vld [vmem:[%s14682_s8 + $0x10] sm:$0xff] }
0x30fb   :  { %v6899_v3 = vpop.xlane.xlu1 %6898 }
0x30fc   :  { %v6903_v8 = vsub.f32 %v6895_v60, %v6899_v3  ;;  %v7242_v3 = vld [vmem:[%s14682_s8 + $0x8] sm:$0xff] }
0x30fe   :  { %v6905_v12 = vmul.f32 1.442695, %v6903_v8  ;;  %v7241_v8 = vld [vmem:[%s14682_s8] sm:$0xff] }
0x30ff   :  { %v6902_v13 = vpop.xlane.xlu0 %6901 }
0x3100   :  { %12764 = vpow2.f32 %v6905_v12  ;;  %v6904_v16 = vsub.f32 %v6896_v0, %v6902_v13  ;;  %v7244_v0 = vld [vmem:[%s14682_s8 + $0x18] sm:$0xff]  ;;  %v7341_v13 = vld [vmem:[%s14683_s28 + $0x30] sm:$0xff] }
0x3101   :  { %v7342_v12 = vld [vmem:[%s14683_s28 + $0x38] sm:$0xff] }
0x3102   :  { %v6907_v17 = vmul.f32 1.442695, %v6904_v16  ;;  %v7340_v16 = vld [vmem:[%s14683_s28 + $0x28] sm:$0xff] }
0x3104   :  { %12766 = vpow2.f32 %v6907_v17  ;;  %v7339_v17 = vld [vmem:[%s14683_s28 + $0x20] sm:$0xff] }
0x310d   :  { %v12765_v48 = vpop.eup %12764 }
0x310e   :  { %v6909_v2 = vsel %vm365_vm2, %v12765_v48, 0.0 }
0x310f   :  { %6910 = vadd.xlane.f32.xlu0 %v6909_v2 }
0x3111   :  { %v12767_v18 = vpop.eup %12766 }
0x3112   :  { %v6912_v21 = vsel %vm365_vm2, %v12767_v18, 0.0 }
0x3113   :  { %6913 = vadd.xlane.f32.xlu1 %v6912_v21 }
0x3124   :  { %6995 = vrot.lane.b32.xlu1 %v13969_v15, %s13105_s10 }
0x3125   :  { %6919 = vrot.lane.b32.xlu0 %v13962_v14, %s13105_s10 }
0x3128   :  { %7073 = vrot.lane.b32.xlu1 %v14066_v4, %s13086_s18 }
0x3129   :  { %7075 = vrot.lane.b32.xlu0 %v14068_v9, %s13086_s18 }
0x312c   :  { %7081 = vrot.lane.b32.xlu1 %v6657_v20, %s13090_s20 }
0x312d   :  { %7083 = vrot.lane.b32.xlu0 %v6733_v44, %s13090_s20 }
0x3198   :  { %v6911_v51 = vpop.xlane.xlu0 %6910 }
0x3199   :  { %12768 = vrcp.f32 %v6911_v51 }
0x319c   :  { %v6914_v22 = vpop.xlane.xlu1 %6913  ;;  %v6920_v23 = vpop.permute.xlu0 %6919 }
0x319d   :  { %12770 = vrcp.f32 %v6914_v22  ;;  %12261 = vmatpush3.msra.mxu0 %v6920_v23 }
0x319e   :  { %12270 = vmatprep.subr.mxu0 %v7104_v25 }
0x31a0   :  { %v6996_v14 = vpop.permute.xlu1 %6995  ;;  %v7076_v35 = vpop.permute.xlu0 %7075 }
0x31a1   :  { %12266 = vmatpush3.msra.mxu1 %v6996_v14  ;;  %v7096_v41 = vsel %vm365_vm2, %v14028_v54, %v7076_v35  ;;  %v11347_v14 = vld [vmem:[#allocation14 + $0x2] ss:$0 sm:$0xff] }
0x31a2   :  { %12281 = vmatprep.subr.mxu1 %v7244_v0 }
0x31a4   :  { %v7074_v33 = vpop.permute.xlu1 %7073  ;;  %v7084_v30 = vpop.permute.xlu0 %7083 }
0x31a5   :  { %v7095_v10 = vsel %vm365_vm2, %v14026_v26, %v7074_v33  ;;  %v7098_v42 = vsel %vm1723_vm4, %v7096_v41, %v7084_v30  ;;  %v11349_v33 = vld [vmem:[%s14684_s1] ss:$0 sm:$0xff] }
0x31a6   :  { %v12769_v15 = vpop.eup %12768 }
0x31a7   :  { %v6917_v4 = vmul.f32 %v12769_v15, %v12765_v48 }
0x31a8   :  { %v7082_v37 = vpop.permute.xlu1 %7081 }
0x31a9   :  { %12263 = vmatmul.mubr.msk.f32.vlgmr.msra.gmra.mxu0 %vm365_vm2, %v6917_v4  ;;  %v7097_v38 = vsel %vm1723_vm4, %v7095_v10, %v7082_v37 }
0x31aa   :  { %v12771_v9 = vpop.eup %12770  ;;  %12271 = vmatpush3.msra.mxu0 %v7104_v25  ;;  %v11348_v25 = vld [vmem:[#allocation14 + $0x3] ss:$0 sm:$0xff] }
0x31ab   :  { %v6918_v24 = vmul.f32 %v12771_v9, %v12767_v18  ;;  %12272 = vmatprep.subr.mxu0 %v7103_v7 }
0x31ac   :  { %12273 = vmatpush3.msra.mxu0 %v7103_v7 }
0x31ad   :  { %12268 = vmatmul.mubr.msk.f32.vlgmr.msra.gmra.mxu1 %vm365_vm2, %v6918_v24  ;;  %12274 = vmatprep.subr.mxu0 %v7102_v62 }
0x31ae   :  { %12275 = vmatpush3.msra.mxu0 %v7102_v62  ;;  %12282 = vmatpush3.msra.mxu1 %v7244_v0 }
0x31af   :  { %12276 = vmatprep.subr.mxu0 %v7101_v29  ;;  %12283 = vmatprep.subr.mxu1 %v7243_v5 }
0x31b0   :  { %12277 = vmatpush3.msra.mxu0 %v7101_v29  ;;  %12284 = vmatpush3.msra.mxu1 %v7243_v5 }
0x31b1   :  { %12285 = vmatprep.subr.mxu1 %v7242_v3  ;;  %12292 = vmatprep.subr.mxu0 %v7342_v12 }
0x31b2   :  { %12286 = vmatpush3.msra.mxu1 %v7242_v3 }
0x31b3   :  { %12287 = vmatprep.subr.mxu1 %v7241_v8 }
0x31b4   :  { %12288 = vmatpush3.msra.mxu1 %v7241_v8 }
0x3269   :  { %v6991_v57 = vpop.f32.mrf.mxu0 }
0x326a   :  { %7089 = vrot.lane.b32.xlu1 %v6991_v57, %s13108_s16  ;;  %v7338_v57 = vld [vmem:[%s14683_s28 + $0x18] sm:$0xff] }
0x326b   :  { %v12264_v61 = vpop.f32.mrf.mxu0 }
0x326c   :  { %v7337_v61 = vld [vmem:[%s14683_s28 + $0x10] sm:$0xff] }
0x326d   :  { %v7067_v31 = vpop.f32.mrf.mxu1 }
0x326e   :  { %7091 = vrot.lane.b32.xlu0 %v7067_v31, %s13108_s16  ;;  %v7336_v31 = vld [vmem:[%s14683_s28 + $0x8] sm:$0xff] }
0x326f   :  { %v12269_v63 = vpop.f32.mrf.mxu1 }
0x3270   :  { %v7335_v63 = vld [vmem:[%s14683_s28] sm:$0xff] }
0x32dc   :  { %v7090_v40 = vpop.permute.xlu1 %7089 }
0x32dd   :  { %v7099_v11 = vsel %vm1726_vm3, %v7097_v38, %v7090_v40 }
0x32de   :  { %12278 = vmatprep.mubr.msk.f32.mxu0 %vm280_vm0, %v7099_v11  ;;  %v11352_v11 = vld [vmem:[%s14685_s21] ss:$0 sm:$0xff] }
0x32e0   :  { %v7092_v43 = vpop.permute.xlu0 %7091 }
0x32e1   :  { %v7100_v34 = vsel %vm1726_vm3, %v7098_v42, %v7092_v43 }
0x32e2   :  { %12279 = vmatmul.mubr.msk.f32.vlgmr.msra.gmra.mxu0 %vm280_vm0, %v7100_v34 }
0x32e3   :  { %12293 = vmatpush3.msra.mxu0 %v7342_v12 }
0x32e4   :  { %12294 = vmatprep.subr.mxu0 %v7341_v13 }
0x32e5   :  { %12295 = vmatpush3.msra.mxu0 %v7341_v13 }
0x32e6   :  { %12296 = vmatprep.subr.mxu0 %v7340_v16 }
0x32e7   :  { %12297 = vmatpush3.msra.mxu0 %v7340_v16  ;;  %v11355_v16 = vld [vmem:[#allocation14 + $0x4] ss:$0 sm:$0xff] }
0x32e8   :  { %12298 = vmatprep.subr.mxu0 %v7339_v17 }
0x32e9   :  { %12299 = vmatpush3.msra.mxu0 %v7339_v17 }
0x32ea   :  { %12300 = vmatprep.subr.mxu0 %v7338_v57 }
0x32eb   :  { %12301 = vmatpush3.msra.mxu0 %v7338_v57 }
0x32ec   :  { %12302 = vmatprep.subr.mxu0 %v7337_v61 }
0x32ed   :  { %12303 = vmatpush3.msra.mxu0 %v7337_v61 }
0x32ee   :  { %12304 = vmatprep.subr.mxu0 %v7336_v31 }
0x32ef   :  { %12305 = vmatpush3.msra.mxu0 %v7336_v31 }
0x32f0   :  { %12306 = vmatprep.subr.mxu0 %v7335_v63 }
0x32f1   :  { %12307 = vmatpush3.msra.mxu0 %v7335_v63 }
0x32f2   :  { %12332 = vmatprep.subr.mxu0 %v13095_v6 }
0x33a2   :  { %v12280_v26 = vpop.f32.mrf.mxu0 }
0x33a3   :  { %v7190_v47 = vadd.f32 %v12280_v26, %v11344_v19 }
0x33a4   :  { %v7184_v46 = vpop.f32.mrf.mxu0 }
0x33a5   :  { %v7194_v20 = vadd.f32 %v7190_v47, %v13956_v39  ;;  %v7185_v55 = vadd.f32 %v11344_v19, %v7184_v46 }
0x33a7   :  { %v7193_v44 = vadd.f32 %v7185_v55, %v13952_v1  ;;  %v7202_v49 = vsel %vm280_vm0, %v7194_v20, 0.0 }
0x33a8   :  { %7203 = vadd.xlane.f32.xlu0 %v7202_v49 }
0x33a9   :  { %v7199_v54 = vsel %vm280_vm0, %v7193_v44, 0.0 }
0x33aa   :  { %7200 = vadd.xlane.f32.xlu1 %v7199_v54 }
0x3431   :  { %v7204_v45 = vpop.xlane.xlu0 %7203 }
0x3432   :  { %v7206_v50 = vmul.f32 0.03125, %v7204_v45 }
0x3433   :  { %v7201_v52 = vpop.xlane.xlu1 %7200 }
0x3434   :  { %v7208_v60 = vsub.f32 %v7194_v20, %v7206_v50  ;;  %v7205_v56 = vmul.f32 0.03125, %v7201_v52 }
0x3436   :  { %v7207_v32 = vsub.f32 %v7193_v44, %v7205_v56  ;;  %v7210_v39 = vmul.f32 %v7208_v60, %v7208_v60 }
0x3438   :  { %v7214_v59 = vsel %vm280_vm0, %v7210_v39, 0.0  ;;  %v7209_v1 = vmul.f32 %v7207_v32, %v7207_v32  ;;  %v7482_v39 = vld [vmem:[#allocation10 + $0x30] sm:$0xff] }
0x3439   :  { %7215 = vadd.xlane.f32.xlu1 %v7214_v59  ;;  %v7481_v59 = vld [vmem:[#allocation10 + $0x28] sm:$0xff] }
0x343a   :  { %v7211_v53 = vsel %vm280_vm0, %v7209_v1, 0.0  ;;  %v7480_v1 = vld [vmem:[#allocation10 + $0x20] sm:$0xff] }
0x343b   :  { %7212 = vadd.xlane.f32.xlu0 %v7211_v53 }
0x34c2   :  { %v7216_v48 = vpop.xlane.xlu1 %7215 }
0x34c3   :  { %v7218_v2 = vmul.f32 0.03125, %v7216_v48 }
0x34c4   :  { %v7213_v18 = vpop.xlane.xlu0 %7212 }
0x34c5   :  { %v7220_v21 = vadd.f32 1e-05, %v7218_v2  ;;  %v7217_v51 = vmul.f32 0.03125, %v7213_v18 }
0x34c7   :  { %12772 = vrsqrt.f32 %v7220_v21  ;;  %v7219_v22 = vadd.f32 1e-05, %v7217_v51  ;;  %v11356_v21 = vld [vmem:[#allocation14 + $0x5] ss:$0 sm:$0xff] }
0x34c9   :  { %12774 = vrsqrt.f32 %v7219_v22 }
0x34d4   :  { %v12773_v23 = vpop.eup %12772 }
0x34d5   :  { %v7224_v15 = vmul.f32 %v12773_v23, %v7208_v60 }
0x34d6   :  { %v12775_v4 = vpop.eup %12774 }
0x34d7   :  { %v7223_v9 = vmul.f32 %v12775_v4, %v7207_v32  ;;  %v7232_v24 = vmul.f32 %v11347_v14, %v7224_v15  ;;  %v7483_v32 = vld [vmem:[#allocation10 + $0x38] sm:$0xff] }
0x34d8   :  { %12311 = vmatprep.subr.mxu1 %v7483_v32 }
0x34d9   :  { %v7231_v7 = vmul.f32 %v11347_v14, %v7223_v9  ;;  %v7240_v29 = vadd.f32 %v11348_v25, %v7232_v24  ;;  %v11358_v14 = vld [vmem:[%s14676_s3 + $0x1] ss:$0 sm:$0xff] }
0x34db   :  { %v7239_v62 = vadd.f32 %v11348_v25, %v7231_v7 }
0x34dd   :  { %12289 = vmatprep.mubr.msk.f32.mxu1 %vm280_vm0, %v7239_v62 }
0x34de   :  { %12290 = vmatmul.mubr.msk.f32.vlgmr.msra.gmra.mxu1 %vm280_vm0, %v7240_v29 }
0x34df   :  { %12312 = vmatpush3.msra.mxu1 %v7483_v32 }
0x34e0   :  { %12313 = vmatprep.subr.mxu1 %v7482_v39 }
0x34e1   :  { %12314 = vmatpush3.msra.mxu1 %v7482_v39 }
0x34e2   :  { %12315 = vmatprep.subr.mxu1 %v7481_v59 }
0x34e3   :  { %12316 = vmatpush3.msra.mxu1 %v7481_v59 }
0x34e4   :  { %12317 = vmatprep.subr.mxu1 %v7480_v1 }
0x34e5   :  { %12318 = vmatpush3.msra.mxu1 %v7480_v1 }
0x34e6   :  { %12322 = vmatprep.subr.mxu1 %v13095_v6 }
0x359e   :  { %v12291_v35 = vpop.f32.mrf.mxu1 }
0x359f   :  { %v7330_v37 = vadd.f32 %v12291_v35, %v11349_v33 }
0x35a0   :  { %v7324_v10 = vpop.f32.mrf.mxu1 }
0x35a1   :  { %v7325_v30 = vadd.f32 %v11349_v33, %v7324_v10  ;;  %v7334_v40 = vmax.f32 %v7330_v37, 0.0 }
0x35a3   :  { %v7333_v38 = vmax.f32 %v7325_v30, 0.0 }
0x35a5   :  { %12308 = vmatprep.mubr.msk.f32.mxu0 %vm1978_vm5, %v7333_v38 }
0x35a6   :  { %12309 = vmatmul.mubr.msk.f32.vlgmr.msra.gmra.mxu0 %vm1978_vm5, %v7334_v40 }
0x35a7   :  { %12334 = vmatprep.mubr.msk.f32.mxu0 %vm13096_vm1, %v13095_v6 }
0x3666   :  { %v12310_v41 = vpop.f32.mrf.mxu0 }
0x3667   :  { %v7428_v42 = vadd.f32 %v12310_v41, %v11352_v11 }
0x3668   :  { %v7422_v43 = vpop.f32.mrf.mxu0 }
0x3669   :  { %v7432_v34 = vadd.f32 %v7428_v42, %v7240_v29  ;;  %v7423_v19 = vadd.f32 %v11352_v11, %v7422_v43 }
0x366b   :  { %v7431_v26 = vadd.f32 %v7423_v19, %v7239_v62  ;;  %v7440_v47 = vsel %vm280_vm0, %v7432_v34, 0.0 }
0x366c   :  { %7441 = vadd.xlane.f32.xlu1 %v7440_v47 }
0x366d   :  { %v7437_v46 = vsel %vm280_vm0, %v7431_v26, 0.0 }
0x366e   :  { %7438 = vadd.xlane.f32.xlu0 %v7437_v46 }
0x36f5   :  { %v7442_v20 = vpop.xlane.xlu1 %7441 }
0x36f6   :  { %v7444_v55 = vmul.f32 0.03125, %v7442_v20 }
0x36f7   :  { %v7439_v44 = vpop.xlane.xlu0 %7438 }
0x36f8   :  { %v7446_v49 = vsub.f32 %v7432_v34, %v7444_v55  ;;  %v7443_v54 = vmul.f32 0.03125, %v7439_v44 }
0x36fa   :  { %v7445_v45 = vsub.f32 %v7431_v26, %v7443_v54  ;;  %v7448_v50 = vmul.f32 %v7446_v49, %v7446_v49 }
0x36fc   :  { %v7452_v52 = vsel %vm280_vm0, %v7448_v50, 0.0  ;;  %v7447_v60 = vmul.f32 %v7445_v45, %v7445_v45 }
0x36fd   :  { %7453 = vadd.xlane.f32.xlu1 %v7452_v52 }
0x36fe   :  { %v7449_v56 = vsel %vm280_vm0, %v7447_v60, 0.0 }
0x36ff   :  { %7450 = vadd.xlane.f32.xlu0 %v7449_v56 }
0x3786   :  { %v7454_v53 = vpop.xlane.xlu1 %7453 }
0x3787   :  { %v7456_v0 = vmul.f32 0.03125, %v7454_v53 }
0x3788   :  { %v7451_v5 = vpop.xlane.xlu0 %7450 }
0x3789   :  { %v7458_v3 = vadd.f32 1e-05, %v7456_v0  ;;  %v7455_v8 = vmul.f32 0.03125, %v7451_v5 }
0x378b   :  { %12776 = vrsqrt.f32 %v7458_v3  ;;  %v7457_v12 = vadd.f32 1e-05, %v7455_v8 }
0x378d   :  { %12778 = vrsqrt.f32 %v7457_v12 }
0x3798   :  { %v12777_v13 = vpop.eup %12776 }
0x3799   :  { %v7462_v17 = vmul.f32 %v12777_v13, %v7446_v49 }
0x379a   :  { %v12779_v48 = vpop.eup %12778 }
0x379b   :  { %v7461_v2 = vmul.f32 %v12779_v48, %v7445_v45  ;;  %v7470_v18 = vmul.f32 %v11355_v16, %v7462_v17 }
0x379d   :  { %v7469_v51 = vmul.f32 %v11355_v16, %v7461_v2  ;;  %v14175_v23 = vadd.f32 %v11356_v21, %v7470_v18 }
0x379f   :  { %v14173_v22 = vadd.f32 %v11356_v21, %v7469_v51 }
0x37a1   :  { %12319 = vmatprep.mubr.msk.f32.mxu1 %vm280_vm0, %v14173_v22 }
0x37a2   :  { %12320 = vmatmul.mubr.msk.f32.vlgmr.msra.gmra.mxu1 %vm280_vm0, %v14175_v23 }
0x37a3   :  { %12324 = vmatprep.mubr.msk.f32.mxu1 %vm13096_vm1, %v13095_v6 }
0x3862   :  { %v12321_v15 = vpop.f32.mrf.mxu1 }
0x3863   :  { %v14184_v4 = vadd.f32 %v12321_v15, %v11358_v14 }
0x3864   :  { %v7564_v9 = vpop.f32.mrf.mxu1 }
0x3865   :  { %v14186_v24 = vadd.f32 %v11358_v14, %v7564_v9  ;;  %7651 = vrot.lane.b32.xlu1 %v14184_v4, %s13097_s5 }
0x3867   :  { %7574 = vrot.lane.b32.xlu0 %v14186_v24, %s13097_s5 }
0x38d7   :  { %v7652_v7 = vpop.permute.xlu1 %7651 }
0x38d9   :  { %v7575_v25 = vpop.permute.xlu0 %7574 }
0x38da   :  { %12323 = vmatpush3.xpose.msk.msra.mxu1 %vm365_vm2, %v7575_v25 }
0x38db   :  { %12327 = vmatprep.subr.mxu1 %v13095_v6 }
0x38dd   :  { %12325 = vmatmul.mubr.msk.f32.vlgmr.msra.gmra.mxu1 %vm365_vm2, %v14186_v24 }
0x38de   :  { %12328 = vmatpush3.xpose.msk.msra.mxu1 %vm365_vm2, %v7652_v7  ;;  %12329 = vmatprep.mubr.msk.f32.mxu1 %vm13096_vm1, %v13095_v6 }
0x38df   :  { %12337 = vmatprep.subr.mxu1 %v13095_v6 }
0x38e1   :  { %12330 = vmatmul.mubr.msk.f32.vlgmr.msra.gmra.mxu1 %vm365_vm2, %v14184_v4 }
0x38e2   :  { %12339 = vmatprep.mubr.msk.f32.mxu1 %vm13096_vm1, %v13095_v6 }
0x399d   :  { %v7646_v62 = vpop.f32.mrf.mxu1 }
0x399e   :  { %v7727_v29 = vmul.f32 0.35355338, %v7646_v62 }
0x399f   :  { %v12326_v57 = vpop.f32.mrf.mxu1 }
0x39a0   :  { %v7729_v61 = vadd.f32 %v7727_v29, %v13763_v28 }
0x39a1   :  { %v7723_v31 = vpop.f32.mrf.mxu1 }
0x39a2   :  { %v7728_v63 = vmul.f32 0.35355338, %v7723_v31  ;;  %v7731_v33 = vsel %vm365_vm2, %v7729_v61, -inf }
0x39a3   :  { %7732 = vmax.xlane.f32.xlu1 %v7731_v33  ;;  %v12331_v35 = vpop.f32.mrf.mxu1 }
0x39a4   :  { %v7730_v37 = vadd.f32 %v7728_v63, %v13767_v36 }
0x39a6   :  { %v7734_v10 = vsel %vm365_vm2, %v7730_v37, -inf }
0x39a7   :  { %7735 = vmax.xlane.f32.xlu0 %v7734_v10 }
0x39b4   :  { %7829 = vrot.lane.b32.xlu1 %v14184_v4, %s13098_s9 }
0x39b8   :  { %7907 = vrot.lane.b32.xlu1 %v14186_v24, %s13099_s6 }
0x39bd   :  { %7753 = vrot.lane.b32.xlu0 %v14186_v24, %s13098_s9 }
0x3a2c   :  { %v7733_v30 = vpop.xlane.xlu1 %7732 }
0x3a2d   :  { %v7737_v38 = vsub.f32 %v7729_v61, %v7733_v30 }
0x3a2f   :  { %v7739_v40 = vmul.f32 1.442695, %v7737_v38 }
0x3a30   :  { %v7830_v11 = vpop.permute.xlu1 %7829  ;;  %v7736_v41 = vpop.xlane.xlu0 %7735 }
0x3a31   :  { %12780 = vpow2.f32 %v7739_v40  ;;  %v7738_v42 = vsub.f32 %v7730_v37, %v7736_v41  ;;  %12338 = vmatpush3.msra.mxu1 %v7830_v11 }
0x3a32   :  { %12347 = vmatprep.subr.mxu1 %v13095_v6 }
0x3a33   :  { %v7741_v43 = vmul.f32 1.442695, %v7738_v42 }
0x3a34   :  { %v7754_v34 = vpop.permute.xlu0 %7753  ;;  %v7908_v20 = vpop.permute.xlu1 %7907 }
0x3a35   :  { %12782 = vpow2.f32 %v7741_v43  ;;  %12333 = vmatpush3.msra.mxu0 %v7754_v34 }
0x3a36   :  { %12342 = vmatprep.subr.mxu0 %v13095_v6 }
0x3a3e   :  { %v12781_v19 = vpop.eup %12780 }
0x3a3f   :  { %v7743_v26 = vsel %vm365_vm2, %v12781_v19, 0.0 }
0x3a40   :  { %7744 = vadd.xlane.f32.xlu0 %v7743_v26 }
0x3a42   :  { %v12783_v47 = vpop.eup %12782 }
0x3a43   :  { %v7746_v46 = vsel %vm365_vm2, %v12783_v47, 0.0 }
0x3a44   :  { %7747 = vadd.xlane.f32.xlu1 %v7746_v46 }
0x3a55   :  { %7905 = vrot.lane.b32.xlu1 %v14186_v24, %s13100_s4 }
0x3a56   :  { %7985 = vrot.lane.b32.xlu0 %v14184_v4, %s13099_s6 }
0x3a5a   :  { %7983 = vrot.lane.b32.xlu0 %v14184_v4, %s13100_s4 }
0x3ac9   :  { %v7745_v55 = vpop.xlane.xlu0 %7744 }
0x3aca   :  { %12784 = vrcp.f32 %v7745_v55 }
0x3acd   :  { %v7748_v44 = vpop.xlane.xlu1 %7747  ;;  %v7986_v50 = vpop.permute.xlu0 %7985 }
0x3ace   :  { %12786 = vrcp.f32 %v7748_v44 }
0x3ad1   :  { %v7906_v60 = vpop.permute.xlu1 %7905  ;;  %v7984_v56 = vpop.permute.xlu0 %7983 }
0x3ad7   :  { %v12785_v49 = vpop.eup %12784 }
0x3ad8   :  { %v7751_v54 = vmul.f32 %v12785_v49, %v12781_v19 }
0x3ada   :  { %12335 = vmatmul.mubr.msk.f32.vlgmr.msra.gmra.mxu0 %vm365_vm2, %v7751_v54 }
0x3adb   :  { %v12787_v45 = vpop.eup %12786  ;;  %12343 = vmatpush3.xpose.msk.msra.mxu0 %vm365_vm2, %v7908_v20  ;;  %12344 = vmatprep.mubr.msk.f32.mxu0 %vm13096_vm1, %v13095_v6 }
0x3adc   :  { %v7752_v52 = vmul.f32 %v12787_v45, %v12783_v47  ;;  %12352 = vmatprep.subr.mxu0 %v13095_v6 }
0x3ade   :  { %12340 = vmatmul.mubr.msk.f32.vlgmr.msra.gmra.mxu1 %vm365_vm2, %v7752_v52  ;;  %12345 = vmatmul.mubr.msk.f32.vlgmr.msra.gmra.mxu0 %vm365_vm2, %v7906_v60 }
0x3adf   :  { %12348 = vmatpush3.xpose.msk.msra.mxu1 %vm365_vm2, %v7986_v50  ;;  %12349 = vmatprep.mubr.msk.f32.mxu1 %vm13096_vm1, %v13095_v6 }
0x3ae0   :  { %12357 = vmatprep.subr.mxu1 %v13095_v6  ;;  %12354 = vmatprep.mubr.msk.f32.mxu0 %vm13096_vm1, %v13095_v6 }
0x3ae2   :  { %12350 = vmatmul.mubr.msk.f32.vlgmr.msra.gmra.mxu1 %vm365_vm2, %v7984_v56 }
0x3ae3   :  { %12359 = vmatprep.mubr.msk.f32.mxu1 %vm13096_vm1, %v13095_v6 }
0x3b9a   :  { %v14240_v32 = vpop.f32.mrf.mxu0 }
0x3b9c   :  { %v12336_v39 = vpop.f32.mrf.mxu0 }
0x3b9e   :  { %v14242_v59 = vpop.f32.mrf.mxu1  ;;  %v7979_v1 = vpop.f32.mrf.mxu0 }
0x3b9f   :  { %v8061_v53 = vmul.f32 0.35355338, %v7979_v1 }
0x3ba0   :  { %v12341_v0 = vpop.f32.mrf.mxu1  ;;  %v12346_v5 = vpop.f32.mrf.mxu0 }
0x3ba1   :  { %v8063_v3 = vadd.f32 %v8061_v53, %v13763_v28 }
0x3ba2   :  { %v8057_v8 = vpop.f32.mrf.mxu1 }
0x3ba3   :  { %v8062_v12 = vmul.f32 0.35355338, %v8057_v8  ;;  %v8065_v13 = vsel %vm365_vm2, %v8063_v3, -inf }
0x3ba4   :  { %8066 = vmax.xlane.f32.xlu1 %v8065_v13  ;;  %v12351_v16 = vpop.f32.mrf.mxu1 }
0x3ba5   :  { %v8064_v17 = vadd.f32 %v8062_v12, %v13767_v36 }
0x3ba7   :  { %v8068_v48 = vsel %vm365_vm2, %v8064_v17, -inf }
0x3ba8   :  { %8069 = vmax.xlane.f32.xlu0 %v8068_v48 }
0x3bb5   :  { %8163 = vrot.lane.b32.xlu1 %v14184_v4, %s13101_s2 }
0x3bb9   :  { %8241 = vrot.lane.b32.xlu1 %v14186_v24, %s13103_s14 }
0x3bbe   :  { %8087 = vrot.lane.b32.xlu0 %v14186_v24, %s13101_s2 }
0x3c2d   :  { %v8067_v2 = vpop.xlane.xlu1 %8066 }
0x3c2e   :  { %v8071_v18 = vsub.f32 %v8063_v3, %v8067_v2 }
0x3c30   :  { %v8073_v21 = vmul.f32 1.442695, %v8071_v18 }
0x3c31   :  { %v8164_v51 = vpop.permute.xlu1 %8163  ;;  %v8070_v14 = vpop.xlane.xlu0 %8069 }
0x3c32   :  { %12788 = vpow2.f32 %v8073_v21  ;;  %v8072_v15 = vsub.f32 %v8064_v17, %v8070_v14  ;;  %12358 = vmatpush3.msra.mxu1 %v8164_v51 }
0x3c33   :  { %12367 = vmatprep.subr.mxu1 %v13095_v6 }
0x3c34   :  { %v8075_v9 = vmul.f32 1.442695, %v8072_v15 }
0x3c35   :  { %v8088_v25 = vpop.permute.xlu0 %8087  ;;  %v8242_v61 = vpop.permute.xlu1 %8241 }
0x3c36   :  { %12790 = vpow2.f32 %v8075_v9  ;;  %12353 = vmatpush3.msra.mxu0 %v8088_v25 }
0x3c37   :  { %12362 = vmatprep.subr.mxu0 %v13095_v6 }
0x3c3f   :  { %v12789_v7 = vpop.eup %12788 }
0x3c40   :  { %v8077_v62 = vsel %vm365_vm2, %v12789_v7, 0.0 }
0x3c41   :  { %8078 = vadd.xlane.f32.xlu0 %v8077_v62 }
0x3c43   :  { %v12791_v29 = vpop.eup %12790 }
0x3c44   :  { %v8080_v57 = vsel %vm365_vm2, %v12791_v29, 0.0 }
0x3c45   :  { %8081 = vadd.xlane.f32.xlu1 %v8080_v57 }
0x3c56   :  { %8239 = vrot.lane.b32.xlu1 %v14186_v24, %s13102_s29 }
0x3c57   :  { %8319 = vrot.lane.b32.xlu0 %v14184_v4, %s13103_s14 }
0x3c5b   :  { %8317 = vrot.lane.b32.xlu0 %v14184_v4, %s13102_s29 }
0x3cca   :  { %v8079_v31 = vpop.xlane.xlu0 %8078 }
0x3ccb   :  { %12792 = vrcp.f32 %v8079_v31 }
0x3cce   :  { %v8082_v63 = vpop.xlane.xlu1 %8081  ;;  %v8320_v10 = vpop.permute.xlu0 %8319 }
0x3ccf   :  { %12794 = vrcp.f32 %v8082_v63 }
0x3cd2   :  { %v8240_v38 = vpop.permute.xlu1 %8239  ;;  %v8318_v40 = vpop.permute.xlu0 %8317 }
0x3cd8   :  { %v12793_v33 = vpop.eup %12792 }
0x3cd9   :  { %v8085_v35 = vmul.f32 %v12793_v33, %v12789_v7 }
0x3cdb   :  { %12355 = vmatmul.mubr.msk.f32.vlgmr.msra.gmra.mxu0 %vm365_vm2, %v8085_v35 }
0x3cdc   :  { %v12795_v37 = vpop.eup %12794  ;;  %12363 = vmatpush3.xpose.msk.msra.mxu0 %vm365_vm2, %v8242_v61  ;;  %12364 = vmatprep.mubr.msk.f32.mxu0 %vm13096_vm1, %v13095_v6 }
0x3cdd   :  { %v8086_v30 = vmul.f32 %v12795_v37, %v12791_v29  ;;  %12372 = vmatprep.subr.mxu0 %v13095_v6 }
0x3cdf   :  { %12360 = vmatmul.mubr.msk.f32.vlgmr.msra.gmra.mxu1 %vm365_vm2, %v8086_v30  ;;  %12365 = vmatmul.mubr.msk.f32.vlgmr.msra.gmra.mxu0 %vm365_vm2, %v8240_v38 }
0x3ce0   :  { %12368 = vmatpush3.xpose.msk.msra.mxu1 %vm365_vm2, %v8320_v10  ;;  %12369 = vmatprep.mubr.msk.f32.mxu1 %vm13096_vm1, %v13095_v6 }
0x3ce1   :  { %12377 = vmatprep.subr.mxu1 %v13095_v6  ;;  %12374 = vmatprep.mubr.msk.f32.mxu0 %vm13096_vm1, %v13095_v6 }
0x3ce3   :  { %12370 = vmatmul.mubr.msk.f32.vlgmr.msra.gmra.mxu1 %vm365_vm2, %v8318_v40 }
0x3ce4   :  { %12379 = vmatprep.mubr.msk.f32.mxu1 %vm13096_vm1, %v13095_v6 }
0x3d9b   :  { %v14280_v11 = vpop.f32.mrf.mxu0 }
0x3d9d   :  { %v12356_v41 = vpop.f32.mrf.mxu0 }
0x3d9f   :  { %v14282_v42 = vpop.f32.mrf.mxu1  ;;  %v8313_v43 = vpop.f32.mrf.mxu0 }
0x3da0   :  { %v8395_v34 = vmul.f32 0.35355338, %v8313_v43 }
0x3da1   :  { %v12361_v19 = vpop.f32.mrf.mxu1  ;;  %v12366_v26 = vpop.f32.mrf.mxu0 }
0x3da2   :  { %v8397_v47 = vadd.f32 %v8395_v34, %v13763_v28 }
0x3da3   :  { %v8391_v46 = vpop.f32.mrf.mxu1 }
0x3da4   :  { %v8396_v20 = vmul.f32 0.35355338, %v8391_v46  ;;  %v8399_v55 = vsel %vm365_vm2, %v8397_v47, -inf }
0x3da5   :  { %8400 = vmax.xlane.f32.xlu1 %v8399_v55  ;;  %v12371_v44 = vpop.f32.mrf.mxu1 }
0x3da6   :  { %v8398_v49 = vadd.f32 %v8396_v20, %v13767_v36 }
0x3da8   :  { %v8402_v54 = vsel %vm365_vm2, %v8398_v49, -inf }
0x3da9   :  { %8403 = vmax.xlane.f32.xlu0 %v8402_v54  ;;  %v8939_v54 = vld [vmem:[#allocation11 + $0x28] sm:$0xff] }
0x3db6   :  { %8497 = vrot.lane.b32.xlu1 %v14184_v4, %s13104_s7 }
0x3dba   :  { %8575 = vrot.lane.b32.xlu1 %v14186_v24, %s13105_s10 }
0x3dbf   :  { %8421 = vrot.lane.b32.xlu0 %v14186_v24, %s13104_s7 }
0x3e2e   :  { %v8401_v45 = vpop.xlane.xlu1 %8400 }
0x3e2f   :  { %v8405_v50 = vsub.f32 %v8397_v47, %v8401_v45  ;;  %v8938_v45 = vld [vmem:[#allocation11 + $0x20] sm:$0xff] }
0x3e31   :  { %v8407_v52 = vmul.f32 1.442695, %v8405_v50 }
0x3e32   :  { %v8498_v60 = vpop.permute.xlu1 %8497  ;;  %v8404_v56 = vpop.xlane.xlu0 %8403 }
0x3e33   :  { %12796 = vpow2.f32 %v8407_v52  ;;  %v8406_v39 = vsub.f32 %v8398_v49, %v8404_v56  ;;  %12378 = vmatpush3.msra.mxu1 %v8498_v60  ;;  %v8940_v49 = vld [vmem:[#allocation11 + $0x30] sm:$0xff] }
0x3e34   :  { %12387 = vmatprep.subr.mxu1 %v13095_v6 }
0x3e35   :  { %v8409_v1 = vmul.f32 1.442695, %v8406_v39 }
0x3e36   :  { %v8422_v53 = vpop.permute.xlu0 %8421  ;;  %v8576_v12 = vpop.permute.xlu1 %8575 }
0x3e37   :  { %12798 = vpow2.f32 %v8409_v1  ;;  %12373 = vmatpush3.msra.mxu0 %v8422_v53 }
0x3e38   :  { %12382 = vmatprep.subr.mxu0 %v13095_v6 }
0x3e40   :  { %v12797_v0 = vpop.eup %12796 }
0x3e41   :  { %v8411_v5 = vsel %vm365_vm2, %v12797_v0, 0.0 }
0x3e42   :  { %8412 = vadd.xlane.f32.xlu0 %v8411_v5 }
0x3e44   :  { %v12799_v3 = vpop.eup %12798 }
0x3e45   :  { %v8414_v8 = vsel %vm365_vm2, %v12799_v3, 0.0 }
0x3e46   :  { %8415 = vadd.xlane.f32.xlu1 %v8414_v8 }
0x3e57   :  { %8573 = vrot.lane.b32.xlu1 %v14186_v24, %s13106_s11 }
0x3e58   :  { %8653 = vrot.lane.b32.xlu0 %v14184_v4, %s13105_s10 }
0x3e5c   :  { %8651 = vrot.lane.b32.xlu0 %v14184_v4, %s13106_s11 }
0x3ecb   :  { %v8413_v13 = vpop.xlane.xlu0 %8412 }
0x3ecc   :  { %12800 = vrcp.f32 %v8413_v13 }
0x3ecf   :  { %v8416_v16 = vpop.xlane.xlu1 %8415  ;;  %v8654_v18 = vpop.permute.xlu0 %8653 }
0x3ed0   :  { %12802 = vrcp.f32 %v8416_v16 }
0x3ed3   :  { %v8574_v51 = vpop.permute.xlu1 %8573  ;;  %v8652_v14 = vpop.permute.xlu0 %8651 }
0x3ed9   :  { %v12801_v17 = vpop.eup %12800 }
0x3eda   :  { %v8419_v48 = vmul.f32 %v12801_v17, %v12797_v0 }
0x3edc   :  { %12375 = vmatmul.mubr.msk.f32.vlgmr.msra.gmra.mxu0 %vm365_vm2, %v8419_v48 }
0x3edd   :  { %v12803_v2 = vpop.eup %12802  ;;  %12383 = vmatpush3.xpose.msk.msra.mxu0 %vm365_vm2, %v8576_v12  ;;  %12384 = vmatprep.mubr.msk.f32.mxu0 %vm13096_vm1, %v13095_v6 }
0x3ede   :  { %v8420_v21 = vmul.f32 %v12803_v2, %v12799_v3  ;;  %12392 = vmatprep.subr.mxu0 %v13095_v6 }
0x3ee0   :  { %12380 = vmatmul.mubr.msk.f32.vlgmr.msra.gmra.mxu1 %vm365_vm2, %v8420_v21  ;;  %12385 = vmatmul.mubr.msk.f32.vlgmr.msra.gmra.mxu0 %vm365_vm2, %v8574_v51 }
0x3ee1   :  { %12388 = vmatpush3.xpose.msk.msra.mxu1 %vm365_vm2, %v8654_v18  ;;  %12389 = vmatprep.mubr.msk.f32.mxu1 %vm13096_vm1, %v13095_v6 }
0x3ee2   :  { %12397 = vmatprep.subr.mxu1 %v13095_v6  ;;  %12394 = vmatprep.mubr.msk.f32.mxu0 %vm13096_vm1, %v13095_v6 }
0x3ee4   :  { %12390 = vmatmul.mubr.msk.f32.vlgmr.msra.gmra.mxu1 %vm365_vm2, %v8652_v14 }
0x3ee5   :  { %12399 = vmatprep.mubr.msk.f32.mxu1 %vm13096_vm1, %v13095_v6 }
0x3f9c   :  { %v8493_v15 = vpop.f32.mrf.mxu0 }
0x3f9e   :  { %v12376_v9 = vpop.f32.mrf.mxu0 }
0x3fa0   :  { %v8569_v25 = vpop.f32.mrf.mxu1  ;;  %v8647_v7 = vpop.f32.mrf.mxu0 }
0x3fa1   :  { %v8729_v62 = vmul.f32 0.35355338, %v8647_v7  ;;  %v9082_v7 = vld [vmem:[#allocation13 + $0x30] sm:$0xff] }
0x3fa2   :  { %v12381_v29 = vpop.f32.mrf.mxu1  ;;  %v12386_v57 = vpop.f32.mrf.mxu0 }
0x3fa3   :  { %v8731_v61 = vadd.f32 %v8729_v62, %v13763_v28  ;;  %v9080_v62 = vld [vmem:[#allocation13 + $0x20] sm:$0xff] }
0x3fa4   :  { %v8725_v31 = vpop.f32.mrf.mxu1 }
0x3fa5   :  { %v8730_v63 = vmul.f32 0.35355338, %v8725_v31  ;;  %v8733_v33 = vsel %vm365_vm2, %v8731_v61, -inf }
0x3fa6   :  { %8734 = vmax.xlane.f32.xlu1 %v8733_v33  ;;  %v12391_v35 = vpop.f32.mrf.mxu1 }
0x3fa7   :  { %v8732_v37 = vadd.f32 %v8730_v63, %v13767_v36 }
0x3fa9   :  { %v8736_v10 = vsel %vm365_vm2, %v8732_v37, -inf }
0x3faa   :  { %8737 = vmax.xlane.f32.xlu0 %v8736_v10  ;;  %v11392_v10 = vld [vmem:[%s14679_s22 + $0x1] ss:$0 sm:$0xff] }
0x402f   :  { %v8735_v30 = vpop.xlane.xlu1 %8734 }
0x4030   :  { %v8739_v38 = vsub.f32 %v8731_v61, %v8735_v30 }
0x4032   :  { %v8741_v40 = vmul.f32 1.442695, %v8739_v38 }
0x4033   :  { %v8738_v41 = vpop.xlane.xlu0 %8737 }
0x4034   :  { %12804 = vpow2.f32 %v8741_v40  ;;  %v8740_v43 = vsub.f32 %v8732_v37, %v8738_v41 }
0x4036   :  { %v8743_v34 = vmul.f32 1.442695, %v8740_v43 }
0x4038   :  { %12806 = vpow2.f32 %v8743_v34 }
0x4041   :  { %v12805_v28 = vpop.eup %12804 }
0x4042   :  { %v8745_v19 = vsel %vm365_vm2, %v12805_v28, 0.0 }
0x4043   :  { %8746 = vadd.xlane.f32.xlu0 %v8745_v19 }
0x4045   :  { %v12807_v26 = vpop.eup %12806 }
0x4046   :  { %v8748_v47 = vsel %vm365_vm2, %v12807_v26, 0.0 }
0x4047   :  { %8749 = vadd.xlane.f32.xlu1 %v8748_v47 }
0x4058   :  { %8831 = vrot.lane.b32.xlu1 %v14184_v4, %s13107_s15 }
0x4059   :  { %8755 = vrot.lane.b32.xlu0 %v14186_v24, %s13107_s15 }
0x405c   :  { %8909 = vrot.lane.b32.xlu1 %v14280_v11, %s13086_s18 }
0x405d   :  { %8911 = vrot.lane.b32.xlu0 %v14282_v42, %s13086_s18  ;;  %v8941_v42 = vld [vmem:[#allocation11 + $0x38] sm:$0xff] }
0x4060   :  { %8917 = vrot.lane.b32.xlu1 %v8493_v15, %s13090_s20 }
0x4061   :  { %8919 = vrot.lane.b32.xlu0 %v8569_v25, %s13090_s20  ;;  %v9083_v25 = vld [vmem:[#allocation13 + $0x38] sm:$0xff] }
0x40cc   :  { %v8747_v36 = vpop.xlane.xlu0 %8746 }
0x40cd   :  { %12808 = vrcp.f32 %v8747_v36 }
0x40d0   :  { %v8750_v46 = vpop.xlane.xlu1 %8749  ;;  %v8756_v20 = vpop.permute.xlu0 %8755 }
0x40d1   :  { %12810 = vrcp.f32 %v8750_v46  ;;  %12393 = vmatpush3.msra.mxu0 %v8756_v20  ;;  %v11389_v46 = vld [vmem:[#allocation14 + $0x6] ss:$0 sm:$0xff] }
0x40d2   :  { %12402 = vmatprep.subr.mxu0 %v8941_v42 }
0x40d4   :  { %v8832_v4 = vpop.permute.xlu1 %8831  ;;  %v8912_v1 = vpop.permute.xlu0 %8911 }
0x40d5   :  { %12398 = vmatpush3.msra.mxu1 %v8832_v4  ;;  %v8932_v13 = vsel %vm365_vm2, %v14242_v59, %v8912_v1 }
0x40d6   :  { %12413 = vmatprep.subr.mxu1 %v9083_v25 }
0x40d8   :  { %v8910_v39 = vpop.permute.xlu1 %8909  ;;  %v8920_v5 = vpop.permute.xlu0 %8919 }
0x40d9   :  { %v8931_v0 = vsel %vm365_vm2, %v14240_v32, %v8910_v39  ;;  %v8934_v16 = vsel %vm1723_vm4, %v8932_v13, %v8920_v5  ;;  %v11386_v32 = vld [vmem:[%s14678_s24 + $0x1] ss:$0 sm:$0xff] }
0x40da   :  { %v12809_v55 = vpop.eup %12808 }
0x40db   :  { %v8753_v24 = vmul.f32 %v12809_v55, %v12805_v28 }
0x40dc   :  { %v8918_v53 = vpop.permute.xlu1 %8917 }
0x40dd   :  { %12395 = vmatmul.mubr.msk.f32.vlgmr.msra.gmra.mxu0 %vm365_vm2, %v8753_v24  ;;  %v8933_v3 = vsel %vm1723_vm4, %v8931_v0, %v8918_v53 }
0x40de   :  { %v12811_v11 = vpop.eup %12810  ;;  %12403 = vmatpush3.msra.mxu0 %v8941_v42 }
0x40df   :  { %v8754_v44 = vmul.f32 %v12811_v11, %v12807_v26  ;;  %12404 = vmatprep.subr.mxu0 %v8940_v49  ;;  %v11390_v11 = vld [vmem:[#allocation14 + $0x7] ss:$0 sm:$0xff] }
0x40e0   :  { %12405 = vmatpush3.msra.mxu0 %v8940_v49 }
0x40e1   :  { %12400 = vmatmul.mubr.msk.f32.vlgmr.msra.gmra.mxu1 %vm365_vm2, %v8754_v44  ;;  %12406 = vmatprep.subr.mxu0 %v8939_v54 }
0x40e2   :  { %12407 = vmatpush3.msra.mxu0 %v8939_v54  ;;  %12414 = vmatpush3.msra.mxu1 %v9083_v25 }
0x40e3   :  { %12408 = vmatprep.subr.mxu0 %v8938_v45  ;;  %12415 = vmatprep.subr.mxu1 %v9082_v7 }
0x40e4   :  { %12409 = vmatpush3.msra.mxu0 %v8938_v45  ;;  %12416 = vmatpush3.msra.mxu1 %v9082_v7 }
0x419d   :  { %v8827_v50 = vpop.f32.mrf.mxu0 }
0x419e   :  { %8925 = vrot.lane.b32.xlu1 %v8827_v50, %s13108_s16 }
0x419f   :  { %v12396_v52 = vpop.f32.mrf.mxu0 }
0x41a1   :  { %v8903_v60 = vpop.f32.mrf.mxu1 }
0x41a2   :  { %8927 = vrot.lane.b32.xlu0 %v8903_v60, %s13108_s16 }
0x41a3   :  { %v12401_v56 = vpop.f32.mrf.mxu1 }
0x4210   :  { %v8926_v8 = vpop.permute.xlu1 %8925 }
0x4211   :  { %v8935_v12 = vsel %vm1726_vm3, %v8933_v3, %v8926_v8  ;;  %v14404_v3 = vld [vmem:[%s13129_s13] ss:$0 sm:$0xff] }
0x4212   :  { %12410 = vmatprep.mubr.msk.f32.mxu0 %vm280_vm0, %v8935_v12 }
0x4214   :  { %v8928_v17 = vpop.permute.xlu0 %8927 }
0x4215   :  { %v8936_v48 = vsel %vm1726_vm3, %v8934_v16, %v8928_v17 }
0x4216   :  { %12411 = vmatmul.mubr.msk.f32.vlgmr.msra.gmra.mxu0 %vm280_vm0, %v8936_v48  ;;  %v14409_v48 = vld [vmem:[%s13129_s13 + $0x1] ss:$0 sm:$0xff]  ;;  %s13110_s13 = smov [#allocation16]  }
0x4217   :  { %12432 = vmatprep.mubr.msk.f32.mxu0 %vm280_vm0, %v13934_v58  ;;  %v9081_v58 = vld [vmem:[#allocation13 + $0x28] sm:$0xff] }
0x4218   :  { %12417 = vmatprep.subr.mxu1 %v9081_v58 }
0x4219   :  { %12418 = vmatpush3.msra.mxu1 %v9081_v58 }
0x421a   :  { %12419 = vmatprep.subr.mxu1 %v9080_v62 }
0x421b   :  { %12420 = vmatpush3.msra.mxu1 %v9080_v62 }
0x421c   :  { %12435 = vmatprep.subr.mxu1 %v13095_v6 }
0x42d6   :  { %v12412_v2 = vpop.f32.mrf.mxu0 }
0x42d7   :  { %v9028_v18 = vadd.f32 %v12412_v2, %v11386_v32 }
0x42d8   :  { %v9022_v21 = vpop.f32.mrf.mxu0 }
0x42d9   :  { %v9032_v51 = vadd.f32 %v9028_v18, %v14175_v23  ;;  %v9023_v14 = vadd.f32 %v11386_v32, %v9022_v21 }
0x42db   :  { %v9031_v15 = vadd.f32 %v9023_v14, %v14173_v22  ;;  %v9040_v59 = vsel %vm280_vm0, %v9032_v51, 0.0 }
0x42dc   :  { %9041 = vadd.xlane.f32.xlu0 %v9040_v59 }
0x42dd   :  { %v9037_v9 = vsel %vm280_vm0, %v9031_v15, 0.0 }
0x42de   :  { %9038 = vadd.xlane.f32.xlu1 %v9037_v9 }
0x4365   :  { %v9042_v22 = vpop.xlane.xlu0 %9041 }
0x4366   :  { %v9044_v23 = vmul.f32 0.03125, %v9042_v22 }
0x4367   :  { %v9039_v29 = vpop.xlane.xlu1 %9038 }
0x4368   :  { %v9046_v57 = vsub.f32 %v9032_v51, %v9044_v23  ;;  %v9043_v61 = vmul.f32 0.03125, %v9039_v29 }
0x436a   :  { %v9045_v31 = vsub.f32 %v9031_v15, %v9043_v61  ;;  %v9048_v63 = vmul.f32 %v9046_v57, %v9046_v57 }
0x436c   :  { %v9052_v33 = vsel %vm280_vm0, %v9048_v63, 0.0  ;;  %v9047_v35 = vmul.f32 %v9045_v31, %v9045_v31 }
0x436d   :  { %9053 = vadd.xlane.f32.xlu1 %v9052_v33 }
0x436e   :  { %v9049_v37 = vsel %vm280_vm0, %v9047_v35, 0.0 }
0x436f   :  { %9050 = vadd.xlane.f32.xlu0 %v9049_v37 }
0x437e   :  { %9181 = vrot.lane.b32.xlu1 %v9082_v7, %s13097_s5 }
0x4382   :  { %9179 = vrot.lane.b32.xlu1 %v9081_v58, %s13097_s5 }
0x4385   :  { %9183 = vrot.lane.b32.xlu0 %v9083_v25, %s13097_s5 }
0x4386   :  { %9189 = vrot.lane.b32.xlu1 %v11392_v10, %s13097_s5 }
0x4389   :  { %9177 = vrot.lane.b32.xlu0 %v9080_v62, %s13097_s5 }
0x43f6   :  { %v9054_v30 = vpop.xlane.xlu1 %9053 }
0x43f7   :  { %v9056_v38 = vmul.f32 0.03125, %v9054_v30 }
0x43f8   :  { %v9051_v40 = vpop.xlane.xlu0 %9050 }
0x43f9   :  { %v9058_v41 = vadd.f32 1e-05, %v9056_v38  ;;  %v9055_v43 = vmul.f32 0.03125, %v9051_v40 }
0x43fa   :  { %v9182_v34 = vpop.permute.xlu1 %9181 }
0x43fb   :  { %12812 = vrsqrt.f32 %v9058_v41  ;;  %v9057_v28 = vadd.f32 1e-05, %v9055_v43 }
0x43fc   :  { %v9184_v19 = vpop.permute.xlu0 %9183 }
0x43fd   :  { %12814 = vrsqrt.f32 %v9057_v28  ;;  %12424 = vmatprep.subr.mxu0 %v9184_v19 }
0x43fe   :  { %12425 = vmatpush3.msra.mxu0 %v9184_v19  ;;  %v9180_v26 = vpop.permute.xlu1 %9179 }
0x43ff   :  { %12426 = vmatprep.subr.mxu0 %v9182_v34 }
0x4400   :  { %12427 = vmatpush3.msra.mxu0 %v9182_v34  ;;  %v9178_v47 = vpop.permute.xlu0 %9177 }
0x4401   :  { %12428 = vmatprep.subr.mxu0 %v9180_v26 }
0x4402   :  { %12429 = vmatpush3.msra.mxu0 %v9180_v26  ;;  %v9190_v54 = vpop.permute.xlu1 %9189 }
0x4403   :  { %12430 = vmatprep.subr.mxu0 %v9178_v47 }
0x4404   :  { %12431 = vmatpush3.msra.mxu0 %v9178_v47 }
0x4405   :  { %12433 = vmatmul.mubr.msk.f32.vlgmr.msra.gmra.mxu0 %vm280_vm0, %v13945_v27  ;;  %12445 = vmatprep.subr.mxu0 %v13095_v6 }
0x4406   :  { %12447 = vmatprep.mubr.msk.f32.mxu0 %vm13096_vm1, %v13095_v6 }
0x4408   :  { %v12813_v36 = vpop.eup %12812 }
0x4409   :  { %v9062_v20 = vmul.f32 %v12813_v36, %v9046_v57 }
0x440a   :  { %v12815_v4 = vpop.eup %12814 }
0x440b   :  { %v9061_v55 = vmul.f32 %v12815_v4, %v9045_v31  ;;  %v9070_v24 = vmul.f32 %v11389_v46, %v9062_v20 }
0x440d   :  { %v9069_v44 = vmul.f32 %v11389_v46, %v9061_v55  ;;  %v14373_v49 = vadd.f32 %v11390_v11, %v9070_v24 }
0x440f   :  { %v14371_v42 = vadd.f32 %v11390_v11, %v9069_v44 }
0x4411   :  { %12421 = vmatprep.mubr.msk.f32.mxu1 %vm280_vm0, %v14371_v42 }
0x4412   :  { %12422 = vmatmul.mubr.msk.f32.vlgmr.msra.gmra.mxu1 %vm280_vm0, %v14373_v49 }
0x4413   :  { %12437 = vmatprep.mubr.msk.f32.mxu1 %vm13096_vm1, %v13095_v6 }
0x44c5   :  { %v12434_v27 = vpop.f32.mrf.mxu0 }
0x44c6   :  { %v14388_v39 = vadd.f32 %v12434_v27, %v9190_v54 }
0x44c7   :  { %v9258_v45 = vpop.f32.mrf.mxu0 }
0x44c8   :  { %v14381_v50 = vadd.f32 %v9258_v45, %v9190_v54 }
0x44ca   :  { %12436 = vmatpush3.xpose.msk.msra.mxu1 %vm365_vm2, %v14381_v50 }
0x44cb   :  { %12440 = vmatprep.subr.mxu1 %v13095_v6 }
0x44d2   :  { %v12423_v52 = vpop.f32.mrf.mxu1 }
0x44d3   :  { %v14396_v1 = vadd.f32 %v12423_v52, %v11392_v10 }
0x44d4   :  { %v9164_v60 = vpop.f32.mrf.mxu1 }
0x44d5   :  { %v14386_v56 = vadd.f32 %v11392_v10, %v9164_v60 }
0x44d7   :  { %12438 = vmatmul.mubr.msk.f32.vlgmr.msra.gmra.mxu1 %vm365_vm2, %v14386_v56 }
0x44d8   :  { %12441 = vmatpush3.xpose.msk.msra.mxu1 %vm365_vm2, %v14388_v39  ;;  %12442 = vmatprep.mubr.msk.f32.mxu1 %vm13096_vm1, %v13095_v6 }
0x44d9   :  { %12450 = vmatprep.subr.mxu1 %v13095_v6 }
0x44db   :  { %12443 = vmatmul.mubr.msk.f32.vlgmr.msra.gmra.mxu1 %vm365_vm2, %v14396_v1 }
0x44dc   :  { %12452 = vmatprep.mubr.msk.f32.mxu1 %vm13096_vm1, %v13095_v6 }
0x4597   :  { %v9339_v53 = vpop.f32.mrf.mxu1 }
0x4598   :  { %v9419_v0 = vmul.f32 0.35355338, %v9339_v53 }
0x4599   :  { %v12439_v5 = vpop.f32.mrf.mxu1 }
0x459a   :  { %v9421_v8 = vadd.f32 %v14404_v3, %v9419_v0 }
0x459b   :  { %v9415_v12 = vpop.f32.mrf.mxu1 }
0x459c   :  { %v9420_v13 = vmul.f32 0.35355338, %v9415_v12  ;;  %v9423_v16 = vsel %vm365_vm2, %v9421_v8, -inf }
0x459d   :  { %9424 = vmax.xlane.f32.xlu0 %v9423_v16  ;;  %v12444_v17 = vpop.f32.mrf.mxu1 }
0x459e   :  { %v9422_v32 = vadd.f32 %v14409_v48, %v9420_v13 }
0x45a0   :  { %v9426_v2 = vsel %vm365_vm2, %v9422_v32, -inf }
0x45a1   :  { %9427 = vmax.xlane.f32.xlu1 %v9426_v2 }
0x45b2   :  { %9445 = vrot.lane.b32.xlu1 %v14381_v50, %s13097_s5 }
0x45b3   :  { %9521 = vrot.lane.b32.xlu0 %v14388_v39, %s13097_s5 }
0x45b6   :  { %9599 = vrot.lane.b32.xlu1 %v14381_v50, %s13100_s4 }
0x45ba   :  { %9677 = vrot.lane.b32.xlu1 %v14388_v39, %s13100_s4 }
0x45be   :  { %9675 = vrot.lane.b32.xlu1 %v14396_v1, %s13100_s4 }
0x4626   :  { %v9425_v18 = vpop.xlane.xlu0 %9424 }
0x4627   :  { %v9429_v21 = vsub.f32 %v9421_v8, %v9425_v18 }
0x4629   :  { %v9431_v51 = vmul.f32 1.442695, %v9429_v21 }
0x462a   :  { %v9522_v14 = vpop.permute.xlu0 %9521  ;;  %v9428_v15 = vpop.xlane.xlu1 %9427 }
0x462b   :  { %12816 = vpow2.f32 %v9431_v51  ;;  %v9430_v59 = vsub.f32 %v9422_v32, %v9428_v15  ;;  %12451 = vmatpush3.msra.mxu1 %v9522_v14 }
0x462c   :  { %12460 = vmatprep.subr.mxu1 %v13095_v6 }
0x462d   :  { %v9433_v9 = vmul.f32 1.442695, %v9430_v59 }
0x462e   :  { %v9446_v25 = vpop.permute.xlu1 %9445 }
0x462f   :  { %12818 = vpow2.f32 %v9433_v9  ;;  %12446 = vmatpush3.msra.mxu0 %v9446_v25 }
0x4630   :  { %12455 = vmatprep.subr.mxu0 %v13095_v6 }
0x4632   :  { %v9600_v57 = vpop.permute.xlu1 %9599 }
0x4636   :  { %v9678_v33 = vpop.permute.xlu1 %9677 }
0x4638   :  { %v12817_v7 = vpop.eup %12816 }
0x4639   :  { %v9435_v58 = vsel %vm365_vm2, %v12817_v7, 0.0 }
0x463a   :  { %9436 = vadd.xlane.f32.xlu0 %v9435_v58  ;;  %v9676_v10 = vpop.permute.xlu1 %9675 }
0x463c   :  { %v12819_v62 = vpop.eup %12818 }
0x463d   :  { %v9438_v22 = vsel %vm365_vm2, %v12819_v62, 0.0 }
0x463e   :  { %9439 = vadd.xlane.f32.xlu0 %v9438_v22 }
0x4654   :  { %9597 = vrot.lane.b32.xlu0 %v14386_v56, %s13100_s4 }
0x46c3   :  { %v9437_v23 = vpop.xlane.xlu0 %9436 }
0x46c4   :  { %12820 = vrcp.f32 %v9437_v23 }
0x46c7   :  { %v9440_v29 = vpop.xlane.xlu0 %9439 }
0x46c8   :  { %12822 = vrcp.f32 %v9440_v29 }
0x46cb   :  { %v9598_v37 = vpop.permute.xlu0 %9597 }
0x46d1   :  { %v12821_v61 = vpop.eup %12820 }
0x46d2   :  { %v14429_v31 = vmul.f32 %v12821_v61, %v12817_v7 }
0x46d4   :  { %12448 = vmatmul.mubr.msk.f32.vlgmr.msra.gmra.mxu0 %vm365_vm2, %v14429_v31 }
0x46d5   :  { %v12823_v63 = vpop.eup %12822  ;;  %12456 = vmatpush3.xpose.msk.msra.mxu0 %vm365_vm2, %v9600_v57  ;;  %12457 = vmatprep.mubr.msk.f32.mxu0 %vm13096_vm1, %v13095_v6 }
0x46d6   :  { %v14436_v35 = vmul.f32 %v12823_v63, %v12819_v62  ;;  %12465 = vmatprep.subr.mxu0 %v13095_v6 }
0x46d8   :  { %12453 = vmatmul.mubr.msk.f32.vlgmr.msra.gmra.mxu1 %vm365_vm2, %v14436_v35  ;;  %12458 = vmatmul.mubr.msk.f32.vlgmr.msra.gmra.mxu0 %vm365_vm2, %v9598_v37 }
0x46d9   :  { %12461 = vmatpush3.xpose.msk.msra.mxu1 %vm365_vm2, %v9678_v33  ;;  %12462 = vmatprep.mubr.msk.f32.mxu1 %vm13096_vm1, %v13095_v6 }
0x46da   :  { %12470 = vmatprep.subr.mxu1 %v13095_v6  ;;  %12467 = vmatprep.mubr.msk.f32.mxu0 %vm13096_vm1, %v13095_v6 }
0x46dc   :  { %12463 = vmatmul.mubr.msk.f32.vlgmr.msra.gmra.mxu1 %vm365_vm2, %v9676_v10 }
0x46dd   :  { %12472 = vmatprep.mubr.msk.f32.mxu1 %vm13096_vm1, %v13095_v6 }
0x4794   :  { %v14451_v30 = vpop.f32.mrf.mxu0 }
0x4796   :  { %v12449_v38 = vpop.f32.mrf.mxu0 }
0x4798   :  { %v14453_v40 = vpop.f32.mrf.mxu1  ;;  %v9671_v41 = vpop.f32.mrf.mxu0 }
0x4799   :  { %v9753_v43 = vmul.f32 0.35355338, %v9671_v41 }
0x479a   :  { %v12454_v34 = vpop.f32.mrf.mxu1  ;;  %v12459_v28 = vpop.f32.mrf.mxu0 }
0x479b   :  { %v9755_v19 = vadd.f32 %v14404_v3, %v9753_v43 }
0x479c   :  { %v9749_v26 = vpop.f32.mrf.mxu1 }
0x479d   :  { %v9754_v47 = vmul.f32 0.35355338, %v9749_v26  ;;  %v9757_v36 = vsel %vm365_vm2, %v9755_v19, -inf }
0x479e   :  { %9758 = vmax.xlane.f32.xlu0 %v9757_v36  ;;  %v12464_v46 = vpop.f32.mrf.mxu1 }
0x479f   :  { %v9756_v20 = vadd.f32 %v14409_v48, %v9754_v47 }
0x47a1   :  { %v9760_v4 = vsel %vm365_vm2, %v9756_v20, -inf }
0x47a2   :  { %9761 = vmax.xlane.f32.xlu1 %v9760_v4 }
0x47b3   :  { %9779 = vrot.lane.b32.xlu1 %v14381_v50, %s13099_s6 }
0x47b4   :  { %9855 = vrot.lane.b32.xlu0 %v14388_v39, %s13099_s6 }
0x47b7   :  { %9933 = vrot.lane.b32.xlu1 %v14381_v50, %s13102_s29 }
0x47bb   :  { %10011 = vrot.lane.b32.xlu1 %v14388_v39, %s13102_s29 }
0x47bf   :  { %10009 = vrot.lane.b32.xlu1 %v14396_v1, %s13102_s29 }
0x4827   :  { %v9759_v55 = vpop.xlane.xlu0 %9758 }
0x4828   :  { %v9763_v24 = vsub.f32 %v9755_v19, %v9759_v55 }
0x482a   :  { %v9765_v11 = vmul.f32 1.442695, %v9763_v24 }
0x482b   :  { %v9856_v44 = vpop.permute.xlu0 %9855  ;;  %v9762_v27 = vpop.xlane.xlu1 %9761 }
0x482c   :  { %12824 = vpow2.f32 %v9765_v11  ;;  %v9764_v54 = vsub.f32 %v9756_v20, %v9762_v27  ;;  %12471 = vmatpush3.msra.mxu1 %v9856_v44 }
0x482d   :  { %12480 = vmatprep.subr.mxu1 %v13095_v6 }
0x482e   :  { %v9767_v45 = vmul.f32 1.442695, %v9764_v54 }
0x482f   :  { %v9780_v52 = vpop.permute.xlu1 %9779 }
0x4830   :  { %12826 = vpow2.f32 %v9767_v45  ;;  %12466 = vmatpush3.msra.mxu0 %v9780_v52 }
0x4831   :  { %12475 = vmatprep.subr.mxu0 %v13095_v6 }
0x4833   :  { %v9934_v13 = vpop.permute.xlu1 %9933 }
0x4837   :  { %v10012_v2 = vpop.permute.xlu1 %10011 }
0x4839   :  { %v12825_v60 = vpop.eup %12824 }
0x483a   :  { %v9769_v53 = vsel %vm365_vm2, %v12825_v60, 0.0 }
0x483b   :  { %9770 = vadd.xlane.f32.xlu0 %v9769_v53  ;;  %v10010_v51 = vpop.permute.xlu1 %10009 }
0x483d   :  { %v12827_v0 = vpop.eup %12826 }
0x483e   :  { %v9772_v5 = vsel %vm365_vm2, %v12827_v0, 0.0 }
0x483f   :  { %9773 = vadd.xlane.f32.xlu0 %v9772_v5 }
0x4855   :  { %9931 = vrot.lane.b32.xlu0 %v14386_v56, %s13102_s29 }
0x48c4   :  { %v9771_v8 = vpop.xlane.xlu0 %9770 }
0x48c5   :  { %12828 = vrcp.f32 %v9771_v8 }
0x48c8   :  { %v9774_v12 = vpop.xlane.xlu0 %9773 }
0x48c9   :  { %12830 = vrcp.f32 %v9774_v12 }
0x48cc   :  { %v9932_v21 = vpop.permute.xlu0 %9931 }
0x48d2   :  { %v12829_v16 = vpop.eup %12828 }
0x48d3   :  { %v14475_v17 = vmul.f32 %v12829_v16, %v12825_v60 }
0x48d5   :  { %12468 = vmatmul.mubr.msk.f32.vlgmr.msra.gmra.mxu0 %vm365_vm2, %v14475_v17 }
0x48d6   :  { %v12831_v32 = vpop.eup %12830  ;;  %12476 = vmatpush3.xpose.msk.msra.mxu0 %vm365_vm2, %v9934_v13  ;;  %12477 = vmatprep.mubr.msk.f32.mxu0 %vm13096_vm1, %v13095_v6 }
0x48d7   :  { %v14482_v18 = vmul.f32 %v12831_v32, %v12827_v0  ;;  %12485 = vmatprep.subr.mxu0 %v13095_v6 }
0x48d9   :  { %12473 = vmatmul.mubr.msk.f32.vlgmr.msra.gmra.mxu1 %vm365_vm2, %v14482_v18  ;;  %12478 = vmatmul.mubr.msk.f32.vlgmr.msra.gmra.mxu0 %vm365_vm2, %v9932_v21 }
0x48da   :  { %12481 = vmatpush3.xpose.msk.msra.mxu1 %vm365_vm2, %v10012_v2  ;;  %12482 = vmatprep.mubr.msk.f32.mxu1 %vm13096_vm1, %v13095_v6 }
0x48db   :  { %12490 = vmatprep.subr.mxu1 %v13095_v6  ;;  %12487 = vmatprep.mubr.msk.f32.mxu0 %vm13096_vm1, %v13095_v6 }
0x48dd   :  { %12483 = vmatmul.mubr.msk.f32.vlgmr.msra.gmra.mxu1 %vm365_vm2, %v10010_v51 }
0x48de   :  { %12492 = vmatprep.mubr.msk.f32.mxu1 %vm13096_vm1, %v13095_v6 }
0x4995   :  { %v14497_v14 = vpop.f32.mrf.mxu0 }
0x4997   :  { %v12469_v15 = vpop.f32.mrf.mxu0 }
0x4999   :  { %v14499_v59 = vpop.f32.mrf.mxu1  ;;  %v10005_v9 = vpop.f32.mrf.mxu0 }
0x499a   :  { %v10087_v25 = vmul.f32 0.35355338, %v10005_v9 }
0x499b   :  { %v12474_v7 = vpop.f32.mrf.mxu1  ;;  %v12479_v58 = vpop.f32.mrf.mxu0 }
0x499c   :  { %v10089_v62 = vadd.f32 %v14404_v3, %v10087_v25 }
0x499d   :  { %v10083_v22 = vpop.f32.mrf.mxu1 }
0x499e   :  { %v10088_v23 = vmul.f32 0.35355338, %v10083_v22  ;;  %v10091_v29 = vsel %vm365_vm2, %v10089_v62, -inf }
0x499f   :  { %10092 = vmax.xlane.f32.xlu0 %v10091_v29  ;;  %v12484_v57 = vpop.f32.mrf.mxu1 }
0x49a0   :  { %v10090_v61 = vadd.f32 %v14409_v48, %v10088_v23 }
0x49a2   :  { %v10094_v63 = vsel %vm365_vm2, %v10090_v61, -inf }
0x49a3   :  { %10095 = vmax.xlane.f32.xlu1 %v10094_v63  ;;  %v11423_v63 = vld [vmem:[%s14680_s23 + $0x30] sm:$0xff] }
0x49b4   :  { %10113 = vrot.lane.b32.xlu1 %v14381_v50, %s13103_s14 }
0x49b5   :  { %10189 = vrot.lane.b32.xlu0 %v14388_v39, %s13103_s14 }
0x49b8   :  { %10267 = vrot.lane.b32.xlu1 %v14381_v50, %s13106_s11 }
0x49bc   :  { %10345 = vrot.lane.b32.xlu1 %v14388_v39, %s13106_s11 }
0x49c0   :  { %10343 = vrot.lane.b32.xlu1 %v14396_v1, %s13106_s11 }
0x4a28   :  { %v10093_v33 = vpop.xlane.xlu0 %10092 }
0x4a29   :  { %v10097_v37 = vsub.f32 %v10089_v62, %v10093_v33  ;;  %v11422_v33 = vld [vmem:[%s14680_s23 + $0x28] sm:$0xff] }
0x4a2b   :  { %v10099_v10 = vmul.f32 1.442695, %v10097_v37  ;;  %v11421_v37 = vld [vmem:[%s14680_s23 + $0x20] sm:$0xff] }
0x4a2c   :  { %v10190_v38 = vpop.permute.xlu0 %10189  ;;  %v10096_v41 = vpop.xlane.xlu1 %10095 }
0x4a2d   :  { %12832 = vpow2.f32 %v10099_v10  ;;  %v10098_v43 = vsub.f32 %v10090_v61, %v10096_v41  ;;  %12491 = vmatpush3.msra.mxu1 %v10190_v38 }
0x4a2e   :  { %12500 = vmatprep.subr.mxu1 %v13095_v6 }
0x4a2f   :  { %v10101_v34 = vmul.f32 1.442695, %v10098_v43 }
0x4a30   :  { %v10114_v28 = vpop.permute.xlu1 %10113 }
0x4a31   :  { %12834 = vpow2.f32 %v10101_v34  ;;  %12486 = vmatpush3.msra.mxu0 %v10114_v28 }
0x4a32   :  { %12495 = vmatprep.subr.mxu0 %v13095_v6 }
0x4a34   :  { %v10268_v20 = vpop.permute.xlu1 %10267 }
0x4a38   :  { %v10346_v11 = vpop.permute.xlu1 %10345 }
0x4a3a   :  { %v12833_v19 = vpop.eup %12832 }
0x4a3b   :  { %v10103_v26 = vsel %vm365_vm2, %v12833_v19, 0.0 }
0x4a3c   :  { %10104 = vadd.xlane.f32.xlu0 %v10103_v26  ;;  %v10344_v27 = vpop.permute.xlu1 %10343 }
0x4a3e   :  { %v12835_v1 = vpop.eup %12834 }
0x4a3f   :  { %v10106_v47 = vsel %vm365_vm2, %v12835_v1, 0.0 }
0x4a40   :  { %10107 = vadd.xlane.f32.xlu0 %v10106_v47 }
0x4a56   :  { %10265 = vrot.lane.b32.xlu0 %v14386_v56, %s13106_s11 }
0x4ac5   :  { %v10105_v36 = vpop.xlane.xlu0 %10104 }
0x4ac6   :  { %12836 = vrcp.f32 %v10105_v36 }
0x4ac9   :  { %v10108_v46 = vpop.xlane.xlu0 %10107 }
0x4aca   :  { %12838 = vrcp.f32 %v10108_v46 }
0x4acd   :  { %v10266_v56 = vpop.permute.xlu0 %10265 }
0x4ad3   :  { %v12837_v4 = vpop.eup %12836 }
0x4ad4   :  { %v14521_v55 = vmul.f32 %v12837_v4, %v12833_v19 }
0x4ad6   :  { %12488 = vmatmul.mubr.msk.f32.vlgmr.msra.gmra.mxu0 %vm365_vm2, %v14521_v55 }
0x4ad7   :  { %v12839_v24 = vpop.eup %12838  ;;  %12496 = vmatpush3.xpose.msk.msra.mxu0 %vm365_vm2, %v10268_v20  ;;  %12497 = vmatprep.mubr.msk.f32.mxu0 %vm13096_vm1, %v13095_v6 }
0x4ad8   :  { %v14528_v44 = vmul.f32 %v12839_v24, %v12835_v1  ;;  %12505 = vmatprep.subr.mxu0 %v13095_v6 }
0x4ada   :  { %12493 = vmatmul.mubr.msk.f32.vlgmr.msra.gmra.mxu1 %vm365_vm2, %v14528_v44  ;;  %12498 = vmatmul.mubr.msk.f32.vlgmr.msra.gmra.mxu0 %vm365_vm2, %v10266_v56  ;;  %v11426_v56 = vld [vmem:[%s14681_s26 + $0x1] ss:$0 sm:$0xff] }
0x4adb   :  { %12501 = vmatpush3.xpose.msk.msra.mxu1 %vm365_vm2, %v10346_v11  ;;  %12502 = vmatprep.mubr.msk.f32.mxu1 %vm13096_vm1, %v13095_v6 }
0x4adc   :  { %12510 = vmatprep.subr.mxu1 %v13095_v6  ;;  %12507 = vmatprep.mubr.msk.f32.mxu0 %vm13096_vm1, %v13095_v6 }
0x4ade   :  { %12503 = vmatmul.mubr.msk.f32.vlgmr.msra.gmra.mxu1 %vm365_vm2, %v10344_v27 }
0x4adf   :  { %12512 = vmatprep.mubr.msk.f32.mxu1 %vm13096_vm1, %v13095_v6 }
0x4b96   :  { %v10185_v54 = vpop.f32.mrf.mxu0 }
0x4b98   :  { %v12489_v45 = vpop.f32.mrf.mxu0 }
0x4b9a   :  { %v10261_v52 = vpop.f32.mrf.mxu1  ;;  %v10339_v60 = vpop.f32.mrf.mxu0 }
0x4b9b   :  { %v10421_v53 = vmul.f32 0.35355338, %v10339_v60 }
0x4b9c   :  { %v12494_v0 = vpop.f32.mrf.mxu1  ;;  %v12499_v5 = vpop.f32.mrf.mxu0 }
0x4b9d   :  { %v10423_v8 = vadd.f32 %v14404_v3, %v10421_v53 }
0x4b9e   :  { %v10417_v12 = vpop.f32.mrf.mxu1 }
0x4b9f   :  { %v10422_v13 = vmul.f32 0.35355338, %v10417_v12  ;;  %v10425_v16 = vsel %vm365_vm2, %v10423_v8, -inf }
0x4ba0   :  { %10426 = vmax.xlane.f32.xlu0 %v10425_v16  ;;  %v12504_v32 = vpop.f32.mrf.mxu1 }
0x4ba1   :  { %v10424_v2 = vadd.f32 %v14409_v48, %v10422_v13 }
0x4ba3   :  { %v10428_v21 = vsel %vm365_vm2, %v10424_v2, -inf }
0x4ba4   :  { %10429 = vmax.xlane.f32.xlu1 %v10428_v21  ;;  %v11434_v21 = vld [vmem:[%s14682_s8 + $0x38] sm:$0xff] }
0x4bb5   :  { %10447 = vrot.lane.b32.xlu1 %v14381_v50, %s13105_s10 }
0x4bb9   :  { %10601 = vrot.lane.b32.xlu1 %v14497_v14, %s13086_s18 }
0x4bbd   :  { %10603 = vrot.lane.b32.xlu1 %v14499_v59, %s13086_s18 }
0x4bc1   :  { %10611 = vrot.lane.b32.xlu1 %v10261_v52, %s13090_s20 }
0x4c29   :  { %v10427_v6 = vpop.xlane.xlu0 %10426 }
0x4c2a   :  { %v10431_v3 = vsub.f32 %v10423_v8, %v10427_v6  ;;  %v11433_v6 = vld [vmem:[%s14682_s8 + $0x30] sm:$0xff] }
0x4c2c   :  { %v10433_v51 = vmul.f32 1.442695, %v10431_v3  ;;  %v11432_v3 = vld [vmem:[%s14682_s8 + $0x28] sm:$0xff] }
0x4c2d   :  { %v10430_v15 = vpop.xlane.xlu1 %10429 }
0x4c2e   :  { %12840 = vpow2.f32 %v10433_v51  ;;  %v10432_v48 = vsub.f32 %v10424_v2, %v10430_v15  ;;  %v11431_v51 = vld [vmem:[%s14682_s8 + $0x20] sm:$0xff]  ;;  %v11446_v15 = vld [vmem:[%s14683_s28 + $0x78] sm:$0xff] }
0x4c30   :  { %v10435_v9 = vmul.f32 1.442695, %v10432_v48  ;;  %v11445_v48 = vld [vmem:[%s14683_s28 + $0x70] sm:$0xff] }
0x4c31   :  { %v10448_v25 = vpop.permute.xlu1 %10447 }
0x4c32   :  { %12842 = vpow2.f32 %v10435_v9  ;;  %12506 = vmatpush3.msra.mxu0 %v10448_v25  ;;  %v11444_v9 = vld [vmem:[%s14683_s28 + $0x68] sm:$0xff]  ;;  %v11443_v25 = vld [vmem:[%s14683_s28 + $0x60] sm:$0xff] }
0x4c35   :  { %v10602_v34 = vpop.permute.xlu1 %10601 }
0x4c36   :  { %v10623_v26 = vsel %vm365_vm2, %v14451_v30, %v10602_v34  ;;  %v11441_v34 = vld [vmem:[%s14683_s28 + $0x50] sm:$0xff] }
0x4c39   :  { %v10604_v28 = vpop.permute.xlu1 %10603 }
0x4c3a   :  { %v10624_v20 = vsel %vm365_vm2, %v14453_v40, %v10604_v28  ;;  %v11440_v28 = vld [vmem:[%s14683_s28 + $0x48] sm:$0xff] }
0x4c3b   :  { %v12841_v7 = vpop.eup %12840 }
0x4c3c   :  { %v10437_v50 = vsel %vm365_vm2, %v12841_v7, 0.0 }
0x4c3d   :  { %10438 = vadd.xlane.f32.xlu0 %v10437_v50  ;;  %v10612_v1 = vpop.permute.xlu1 %10611 }
0x4c3e   :  { %v10626_v4 = vsel %vm1723_vm4, %v10624_v20, %v10612_v1 }
0x4c3f   :  { %v12843_v14 = vpop.eup %12842 }
0x4c40   :  { %v10440_v58 = vsel %vm365_vm2, %v12843_v14, 0.0 }
0x4c41   :  { %10441 = vadd.xlane.f32.xlu0 %v10440_v58 }
0x4c57   :  { %10523 = vrot.lane.b32.xlu0 %v14388_v39, %s13105_s10  ;;  %v11424_v39 = vld [vmem:[%s14680_s23 + $0x38] sm:$0xff] }
0x4c58   :  { %12515 = vmatprep.subr.mxu0 %v11424_v39 }
0x4c5b   :  { %10609 = vrot.lane.b32.xlu0 %v10185_v54, %s13090_s20 }
0x4cc6   :  { %v10439_v59 = vpop.xlane.xlu0 %10438 }
0x4cc7   :  { %12844 = vrcp.f32 %v10439_v59 }
0x4cca   :  { %v10442_v62 = vpop.xlane.xlu0 %10441 }
0x4ccb   :  { %12846 = vrcp.f32 %v10442_v62 }
0x4cce   :  { %v10524_v22 = vpop.permute.xlu0 %10523 }
0x4ccf   :  { %12511 = vmatpush3.msra.mxu1 %v10524_v22 }
0x4cd0   :  { %12526 = vmatprep.subr.mxu1 %v11434_v21 }
0x4cd2   :  { %v10610_v19 = vpop.permute.xlu0 %10609 }
0x4cd3   :  { %v10625_v47 = vsel %vm1723_vm4, %v10623_v26, %v10610_v19  ;;  %v11439_v19 = vld [vmem:[%s14683_s28 + $0x40] sm:$0xff] }
0x4cd4   :  { %v12845_v23 = vpop.eup %12844  ;;  %v11436_v26 = vld [vmem:[%s14684_s1 + $0x1] ss:$0 sm:$0xff] }
0x4cd5   :  { %v14559_v29 = vmul.f32 %v12845_v23, %v12841_v7  ;;  %v11429_v23 = vld [vmem:[#allocation14 + $0x8] ss:$0 sm:$0xff] }
0x4cd7   :  { %12508 = vmatmul.mubr.msk.f32.vlgmr.msra.gmra.mxu0 %vm365_vm2, %v14559_v29 }
0x4cd8   :  { %v12847_v57 = vpop.eup %12846  ;;  %12516 = vmatpush3.msra.mxu0 %v11424_v39  ;;  %v11430_v39 = vld [vmem:[#allocation14 + $0x9] ss:$0 sm:$0xff] }
0x4cd9   :  { %v14563_v61 = vmul.f32 %v12847_v57, %v12843_v14  ;;  %12517 = vmatprep.subr.mxu0 %v11423_v63 }
0x4cda   :  { %12518 = vmatpush3.msra.mxu0 %v11423_v63 }
0x4cdb   :  { %12513 = vmatmul.mubr.msk.f32.vlgmr.msra.gmra.mxu1 %vm365_vm2, %v14563_v61  ;;  %12519 = vmatprep.subr.mxu0 %v11422_v33 }
0x4cdc   :  { %12520 = vmatpush3.msra.mxu0 %v11422_v33  ;;  %12527 = vmatpush3.msra.mxu1 %v11434_v21 }
0x4cdd   :  { %12521 = vmatprep.subr.mxu0 %v11421_v37  ;;  %12528 = vmatprep.subr.mxu1 %v11433_v6 }
0x4cde   :  { %12522 = vmatpush3.msra.mxu0 %v11421_v37  ;;  %12529 = vmatpush3.msra.mxu1 %v11433_v6 }
0x4cdf   :  { %12530 = vmatprep.subr.mxu1 %v11432_v3  ;;  %12537 = vmatprep.subr.mxu0 %v11446_v15 }
0x4ce0   :  { %12531 = vmatpush3.msra.mxu1 %v11432_v3 }
0x4ce1   :  { %12532 = vmatprep.subr.mxu1 %v11431_v51 }
0x4ce2   :  { %12533 = vmatpush3.msra.mxu1 %v11431_v51 }
0x4d97   :  { %v10519_v10 = vpop.f32.mrf.mxu0 }
0x4d98   :  { %10617 = vrot.lane.b32.xlu0 %v10519_v10, %s13108_s16 }
0x4d99   :  { %v12509_v38 = vpop.f32.mrf.mxu0 }
0x4d9b   :  { %v10595_v41 = vpop.f32.mrf.mxu1 }
0x4d9c   :  { %10619 = vrot.lane.b32.xlu1 %v10595_v41, %s13108_s16 }
0x4d9d   :  { %v12514_v43 = vpop.f32.mrf.mxu1 }
0x4d9e   :  { %v11442_v43 = vld [vmem:[%s14683_s28 + $0x58] sm:$0xff] }
0x4e0a   :  { %v10618_v36 = vpop.permute.xlu0 %10617 }
0x4e0b   :  { %v10627_v46 = vsel %vm1726_vm3, %v10625_v47, %v10618_v36 }
0x4e0c   :  { %12523 = vmatprep.mubr.msk.f32.mxu0 %vm280_vm0, %v10627_v46 }
0x4e0e   :  { %v10620_v24 = vpop.permute.xlu1 %10619 }
0x4e0f   :  { %v10628_v11 = vsel %vm1726_vm3, %v10626_v4, %v10620_v24  ;;  %v11448_v24 = vld [vmem:[%s14685_s21 + $0x1] ss:$0 sm:$0xff] }
0x4e10   :  { %12524 = vmatmul.mubr.msk.f32.vlgmr.msra.gmra.mxu0 %vm280_vm0, %v10628_v11 }
0x4e11   :  { %12538 = vmatpush3.msra.mxu0 %v11446_v15 }
0x4e12   :  { %12539 = vmatprep.subr.mxu0 %v11445_v48 }
0x4e13   :  { %12540 = vmatpush3.msra.mxu0 %v11445_v48 }
0x4e14   :  { %12541 = vmatprep.subr.mxu0 %v11444_v9 }
0x4e15   :  { %12542 = vmatpush3.msra.mxu0 %v11444_v9 }
0x4e16   :  { %12543 = vmatprep.subr.mxu0 %v11443_v25 }
0x4e17   :  { %12544 = vmatpush3.msra.mxu0 %v11443_v25 }
0x4e18   :  { %12545 = vmatprep.subr.mxu0 %v11442_v43 }
0x4e19   :  { %12546 = vmatpush3.msra.mxu0 %v11442_v43 }
0x4e1a   :  { %12547 = vmatprep.subr.mxu0 %v11441_v34 }
0x4e1b   :  { %12548 = vmatpush3.msra.mxu0 %v11441_v34 }
0x4e1c   :  { %12549 = vmatprep.subr.mxu0 %v11440_v28 }
0x4e1d   :  { %12550 = vmatpush3.msra.mxu0 %v11440_v28 }
0x4e1e   :  { %12551 = vmatprep.subr.mxu0 %v11439_v19 }
0x4e1f   :  { %12552 = vmatpush3.msra.mxu0 %v11439_v19 }
0x4ed0   :  { %v12525_v30 = vpop.f32.mrf.mxu0 }
0x4ed1   :  { %v10746_v27 = vadd.f32 %v12525_v30, %v11426_v56 }
0x4ed2   :  { %v10740_v54 = vpop.f32.mrf.mxu0 }
0x4ed3   :  { %v10750_v45 = vadd.f32 %v10746_v27, %v14373_v49  ;;  %v10741_v52 = vadd.f32 %v11426_v56, %v10740_v54 }
0x4ed5   :  { %v10749_v60 = vadd.f32 %v10741_v52, %v14371_v42  ;;  %v10758_v53 = vsel %vm280_vm0, %v10750_v45, 0.0 }
0x4ed6   :  { %10759 = vadd.xlane.f32.xlu1 %v10758_v53 }
0x4ed7   :  { %v10755_v40 = vsel %vm280_vm0, %v10749_v60, 0.0 }
0x4ed8   :  { %10756 = vadd.xlane.f32.xlu0 %v10755_v40 }
0x4f5f   :  { %v10760_v0 = vpop.xlane.xlu1 %10759 }
0x4f60   :  { %v10762_v5 = vmul.f32 0.03125, %v10760_v0 }
0x4f61   :  { %v10757_v8 = vpop.xlane.xlu0 %10756 }
0x4f62   :  { %v10761_v12 = vmul.f32 0.03125, %v10757_v8  ;;  %v10764_v13 = vsub.f32 %v10750_v45, %v10762_v5 }
0x4f64   :  { %v10763_v16 = vsub.f32 %v10749_v60, %v10761_v12  ;;  %v10766_v42 = vmul.f32 %v10764_v13, %v10764_v13 }
0x4f66   :  { %v10765_v49 = vmul.f32 %v10763_v16, %v10763_v16  ;;  %v10770_v2 = vsel %vm280_vm0, %v10766_v42, 0.0  ;;  %v11042_v42 = vld [vmem:[%s13249_s17 + $0x18] sm:$0xff] }
0x4f67   :  { %12556 = vmatprep.subr.mxu1 %v11042_v42 }
0x4f68   :  { %v10767_v32 = vsel %vm280_vm0, %v10765_v49, 0.0 }
0x4f69   :  { %10768 = vadd.xlane.f32.xlu0 %v10767_v32 }
0x4f6d   :  { %10771 = vadd.xlane.f32.xlu0 %v10770_v2  ;;  %v11041_v2 = vld [vmem:[%s13249_s17 + $0x10] sm:$0xff] }
0x4ff2   :  { %v10769_v7 = vpop.xlane.xlu0 %10768 }
0x4ff3   :  { %v10773_v50 = vmul.f32 0.03125, %v10769_v7 }
0x4ff5   :  { %v10775_v14 = vadd.f32 1e-05, %v10773_v50 }
0x4ff6   :  { %v10772_v58 = vpop.xlane.xlu0 %10771 }
0x4ff7   :  { %12848 = vrsqrt.f32 %v10775_v14  ;;  %v10774_v59 = vmul.f32 0.03125, %v10772_v58 }
0x4ff9   :  { %v10776_v62 = vadd.f32 1e-05, %v10774_v59 }
0x4ffb   :  { %12850 = vrsqrt.f32 %v10776_v62 }
0x5004   :  { %v12849_v22 = vpop.eup %12848 }
0x5005   :  { %v10779_v57 = vmul.f32 %v12849_v22, %v10763_v16 }
0x5007   :  { %v10787_v63 = vmul.f32 %v11429_v23, %v10779_v57 }
0x5008   :  { %v12851_v33 = vpop.eup %12850 }
0x5009   :  { %v10780_v37 = vmul.f32 %v12851_v33, %v10764_v13  ;;  %v10795_v10 = vadd.f32 %v11430_v39, %v10787_v63  ;;  %v11452_v33 = vld [vmem:[#allocation14 + $0xb] ss:$0 sm:$0xff] }
0x500b   :  { %v10788_v38 = vmul.f32 %v11429_v23, %v10780_v37  ;;  %12534 = vmatprep.mubr.msk.f32.mxu1 %vm280_vm0, %v10795_v10 }
0x500d   :  { %v10796_v41 = vadd.f32 %v11430_v39, %v10788_v38 }
0x500f   :  { %12535 = vmatmul.mubr.msk.f32.vlgmr.msra.gmra.mxu1 %vm280_vm0, %v10796_v41 }
0x5010   :  { %12557 = vmatpush3.msra.mxu1 %v11042_v42 }
0x5011   :  { %12558 = vmatprep.subr.mxu1 %v11041_v2 }
0x5012   :  { %12559 = vmatpush3.msra.mxu1 %v11041_v2 }
0x50cf   :  { %v12536_v1 = vpop.f32.mrf.mxu1 }
0x50d0   :  { %v10888_v47 = vadd.f32 %v12536_v1, %v11436_v26 }
0x50d1   :  { %v10882_v36 = vpop.f32.mrf.mxu1 }
0x50d2   :  { %v10883_v46 = vadd.f32 %v11436_v26, %v10882_v36  ;;  %v10892_v4 = vmax.f32 %v10888_v47, 0.0 }
0x50d4   :  { %v10891_v20 = vmax.f32 %v10883_v46, 0.0 }
0x50d6   :  { %12553 = vmatprep.mubr.msk.f32.mxu0 %vm1978_vm5, %v10891_v20 }
0x50d7   :  { %12554 = vmatmul.mubr.msk.f32.vlgmr.msra.gmra.mxu0 %vm1978_vm5, %v10892_v4 }
0x5197   :  { %v12555_v11 = vpop.f32.mrf.mxu0 }
0x5198   :  { %v10988_v56 = vadd.f32 %v12555_v11, %v11448_v24 }
0x5199   :  { %v10982_v30 = vpop.f32.mrf.mxu0 }
0x519a   :  { %v10992_v27 = vadd.f32 %v10988_v56, %v10796_v41  ;;  %v10983_v54 = vadd.f32 %v11448_v24, %v10982_v30 }
0x519c   :  { %v10991_v45 = vadd.f32 %v10983_v54, %v10795_v10  ;;  %v11000_v52 = vsel %vm280_vm0, %v10992_v27, 0.0 }
0x519d   :  { %11001 = vadd.xlane.f32.xlu0 %v11000_v52 }
0x519e   :  { %v10997_v60 = vsel %vm280_vm0, %v10991_v45, 0.0 }
0x519f   :  { %10998 = vadd.xlane.f32.xlu1 %v10997_v60 }
0x5226   :  { %v11002_v53 = vpop.xlane.xlu0 %11001 }
0x5227   :  { %v11004_v40 = vmul.f32 0.03125, %v11002_v53 }
0x5228   :  { %v10999_v0 = vpop.xlane.xlu1 %10998 }
0x5229   :  { %v11006_v5 = vsub.f32 %v10992_v27, %v11004_v40  ;;  %v11003_v8 = vmul.f32 0.03125, %v10999_v0 }
0x522b   :  { %v11005_v12 = vsub.f32 %v10991_v45, %v11003_v8  ;;  %v11008_v13 = vmul.f32 %v11006_v5, %v11006_v5 }
0x522d   :  { %v11012_v16 = vsel %vm280_vm0, %v11008_v13, 0.0  ;;  %v11007_v49 = vmul.f32 %v11005_v12, %v11005_v12 }
0x522e   :  { %11013 = vadd.xlane.f32.xlu0 %v11012_v16 }
0x522f   :  { %v11009_v32 = vsel %vm280_vm0, %v11007_v49, 0.0 }
0x5230   :  { %11010 = vadd.xlane.f32.xlu1 %v11009_v32 }
0x5241   :  { %10629 = vrot.lane.b32.xlu1 %v14475_v17, %s13086_s18  ;;  %v11040_v17 = vld [vmem:[%s13249_s17 + $0x8] sm:$0xff] }
0x5242   :  { %12560 = vmatprep.subr.mxu1 %v11040_v17 }
0x5243   :  { %12561 = vmatpush3.msra.mxu1 %v11040_v17 }
0x5244   :  { %10631 = vrot.lane.b32.xlu0 %v14482_v18, %s13086_s18  ;;  %v11039_v18 = vld [vmem:[%s13249_s17] sm:$0xff]  ;;  %s11138_s17 = sshll.u32 %s13110_s13, 4  ;;  %s11139_s17 = int_to_ptr.vmem [resolvable:$true] %s11138_s17 }
0x5245   :  { %10635 = vrot.lane.b32.xlu1 %v14521_v55, %s13090_s20  ;;  %12562 = vmatprep.subr.mxu1 %v11039_v18  ;;  %p13027_p13 = scmp.lt.s32.totalorder %s11139_s17, %s11139_s17 }
0x5246   :  { %12563 = vmatpush3.msra.mxu1 %v11039_v18 }
0x5248   :  { %10641 = vrot.lane.b32.xlu0 %v14559_v29, %s13108_s16 }
0x5249   :  { %10637 = vrot.lane.b32.xlu1 %v14528_v44, %s13090_s20 }
0x524d   :  { %10643 = vrot.lane.b32.xlu1 %v14563_v61, %s13108_s16 }
0x52b7   :  { %v11014_v55 = vpop.xlane.xlu0 %11013 }
0x52b8   :  { %v11016_v29 = vmul.f32 0.03125, %v11014_v55 }
0x52b9   :  { %v11011_v21 = vpop.xlane.xlu1 %11010 }
0x52ba   :  { %v11018_v44 = vadd.f32 1e-05, %v11016_v29  ;;  %v11015_v6 = vmul.f32 0.03125, %v11011_v21 }
0x52bb   :  { %v10632_v51 = vpop.permute.xlu0 %10631 }
0x52bc   :  { %12852 = vrsqrt.f32 %v11018_v44  ;;  %v11017_v3 = vadd.f32 1e-05, %v11015_v6  ;;  %v10648_v14 = vsel %vm365_vm2, %v14436_v35, %v10632_v51  ;;  %v11453_v35 = vld [vmem:[%s13254_s12] ss:$0 sm:$0xff] }
0x52bd   :  { %v10630_v15 = vpop.permute.xlu1 %10629 }
0x52be   :  { %12854 = vrsqrt.f32 %v11017_v3  ;;  %v10647_v61 = vsel %vm365_vm2, %v14429_v31, %v10630_v15  ;;  %v11451_v31 = vld [vmem:[#allocation14 + $0xa] ss:$0 sm:$0xff] }
0x52bf   :  { %v10642_v9 = vpop.permute.xlu0 %10641 }
0x52c1   :  { %v10636_v48 = vpop.permute.xlu1 %10635 }
0x52c2   :  { %v10649_v25 = vsel %vm1723_vm4, %v10647_v61, %v10636_v48 }
0x52c3   :  { %v10651_v7 = vsel %vm1726_vm3, %v10649_v25, %v10642_v9 }
0x52c4   :  { %10653 = vst.msk [vmem:[%s13264_s30] sm:$0xff] %vm280_vm0, %v10651_v7 }
0x52c5   :  { %v10638_v50 = vpop.permute.xlu1 %10637 }
0x52c6   :  { %v10650_v59 = vsel %vm1723_vm4, %v10648_v14, %v10638_v50 }
0x52c9   :  { %v12853_v58 = vpop.eup %12852  ;;  %v10644_v62 = vpop.permute.xlu1 %10643 }
0x52ca   :  { %v10652_v22 = vsel %vm1726_vm3, %v10650_v59, %v10644_v62  ;;  %v11022_v23 = vmul.f32 %v12853_v58, %v11006_v5 }
0x52cb   :  { %v12855_v57 = vpop.eup %12854  ;;  %10654 = vst.msk [vmem:[%s13264_s30 + $0x8] sm:$0xff] %vm280_vm0, %v10652_v22  ;;  %s13022_s30 = scalar_lea.vmem %s11139_s17, 256 }
0x52cc   :  { %v11021_v39 = vmul.f32 %v12855_v57, %v11005_v12  ;;  %v11030_v63 = vmul.f32 %v11451_v31, %v11022_v23  ;;  %p13023_p12 = scmp.ne.s32.totalorder %s11139_s17, %s13022_s30  ;;  %p13028_p0 = scmp.lt.s32.totalorder %s13022_s30, %s13022_s30 }
0x52ce   :  { %v11029_v37 = vmul.f32 %v11451_v31, %v11021_v39  ;;  %v11038_v38 = vadd.f32 %v11452_v33, %v11030_v63  ;;  %p13029_p1 = por %p13028_p0, %p13027_p13 }
0x52d0   :  { %v11037_v10 = vadd.f32 %v11452_v33, %v11029_v37  ;;  %p13030_p2 = pnand %p13029_p1, %p13023_p12 }
0x52d2   :  { %12564 = vmatprep.mubr.msk.f32.mxu1 %vm280_vm0, %v11037_v10 }
0x52d3   :  { %12565 = vmatmul.mubr.msk.f32.vlgmr.msra.gmra.mxu1 %vm280_vm0, %v11038_v38 }
0x5393   :  { %v12566_v41 = vpop.f32.mrf.mxu1 }
0x5394   :  { %v11128_v43 = vadd.f32 %v12566_v41, %v11453_v35 }
0x5395   :  { %v11122_v34 = vpop.f32.mrf.mxu1 }
0x5396   :  { %11132 = vst.msk [vmem:[#allocation16 + $0x8] sm:$0xff] %vm1723_vm4, %v11128_v43  ;;  %v11123_v28 = vadd.f32 %v11453_v35, %v11122_v34 }
0x5398   :  { %11131 = vst.msk [vmem:[#allocation16] sm:$0xff] %vm1723_vm4, %v11123_v28 }
0x5399   :  { %13033 = shalt.err (!%p13030_p2)
}
0x539a   :  { %11144 = dma.vmem_to_hbm [thread:$0]  %s11139_s17, 256, %s13259_s27, [#allocation4], %s13085_s0, %s13085_s0, %s13086_s18  }
0x539b   :  { %13052 = dma.done.wait [#allocation4], 256  }
0x539c   :  { %13053 = vsyncadd [#allocation4], 4294967040 }
0x539d   :  { %11152 = vsyncpa [#allocation3], 1 }
0x539e   :  { %11153 = vsyncpa [#allocation6], 1 }
0x539f   :  { %11154 = vsyncpa [#allocation9], 1 }
0x53a0   :  { %11155 = vsyncpa [#allocation12], 1 }
0x53a1   :  { %11156 = vsyncpa [#allocation15], 1 }
0x53a2   :  { %11157 = vsyncpa [#allocation4], 1 }

</bundles_post_ra>
